<compile_context>
chip_gen: v6e
topology: v6e:2x2x1
jax: 0.10.0
libtpu: 0.0.40
codegen_flags: <defaults>
</compile_context>

<pallas_src>
import functools

import jax
import jax.numpy as jnp
from jax.experimental import pallas as pl
from jax.experimental.pallas import tpu as pltpu


# --------------------------- tiling helpers --------------------------------

_MAX_TM = 256  # row-tile cap: bounded per-block VMEM, double-buffered pipeline

_COMPILER_PARAMS = pltpu.CompilerParams(
    dimension_semantics=("parallel",),   # M tiles are independent -> megacore on v7x
    vmem_limit_bytes=32 * 1024 * 1024,
)


def _round_up(x, m):
    return (x + m - 1) // m * m


def _row_tiles(m):
    """Return (padded_rows, row_tile): padded_rows % row_tile == 0, tile % 8 == 0."""
    if m <= _MAX_TM:
        mp = _round_up(m, 8)
        return mp, mp
    mp = _round_up(m, _MAX_TM)
    return mp, _MAX_TM


def _pad_rows(a, mp):
    m = a.shape[0]
    if m == mp:
        return a
    return jnp.pad(a, ((0, mp - m), (0, 0)))   # zero rows: contribute 0 to BN sums


# ----------------------------- Pallas kernels -------------------------------

def _conv_stats_kernel(a_ref, w_ref, o_ref, ssum_ref, ssq_ref):
    """bf16 matmul with f32 accumulation; also emits per-tile BN partial stats."""
    acc = jnp.dot(a_ref[...], w_ref[...], preferred_element_type=jnp.float32)
    o_ref[...] = acc
    ssum_ref[...] = jnp.sum(acc, axis=0, keepdims=True).reshape(1, 1, -1)
    ssq_ref[...] = jnp.sum(acc * acc, axis=0, keepdims=True).reshape(1, 1, -1)


def _bn_act_kernel(x_ref, s_ref, b_ref, o_ref, *, relu):
    """Fused BN affine (+ReLU) epilogue: y = x*scale + bias."""
    y = x_ref[...] * s_ref[...] + b_ref[...]
    if relu:
        y = jnp.maximum(y, 0.0)
    o_ref[...] = y.astype(o_ref.dtype)


def _bn_act_add_kernel(x_ref, sc_ref, s_ref, b_ref, o_ref):
    """Fused BN affine + residual add + ReLU (basic-block tail)."""
    y = x_ref[...] * s_ref[...] + b_ref[...] + sc_ref[...].astype(jnp.float32)
    o_ref[...] = jnp.maximum(y, 0.0).astype(o_ref.dtype)


def _maxpool3_stats_kernel(a_ref, b_ref, c_ref, o_ref, ssum_ref, ssq_ref):
    """Running max over 3 row-shifted views + BN partial stats of the result."""
    m = jnp.maximum(jnp.maximum(a_ref[...], b_ref[...]), c_ref[...])
    o_ref[...] = m
    ssum_ref[...] = jnp.sum(m, axis=0, keepdims=True).reshape(1, 1, -1)
    ssq_ref[...] = jnp.sum(m * m, axis=0, keepdims=True).reshape(1, 1, -1)


def _matmul_bias_kernel(a_ref, w_ref, b_ref, o_ref):
    o_ref[...] = (
        jnp.dot(a_ref[...], w_ref[...], preferred_element_type=jnp.float32)
        + b_ref[...]
    )


# --------------------------- kernel wrappers --------------------------------

def _conv_call(a, w, tm):
    """a: (Mp, K) bf16, w: (K, Cout) bf16 -> (out f32, ssum, ssq)."""
    mp, k = a.shape
    cout = w.shape[1]
    t = mp // tm
    row_a = pl.BlockSpec((tm, k), lambda i: (i, 0))
    row_o = pl.BlockSpec((tm, cout), lambda i: (i, 0))
    stat = pl.BlockSpec((1, 1, cout), lambda i: (i, 0, 0))
    return pl.pallas_call(
        _conv_stats_kernel,
        out_shape=[jax.ShapeDtypeStruct((mp, cout), jnp.float32),
                   jax.ShapeDtypeStruct((t, 1, cout), jnp.float32),
                   jax.ShapeDtypeStruct((t, 1, cout), jnp.float32)],
        grid=(t,),
        in_specs=[row_a, pl.BlockSpec((k, cout), lambda i: (0, 0))],
        out_specs=[row_o, stat, stat],
        compiler_params=_COMPILER_PARAMS,
    )(a, w)


def _im2col(x, k, stride, pad):
    """x: (N,H,W,C) NHWC -> ((N*Ho*Wo, k*k*C), (N,Ho,Wo)).  Order (kh, kw, cin).

    TODO(synk): the shifted-window extraction itself stays in XLA glue -- the
    per-tap element offsets are not expressible with plain Blocked index_maps,
    so a fully in-kernel tap-accumulation conv is left as a follow-up.
    """
    N, H, W, C = x.shape
    xp = jnp.pad(x, ((0, 0), (pad, pad), (pad, pad), (0, 0)))
    Hp, Wp = H + 2 * pad, W + 2 * pad
    Ho = (Hp - k) // stride + 1
    Wo = (Wp - k) // stride + 1
    cols = []
    for dy in range(k):
        for dx in range(k):
            cols.append(
                xp[:, dy:dy + stride * Ho:stride, dx:dx + stride * Wo:stride, :])
    cols = jnp.stack(cols, axis=3)            # (N, Ho, Wo, k*k, C)
    return cols.reshape(N * Ho * Wo, k * k * C), (N, Ho, Wo)


def conv2d_bn_stats(x_nhwc, w, stride, pad):
    """Conv (no bias -- cancelled by the following BN) + per-channel BN stats.

    Returns (out f32 (Mp, Cout), (ssum, ssq), (N, Ho, Wo), true_M).
    """
    k = w.shape[0]
    cols, (N, Ho, Wo) = _im2col(x_nhwc.astype(jnp.bfloat16), k, stride, pad)
    M = N * Ho * Wo
    Mp, TM = _row_tiles(M)
    cols = _pad_rows(cols, Mp)
    wmat = w.reshape(-1, w.shape[-1]).astype(jnp.bfloat16)
    out, ssum, ssq = _conv_call(cols, wmat, TM)
    return out, (ssum, ssq), (N, Ho, Wo), M


def _bn_fold(ssum, ssq, count, gamma, beta, eps=1e-5):
    """Fold batch stats into a per-channel (scale, bias) pair (tiny glue)."""
    s = jnp.sum(ssum, axis=(0, 1))
    q = jnp.sum(ssq, axis=(0, 1))
    mean = s / count
    var = jnp.maximum(q / count - mean * mean, 0.0)   # biased var (PyTorch training)
    scale = gamma * jax.lax.rsqrt(var + eps)
    bias = beta - mean * scale
    return scale, bias


def bn_act(x, scale, bias, *, relu=True, shortcut=None, out_dtype=jnp.bfloat16):
    """Fused y = x*scale + bias (+ shortcut) (+ ReLU).  x: (Mp, C) f32."""
    Mp, C = x.shape
    _, TM = _row_tiles(Mp)
    T = Mp // TM
    row = pl.BlockSpec((TM, C), lambda i: (i, 0))
    vec = pl.BlockSpec((1, C), lambda i: (0, 0))
    s2 = scale.reshape(1, C).astype(jnp.float32)
    b2 = bias.reshape(1, C).astype(jnp.float32)
    if shortcut is None:
        return pl.pallas_call(
            functools.partial(_bn_act_kernel, relu=relu),
            out_shape=jax.ShapeDtypeStruct((Mp, C), out_dtype),
            grid=(T,),
            in_specs=[row, vec, vec],
            out_specs=row,
            compiler_params=_COMPILER_PARAMS,
        )(x, s2, b2)
    sc = _pad_rows(shortcut, Mp)
    return pl.pallas_call(
        _bn_act_add_kernel,
        out_shape=jax.ShapeDtypeStruct((Mp, C), out_dtype),
        grid=(T,),
        in_specs=[row, row, vec, vec],
        out_specs=row,
        compiler_params=_COMPILER_PARAMS,
    )(x, sc, s2, b2)


def maxpool3x3_s2_p1_bn_stats(x_nhwc):
    """MaxPool2d(3, stride=2, padding=1) + BN stats of the pooled output.

    The W-direction 3-tap max is done by XLA over shifted strided views (fused,
    no 9x window stack in HBM); the H-direction max + stats run in Pallas.
    """
    N, H, W, C = x_nhwc.shape
    Ho = (H + 2 - 3) // 2 + 1
    Wo = (W + 2 - 3) // 2 + 1
    xp = jnp.pad(x_nhwc, ((0, 0), (1, 1), (1, 1), (0, 0)),
                 constant_values=-jnp.inf)
    colmax = None
    for dx in range(3):
        v = xp[:, :, dx:dx + 2 * Wo:2, :]
        colmax = v if colmax is None else jnp.maximum(colmax, v)
    views = [colmax[:, dy:dy + 2 * Ho:2, :, :].reshape(N * Ho * Wo, C)
             for dy in range(3)]
    M = N * Ho * Wo
    Mp, TM = _row_tiles(M)
    views = [_pad_rows(v, Mp) for v in views]
    T = Mp // TM
    row = pl.BlockSpec((TM, C), lambda i: (i, 0))
    stat = pl.BlockSpec((1, 1, C), lambda i: (i, 0, 0))
    pooled, ssum, ssq = pl.pallas_call(
        _maxpool3_stats_kernel,
        out_shape=[jax.ShapeDtypeStruct((Mp, C), jnp.float32),
                   jax.ShapeDtypeStruct((T, 1, C), jnp.float32),
                   jax.ShapeDtypeStruct((T, 1, C), jnp.float32)],
        grid=(T,),
        in_specs=[row, row, row],
        out_specs=[row, stat, stat],
        compiler_params=_COMPILER_PARAMS,
    )(*views)
    return pooled, (ssum, ssq), (N, Ho, Wo), M


def linear(x, w, b):
    """FC: (M,K) @ (K,N) + b, bf16 operands, f32 accumulate."""
    M, K = x.shape
    Nout = w.shape[1]
    Mp, TM = _row_tiles(M)
    xp = _pad_rows(x, Mp)
    T = Mp // TM
    out = pl.pallas_call(
        _matmul_bias_kernel,
        out_shape=jax.ShapeDtypeStruct((Mp, Nout), jnp.float32),
        grid=(T,),
        in_specs=[pl.BlockSpec((TM, K), lambda i: (i, 0)),
                  pl.BlockSpec((K, Nout), lambda i: (0, 0)),
                  pl.BlockSpec((1, Nout), lambda i: (0, 0))],
        out_specs=pl.BlockSpec((TM, Nout), lambda i: (i, 0)),
        compiler_params=_COMPILER_PARAMS,
    )(xp.astype(jnp.bfloat16), w.astype(jnp.bfloat16),
      b.reshape(1, Nout).astype(jnp.float32))
    return out[:M]


# ------------------------------ model blocks --------------------------------

def resblock_forward(x, p):
    """Standard basic block on NHWC bf16 input; returns NHWC bf16 output."""
    N, H, W, Cin = x.shape
    downsample = "sc_w" in p
    if downsample:
        sc_out, sc_st, _, Msc = conv2d_bn_stats(x, p["sc_w"], stride=2, pad=0)
        ss, sb = _bn_fold(*sc_st, Msc, p["sc_g"], p["sc_be"])
        sc = bn_act(sc_out, ss, sb, relu=False)           # (Mp, Cout) bf16
        stride1 = 2
    else:
        sc = x.reshape(N * H * W, Cin)                    # identity shortcut
        stride1 = 1

    h, st1, (n1, ho1, wo1), M1 = conv2d_bn_stats(x, p["w1"], stride=stride1, pad=1)
    s1, b1 = _bn_fold(*st1, M1, p["g1"], p["be1"])
    h = bn_act(h, s1, b1, relu=True)
    h = h[:M1].reshape(n1, ho1, wo1, -1)

    h2, st2, (n2, ho2, wo2), M2 = conv2d_bn_stats(h, p["w2"], stride=1, pad=1)
    s2, b2 = _bn_fold(*st2, M2, p["g2"], p["be2"])
    out = bn_act(h2, s2, b2, relu=True, shortcut=sc)      # fused residual + ReLU
    return out[:M2].reshape(n2, ho2, wo2, -1)


def net_forward(params, x_nchw):
    # NCHW (PyTorch) -> NHWC (channels on the 128-lane axis); bf16 activations.
    x = jnp.transpose(x_nchw, (0, 2, 3, 1)).astype(jnp.bfloat16)

    # layer0: Conv7x7 s2 p3 -> MaxPool3x3 s2 p1 -> BN -> ReLU
    h, _, (N, Ho, Wo), M0 = conv2d_bn_stats(x, params["l0_w"], stride=2, pad=3)
    h = h[:M0].reshape(N, Ho, Wo, -1)
    pooled, pstats, (N, Ho, Wo), M1 = maxpool3x3_s2_p1_bn_stats(h)
    s0, b0 = _bn_fold(*pstats, M1, params["l0_g"], params["l0_be"])
    h = bn_act(pooled, s0, b0, relu=True)
    h = h[:M1].reshape(N, Ho, Wo, -1)

    for blk in params["layer1"]:
        h = resblock_forward(h, blk)
    for blk in params["layer2"]:
        h = resblock_forward(h, blk)
    for blk in params["layer3"]:
        h = resblock_forward(h, blk)

    # torch.flatten(input, 1): the (C,H,W) flatten order is folded into the
    # FC weight rows at init, so a plain NHWC flatten is used here.
    N, H, W, C = h.shape
    flat = h.reshape(N, H * W * C)
    return linear(flat, params["fc_w"], params["fc_b"])


# --------------------------- deterministic init -----------------------------

def _conv_init(key, kh, kw, cin, cout):
    std = (2.0 / (kh * kw * cin)) ** 0.5
    # Conv biases are omitted: they are exactly cancelled by the following
    # BatchNorm's mean subtraction (identical numerics, less work).
    return jax.random.normal(key, (kh, kw, cin, cout), jnp.float32) * std


def _bn_init(c):
    # PyTorch BatchNorm2d defaults: weight=1, bias=0.
    return jnp.ones((c,), jnp.float32), jnp.zeros((c,), jnp.float32)


def _block_init(key, cin, cout, downsample):
    k1, k2, k3 = jax.random.split(key, 3)
    p = dict(w1=_conv_init(k1, 3, 3, cin, cout),
             w2=_conv_init(k2, 3, 3, cout, cout))
    p["g1"], p["be1"] = _bn_init(cout)
    p["g2"], p["be2"] = _bn_init(cout)
    if downsample:
        p["sc_w"] = _conv_init(k3, 1, 1, cin, cout)
        p["sc_g"], p["sc_be"] = _bn_init(cout)
    return p


def init_params(key, in_channels):
    keys = jax.random.split(key, 9)
    l0_w = _conv_init(keys[0], 7, 7, in_channels, 64)
    l0_g, l0_be = _bn_init(64)
    # FC weight is created in the PyTorch (C,H,W) flatten row order, then its
    # rows are permuted once into NHWC flatten order -> no runtime transpose.
    fc_w = jax.random.normal(keys[7], (1024, 10), jnp.float32) * (1.0 / 1024) ** 0.5
    C, H, W = 256, 2, 2
    fc_w = fc_w.reshape(C, H, W, 10).transpose(1, 2, 0, 3).reshape(H * W * C, 10)
    fc_b = jax.random.normal(keys[8], (10,), jnp.float32) * 0.01
    return dict(
        l0_w=l0_w, l0_g=l0_g, l0_be=l0_be,
        layer1=[_block_init(keys[1], 64, 64, False),
                _block_init(keys[2], 64, 64, False)],
        layer2=[_block_init(keys[3], 64, 256, True),
                _block_init(keys[4], 256, 256, False)],
        layer3=[_block_init(keys[5], 256, 256, True),
                _block_init(keys[6], 256, 256, False)],
        fc_w=fc_w, fc_b=fc_b,
    )


# --------------------------------- main --------------------------------------

if __name__ == "__main__":
    key = jax.random.PRNGKey(0)
    pkey, xkey = jax.random.split(key)

    in_channels = 3
    # 32x32 input so layer3 output is 256ch x 2x2 -> flatten = 1024, matching
    # nn.Linear(1024, 10) in the PyTorch module.
    x = jax.random.normal(xkey, (2, in_channels, 32, 32), jnp.float32)  # NCHW

    params = init_params(pkey, in_channels)
    fwd = jax.jit(net_forward)
    out = jax.block_until_ready(fwd(params, x))

    assert out.shape == (2, 10), out.shape
    assert bool(jnp.all(jnp.isfinite(out)))
    print("KERNEL_OK")
</pallas_src>

<mosaic_0001>
module attributes {stable_mosaic.version = 11 : i64} {
  func.func @_conv_stats_kernel(%arg0: i32, %arg1: memref<256x147xbf16, #tpu.memory_space<vmem>>, %arg2: memref<147x64xbf16, #tpu.memory_space<vmem>>, %arg3: memref<256x64xf32, #tpu.memory_space<vmem>>, %arg4: memref<1x1x64xf32, #tpu.memory_space<vmem>>, %arg5: memref<1x1x64xf32, #tpu.memory_space<vmem>>) attributes {dimension_semantics = [#tpu.dimension_semantics<parallel>], iteration_bounds = array<i64: 2>, scalar_prefetch = 0 : i64, scratch_operands = 0 : i64, tpu.core_type = #tpu.core_type<tc>, window_params = [{transform_indices = @transform_0, window_bounds = array<i64: 256, 147>}, {pipeline_mode = #tpu.pipeline_mode<synchronous>, transform_indices = @transform_1, window_bounds = array<i64: 147, 64>}, {transform_indices = @transform_2, window_bounds = array<i64: 256, 64>}, {transform_indices = @transform_3, window_bounds = array<i64: 1, 1, 64>}, {transform_indices = @transform_4, window_bounds = array<i64: 1, 1, 64>}]} {
    %c0 = arith.constant 0 : index
    %c0_0 = arith.constant 0 : index
    %0 = vector.load %arg1[%c0, %c0_0] : memref<256x147xbf16, #tpu.memory_space<vmem>>, vector<256x147xbf16>
    %c0_1 = arith.constant 0 : index
    %c0_2 = arith.constant 0 : index
    %1 = vector.load %arg2[%c0_1, %c0_2] : memref<147x64xbf16, #tpu.memory_space<vmem>>, vector<147x64xbf16>
    %cst = arith.constant dense<0.000000e+00> : vector<256x64xf32>
    %2 = tpu.matmul %0, %1, %cst {dimension_numbers = #tpu.dot_dimension_numbers<[1], [0], [0], [1], [0, 0, 1, 1], [], []>} : vector<256x147xbf16>, vector<147x64xbf16>, vector<256x64xf32> -> vector<256x64xf32>
    %c0_3 = arith.constant 0 : index
    %c0_4 = arith.constant 0 : index
    %3 = vector.load %arg3[%c0_3, %c0_4] : memref<256x64xf32, #tpu.memory_space<vmem>>, vector<256x64xf32>
    tpu.vector_store %arg3[%c0_3, %c0_4], %2 {strides = array<i32>} : memref<256x64xf32, #tpu.memory_space<vmem>>, vector<256x64xf32>,
    %cst_5 = arith.constant dense<0.000000e+00> : vector<64xf32>
    %4 = vector.multi_reduction <add>, %2, %cst_5 [0] : vector<256x64xf32> to vector<64xf32>
    %5 = vector.shape_cast %4 : vector<64xf32> to vector<1x64xf32>
    %6 = vector.shape_cast %5 : vector<1x64xf32> to vector<1x1x64xf32>
    %c0_6 = arith.constant 0 : index
    %c0_7 = arith.constant 0 : index
    %c0_8 = arith.constant 0 : index
    %7 = vector.load %arg4[%c0_6, %c0_7, %c0_8] : memref<1x1x64xf32, #tpu.memory_space<vmem>>, vector<1x1x64xf32>
    tpu.vector_store %arg4[%c0_6, %c0_7, %c0_8], %6 {strides = array<i32>} : memref<1x1x64xf32, #tpu.memory_space<vmem>>, vector<1x1x64xf32>,
    %8 = arith.mulf %2, %2 : vector<256x64xf32>
    %cst_9 = arith.constant dense<0.000000e+00> : vector<64xf32>
    %9 = vector.multi_reduction <add>, %8, %cst_9 [0] : vector<256x64xf32> to vector<64xf32>
    %10 = vector.shape_cast %9 : vector<64xf32> to vector<1x64xf32>
    %11 = vector.shape_cast %10 : vector<1x64xf32> to vector<1x1x64xf32>
    %c0_10 = arith.constant 0 : index
    %c0_11 = arith.constant 0 : index
    %c0_12 = arith.constant 0 : index
    %12 = vector.load %arg5[%c0_10, %c0_11, %c0_12] : memref<1x1x64xf32, #tpu.memory_space<vmem>>, vector<1x1x64xf32>
    tpu.vector_store %arg5[%c0_10, %c0_11, %c0_12], %11 {strides = array<i32>} : memref<1x1x64xf32, #tpu.memory_space<vmem>>, vector<1x1x64xf32>,
    return
  }
  func.func @transform_0(%arg0: i32) -> (i32, i32) {
    %c0_i32 = arith.constant 0 : i32
    %c0_i32_0 = arith.constant 0 : i32
    return %arg0, %c0_i32 : i32, i32
  }
  func.func @transform_1(%arg0: i32) -> (i32, i32) {
    %c0_i32 = arith.constant 0 : i32
    %c0_i32_0 = arith.constant 0 : i32
    %c0_i32_1 = arith.constant 0 : i32
    return %c0_i32, %c0_i32_0 : i32, i32
  }
  func.func @transform_2(%arg0: i32) -> (i32, i32) {
    %c0_i32 = arith.constant 0 : i32
    %c0_i32_0 = arith.constant 0 : i32
    return %arg0, %c0_i32 : i32, i32
  }
  func.func @transform_3(%arg0: i32) -> (i32, i32, i32) {
    %c0_i32 = arith.constant 0 : i32
    %c0_i32_0 = arith.constant 0 : i32
    %c0_i32_1 = arith.constant 0 : i32
    return %arg0, %c0_i32, %c0_i32_0 : i32, i32, i32
  }
  func.func @transform_4(%arg0: i32) -> (i32, i32, i32) {
    %c0_i32 = arith.constant 0 : i32
    %c0_i32_0 = arith.constant 0 : i32
    %c0_i32_1 = arith.constant 0 : i32
    return %arg0, %c0_i32, %c0_i32_0 : i32, i32, i32
  }
}

module attributes {stable_mosaic.version = 11 : i64} {
  func.func @_maxpool3_stats_kernel(%arg0: i32, %arg1: memref<128x64xf32, #tpu.memory_space<vmem>>, %arg2: memref<128x64xf32, #tpu.memory_space<vmem>>, %arg3: memref<128x64xf32, #tpu.memory_space<vmem>>, %arg4: memref<128x64xf32, #tpu.memory_space<vmem>>, %arg5: memref<1x1x64xf32, #tpu.memory_space<vmem>>, %arg6: memref<1x1x64xf32, #tpu.memory_space<vmem>>) attributes {dimension_semantics = [#tpu.dimension_semantics<parallel>], iteration_bounds = array<i64: 1>, scalar_prefetch = 0 : i64, scratch_operands = 0 : i64, tpu.core_type = #tpu.core_type<tc>, window_params = [{transform_indices = @transform_0, window_bounds = array<i64: 128, 64>}, {transform_indices = @transform_1, window_bounds = array<i64: 128, 64>}, {transform_indices = @transform_2, window_bounds = array<i64: 128, 64>}, {transform_indices = @transform_3, window_bounds = array<i64: 128, 64>}, {transform_indices = @transform_4, window_bounds = array<i64: 1, 1, 64>}, {transform_indices = @transform_5, window_bounds = array<i64: 1, 1, 64>}]} {
    %c0 = arith.constant 0 : index
    %c0_0 = arith.constant 0 : index
    %0 = vector.load %arg1[%c0, %c0_0] : memref<128x64xf32, #tpu.memory_space<vmem>>, vector<128x64xf32>
    %c0_1 = arith.constant 0 : index
    %c0_2 = arith.constant 0 : index
    %1 = vector.load %arg2[%c0_1, %c0_2] : memref<128x64xf32, #tpu.memory_space<vmem>>, vector<128x64xf32>
    %2 = arith.maximumf %0, %1 : vector<128x64xf32>
    %c0_3 = arith.constant 0 : index
    %c0_4 = arith.constant 0 : index
    %3 = vector.load %arg3[%c0_3, %c0_4] : memref<128x64xf32, #tpu.memory_space<vmem>>, vector<128x64xf32>
    %4 = arith.maximumf %2, %3 : vector<128x64xf32>
    %c0_5 = arith.constant 0 : index
    %c0_6 = arith.constant 0 : index
    %5 = vector.load %arg4[%c0_5, %c0_6] : memref<128x64xf32, #tpu.memory_space<vmem>>, vector<128x64xf32>
    tpu.vector_store %arg4[%c0_5, %c0_6], %4 {strides = array<i32>} : memref<128x64xf32, #tpu.memory_space<vmem>>, vector<128x64xf32>,
    %cst = arith.constant dense<0.000000e+00> : vector<64xf32>
    %6 = vector.multi_reduction <add>, %4, %cst [0] : vector<128x64xf32> to vector<64xf32>
    %7 = vector.shape_cast %6 : vector<64xf32> to vector<1x64xf32>
    %8 = vector.shape_cast %7 : vector<1x64xf32> to vector<1x1x64xf32>
    %c0_7 = arith.constant 0 : index
    %c0_8 = arith.constant 0 : index
    %c0_9 = arith.constant 0 : index
    %9 = vector.load %arg5[%c0_7, %c0_8, %c0_9] : memref<1x1x64xf32, #tpu.memory_space<vmem>>, vector<1x1x64xf32>
    tpu.vector_store %arg5[%c0_7, %c0_8, %c0_9], %8 {strides = array<i32>} : memref<1x1x64xf32, #tpu.memory_space<vmem>>, vector<1x1x64xf32>,
    %10 = arith.mulf %4, %4 : vector<128x64xf32>
    %cst_10 = arith.constant dense<0.000000e+00> : vector<64xf32>
    %11 = vector.multi_reduction <add>, %10, %cst_10 [0] : vector<128x64xf32> to vector<64xf32>
    %12 = vector.shape_cast %11 : vector<64xf32> to vector<1x64xf32>
    %13 = vector.shape_cast %12 : vector<1x64xf32> to vector<1x1x64xf32>
    %c0_11 = arith.constant 0 : index
    %c0_12 = arith.constant 0 : index
    %c0_13 = arith.constant 0 : index
    %14 = vector.load %arg6[%c0_11, %c0_12, %c0_13] : memref<1x1x64xf32, #tpu.memory_space<vmem>>, vector<1x1x64xf32>
    tpu.vector_store %arg6[%c0_11, %c0_12, %c0_13], %13 {strides = array<i32>} : memref<1x1x64xf32, #tpu.memory_space<vmem>>, vector<1x1x64xf32>,
    return
  }
  func.func @transform_0(%arg0: i32) -> (i32, i32) {
    %c0_i32 = arith.constant 0 : i32
    %c0_i32_0 = arith.constant 0 : i32
    return %arg0, %c0_i32 : i32, i32
  }
  func.func @transform_1(%arg0: i32) -> (i32, i32) {
    %c0_i32 = arith.constant 0 : i32
    %c0_i32_0 = arith.constant 0 : i32
    return %arg0, %c0_i32 : i32, i32
  }
  func.func @transform_2(%arg0: i32) -> (i32, i32) {
    %c0_i32 = arith.constant 0 : i32
    %c0_i32_0 = arith.constant 0 : i32
    return %arg0, %c0_i32 : i32, i32
  }
  func.func @transform_3(%arg0: i32) -> (i32, i32) {
    %c0_i32 = arith.constant 0 : i32
    %c0_i32_0 = arith.constant 0 : i32
    return %arg0, %c0_i32 : i32, i32
  }
  func.func @transform_4(%arg0: i32) -> (i32, i32, i32) {
    %c0_i32 = arith.constant 0 : i32
    %c0_i32_0 = arith.constant 0 : i32
    %c0_i32_1 = arith.constant 0 : i32
    return %arg0, %c0_i32, %c0_i32_0 : i32, i32, i32
  }
  func.func @transform_5(%arg0: i32) -> (i32, i32, i32) {
    %c0_i32 = arith.constant 0 : i32
    %c0_i32_0 = arith.constant 0 : i32
    %c0_i32_1 = arith.constant 0 : i32
    return %arg0, %c0_i32, %c0_i32_0 : i32, i32, i32
  }
}

module attributes {stable_mosaic.version = 11 : i64} {
  func.func @_bn_act_kernel(%arg0: i32, %arg1: memref<128x64xf32, #tpu.memory_space<vmem>>, %arg2: memref<1x64xf32, #tpu.memory_space<vmem>>, %arg3: memref<1x64xf32, #tpu.memory_space<vmem>>, %arg4: memref<128x64xbf16, #tpu.memory_space<vmem>>) attributes {dimension_semantics = [#tpu.dimension_semantics<parallel>], iteration_bounds = array<i64: 1>, scalar_prefetch = 0 : i64, scratch_operands = 0 : i64, tpu.core_type = #tpu.core_type<tc>, window_params = [{transform_indices = @transform_0, window_bounds = array<i64: 128, 64>}, {pipeline_mode = #tpu.pipeline_mode<synchronous>, transform_indices = @transform_1, window_bounds = array<i64: 1, 64>}, {pipeline_mode = #tpu.pipeline_mode<synchronous>, transform_indices = @transform_2, window_bounds = array<i64: 1, 64>}, {transform_indices = @transform_3, window_bounds = array<i64: 128, 64>}]} {
    %c0 = arith.constant 0 : index
    %c0_0 = arith.constant 0 : index
    %0 = vector.load %arg1[%c0, %c0_0] : memref<128x64xf32, #tpu.memory_space<vmem>>, vector<128x64xf32>
    %c0_1 = arith.constant 0 : index
    %c0_2 = arith.constant 0 : index
    %1 = vector.load %arg2[%c0_1, %c0_2] : memref<1x64xf32, #tpu.memory_space<vmem>>, vector<1x64xf32>
    %2 = vector.broadcast %1 : vector<1x64xf32> to vector<128x64xf32>
    %3 = arith.mulf %0, %2 : vector<128x64xf32>
    %c0_3 = arith.constant 0 : index
    %c0_4 = arith.constant 0 : index
    %4 = vector.load %arg3[%c0_3, %c0_4] : memref<1x64xf32, #tpu.memory_space<vmem>>, vector<1x64xf32>
    %5 = vector.broadcast %4 : vector<1x64xf32> to vector<128x64xf32>
    %6 = arith.addf %3, %5 : vector<128x64xf32>
    %cst = arith.constant 0.000000e+00 : f32
    %7 = vector.broadcast %cst : f32 to vector<128x64xf32>
    %8 = arith.maximumf %6, %7 : vector<128x64xf32>
    %9 = arith.truncf %8 : vector<128x64xf32> to vector<128x64xbf16>
    %c0_5 = arith.constant 0 : index
    %c0_6 = arith.constant 0 : index
    %10 = vector.load %arg4[%c0_5, %c0_6] : memref<128x64xbf16, #tpu.memory_space<vmem>>, vector<128x64xbf16>
    tpu.vector_store %arg4[%c0_5, %c0_6], %9 {strides = array<i32>} : memref<128x64xbf16, #tpu.memory_space<vmem>>, vector<128x64xbf16>,
    return
  }
  func.func @transform_0(%arg0: i32) -> (i32, i32) {
    %c0_i32 = arith.constant 0 : i32
    %c0_i32_0 = arith.constant 0 : i32
    return %arg0, %c0_i32 : i32, i32
  }
  func.func @transform_1(%arg0: i32) -> (i32, i32) {
    %c0_i32 = arith.constant 0 : i32
    %c0_i32_0 = arith.constant 0 : i32
    %c0_i32_1 = arith.constant 0 : i32
    return %c0_i32, %c0_i32_0 : i32, i32
  }
  func.func @transform_2(%arg0: i32) -> (i32, i32) {
    %c0_i32 = arith.constant 0 : i32
    %c0_i32_0 = arith.constant 0 : i32
    %c0_i32_1 = arith.constant 0 : i32
    return %c0_i32, %c0_i32_0 : i32, i32
  }
  func.func @transform_3(%arg0: i32) -> (i32, i32) {
    %c0_i32 = arith.constant 0 : i32
    %c0_i32_0 = arith.constant 0 : i32
    return %arg0, %c0_i32 : i32, i32
  }
}

module attributes {stable_mosaic.version = 11 : i64} {
  func.func @_conv_stats_kernel(%arg0: i32, %arg1: memref<128x576xbf16, #tpu.memory_space<vmem>>, %arg2: memref<576x64xbf16, #tpu.memory_space<vmem>>, %arg3: memref<128x64xf32, #tpu.memory_space<vmem>>, %arg4: memref<1x1x64xf32, #tpu.memory_space<vmem>>, %arg5: memref<1x1x64xf32, #tpu.memory_space<vmem>>) attributes {dimension_semantics = [#tpu.dimension_semantics<parallel>], iteration_bounds = array<i64: 1>, scalar_prefetch = 0 : i64, scratch_operands = 0 : i64, tpu.core_type = #tpu.core_type<tc>, window_params = [{transform_indices = @transform_0, window_bounds = array<i64: 128, 576>}, {pipeline_mode = #tpu.pipeline_mode<synchronous>, transform_indices = @transform_1, window_bounds = array<i64: 576, 64>}, {transform_indices = @transform_2, window_bounds = array<i64: 128, 64>}, {transform_indices = @transform_3, window_bounds = array<i64: 1, 1, 64>}, {transform_indices = @transform_4, window_bounds = array<i64: 1, 1, 64>}]} {
    %c0 = arith.constant 0 : index
    %c0_0 = arith.constant 0 : index
    %0 = vector.load %arg1[%c0, %c0_0] : memref<128x576xbf16, #tpu.memory_space<vmem>>, vector<128x576xbf16>
    %c0_1 = arith.constant 0 : index
    %c0_2 = arith.constant 0 : index
    %1 = vector.load %arg2[%c0_1, %c0_2] : memref<576x64xbf16, #tpu.memory_space<vmem>>, vector<576x64xbf16>
    %cst = arith.constant dense<0.000000e+00> : vector<128x64xf32>
    %2 = tpu.matmul %0, %1, %cst {dimension_numbers = #tpu.dot_dimension_numbers<[1], [0], [0], [1], [0, 0, 1, 1], [], []>} : vector<128x576xbf16>, vector<576x64xbf16>, vector<128x64xf32> -> vector<128x64xf32>
    %c0_3 = arith.constant 0 : index
    %c0_4 = arith.constant 0 : index
    %3 = vector.load %arg3[%c0_3, %c0_4] : memref<128x64xf32, #tpu.memory_space<vmem>>, vector<128x64xf32>
    tpu.vector_store %arg3[%c0_3, %c0_4], %2 {strides = array<i32>} : memref<128x64xf32, #tpu.memory_space<vmem>>, vector<128x64xf32>,
    %cst_5 = arith.constant dense<0.000000e+00> : vector<64xf32>
    %4 = vector.multi_reduction <add>, %2, %cst_5 [0] : vector<128x64xf32> to vector<64xf32>
    %5 = vector.shape_cast %4 : vector<64xf32> to vector<1x64xf32>
    %6 = vector.shape_cast %5 : vector<1x64xf32> to vector<1x1x64xf32>
    %c0_6 = arith.constant 0 : index
    %c0_7 = arith.constant 0 : index
    %c0_8 = arith.constant 0 : index
    %7 = vector.load %arg4[%c0_6, %c0_7, %c0_8] : memref<1x1x64xf32, #tpu.memory_space<vmem>>, vector<1x1x64xf32>
    tpu.vector_store %arg4[%c0_6, %c0_7, %c0_8], %6 {strides = array<i32>} : memref<1x1x64xf32, #tpu.memory_space<vmem>>, vector<1x1x64xf32>,
    %8 = arith.mulf %2, %2 : vector<128x64xf32>
    %cst_9 = arith.constant dense<0.000000e+00> : vector<64xf32>
    %9 = vector.multi_reduction <add>, %8, %cst_9 [0] : vector<128x64xf32> to vector<64xf32>
    %10 = vector.shape_cast %9 : vector<64xf32> to vector<1x64xf32>
    %11 = vector.shape_cast %10 : vector<1x64xf32> to vector<1x1x64xf32>
    %c0_10 = arith.constant 0 : index
    %c0_11 = arith.constant 0 : index
    %c0_12 = arith.constant 0 : index
    %12 = vector.load %arg5[%c0_10, %c0_11, %c0_12] : memref<1x1x64xf32, #tpu.memory_space<vmem>>, vector<1x1x64xf32>
    tpu.vector_store %arg5[%c0_10, %c0_11, %c0_12], %11 {strides = array<i32>} : memref<1x1x64xf32, #tpu.memory_space<vmem>>, vector<1x1x64xf32>,
    return
  }
  func.func @transform_0(%arg0: i32) -> (i32, i32) {
    %c0_i32 = arith.constant 0 : i32
    %c0_i32_0 = arith.constant 0 : i32
    return %arg0, %c0_i32 : i32, i32
  }
  func.func @transform_1(%arg0: i32) -> (i32, i32) {
    %c0_i32 = arith.constant 0 : i32
    %c0_i32_0 = arith.constant 0 : i32
    %c0_i32_1 = arith.constant 0 : i32
    return %c0_i32, %c0_i32_0 : i32, i32
  }
  func.func @transform_2(%arg0: i32) -> (i32, i32) {
    %c0_i32 = arith.constant 0 : i32
    %c0_i32_0 = arith.constant 0 : i32
    return %arg0, %c0_i32 : i32, i32
  }
  func.func @transform_3(%arg0: i32) -> (i32, i32, i32) {
    %c0_i32 = arith.constant 0 : i32
    %c0_i32_0 = arith.constant 0 : i32
    %c0_i32_1 = arith.constant 0 : i32
    return %arg0, %c0_i32, %c0_i32_0 : i32, i32, i32
  }
  func.func @transform_4(%arg0: i32) -> (i32, i32, i32) {
    %c0_i32 = arith.constant 0 : i32
    %c0_i32_0 = arith.constant 0 : i32
    %c0_i32_1 = arith.constant 0 : i32
    return %arg0, %c0_i32, %c0_i32_0 : i32, i32, i32
  }
}

module attributes {stable_mosaic.version = 11 : i64} {
  func.func @_bn_act_add_kernel(%arg0: i32, %arg1: memref<128x64xf32, #tpu.memory_space<vmem>>, %arg2: memref<128x64xbf16, #tpu.memory_space<vmem>>, %arg3: memref<1x64xf32, #tpu.memory_space<vmem>>, %arg4: memref<1x64xf32, #tpu.memory_space<vmem>>, %arg5: memref<128x64xbf16, #tpu.memory_space<vmem>>) attributes {dimension_semantics = [#tpu.dimension_semantics<parallel>], iteration_bounds = array<i64: 1>, scalar_prefetch = 0 : i64, scratch_operands = 0 : i64, tpu.core_type = #tpu.core_type<tc>, window_params = [{transform_indices = @transform_0, window_bounds = array<i64: 128, 64>}, {transform_indices = @transform_1, window_bounds = array<i64: 128, 64>}, {pipeline_mode = #tpu.pipeline_mode<synchronous>, transform_indices = @transform_2, window_bounds = array<i64: 1, 64>}, {pipeline_mode = #tpu.pipeline_mode<synchronous>, transform_indices = @transform_3, window_bounds = array<i64: 1, 64>}, {transform_indices = @transform_4, window_bounds = array<i64: 128, 64>}]} {
    %c0 = arith.constant 0 : index
    %c0_0 = arith.constant 0 : index
    %0 = vector.load %arg1[%c0, %c0_0] : memref<128x64xf32, #tpu.memory_space<vmem>>, vector<128x64xf32>
    %c0_1 = arith.constant 0 : index
    %c0_2 = arith.constant 0 : index
    %1 = vector.load %arg3[%c0_1, %c0_2] : memref<1x64xf32, #tpu.memory_space<vmem>>, vector<1x64xf32>
    %2 = vector.broadcast %1 : vector<1x64xf32> to vector<128x64xf32>
    %3 = arith.mulf %0, %2 : vector<128x64xf32>
    %c0_3 = arith.constant 0 : index
    %c0_4 = arith.constant 0 : index
    %4 = vector.load %arg4[%c0_3, %c0_4] : memref<1x64xf32, #tpu.memory_space<vmem>>, vector<1x64xf32>
    %5 = vector.broadcast %4 : vector<1x64xf32> to vector<128x64xf32>
    %6 = arith.addf %3, %5 : vector<128x64xf32>
    %c0_5 = arith.constant 0 : index
    %c0_6 = arith.constant 0 : index
    %7 = vector.load %arg2[%c0_5, %c0_6] : memref<128x64xbf16, #tpu.memory_space<vmem>>, vector<128x64xbf16>
    %8 = arith.extf %7 : vector<128x64xbf16> to vector<128x64xf32>
    %9 = arith.addf %6, %8 : vector<128x64xf32>
    %cst = arith.constant 0.000000e+00 : f32
    %10 = vector.broadcast %cst : f32 to vector<128x64xf32>
    %11 = arith.maximumf %9, %10 : vector<128x64xf32>
    %12 = arith.truncf %11 : vector<128x64xf32> to vector<128x64xbf16>
    %c0_7 = arith.constant 0 : index
    %c0_8 = arith.constant 0 : index
    %13 = vector.load %arg5[%c0_7, %c0_8] : memref<128x64xbf16, #tpu.memory_space<vmem>>, vector<128x64xbf16>
    tpu.vector_store %arg5[%c0_7, %c0_8], %12 {strides = array<i32>} : memref<128x64xbf16, #tpu.memory_space<vmem>>, vector<128x64xbf16>,
    return
  }
  func.func @transform_0(%arg0: i32) -> (i32, i32) {
    %c0_i32 = arith.constant 0 : i32
    %c0_i32_0 = arith.constant 0 : i32
    return %arg0, %c0_i32 : i32, i32
  }
  func.func @transform_1(%arg0: i32) -> (i32, i32) {
    %c0_i32 = arith.constant 0 : i32
    %c0_i32_0 = arith.constant 0 : i32
    return %arg0, %c0_i32 : i32, i32
  }
  func.func @transform_2(%arg0: i32) -> (i32, i32) {
    %c0_i32 = arith.constant 0 : i32
    %c0_i32_0 = arith.constant 0 : i32
    %c0_i32_1 = arith.constant 0 : i32
    return %c0_i32, %c0_i32_0 : i32, i32
  }
  func.func @transform_3(%arg0: i32) -> (i32, i32) {
    %c0_i32 = arith.constant 0 : i32
    %c0_i32_0 = arith.constant 0 : i32
    %c0_i32_1 = arith.constant 0 : i32
    return %c0_i32, %c0_i32_0 : i32, i32
  }
  func.func @transform_4(%arg0: i32) -> (i32, i32) {
    %c0_i32 = arith.constant 0 : i32
    %c0_i32_0 = arith.constant 0 : i32
    return %arg0, %c0_i32 : i32, i32
  }
}

module attributes {stable_mosaic.version = 11 : i64} {
  func.func @_conv_stats_kernel(%arg0: i32, %arg1: memref<32x576xbf16, #tpu.memory_space<vmem>>, %arg2: memref<576x256xbf16, #tpu.memory_space<vmem>>, %arg3: memref<32x256xf32, #tpu.memory_space<vmem>>, %arg4: memref<1x1x256xf32, #tpu.memory_space<vmem>>, %arg5: memref<1x1x256xf32, #tpu.memory_space<vmem>>) attributes {dimension_semantics = [#tpu.dimension_semantics<parallel>], iteration_bounds = array<i64: 1>, scalar_prefetch = 0 : i64, scratch_operands = 0 : i64, tpu.core_type = #tpu.core_type<tc>, window_params = [{transform_indices = @transform_0, window_bounds = array<i64: 32, 576>}, {pipeline_mode = #tpu.pipeline_mode<synchronous>, transform_indices = @transform_1, window_bounds = array<i64: 576, 256>}, {transform_indices = @transform_2, window_bounds = array<i64: 32, 256>}, {transform_indices = @transform_3, window_bounds = array<i64: 1, 1, 256>}, {transform_indices = @transform_4, window_bounds = array<i64: 1, 1, 256>}]} {
    %c0 = arith.constant 0 : index
    %c0_0 = arith.constant 0 : index
    %0 = vector.load %arg1[%c0, %c0_0] : memref<32x576xbf16, #tpu.memory_space<vmem>>, vector<32x576xbf16>
    %c0_1 = arith.constant 0 : index
    %c0_2 = arith.constant 0 : index
    %1 = vector.load %arg2[%c0_1, %c0_2] : memref<576x256xbf16, #tpu.memory_space<vmem>>, vector<576x256xbf16>
    %cst = arith.constant dense<0.000000e+00> : vector<32x256xf32>
    %2 = tpu.matmul %0, %1, %cst {dimension_numbers = #tpu.dot_dimension_numbers<[1], [0], [0], [1], [0, 0, 1, 1], [], []>} : vector<32x576xbf16>, vector<576x256xbf16>, vector<32x256xf32> -> vector<32x256xf32>
    %c0_3 = arith.constant 0 : index
    %c0_4 = arith.constant 0 : index
    %3 = vector.load %arg3[%c0_3, %c0_4] : memref<32x256xf32, #tpu.memory_space<vmem>>, vector<32x256xf32>
    tpu.vector_store %arg3[%c0_3, %c0_4], %2 {strides = array<i32>} : memref<32x256xf32, #tpu.memory_space<vmem>>, vector<32x256xf32>,
    %cst_5 = arith.constant dense<0.000000e+00> : vector<256xf32>
    %4 = vector.multi_reduction <add>, %2, %cst_5 [0] : vector<32x256xf32> to vector<256xf32>
    %5 = vector.shape_cast %4 : vector<256xf32> to vector<1x256xf32>
    %6 = vector.shape_cast %5 : vector<1x256xf32> to vector<1x1x256xf32>
    %c0_6 = arith.constant 0 : index
    %c0_7 = arith.constant 0 : index
    %c0_8 = arith.constant 0 : index
    %7 = vector.load %arg4[%c0_6, %c0_7, %c0_8] : memref<1x1x256xf32, #tpu.memory_space<vmem>>, vector<1x1x256xf32>
    tpu.vector_store %arg4[%c0_6, %c0_7, %c0_8], %6 {strides = array<i32>} : memref<1x1x256xf32, #tpu.memory_space<vmem>>, vector<1x1x256xf32>,
    %8 = arith.mulf %2, %2 : vector<32x256xf32>
    %cst_9 = arith.constant dense<0.000000e+00> : vector<256xf32>
    %9 = vector.multi_reduction <add>, %8, %cst_9 [0] : vector<32x256xf32> to vector<256xf32>
    %10 = vector.shape_cast %9 : vector<256xf32> to vector<1x256xf32>
    %11 = vector.shape_cast %10 : vector<1x256xf32> to vector<1x1x256xf32>
    %c0_10 = arith.constant 0 : index
    %c0_11 = arith.constant 0 : index
    %c0_12 = arith.constant 0 : index
    %12 = vector.load %arg5[%c0_10, %c0_11, %c0_12] : memref<1x1x256xf32, #tpu.memory_space<vmem>>, vector<1x1x256xf32>
    tpu.vector_store %arg5[%c0_10, %c0_11, %c0_12], %11 {strides = array<i32>} : memref<1x1x256xf32, #tpu.memory_space<vmem>>, vector<1x1x256xf32>,
    return
  }
  func.func @transform_0(%arg0: i32) -> (i32, i32) {
    %c0_i32 = arith.constant 0 : i32
    %c0_i32_0 = arith.constant 0 : i32
    return %arg0, %c0_i32 : i32, i32
  }
  func.func @transform_1(%arg0: i32) -> (i32, i32) {
    %c0_i32 = arith.constant 0 : i32
    %c0_i32_0 = arith.constant 0 : i32
    %c0_i32_1 = arith.constant 0 : i32
    return %c0_i32, %c0_i32_0 : i32, i32
  }
  func.func @transform_2(%arg0: i32) -> (i32, i32) {
    %c0_i32 = arith.constant 0 : i32
    %c0_i32_0 = arith.constant 0 : i32
    return %arg0, %c0_i32 : i32, i32
  }
  func.func @transform_3(%arg0: i32) -> (i32, i32, i32) {
    %c0_i32 = arith.constant 0 : i32
    %c0_i32_0 = arith.constant 0 : i32
    %c0_i32_1 = arith.constant 0 : i32
    return %arg0, %c0_i32, %c0_i32_0 : i32, i32, i32
  }
  func.func @transform_4(%arg0: i32) -> (i32, i32, i32) {
    %c0_i32 = arith.constant 0 : i32
    %c0_i32_0 = arith.constant 0 : i32
    %c0_i32_1 = arith.constant 0 : i32
    return %arg0, %c0_i32, %c0_i32_0 : i32, i32, i32
  }
}

module attributes {stable_mosaic.version = 11 : i64} {
  func.func @_bn_act_kernel(%arg0: i32, %arg1: memref<32x256xf32, #tpu.memory_space<vmem>>, %arg2: memref<1x256xf32, #tpu.memory_space<vmem>>, %arg3: memref<1x256xf32, #tpu.memory_space<vmem>>, %arg4: memref<32x256xbf16, #tpu.memory_space<vmem>>) attributes {dimension_semantics = [#tpu.dimension_semantics<parallel>], iteration_bounds = array<i64: 1>, scalar_prefetch = 0 : i64, scratch_operands = 0 : i64, tpu.core_type = #tpu.core_type<tc>, window_params = [{transform_indices = @transform_0, window_bounds = array<i64: 32, 256>}, {pipeline_mode = #tpu.pipeline_mode<synchronous>, transform_indices = @transform_1, window_bounds = array<i64: 1, 256>}, {pipeline_mode = #tpu.pipeline_mode<synchronous>, transform_indices = @transform_2, window_bounds = array<i64: 1, 256>}, {transform_indices = @transform_3, window_bounds = array<i64: 32, 256>}]} {
    %c0 = arith.constant 0 : index
    %c0_0 = arith.constant 0 : index
    %0 = vector.load %arg1[%c0, %c0_0] : memref<32x256xf32, #tpu.memory_space<vmem>>, vector<32x256xf32>
    %c0_1 = arith.constant 0 : index
    %c0_2 = arith.constant 0 : index
    %1 = vector.load %arg2[%c0_1, %c0_2] : memref<1x256xf32, #tpu.memory_space<vmem>>, vector<1x256xf32>
    %2 = vector.broadcast %1 : vector<1x256xf32> to vector<32x256xf32>
    %3 = arith.mulf %0, %2 : vector<32x256xf32>
    %c0_3 = arith.constant 0 : index
    %c0_4 = arith.constant 0 : index
    %4 = vector.load %arg3[%c0_3, %c0_4] : memref<1x256xf32, #tpu.memory_space<vmem>>, vector<1x256xf32>
    %5 = vector.broadcast %4 : vector<1x256xf32> to vector<32x256xf32>
    %6 = arith.addf %3, %5 : vector<32x256xf32>
    %cst = arith.constant 0.000000e+00 : f32
    %7 = vector.broadcast %cst : f32 to vector<32x256xf32>
    %8 = arith.maximumf %6, %7 : vector<32x256xf32>
    %9 = arith.truncf %8 : vector<32x256xf32> to vector<32x256xbf16>
    %c0_5 = arith.constant 0 : index
    %c0_6 = arith.constant 0 : index
    %10 = vector.load %arg4[%c0_5, %c0_6] : memref<32x256xbf16, #tpu.memory_space<vmem>>, vector<32x256xbf16>
    tpu.vector_store %arg4[%c0_5, %c0_6], %9 {strides = array<i32>} : memref<32x256xbf16, #tpu.memory_space<vmem>>, vector<32x256xbf16>,
    return
  }
  func.func @transform_0(%arg0: i32) -> (i32, i32) {
    %c0_i32 = arith.constant 0 : i32
    %c0_i32_0 = arith.constant 0 : i32
    return %arg0, %c0_i32 : i32, i32
  }
  func.func @transform_1(%arg0: i32) -> (i32, i32) {
    %c0_i32 = arith.constant 0 : i32
    %c0_i32_0 = arith.constant 0 : i32
    %c0_i32_1 = arith.constant 0 : i32
    return %c0_i32, %c0_i32_0 : i32, i32
  }
  func.func @transform_2(%arg0: i32) -> (i32, i32) {
    %c0_i32 = arith.constant 0 : i32
    %c0_i32_0 = arith.constant 0 : i32
    %c0_i32_1 = arith.constant 0 : i32
    return %c0_i32, %c0_i32_0 : i32, i32
  }
  func.func @transform_3(%arg0: i32) -> (i32, i32) {
    %c0_i32 = arith.constant 0 : i32
    %c0_i32_0 = arith.constant 0 : i32
    return %arg0, %c0_i32 : i32, i32
  }
}

module attributes {stable_mosaic.version = 11 : i64} {
  func.func @_conv_stats_kernel(%arg0: i32, %arg1: memref<32x2304xbf16, #tpu.memory_space<vmem>>, %arg2: memref<2304x256xbf16, #tpu.memory_space<vmem>>, %arg3: memref<32x256xf32, #tpu.memory_space<vmem>>, %arg4: memref<1x1x256xf32, #tpu.memory_space<vmem>>, %arg5: memref<1x1x256xf32, #tpu.memory_space<vmem>>) attributes {dimension_semantics = [#tpu.dimension_semantics<parallel>], iteration_bounds = array<i64: 1>, scalar_prefetch = 0 : i64, scratch_operands = 0 : i64, tpu.core_type = #tpu.core_type<tc>, window_params = [{transform_indices = @transform_0, window_bounds = array<i64: 32, 2304>}, {pipeline_mode = #tpu.pipeline_mode<synchronous>, transform_indices = @transform_1, window_bounds = array<i64: 2304, 256>}, {transform_indices = @transform_2, window_bounds = array<i64: 32, 256>}, {transform_indices = @transform_3, window_bounds = array<i64: 1, 1, 256>}, {transform_indices = @transform_4, window_bounds = array<i64: 1, 1, 256>}]} {
    %c0 = arith.constant 0 : index
    %c0_0 = arith.constant 0 : index
    %0 = vector.load %arg1[%c0, %c0_0] : memref<32x2304xbf16, #tpu.memory_space<vmem>>, vector<32x2304xbf16>
    %c0_1 = arith.constant 0 : index
    %c0_2 = arith.constant 0 : index
    %1 = vector.load %arg2[%c0_1, %c0_2] : memref<2304x256xbf16, #tpu.memory_space<vmem>>, vector<2304x256xbf16>
    %cst = arith.constant dense<0.000000e+00> : vector<32x256xf32>
    %2 = tpu.matmul %0, %1, %cst {dimension_numbers = #tpu.dot_dimension_numbers<[1], [0], [0], [1], [0, 0, 1, 1], [], []>} : vector<32x2304xbf16>, vector<2304x256xbf16>, vector<32x256xf32> -> vector<32x256xf32>
    %c0_3 = arith.constant 0 : index
    %c0_4 = arith.constant 0 : index
    %3 = vector.load %arg3[%c0_3, %c0_4] : memref<32x256xf32, #tpu.memory_space<vmem>>, vector<32x256xf32>
    tpu.vector_store %arg3[%c0_3, %c0_4], %2 {strides = array<i32>} : memref<32x256xf32, #tpu.memory_space<vmem>>, vector<32x256xf32>,
    %cst_5 = arith.constant dense<0.000000e+00> : vector<256xf32>
    %4 = vector.multi_reduction <add>, %2, %cst_5 [0] : vector<32x256xf32> to vector<256xf32>
    %5 = vector.shape_cast %4 : vector<256xf32> to vector<1x256xf32>
    %6 = vector.shape_cast %5 : vector<1x256xf32> to vector<1x1x256xf32>
    %c0_6 = arith.constant 0 : index
    %c0_7 = arith.constant 0 : index
    %c0_8 = arith.constant 0 : index
    %7 = vector.load %arg4[%c0_6, %c0_7, %c0_8] : memref<1x1x256xf32, #tpu.memory_space<vmem>>, vector<1x1x256xf32>
    tpu.vector_store %arg4[%c0_6, %c0_7, %c0_8], %6 {strides = array<i32>} : memref<1x1x256xf32, #tpu.memory_space<vmem>>, vector<1x1x256xf32>,
    %8 = arith.mulf %2, %2 : vector<32x256xf32>
    %cst_9 = arith.constant dense<0.000000e+00> : vector<256xf32>
    %9 = vector.multi_reduction <add>, %8, %cst_9 [0] : vector<32x256xf32> to vector<256xf32>
    %10 = vector.shape_cast %9 : vector<256xf32> to vector<1x256xf32>
    %11 = vector.shape_cast %10 : vector<1x256xf32> to vector<1x1x256xf32>
    %c0_10 = arith.constant 0 : index
    %c0_11 = arith.constant 0 : index
    %c0_12 = arith.constant 0 : index
    %12 = vector.load %arg5[%c0_10, %c0_11, %c0_12] : memref<1x1x256xf32, #tpu.memory_space<vmem>>, vector<1x1x256xf32>
    tpu.vector_store %arg5[%c0_10, %c0_11, %c0_12], %11 {strides = array<i32>} : memref<1x1x256xf32, #tpu.memory_space<vmem>>, vector<1x1x256xf32>,
    return
  }
  func.func @transform_0(%arg0: i32) -> (i32, i32) {
    %c0_i32 = arith.constant 0 : i32
    %c0_i32_0 = arith.constant 0 : i32
    return %arg0, %c0_i32 : i32, i32
  }
  func.func @transform_1(%arg0: i32) -> (i32, i32) {
    %c0_i32 = arith.constant 0 : i32
    %c0_i32_0 = arith.constant 0 : i32
    %c0_i32_1 = arith.constant 0 : i32
    return %c0_i32, %c0_i32_0 : i32, i32
  }
  func.func @transform_2(%arg0: i32) -> (i32, i32) {
    %c0_i32 = arith.constant 0 : i32
    %c0_i32_0 = arith.constant 0 : i32
    return %arg0, %c0_i32 : i32, i32
  }
  func.func @transform_3(%arg0: i32) -> (i32, i32, i32) {
    %c0_i32 = arith.constant 0 : i32
    %c0_i32_0 = arith.constant 0 : i32
    %c0_i32_1 = arith.constant 0 : i32
    return %arg0, %c0_i32, %c0_i32_0 : i32, i32, i32
  }
  func.func @transform_4(%arg0: i32) -> (i32, i32, i32) {
    %c0_i32 = arith.constant 0 : i32
    %c0_i32_0 = arith.constant 0 : i32
    %c0_i32_1 = arith.constant 0 : i32
    return %arg0, %c0_i32, %c0_i32_0 : i32, i32, i32
  }
}

module attributes {stable_mosaic.version = 11 : i64} {
  func.func @_bn_act_kernel(%arg0: i32, %arg1: memref<32x256xf32, #tpu.memory_space<vmem>>, %arg2: memref<1x256xf32, #tpu.memory_space<vmem>>, %arg3: memref<1x256xf32, #tpu.memory_space<vmem>>, %arg4: memref<32x256xbf16, #tpu.memory_space<vmem>>) attributes {dimension_semantics = [#tpu.dimension_semantics<parallel>], iteration_bounds = array<i64: 1>, scalar_prefetch = 0 : i64, scratch_operands = 0 : i64, tpu.core_type = #tpu.core_type<tc>, window_params = [{transform_indices = @transform_0, window_bounds = array<i64: 32, 256>}, {pipeline_mode = #tpu.pipeline_mode<synchronous>, transform_indices = @transform_1, window_bounds = array<i64: 1, 256>}, {pipeline_mode = #tpu.pipeline_mode<synchronous>, transform_indices = @transform_2, window_bounds = array<i64: 1, 256>}, {transform_indices = @transform_3, window_bounds = array<i64: 32, 256>}]} {
    %c0 = arith.constant 0 : index
    %c0_0 = arith.constant 0 : index
    %0 = vector.load %arg1[%c0, %c0_0] : memref<32x256xf32, #tpu.memory_space<vmem>>, vector<32x256xf32>
    %c0_1 = arith.constant 0 : index
    %c0_2 = arith.constant 0 : index
    %1 = vector.load %arg2[%c0_1, %c0_2] : memref<1x256xf32, #tpu.memory_space<vmem>>, vector<1x256xf32>
    %2 = vector.broadcast %1 : vector<1x256xf32> to vector<32x256xf32>
    %3 = arith.mulf %0, %2 : vector<32x256xf32>
    %c0_3 = arith.constant 0 : index
    %c0_4 = arith.constant 0 : index
    %4 = vector.load %arg3[%c0_3, %c0_4] : memref<1x256xf32, #tpu.memory_space<vmem>>, vector<1x256xf32>
    %5 = vector.broadcast %4 : vector<1x256xf32> to vector<32x256xf32>
    %6 = arith.addf %3, %5 : vector<32x256xf32>
    %7 = arith.truncf %6 : vector<32x256xf32> to vector<32x256xbf16>
    %c0_5 = arith.constant 0 : index
    %c0_6 = arith.constant 0 : index
    %8 = vector.load %arg4[%c0_5, %c0_6] : memref<32x256xbf16, #tpu.memory_space<vmem>>, vector<32x256xbf16>
    tpu.vector_store %arg4[%c0_5, %c0_6], %7 {strides = array<i32>} : memref<32x256xbf16, #tpu.memory_space<vmem>>, vector<32x256xbf16>,
    return
  }
  func.func @transform_0(%arg0: i32) -> (i32, i32) {
    %c0_i32 = arith.constant 0 : i32
    %c0_i32_0 = arith.constant 0 : i32
    return %arg0, %c0_i32 : i32, i32
  }
  func.func @transform_1(%arg0: i32) -> (i32, i32) {
    %c0_i32 = arith.constant 0 : i32
    %c0_i32_0 = arith.constant 0 : i32
    %c0_i32_1 = arith.constant 0 : i32
    return %c0_i32, %c0_i32_0 : i32, i32
  }
  func.func @transform_2(%arg0: i32) -> (i32, i32) {
    %c0_i32 = arith.constant 0 : i32
    %c0_i32_0 = arith.constant 0 : i32
    %c0_i32_1 = arith.constant 0 : i32
    return %c0_i32, %c0_i32_0 : i32, i32
  }
  func.func @transform_3(%arg0: i32) -> (i32, i32) {
    %c0_i32 = arith.constant 0 : i32
    %c0_i32_0 = arith.constant 0 : i32
    return %arg0, %c0_i32 : i32, i32
  }
}

module attributes {stable_mosaic.version = 11 : i64} {
  func.func @_conv_stats_kernel(%arg0: i32, %arg1: memref<32x64xbf16, #tpu.memory_space<vmem>>, %arg2: memref<64x256xbf16, #tpu.memory_space<vmem>>, %arg3: memref<32x256xf32, #tpu.memory_space<vmem>>, %arg4: memref<1x1x256xf32, #tpu.memory_space<vmem>>, %arg5: memref<1x1x256xf32, #tpu.memory_space<vmem>>) attributes {dimension_semantics = [#tpu.dimension_semantics<parallel>], iteration_bounds = array<i64: 1>, scalar_prefetch = 0 : i64, scratch_operands = 0 : i64, tpu.core_type = #tpu.core_type<tc>, window_params = [{transform_indices = @transform_0, window_bounds = array<i64: 32, 64>}, {pipeline_mode = #tpu.pipeline_mode<synchronous>, transform_indices = @transform_1, window_bounds = array<i64: 64, 256>}, {transform_indices = @transform_2, window_bounds = array<i64: 32, 256>}, {transform_indices = @transform_3, window_bounds = array<i64: 1, 1, 256>}, {transform_indices = @transform_4, window_bounds = array<i64: 1, 1, 256>}]} {
    %c0 = arith.constant 0 : index
    %c0_0 = arith.constant 0 : index
    %0 = vector.load %arg1[%c0, %c0_0] : memref<32x64xbf16, #tpu.memory_space<vmem>>, vector<32x64xbf16>
    %c0_1 = arith.constant 0 : index
    %c0_2 = arith.constant 0 : index
    %1 = vector.load %arg2[%c0_1, %c0_2] : memref<64x256xbf16, #tpu.memory_space<vmem>>, vector<64x256xbf16>
    %cst = arith.constant dense<0.000000e+00> : vector<32x256xf32>
    %2 = tpu.matmul %0, %1, %cst {dimension_numbers = #tpu.dot_dimension_numbers<[1], [0], [0], [1], [0, 0, 1, 1], [], []>} : vector<32x64xbf16>, vector<64x256xbf16>, vector<32x256xf32> -> vector<32x256xf32>
    %c0_3 = arith.constant 0 : index
    %c0_4 = arith.constant 0 : index
    %3 = vector.load %arg3[%c0_3, %c0_4] : memref<32x256xf32, #tpu.memory_space<vmem>>, vector<32x256xf32>
    tpu.vector_store %arg3[%c0_3, %c0_4], %2 {strides = array<i32>} : memref<32x256xf32, #tpu.memory_space<vmem>>, vector<32x256xf32>,
    %cst_5 = arith.constant dense<0.000000e+00> : vector<256xf32>
    %4 = vector.multi_reduction <add>, %2, %cst_5 [0] : vector<32x256xf32> to vector<256xf32>
    %5 = vector.shape_cast %4 : vector<256xf32> to vector<1x256xf32>
    %6 = vector.shape_cast %5 : vector<1x256xf32> to vector<1x1x256xf32>
    %c0_6 = arith.constant 0 : index
    %c0_7 = arith.constant 0 : index
    %c0_8 = arith.constant 0 : index
    %7 = vector.load %arg4[%c0_6, %c0_7, %c0_8] : memref<1x1x256xf32, #tpu.memory_space<vmem>>, vector<1x1x256xf32>
    tpu.vector_store %arg4[%c0_6, %c0_7, %c0_8], %6 {strides = array<i32>} : memref<1x1x256xf32, #tpu.memory_space<vmem>>, vector<1x1x256xf32>,
    %8 = arith.mulf %2, %2 : vector<32x256xf32>
    %cst_9 = arith.constant dense<0.000000e+00> : vector<256xf32>
    %9 = vector.multi_reduction <add>, %8, %cst_9 [0] : vector<32x256xf32> to vector<256xf32>
    %10 = vector.shape_cast %9 : vector<256xf32> to vector<1x256xf32>
    %11 = vector.shape_cast %10 : vector<1x256xf32> to vector<1x1x256xf32>
    %c0_10 = arith.constant 0 : index
    %c0_11 = arith.constant 0 : index
    %c0_12 = arith.constant 0 : index
    %12 = vector.load %arg5[%c0_10, %c0_11, %c0_12] : memref<1x1x256xf32, #tpu.memory_space<vmem>>, vector<1x1x256xf32>
    tpu.vector_store %arg5[%c0_10, %c0_11, %c0_12], %11 {strides = array<i32>} : memref<1x1x256xf32, #tpu.memory_space<vmem>>, vector<1x1x256xf32>,
    return
  }
  func.func @transform_0(%arg0: i32) -> (i32, i32) {
    %c0_i32 = arith.constant 0 : i32
    %c0_i32_0 = arith.constant 0 : i32
    return %arg0, %c0_i32 : i32, i32
  }
  func.func @transform_1(%arg0: i32) -> (i32, i32) {
    %c0_i32 = arith.constant 0 : i32
    %c0_i32_0 = arith.constant 0 : i32
    %c0_i32_1 = arith.constant 0 : i32
    return %c0_i32, %c0_i32_0 : i32, i32
  }
  func.func @transform_2(%arg0: i32) -> (i32, i32) {
    %c0_i32 = arith.constant 0 : i32
    %c0_i32_0 = arith.constant 0 : i32
    return %arg0, %c0_i32 : i32, i32
  }
  func.func @transform_3(%arg0: i32) -> (i32, i32, i32) {
    %c0_i32 = arith.constant 0 : i32
    %c0_i32_0 = arith.constant 0 : i32
    %c0_i32_1 = arith.constant 0 : i32
    return %arg0, %c0_i32, %c0_i32_0 : i32, i32, i32
  }
  func.func @transform_4(%arg0: i32) -> (i32, i32, i32) {
    %c0_i32 = arith.constant 0 : i32
    %c0_i32_0 = arith.constant 0 : i32
    %c0_i32_1 = arith.constant 0 : i32
    return %arg0, %c0_i32, %c0_i32_0 : i32, i32, i32
  }
}

module attributes {stable_mosaic.version = 11 : i64} {
  func.func @_bn_act_add_kernel(%arg0: i32, %arg1: memref<32x256xf32, #tpu.memory_space<vmem>>, %arg2: memref<32x256xbf16, #tpu.memory_space<vmem>>, %arg3: memref<1x256xf32, #tpu.memory_space<vmem>>, %arg4: memref<1x256xf32, #tpu.memory_space<vmem>>, %arg5: memref<32x256xbf16, #tpu.memory_space<vmem>>) attributes {dimension_semantics = [#tpu.dimension_semantics<parallel>], iteration_bounds = array<i64: 1>, scalar_prefetch = 0 : i64, scratch_operands = 0 : i64, tpu.core_type = #tpu.core_type<tc>, window_params = [{transform_indices = @transform_0, window_bounds = array<i64: 32, 256>}, {transform_indices = @transform_1, window_bounds = array<i64: 32, 256>}, {pipeline_mode = #tpu.pipeline_mode<synchronous>, transform_indices = @transform_2, window_bounds = array<i64: 1, 256>}, {pipeline_mode = #tpu.pipeline_mode<synchronous>, transform_indices = @transform_3, window_bounds = array<i64: 1, 256>}, {transform_indices = @transform_4, window_bounds = array<i64: 32, 256>}]} {
    %c0 = arith.constant 0 : index
    %c0_0 = arith.constant 0 : index
    %0 = vector.load %arg1[%c0, %c0_0] : memref<32x256xf32, #tpu.memory_space<vmem>>, vector<32x256xf32>
    %c0_1 = arith.constant 0 : index
    %c0_2 = arith.constant 0 : index
    %1 = vector.load %arg3[%c0_1, %c0_2] : memref<1x256xf32, #tpu.memory_space<vmem>>, vector<1x256xf32>
    %2 = vector.broadcast %1 : vector<1x256xf32> to vector<32x256xf32>
    %3 = arith.mulf %0, %2 : vector<32x256xf32>
    %c0_3 = arith.constant 0 : index
    %c0_4 = arith.constant 0 : index
    %4 = vector.load %arg4[%c0_3, %c0_4] : memref<1x256xf32, #tpu.memory_space<vmem>>, vector<1x256xf32>
    %5 = vector.broadcast %4 : vector<1x256xf32> to vector<32x256xf32>
    %6 = arith.addf %3, %5 : vector<32x256xf32>
    %c0_5 = arith.constant 0 : index
    %c0_6 = arith.constant 0 : index
    %7 = vector.load %arg2[%c0_5, %c0_6] : memref<32x256xbf16, #tpu.memory_space<vmem>>, vector<32x256xbf16>
    %8 = arith.extf %7 : vector<32x256xbf16> to vector<32x256xf32>
    %9 = arith.addf %6, %8 : vector<32x256xf32>
    %cst = arith.constant 0.000000e+00 : f32
    %10 = vector.broadcast %cst : f32 to vector<32x256xf32>
    %11 = arith.maximumf %9, %10 : vector<32x256xf32>
    %12 = arith.truncf %11 : vector<32x256xf32> to vector<32x256xbf16>
    %c0_7 = arith.constant 0 : index
    %c0_8 = arith.constant 0 : index
    %13 = vector.load %arg5[%c0_7, %c0_8] : memref<32x256xbf16, #tpu.memory_space<vmem>>, vector<32x256xbf16>
    tpu.vector_store %arg5[%c0_7, %c0_8], %12 {strides = array<i32>} : memref<32x256xbf16, #tpu.memory_space<vmem>>, vector<32x256xbf16>,
    return
  }
  func.func @transform_0(%arg0: i32) -> (i32, i32) {
    %c0_i32 = arith.constant 0 : i32
    %c0_i32_0 = arith.constant 0 : i32
    return %arg0, %c0_i32 : i32, i32
  }
  func.func @transform_1(%arg0: i32) -> (i32, i32) {
    %c0_i32 = arith.constant 0 : i32
    %c0_i32_0 = arith.constant 0 : i32
    return %arg0, %c0_i32 : i32, i32
  }
  func.func @transform_2(%arg0: i32) -> (i32, i32) {
    %c0_i32 = arith.constant 0 : i32
    %c0_i32_0 = arith.constant 0 : i32
    %c0_i32_1 = arith.constant 0 : i32
    return %c0_i32, %c0_i32_0 : i32, i32
  }
  func.func @transform_3(%arg0: i32) -> (i32, i32) {
    %c0_i32 = arith.constant 0 : i32
    %c0_i32_0 = arith.constant 0 : i32
    %c0_i32_1 = arith.constant 0 : i32
    return %c0_i32, %c0_i32_0 : i32, i32
  }
  func.func @transform_4(%arg0: i32) -> (i32, i32) {
    %c0_i32 = arith.constant 0 : i32
    %c0_i32_0 = arith.constant 0 : i32
    return %arg0, %c0_i32 : i32, i32
  }
}

module attributes {stable_mosaic.version = 11 : i64} {
  func.func @_conv_stats_kernel(%arg0: i32, %arg1: memref<8x2304xbf16, #tpu.memory_space<vmem>>, %arg2: memref<2304x256xbf16, #tpu.memory_space<vmem>>, %arg3: memref<8x256xf32, #tpu.memory_space<vmem>>, %arg4: memref<1x1x256xf32, #tpu.memory_space<vmem>>, %arg5: memref<1x1x256xf32, #tpu.memory_space<vmem>>) attributes {dimension_semantics = [#tpu.dimension_semantics<parallel>], iteration_bounds = array<i64: 1>, scalar_prefetch = 0 : i64, scratch_operands = 0 : i64, tpu.core_type = #tpu.core_type<tc>, window_params = [{transform_indices = @transform_0, window_bounds = array<i64: 8, 2304>}, {pipeline_mode = #tpu.pipeline_mode<synchronous>, transform_indices = @transform_1, window_bounds = array<i64: 2304, 256>}, {transform_indices = @transform_2, window_bounds = array<i64: 8, 256>}, {transform_indices = @transform_3, window_bounds = array<i64: 1, 1, 256>}, {transform_indices = @transform_4, window_bounds = array<i64: 1, 1, 256>}]} {
    %c0 = arith.constant 0 : index
    %c0_0 = arith.constant 0 : index
    %0 = vector.load %arg1[%c0, %c0_0] : memref<8x2304xbf16, #tpu.memory_space<vmem>>, vector<8x2304xbf16>
    %c0_1 = arith.constant 0 : index
    %c0_2 = arith.constant 0 : index
    %1 = vector.load %arg2[%c0_1, %c0_2] : memref<2304x256xbf16, #tpu.memory_space<vmem>>, vector<2304x256xbf16>
    %cst = arith.constant dense<0.000000e+00> : vector<8x256xf32>
    %2 = tpu.matmul %0, %1, %cst {dimension_numbers = #tpu.dot_dimension_numbers<[1], [0], [0], [1], [0, 0, 1, 1], [], []>} : vector<8x2304xbf16>, vector<2304x256xbf16>, vector<8x256xf32> -> vector<8x256xf32>
    %c0_3 = arith.constant 0 : index
    %c0_4 = arith.constant 0 : index
    %3 = vector.load %arg3[%c0_3, %c0_4] : memref<8x256xf32, #tpu.memory_space<vmem>>, vector<8x256xf32>
    tpu.vector_store %arg3[%c0_3, %c0_4], %2 {strides = array<i32>} : memref<8x256xf32, #tpu.memory_space<vmem>>, vector<8x256xf32>,
    %cst_5 = arith.constant dense<0.000000e+00> : vector<256xf32>
    %4 = vector.multi_reduction <add>, %2, %cst_5 [0] : vector<8x256xf32> to vector<256xf32>
    %5 = vector.shape_cast %4 : vector<256xf32> to vector<1x256xf32>
    %6 = vector.shape_cast %5 : vector<1x256xf32> to vector<1x1x256xf32>
    %c0_6 = arith.constant 0 : index
    %c0_7 = arith.constant 0 : index
    %c0_8 = arith.constant 0 : index
    %7 = vector.load %arg4[%c0_6, %c0_7, %c0_8] : memref<1x1x256xf32, #tpu.memory_space<vmem>>, vector<1x1x256xf32>
    tpu.vector_store %arg4[%c0_6, %c0_7, %c0_8], %6 {strides = array<i32>} : memref<1x1x256xf32, #tpu.memory_space<vmem>>, vector<1x1x256xf32>,
    %8 = arith.mulf %2, %2 : vector<8x256xf32>
    %cst_9 = arith.constant dense<0.000000e+00> : vector<256xf32>
    %9 = vector.multi_reduction <add>, %8, %cst_9 [0] : vector<8x256xf32> to vector<256xf32>
    %10 = vector.shape_cast %9 : vector<256xf32> to vector<1x256xf32>
    %11 = vector.shape_cast %10 : vector<1x256xf32> to vector<1x1x256xf32>
    %c0_10 = arith.constant 0 : index
    %c0_11 = arith.constant 0 : index
    %c0_12 = arith.constant 0 : index
    %12 = vector.load %arg5[%c0_10, %c0_11, %c0_12] : memref<1x1x256xf32, #tpu.memory_space<vmem>>, vector<1x1x256xf32>
    tpu.vector_store %arg5[%c0_10, %c0_11, %c0_12], %11 {strides = array<i32>} : memref<1x1x256xf32, #tpu.memory_space<vmem>>, vector<1x1x256xf32>,
    return
  }
  func.func @transform_0(%arg0: i32) -> (i32, i32) {
    %c0_i32 = arith.constant 0 : i32
    %c0_i32_0 = arith.constant 0 : i32
    return %arg0, %c0_i32 : i32, i32
  }
  func.func @transform_1(%arg0: i32) -> (i32, i32) {
    %c0_i32 = arith.constant 0 : i32
    %c0_i32_0 = arith.constant 0 : i32
    %c0_i32_1 = arith.constant 0 : i32
    return %c0_i32, %c0_i32_0 : i32, i32
  }
  func.func @transform_2(%arg0: i32) -> (i32, i32) {
    %c0_i32 = arith.constant 0 : i32
    %c0_i32_0 = arith.constant 0 : i32
    return %arg0, %c0_i32 : i32, i32
  }
  func.func @transform_3(%arg0: i32) -> (i32, i32, i32) {
    %c0_i32 = arith.constant 0 : i32
    %c0_i32_0 = arith.constant 0 : i32
    %c0_i32_1 = arith.constant 0 : i32
    return %arg0, %c0_i32, %c0_i32_0 : i32, i32, i32
  }
  func.func @transform_4(%arg0: i32) -> (i32, i32, i32) {
    %c0_i32 = arith.constant 0 : i32
    %c0_i32_0 = arith.constant 0 : i32
    %c0_i32_1 = arith.constant 0 : i32
    return %arg0, %c0_i32, %c0_i32_0 : i32, i32, i32
  }
}

module attributes {stable_mosaic.version = 11 : i64} {
  func.func @_bn_act_kernel(%arg0: i32, %arg1: memref<8x256xf32, #tpu.memory_space<vmem>>, %arg2: memref<1x256xf32, #tpu.memory_space<vmem>>, %arg3: memref<1x256xf32, #tpu.memory_space<vmem>>, %arg4: memref<8x256xbf16, #tpu.memory_space<vmem>>) attributes {dimension_semantics = [#tpu.dimension_semantics<parallel>], iteration_bounds = array<i64: 1>, scalar_prefetch = 0 : i64, scratch_operands = 0 : i64, tpu.core_type = #tpu.core_type<tc>, window_params = [{transform_indices = @transform_0, window_bounds = array<i64: 8, 256>}, {pipeline_mode = #tpu.pipeline_mode<synchronous>, transform_indices = @transform_1, window_bounds = array<i64: 1, 256>}, {pipeline_mode = #tpu.pipeline_mode<synchronous>, transform_indices = @transform_2, window_bounds = array<i64: 1, 256>}, {transform_indices = @transform_3, window_bounds = array<i64: 8, 256>}]} {
    %c0 = arith.constant 0 : index
    %c0_0 = arith.constant 0 : index
    %0 = vector.load %arg1[%c0, %c0_0] : memref<8x256xf32, #tpu.memory_space<vmem>>, vector<8x256xf32>
    %c0_1 = arith.constant 0 : index
    %c0_2 = arith.constant 0 : index
    %1 = vector.load %arg2[%c0_1, %c0_2] : memref<1x256xf32, #tpu.memory_space<vmem>>, vector<1x256xf32>
    %2 = vector.broadcast %1 : vector<1x256xf32> to vector<8x256xf32>
    %3 = arith.mulf %0, %2 : vector<8x256xf32>
    %c0_3 = arith.constant 0 : index
    %c0_4 = arith.constant 0 : index
    %4 = vector.load %arg3[%c0_3, %c0_4] : memref<1x256xf32, #tpu.memory_space<vmem>>, vector<1x256xf32>
    %5 = vector.broadcast %4 : vector<1x256xf32> to vector<8x256xf32>
    %6 = arith.addf %3, %5 : vector<8x256xf32>
    %cst = arith.constant 0.000000e+00 : f32
    %7 = vector.broadcast %cst : f32 to vector<8x256xf32>
    %8 = arith.maximumf %6, %7 : vector<8x256xf32>
    %9 = arith.truncf %8 : vector<8x256xf32> to vector<8x256xbf16>
    %c0_5 = arith.constant 0 : index
    %c0_6 = arith.constant 0 : index
    %10 = vector.load %arg4[%c0_5, %c0_6] : memref<8x256xbf16, #tpu.memory_space<vmem>>, vector<8x256xbf16>
    tpu.vector_store %arg4[%c0_5, %c0_6], %9 {strides = array<i32>} : memref<8x256xbf16, #tpu.memory_space<vmem>>, vector<8x256xbf16>,
    return
  }
  func.func @transform_0(%arg0: i32) -> (i32, i32) {
    %c0_i32 = arith.constant 0 : i32
    %c0_i32_0 = arith.constant 0 : i32
    return %arg0, %c0_i32 : i32, i32
  }
  func.func @transform_1(%arg0: i32) -> (i32, i32) {
    %c0_i32 = arith.constant 0 : i32
    %c0_i32_0 = arith.constant 0 : i32
    %c0_i32_1 = arith.constant 0 : i32
    return %c0_i32, %c0_i32_0 : i32, i32
  }
  func.func @transform_2(%arg0: i32) -> (i32, i32) {
    %c0_i32 = arith.constant 0 : i32
    %c0_i32_0 = arith.constant 0 : i32
    %c0_i32_1 = arith.constant 0 : i32
    return %c0_i32, %c0_i32_0 : i32, i32
  }
  func.func @transform_3(%arg0: i32) -> (i32, i32) {
    %c0_i32 = arith.constant 0 : i32
    %c0_i32_0 = arith.constant 0 : i32
    return %arg0, %c0_i32 : i32, i32
  }
}

module attributes {stable_mosaic.version = 11 : i64} {
  func.func @_bn_act_kernel(%arg0: i32, %arg1: memref<8x256xf32, #tpu.memory_space<vmem>>, %arg2: memref<1x256xf32, #tpu.memory_space<vmem>>, %arg3: memref<1x256xf32, #tpu.memory_space<vmem>>, %arg4: memref<8x256xbf16, #tpu.memory_space<vmem>>) attributes {dimension_semantics = [#tpu.dimension_semantics<parallel>], iteration_bounds = array<i64: 1>, scalar_prefetch = 0 : i64, scratch_operands = 0 : i64, tpu.core_type = #tpu.core_type<tc>, window_params = [{transform_indices = @transform_0, window_bounds = array<i64: 8, 256>}, {pipeline_mode = #tpu.pipeline_mode<synchronous>, transform_indices = @transform_1, window_bounds = array<i64: 1, 256>}, {pipeline_mode = #tpu.pipeline_mode<synchronous>, transform_indices = @transform_2, window_bounds = array<i64: 1, 256>}, {transform_indices = @transform_3, window_bounds = array<i64: 8, 256>}]} {
    %c0 = arith.constant 0 : index
    %c0_0 = arith.constant 0 : index
    %0 = vector.load %arg1[%c0, %c0_0] : memref<8x256xf32, #tpu.memory_space<vmem>>, vector<8x256xf32>
    %c0_1 = arith.constant 0 : index
    %c0_2 = arith.constant 0 : index
    %1 = vector.load %arg2[%c0_1, %c0_2] : memref<1x256xf32, #tpu.memory_space<vmem>>, vector<1x256xf32>
    %2 = vector.broadcast %1 : vector<1x256xf32> to vector<8x256xf32>
    %3 = arith.mulf %0, %2 : vector<8x256xf32>
    %c0_3 = arith.constant 0 : index
    %c0_4 = arith.constant 0 : index
    %4 = vector.load %arg3[%c0_3, %c0_4] : memref<1x256xf32, #tpu.memory_space<vmem>>, vector<1x256xf32>
    %5 = vector.broadcast %4 : vector<1x256xf32> to vector<8x256xf32>
    %6 = arith.addf %3, %5 : vector<8x256xf32>
    %7 = arith.truncf %6 : vector<8x256xf32> to vector<8x256xbf16>
    %c0_5 = arith.constant 0 : index
    %c0_6 = arith.constant 0 : index
    %8 = vector.load %arg4[%c0_5, %c0_6] : memref<8x256xbf16, #tpu.memory_space<vmem>>, vector<8x256xbf16>
    tpu.vector_store %arg4[%c0_5, %c0_6], %7 {strides = array<i32>} : memref<8x256xbf16, #tpu.memory_space<vmem>>, vector<8x256xbf16>,
    return
  }
  func.func @transform_0(%arg0: i32) -> (i32, i32) {
    %c0_i32 = arith.constant 0 : i32
    %c0_i32_0 = arith.constant 0 : i32
    return %arg0, %c0_i32 : i32, i32
  }
  func.func @transform_1(%arg0: i32) -> (i32, i32) {
    %c0_i32 = arith.constant 0 : i32
    %c0_i32_0 = arith.constant 0 : i32
    %c0_i32_1 = arith.constant 0 : i32
    return %c0_i32, %c0_i32_0 : i32, i32
  }
  func.func @transform_2(%arg0: i32) -> (i32, i32) {
    %c0_i32 = arith.constant 0 : i32
    %c0_i32_0 = arith.constant 0 : i32
    %c0_i32_1 = arith.constant 0 : i32
    return %c0_i32, %c0_i32_0 : i32, i32
  }
  func.func @transform_3(%arg0: i32) -> (i32, i32) {
    %c0_i32 = arith.constant 0 : i32
    %c0_i32_0 = arith.constant 0 : i32
    return %arg0, %c0_i32 : i32, i32
  }
}

module attributes {stable_mosaic.version = 11 : i64} {
  func.func @_conv_stats_kernel(%arg0: i32, %arg1: memref<8x256xbf16, #tpu.memory_space<vmem>>, %arg2: memref<256x256xbf16, #tpu.memory_space<vmem>>, %arg3: memref<8x256xf32, #tpu.memory_space<vmem>>, %arg4: memref<1x1x256xf32, #tpu.memory_space<vmem>>, %arg5: memref<1x1x256xf32, #tpu.memory_space<vmem>>) attributes {dimension_semantics = [#tpu.dimension_semantics<parallel>], iteration_bounds = array<i64: 1>, scalar_prefetch = 0 : i64, scratch_operands = 0 : i64, tpu.core_type = #tpu.core_type<tc>, window_params = [{transform_indices = @transform_0, window_bounds = array<i64: 8, 256>}, {pipeline_mode = #tpu.pipeline_mode<synchronous>, transform_indices = @transform_1, window_bounds = array<i64: 256, 256>}, {transform_indices = @transform_2, window_bounds = array<i64: 8, 256>}, {transform_indices = @transform_3, window_bounds = array<i64: 1, 1, 256>}, {transform_indices = @transform_4, window_bounds = array<i64: 1, 1, 256>}]} {
    %c0 = arith.constant 0 : index
    %c0_0 = arith.constant 0 : index
    %0 = vector.load %arg1[%c0, %c0_0] : memref<8x256xbf16, #tpu.memory_space<vmem>>, vector<8x256xbf16>
    %c0_1 = arith.constant 0 : index
    %c0_2 = arith.constant 0 : index
    %1 = vector.load %arg2[%c0_1, %c0_2] : memref<256x256xbf16, #tpu.memory_space<vmem>>, vector<256x256xbf16>
    %cst = arith.constant dense<0.000000e+00> : vector<8x256xf32>
    %2 = tpu.matmul %0, %1, %cst {dimension_numbers = #tpu.dot_dimension_numbers<[1], [0], [0], [1], [0, 0, 1, 1], [], []>} : vector<8x256xbf16>, vector<256x256xbf16>, vector<8x256xf32> -> vector<8x256xf32>
    %c0_3 = arith.constant 0 : index
    %c0_4 = arith.constant 0 : index
    %3 = vector.load %arg3[%c0_3, %c0_4] : memref<8x256xf32, #tpu.memory_space<vmem>>, vector<8x256xf32>
    tpu.vector_store %arg3[%c0_3, %c0_4], %2 {strides = array<i32>} : memref<8x256xf32, #tpu.memory_space<vmem>>, vector<8x256xf32>,
    %cst_5 = arith.constant dense<0.000000e+00> : vector<256xf32>
    %4 = vector.multi_reduction <add>, %2, %cst_5 [0] : vector<8x256xf32> to vector<256xf32>
    %5 = vector.shape_cast %4 : vector<256xf32> to vector<1x256xf32>
    %6 = vector.shape_cast %5 : vector<1x256xf32> to vector<1x1x256xf32>
    %c0_6 = arith.constant 0 : index
    %c0_7 = arith.constant 0 : index
    %c0_8 = arith.constant 0 : index
    %7 = vector.load %arg4[%c0_6, %c0_7, %c0_8] : memref<1x1x256xf32, #tpu.memory_space<vmem>>, vector<1x1x256xf32>
    tpu.vector_store %arg4[%c0_6, %c0_7, %c0_8], %6 {strides = array<i32>} : memref<1x1x256xf32, #tpu.memory_space<vmem>>, vector<1x1x256xf32>,
    %8 = arith.mulf %2, %2 : vector<8x256xf32>
    %cst_9 = arith.constant dense<0.000000e+00> : vector<256xf32>
    %9 = vector.multi_reduction <add>, %8, %cst_9 [0] : vector<8x256xf32> to vector<256xf32>
    %10 = vector.shape_cast %9 : vector<256xf32> to vector<1x256xf32>
    %11 = vector.shape_cast %10 : vector<1x256xf32> to vector<1x1x256xf32>
    %c0_10 = arith.constant 0 : index
    %c0_11 = arith.constant 0 : index
    %c0_12 = arith.constant 0 : index
    %12 = vector.load %arg5[%c0_10, %c0_11, %c0_12] : memref<1x1x256xf32, #tpu.memory_space<vmem>>, vector<1x1x256xf32>
    tpu.vector_store %arg5[%c0_10, %c0_11, %c0_12], %11 {strides = array<i32>} : memref<1x1x256xf32, #tpu.memory_space<vmem>>, vector<1x1x256xf32>,
    return
  }
  func.func @transform_0(%arg0: i32) -> (i32, i32) {
    %c0_i32 = arith.constant 0 : i32
    %c0_i32_0 = arith.constant 0 : i32
    return %arg0, %c0_i32 : i32, i32
  }
  func.func @transform_1(%arg0: i32) -> (i32, i32) {
    %c0_i32 = arith.constant 0 : i32
    %c0_i32_0 = arith.constant 0 : i32
    %c0_i32_1 = arith.constant 0 : i32
    return %c0_i32, %c0_i32_0 : i32, i32
  }
  func.func @transform_2(%arg0: i32) -> (i32, i32) {
    %c0_i32 = arith.constant 0 : i32
    %c0_i32_0 = arith.constant 0 : i32
    return %arg0, %c0_i32 : i32, i32
  }
  func.func @transform_3(%arg0: i32) -> (i32, i32, i32) {
    %c0_i32 = arith.constant 0 : i32
    %c0_i32_0 = arith.constant 0 : i32
    %c0_i32_1 = arith.constant 0 : i32
    return %arg0, %c0_i32, %c0_i32_0 : i32, i32, i32
  }
  func.func @transform_4(%arg0: i32) -> (i32, i32, i32) {
    %c0_i32 = arith.constant 0 : i32
    %c0_i32_0 = arith.constant 0 : i32
    %c0_i32_1 = arith.constant 0 : i32
    return %arg0, %c0_i32, %c0_i32_0 : i32, i32, i32
  }
}

module attributes {stable_mosaic.version = 11 : i64} {
  func.func @_bn_act_add_kernel(%arg0: i32, %arg1: memref<8x256xf32, #tpu.memory_space<vmem>>, %arg2: memref<8x256xbf16, #tpu.memory_space<vmem>>, %arg3: memref<1x256xf32, #tpu.memory_space<vmem>>, %arg4: memref<1x256xf32, #tpu.memory_space<vmem>>, %arg5: memref<8x256xbf16, #tpu.memory_space<vmem>>) attributes {dimension_semantics = [#tpu.dimension_semantics<parallel>], iteration_bounds = array<i64: 1>, scalar_prefetch = 0 : i64, scratch_operands = 0 : i64, tpu.core_type = #tpu.core_type<tc>, window_params = [{transform_indices = @transform_0, window_bounds = array<i64: 8, 256>}, {transform_indices = @transform_1, window_bounds = array<i64: 8, 256>}, {pipeline_mode = #tpu.pipeline_mode<synchronous>, transform_indices = @transform_2, window_bounds = array<i64: 1, 256>}, {pipeline_mode = #tpu.pipeline_mode<synchronous>, transform_indices = @transform_3, window_bounds = array<i64: 1, 256>}, {transform_indices = @transform_4, window_bounds = array<i64: 8, 256>}]} {
    %c0 = arith.constant 0 : index
    %c0_0 = arith.constant 0 : index
    %0 = vector.load %arg1[%c0, %c0_0] : memref<8x256xf32, #tpu.memory_space<vmem>>, vector<8x256xf32>
    %c0_1 = arith.constant 0 : index
    %c0_2 = arith.constant 0 : index
    %1 = vector.load %arg3[%c0_1, %c0_2] : memref<1x256xf32, #tpu.memory_space<vmem>>, vector<1x256xf32>
    %2 = vector.broadcast %1 : vector<1x256xf32> to vector<8x256xf32>
    %3 = arith.mulf %0, %2 : vector<8x256xf32>
    %c0_3 = arith.constant 0 : index
    %c0_4 = arith.constant 0 : index
    %4 = vector.load %arg4[%c0_3, %c0_4] : memref<1x256xf32, #tpu.memory_space<vmem>>, vector<1x256xf32>
    %5 = vector.broadcast %4 : vector<1x256xf32> to vector<8x256xf32>
    %6 = arith.addf %3, %5 : vector<8x256xf32>
    %c0_5 = arith.constant 0 : index
    %c0_6 = arith.constant 0 : index
    %7 = vector.load %arg2[%c0_5, %c0_6] : memref<8x256xbf16, #tpu.memory_space<vmem>>, vector<8x256xbf16>
    %8 = arith.extf %7 : vector<8x256xbf16> to vector<8x256xf32>
    %9 = arith.addf %6, %8 : vector<8x256xf32>
    %cst = arith.constant 0.000000e+00 : f32
    %10 = vector.broadcast %cst : f32 to vector<8x256xf32>
    %11 = arith.maximumf %9, %10 : vector<8x256xf32>
    %12 = arith.truncf %11 : vector<8x256xf32> to vector<8x256xbf16>
    %c0_7 = arith.constant 0 : index
    %c0_8 = arith.constant 0 : index
    %13 = vector.load %arg5[%c0_7, %c0_8] : memref<8x256xbf16, #tpu.memory_space<vmem>>, vector<8x256xbf16>
    tpu.vector_store %arg5[%c0_7, %c0_8], %12 {strides = array<i32>} : memref<8x256xbf16, #tpu.memory_space<vmem>>, vector<8x256xbf16>,
    return
  }
  func.func @transform_0(%arg0: i32) -> (i32, i32) {
    %c0_i32 = arith.constant 0 : i32
    %c0_i32_0 = arith.constant 0 : i32
    return %arg0, %c0_i32 : i32, i32
  }
  func.func @transform_1(%arg0: i32) -> (i32, i32) {
    %c0_i32 = arith.constant 0 : i32
    %c0_i32_0 = arith.constant 0 : i32
    return %arg0, %c0_i32 : i32, i32
  }
  func.func @transform_2(%arg0: i32) -> (i32, i32) {
    %c0_i32 = arith.constant 0 : i32
    %c0_i32_0 = arith.constant 0 : i32
    %c0_i32_1 = arith.constant 0 : i32
    return %c0_i32, %c0_i32_0 : i32, i32
  }
  func.func @transform_3(%arg0: i32) -> (i32, i32) {
    %c0_i32 = arith.constant 0 : i32
    %c0_i32_0 = arith.constant 0 : i32
    %c0_i32_1 = arith.constant 0 : i32
    return %c0_i32, %c0_i32_0 : i32, i32
  }
  func.func @transform_4(%arg0: i32) -> (i32, i32) {
    %c0_i32 = arith.constant 0 : i32
    %c0_i32_0 = arith.constant 0 : i32
    return %arg0, %c0_i32 : i32, i32
  }
}

module attributes {stable_mosaic.version = 11 : i64} {
  func.func @_matmul_bias_kernel(%arg0: i32, %arg1: memref<8x1024xbf16, #tpu.memory_space<vmem>>, %arg2: memref<1024x10xbf16, #tpu.memory_space<vmem>>, %arg3: memref<1x10xf32, #tpu.memory_space<vmem>>, %arg4: memref<8x10xf32, #tpu.memory_space<vmem>>) attributes {dimension_semantics = [#tpu.dimension_semantics<parallel>], iteration_bounds = array<i64: 1>, scalar_prefetch = 0 : i64, scratch_operands = 0 : i64, tpu.core_type = #tpu.core_type<tc>, window_params = [{transform_indices = @transform_0, window_bounds = array<i64: 8, 1024>}, {pipeline_mode = #tpu.pipeline_mode<synchronous>, transform_indices = @transform_1, window_bounds = array<i64: 1024, 10>}, {pipeline_mode = #tpu.pipeline_mode<synchronous>, transform_indices = @transform_2, window_bounds = array<i64: 1, 10>}, {transform_indices = @transform_3, window_bounds = array<i64: 8, 10>}]} {
    %c0 = arith.constant 0 : index
    %c0_0 = arith.constant 0 : index
    %0 = vector.load %arg1[%c0, %c0_0] : memref<8x1024xbf16, #tpu.memory_space<vmem>>, vector<8x1024xbf16>
    %c0_1 = arith.constant 0 : index
    %c0_2 = arith.constant 0 : index
    %1 = vector.load %arg2[%c0_1, %c0_2] : memref<1024x10xbf16, #tpu.memory_space<vmem>>, vector<1024x10xbf16>
    %cst = arith.constant dense<0.000000e+00> : vector<8x10xf32>
    %2 = tpu.matmul %0, %1, %cst {dimension_numbers = #tpu.dot_dimension_numbers<[1], [0], [0], [1], [0, 0, 1, 1], [], []>} : vector<8x1024xbf16>, vector<1024x10xbf16>, vector<8x10xf32> -> vector<8x10xf32>
    %c0_3 = arith.constant 0 : index
    %c0_4 = arith.constant 0 : index
    %3 = vector.load %arg3[%c0_3, %c0_4] : memref<1x10xf32, #tpu.memory_space<vmem>>, vector<1x10xf32>
    %4 = vector.broadcast %3 : vector<1x10xf32> to vector<8x10xf32>
    %5 = arith.addf %2, %4 : vector<8x10xf32>
    %c0_5 = arith.constant 0 : index
    %c0_6 = arith.constant 0 : index
    %6 = vector.load %arg4[%c0_5, %c0_6] : memref<8x10xf32, #tpu.memory_space<vmem>>, vector<8x10xf32>
    tpu.vector_store %arg4[%c0_5, %c0_6], %5 {strides = array<i32>} : memref<8x10xf32, #tpu.memory_space<vmem>>, vector<8x10xf32>,
    return
  }
  func.func @transform_0(%arg0: i32) -> (i32, i32) {
    %c0_i32 = arith.constant 0 : i32
    %c0_i32_0 = arith.constant 0 : i32
    return %arg0, %c0_i32 : i32, i32
  }
  func.func @transform_1(%arg0: i32) -> (i32, i32) {
    %c0_i32 = arith.constant 0 : i32
    %c0_i32_0 = arith.constant 0 : i32
    %c0_i32_1 = arith.constant 0 : i32
    return %c0_i32, %c0_i32_0 : i32, i32
  }
  func.func @transform_2(%arg0: i32) -> (i32, i32) {
    %c0_i32 = arith.constant 0 : i32
    %c0_i32_0 = arith.constant 0 : i32
    %c0_i32_1 = arith.constant 0 : i32
    return %c0_i32, %c0_i32_0 : i32, i32
  }
  func.func @transform_3(%arg0: i32) -> (i32, i32) {
    %c0_i32 = arith.constant 0 : i32
    %c0_i32_0 = arith.constant 0 : i32
    return %arg0, %c0_i32 : i32, i32
  }
}

</mosaic_0001>

<bundles_post_ra>
// kernel: net_forward.33
= control target key start
LH: loop header
LB: loop body
LE: loop exit
PB: predicated region body
PF: predicated region fallthrough
CT: control target
= control target key end

     0   :  { %vm97_vm0 = vcmask 523264   ;;  %vm151_vm1 = vcmask 516096   ;;  %s495_s0 = inlined_call_operand.vmem [shape: f32[128,64], index: 0, kind: input, shape index: {}]   ;;  %s496_s1 = inlined_call_operand.vmem [shape: f32[128,64], index: 1, kind: input, shape index: {}]   ;;  %s497_s2 = inlined_call_operand.vmem [shape: f32[128,64], index: 2, kind: input, shape index: {}]   ;;  %s498_s3 = inlined_call_operand.vmem [shape: f32[128,64], index: 3, kind: output, shape index: {0}]   ;;  %s499_s4 = inlined_call_operand.vmem [shape: f32[1,1,64], index: 4, kind: output, shape index: {1}]   ;;  %s500_s5 = inlined_call_operand.vmem [shape: f32[1,1,64], index: 5, kind: output, shape index: {2}]  }
   0x1   :  { %v17_v0 = vld [vmem:[%s495_s0] sm:$0xff]  ;;  %v18_v4 = vld [vmem:[%s495_s0 + $0x8] sm:$0xff]  ;;  %v19_v8 = vld [vmem:[%s495_s0 + $0x10] sm:$0xff] }
   0x2   :  { %v33_v1 = vld [vmem:[%s496_s1] sm:$0xff]  ;;  %v34_v5 = vld [vmem:[%s496_s1 + $0x8] sm:$0xff]  ;;  %v35_v9 = vld [vmem:[%s496_s1 + $0x10] sm:$0xff] }
   0x3   :  { %v65_v2 = vld [vmem:[%s497_s2] sm:$0xff]  ;;  %v49_v3 = vmax.f32 %v17_v0, %v33_v1  ;;  %v66_v6 = vld [vmem:[%s497_s2 + $0x8] sm:$0xff]  ;;  %v50_v7 = vmax.f32 %v18_v4, %v34_v5  ;;  %v67_v10 = vld [vmem:[%s497_s2 + $0x10] sm:$0xff]  ;;  %v51_v12 = vmax.f32 %v19_v8, %v35_v9 }
   0x4   :  { %v20_v13 = vld [vmem:[%s495_s0 + $0x18] sm:$0xff]  ;;  %v21_v18 = vld [vmem:[%s495_s0 + $0x20] sm:$0xff]  ;;  %v22_v25 = vld [vmem:[%s495_s0 + $0x28] sm:$0xff] }
   0x5   :  { %v81_v11 = vmax.f32 %v49_v3, %v65_v2  ;;  %v36_v14 = vld [vmem:[%s496_s1 + $0x18] sm:$0xff]  ;;  %v82_v16 = vmax.f32 %v50_v7, %v66_v6  ;;  %v37_v19 = vld [vmem:[%s496_s1 + $0x20] sm:$0xff]  ;;  %v83_v22 = vmax.f32 %v51_v12, %v67_v10  ;;  %v38_v26 = vld [vmem:[%s496_s1 + $0x28] sm:$0xff] }
   0x6   :  { %v68_v15 = vld [vmem:[%s497_s2 + $0x18] sm:$0xff]  ;;  %v52_v17 = vmax.f32 %v20_v13, %v36_v14  ;;  %v53_v23 = vmax.f32 %v21_v18, %v37_v19  ;;  %v69_v24 = vld [vmem:[%s497_s2 + $0x20] sm:$0xff]  ;;  %v54_v30 = vmax.f32 %v22_v25, %v38_v26  ;;  %v70_v31 = vld [vmem:[%s497_s2 + $0x28] sm:$0xff] }
   0x7   :  { %98 = vst.msk [vmem:[%s498_s3] sm:$0xff] %vm97_vm0, %v81_v11  ;;  %v114_v20 = vsel %vm97_vm0, %v81_v11, 0.0  ;;  %v153_v21 = vmul.f32 %v81_v11, %v81_v11  ;;  %99 = vst.msk [vmem:[%s498_s3 + $0x8] sm:$0xff] %vm97_vm0, %v82_v16  ;;  %v115_v27 = vsel %vm97_vm0, %v82_v16, 0.0  ;;  %v154_v28 = vmul.f32 %v82_v16, %v82_v16  ;;  %v23_v36 = vld [vmem:[%s495_s0 + $0x30] sm:$0xff]  ;;  %v24_v43 = vld [vmem:[%s495_s0 + $0x38] sm:$0xff] }
   0x8   :  { %v84_v29 = vmax.f32 %v52_v17, %v68_v15  ;;  %v116_v33 = vadd.f32 %v115_v27, %v114_v20  ;;  %100 = vst.msk [vmem:[%s498_s3 + $0x10] sm:$0xff] %vm97_vm0, %v83_v22  ;;  %v117_v34 = vsel %vm97_vm0, %v83_v22, 0.0  ;;  %v155_v35 = vmul.f32 %v83_v22, %v83_v22  ;;  %v39_v37 = vld [vmem:[%s496_s1 + $0x30] sm:$0xff]  ;;  %v40_v48 = vld [vmem:[%s496_s1 + $0x38] sm:$0xff]  ;;  %v25_v49 = vld [vmem:[%s495_s0 + $0x40] sm:$0xff] }
   0x9   :  { %v169_v32 = vsel %vm97_vm0, %v153_v21, 0.0  ;;  %v170_v38 = vsel %vm97_vm0, %v154_v28, 0.0  ;;  %v85_v41 = vmax.f32 %v53_v23, %v69_v24  ;;  %v71_v42 = vld [vmem:[%s497_s2 + $0x30] sm:$0xff]  ;;  %v86_v47 = vmax.f32 %v54_v30, %v70_v31  ;;  %v41_v50 = vld [vmem:[%s496_s1 + $0x40] sm:$0xff]  ;;  %v26_v55 = vld [vmem:[%s495_s0 + $0x48] sm:$0xff] }
   0xa   :  { %101 = vst.msk [vmem:[%s498_s3 + $0x18] sm:$0xff] %vm97_vm0, %v84_v29  ;;  %v119_v39 = vsel %vm97_vm0, %v84_v29, 0.0  ;;  %v156_v40 = vmul.f32 %v84_v29, %v84_v29  ;;  %v171_v44 = vadd.f32 %v170_v38, %v169_v32  ;;  %v118_v45 = vadd.f32 %v117_v34, %v116_v33  ;;  %v42_v56 = vld [vmem:[%s496_s1 + $0x48] sm:$0xff]  ;;  %v72_v61 = vld [vmem:[%s497_s2 + $0x38] sm:$0xff]  ;;  %v73_v62 = vld [vmem:[%s497_s2 + $0x40] sm:$0xff] }
   0xb   :  { %v172_v46 = vsel %vm97_vm0, %v155_v35, 0.0  ;;  %102 = vst.msk [vmem:[%s498_s3 + $0x20] sm:$0xff] %vm97_vm0, %v85_v41  ;;  %v121_v52 = vsel %vm97_vm0, %v85_v41, 0.0  ;;  %v157_v53 = vmul.f32 %v85_v41, %v85_v41  ;;  %v55_v54 = vmax.f32 %v23_v36, %v39_v37  ;;  %103 = vst.msk [vmem:[%s498_s3 + $0x28] sm:$0xff] %vm97_vm0, %v86_v47  ;;  %v74_v3 = vld [vmem:[%s497_s2 + $0x48] sm:$0xff]  ;;  %v27_v4 = vld [vmem:[%s495_s0 + $0x50] sm:$0xff] }
   0xc   :  { %v174_v51 = vsel %vm97_vm0, %v156_v40, 0.0  ;;  %v173_v57 = vadd.f32 %v172_v46, %v171_v44  ;;  %v120_v58 = vadd.f32 %v119_v39, %v118_v45  ;;  %v123_v59 = vsel %vm97_vm0, %v86_v47, 0.0  ;;  %v43_v5 = vld [vmem:[%s496_s1 + $0x50] sm:$0xff]  ;;  %v28_v19 = vld [vmem:[%s495_s0 + $0x58] sm:$0xff]  ;;  %v29_v24 = vld [vmem:[%s495_s0 + $0x60] sm:$0xff] }
   0xd   :  { %v158_v60 = vmul.f32 %v86_v47, %v86_v47  ;;  %v176_v63 = vsel %vm97_vm0, %v157_v53, 0.0  ;;  %v87_v0 = vmax.f32 %v55_v54, %v71_v42  ;;  %v56_v1 = vmax.f32 %v24_v43, %v40_v48  ;;  %v75_v18 = vld [vmem:[%s497_s2 + $0x50] sm:$0xff]  ;;  %v44_v20 = vld [vmem:[%s496_s1 + $0x58] sm:$0xff]  ;;  %v45_v25 = vld [vmem:[%s496_s1 + $0x60] sm:$0xff] }
   0xe   :  { %v57_v2 = vmax.f32 %v25_v49, %v41_v50  ;;  %v175_v6 = vadd.f32 %v174_v51, %v173_v57  ;;  %v122_v7 = vadd.f32 %v121_v52, %v120_v58  ;;  %v58_v9 = vmax.f32 %v26_v55, %v42_v56  ;;  %v76_v30 = vld [vmem:[%s497_s2 + $0x58] sm:$0xff]  ;;  %v77_v35 = vld [vmem:[%s497_s2 + $0x60] sm:$0xff]  ;;  %v30_v36 = vld [vmem:[%s495_s0 + $0x68] sm:$0xff] }
   0xf   :  { %v178_v8 = vsel %vm97_vm0, %v158_v60, 0.0  ;;  %104 = vst.msk [vmem:[%s498_s3 + $0x30] sm:$0xff] %vm97_vm0, %v87_v0  ;;  %v125_v10 = vsel %vm97_vm0, %v87_v0, 0.0  ;;  %v159_v11 = vmul.f32 %v87_v0, %v87_v0  ;;  %v88_v12 = vmax.f32 %v56_v1, %v72_v61  ;;  %v46_v37 = vld [vmem:[%s496_s1 + $0x68] sm:$0xff]  ;;  %v31_v41 = vld [vmem:[%s495_s0 + $0x70] sm:$0xff]  ;;  %v32_v53 = vld [vmem:[%s495_s0 + $0x78] sm:$0xff] }
  0x10   :  { %v89_v13 = vmax.f32 %v57_v2, %v73_v62  ;;  %v177_v14 = vadd.f32 %v176_v63, %v175_v6  ;;  %v124_v15 = vadd.f32 %v123_v59, %v122_v7  ;;  %v90_v16 = vmax.f32 %v58_v9, %v74_v3  ;;  %v47_v42 = vld [vmem:[%s496_s1 + $0x70] sm:$0xff]  ;;  %v78_v47 = vld [vmem:[%s497_s2 + $0x68] sm:$0xff]  ;;  %v48_v54 = vld [vmem:[%s496_s1 + $0x78] sm:$0xff] }
  0x11   :  { %v59_v17 = vmax.f32 %v27_v4, %v43_v5  ;;  %v180_v21 = vsel %vm97_vm0, %v159_v11, 0.0  ;;  %105 = vst.msk [vmem:[%s498_s3 + $0x38] sm:$0xff] %vm97_vm0, %v88_v12  ;;  %v127_v22 = vsel %vm97_vm0, %v88_v12, 0.0  ;;  %v160_v23 = vmul.f32 %v88_v12, %v88_v12  ;;  %v79_v52 = vld [vmem:[%s497_s2 + $0x70] sm:$0xff]  ;;  %v80_v3 = vld [vmem:[%s497_s2 + $0x78] sm:$0xff] }
  0x12   :  { %106 = vst.msk [vmem:[%s498_s3 + $0x40] sm:$0xff] %vm97_vm0, %v89_v13  ;;  %v179_v26 = vadd.f32 %v178_v8, %v177_v14  ;;  %v126_v27 = vadd.f32 %v125_v10, %v124_v15  ;;  %v129_v28 = vsel %vm97_vm0, %v89_v13, 0.0  ;;  %v161_v29 = vmul.f32 %v89_v13, %v89_v13  ;;  %107 = vst.msk [vmem:[%s498_s3 + $0x48] sm:$0xff] %vm97_vm0, %v90_v16 }
  0x13   :  { %v182_v31 = vsel %vm97_vm0, %v160_v23, 0.0  ;;  %v162_v32 = vmul.f32 %v90_v16, %v90_v16  ;;  %v91_v33 = vmax.f32 %v59_v17, %v75_v18  ;;  %v60_v34 = vmax.f32 %v28_v19, %v44_v20 }
  0x14   :  { %v181_v38 = vadd.f32 %v180_v21, %v179_v26  ;;  %v128_v39 = vadd.f32 %v127_v22, %v126_v27  ;;  %v61_v40 = vmax.f32 %v29_v24, %v45_v25  ;;  %v184_v43 = vsel %vm97_vm0, %v161_v29, 0.0 }
  0x15   :  { %v131_v44 = vsel %vm97_vm0, %v90_v16, 0.0  ;;  %108 = vst.msk [vmem:[%s498_s3 + $0x50] sm:$0xff] %vm97_vm0, %v91_v33  ;;  %v163_v45 = vmul.f32 %v91_v33, %v91_v33  ;;  %v92_v46 = vmax.f32 %v60_v34, %v76_v30  ;;  %v62_v51 = vmax.f32 %v30_v36, %v46_v37 }
  0x16   :  { %v183_v48 = vadd.f32 %v182_v31, %v181_v38  ;;  %v130_v49 = vadd.f32 %v129_v28, %v128_v39  ;;  %v93_v50 = vmax.f32 %v61_v40, %v77_v35  ;;  %v186_v55 = vsel %vm97_vm0, %v162_v32, 0.0 }
  0x17   :  { %v133_v56 = vsel %vm97_vm0, %v91_v33, 0.0  ;;  %109 = vst.msk [vmem:[%s498_s3 + $0x58] sm:$0xff] %vm97_vm0, %v92_v46  ;;  %v164_v57 = vmul.f32 %v92_v46, %v92_v46  ;;  %v63_v58 = vmax.f32 %v31_v41, %v47_v42  ;;  %v188_v61 = vsel %vm97_vm0, %v163_v45, 0.0 }
  0x18   :  { %v185_v59 = vadd.f32 %v184_v43, %v183_v48  ;;  %v132_v60 = vadd.f32 %v131_v44, %v130_v49  ;;  %v135_v62 = vsel %vm97_vm0, %v92_v46, 0.0  ;;  %110 = vst.msk [vmem:[%s498_s3 + $0x60] sm:$0xff] %vm97_vm0, %v93_v50  ;;  %v165_v63 = vmul.f32 %v93_v50, %v93_v50 }
  0x19   :  { %v94_v0 = vmax.f32 %v62_v51, %v78_v47  ;;  %v95_v1 = vmax.f32 %v63_v58, %v79_v52  ;;  %v64_v2 = vmax.f32 %v32_v53, %v48_v54  ;;  %v190_v6 = vsel %vm97_vm0, %v164_v57, 0.0 }
  0x1a   :  { %v187_v4 = vadd.f32 %v186_v55, %v185_v59  ;;  %v134_v5 = vadd.f32 %v133_v56, %v132_v60  ;;  %v137_v7 = vsel %vm97_vm0, %v93_v50, 0.0  ;;  %v192_v12 = vsel %vm97_vm0, %v165_v63, 0.0 }
  0x1b   :  { %111 = vst.msk [vmem:[%s498_s3 + $0x68] sm:$0xff] %vm97_vm0, %v94_v0  ;;  %v166_v8 = vmul.f32 %v94_v0, %v94_v0  ;;  %112 = vst.msk [vmem:[%s498_s3 + $0x70] sm:$0xff] %vm97_vm0, %v95_v1  ;;  %v96_v11 = vmax.f32 %v64_v2, %v80_v3  ;;  %v139_v13 = vsel %vm97_vm0, %v94_v0, 0.0  ;;  %v167_v14 = vmul.f32 %v95_v1, %v95_v1 }
  0x1c   :  { %v189_v9 = vadd.f32 %v188_v61, %v187_v4  ;;  %v136_v10 = vadd.f32 %v135_v62, %v134_v5  ;;  %v141_v18 = vsel %vm97_vm0, %v95_v1, 0.0 }
  0x1d   :  { %113 = vst.msk [vmem:[%s498_s3 + $0x78] sm:$0xff] %vm97_vm0, %v96_v11  ;;  %v194_v17 = vsel %vm97_vm0, %v166_v8, 0.0  ;;  %v168_v19 = vmul.f32 %v96_v11, %v96_v11  ;;  %v196_v22 = vsel %vm97_vm0, %v167_v14, 0.0  ;;  %v143_v23 = vsel %vm97_vm0, %v96_v11, 0.0 }
  0x1e   :  { %v191_v15 = vadd.f32 %v190_v6, %v189_v9  ;;  %v138_v16 = vadd.f32 %v137_v7, %v136_v10 }
  0x1f   :  { %v198_v26 = vsel %vm97_vm0, %v168_v19, 0.0 }
  0x20   :  { %v193_v20 = vadd.f32 %v192_v12, %v191_v15  ;;  %v140_v21 = vadd.f32 %v139_v13, %v138_v16 }
  0x22   :  { %v195_v24 = vadd.f32 %v194_v17, %v193_v20  ;;  %v142_v25 = vadd.f32 %v141_v18, %v140_v21 }
  0x24   :  { %v197_v27 = vadd.f32 %v196_v22, %v195_v24  ;;  %v144_v28 = vadd.f32 %v143_v23, %v142_v25 }
  0x26   :  { %v145_v29 = vrot.slane %v144_v28, 4  ;;  %v199_v30 = vadd.f32 %v198_v26, %v197_v27 }
  0x28   :  { %v146_v31 = vadd.f32 %v145_v29, %v144_v28  ;;  %v200_v32 = vrot.slane %v199_v30, 4 }
  0x2a   :  { %v147_v33 = vrot.slane %v146_v31, 2  ;;  %v201_v34 = vadd.f32 %v200_v32, %v199_v30 }
  0x2c   :  { %v148_v35 = vadd.f32 %v147_v33, %v146_v31  ;;  %v202_v36 = vrot.slane %v201_v34, 2 }
  0x2e   :  { %v149_v37 = vrot.slane %v148_v35, 1  ;;  %v203_v38 = vadd.f32 %v202_v36, %v201_v34 }
  0x30   :  { %v150_v39 = vadd.f32 %v149_v37, %v148_v35  ;;  %v204_v40 = vrot.slane %v203_v38, 1 }
  0x32   :  { %152 = vst.msk [vmem:[%s499_s4] sm:$0x1] %vm151_vm1, %v150_v39  ;;  %v205_v41 = vadd.f32 %v204_v40, %v203_v38 }
  0x34   :  { %206 = vst.msk [vmem:[%s500_s5] sm:$0x1] %vm151_vm1, %v205_v41 }

// kernel: net_forward.34
= control target key start
LH: loop header
LB: loop body
LE: loop exit
PB: predicated region body
PF: predicated region fallthrough
CT: control target
= control target key end

     0   :  { %vm156_vm0 = vcmask 519168   ;;  %s385_s0 = inlined_call_operand.vmem [shape: f32[128,64], index: 0, kind: input, shape index: {}]   ;;  %s386_s1 = inlined_call_operand.vmem [shape: f32[1,64], index: 1, kind: input, shape index: {}]   ;;  %s387_s2 = inlined_call_operand.vmem [shape: f32[1,64], index: 2, kind: input, shape index: {}]   ;;  %s388_s3 = inlined_call_operand.vmem [shape: bf16[128,64], index: 3, kind: output, shape index: {}]  }
   0x1   :  { %v14_v0 = vld [vmem:[%s385_s0] sm:$0xff]  ;;  %v15_v4 = vld [vmem:[%s385_s0 + $0x8] sm:$0xff]  ;;  %v16_v5 = vld [vmem:[%s385_s0 + $0x10] sm:$0xff] }
   0x2   :  { %v237_v1 = vld [vmem:[%s386_s1] ss:$0 sm:$0xff]  ;;  %v17_v6 = vld [vmem:[%s385_s0 + $0x18] sm:$0xff]  ;;  %v19_v11 = vld [vmem:[%s385_s0 + $0x28] sm:$0xff] }
   0x3   :  { %v242_v2 = vld [vmem:[%s387_s2] ss:$0 sm:$0xff]  ;;  %v37_v3 = vmul.f32 %v237_v1, %v14_v0  ;;  %v38_v7 = vmul.f32 %v237_v1, %v15_v4  ;;  %v39_v8 = vmul.f32 %v237_v1, %v16_v5  ;;  %v40_v9 = vmul.f32 %v237_v1, %v17_v6  ;;  %v20_v12 = vld [vmem:[%s385_s0 + $0x30] sm:$0xff]  ;;  %v21_v17 = vld [vmem:[%s385_s0 + $0x38] sm:$0xff] }
   0x4   :  { %v18_v10 = vld [vmem:[%s385_s0 + $0x20] sm:$0xff]  ;;  %v42_v15 = vmul.f32 %v237_v1, %v19_v11  ;;  %v43_v16 = vmul.f32 %v237_v1, %v20_v12  ;;  %v44_v21 = vmul.f32 %v237_v1, %v21_v17  ;;  %v23_v35 = vld [vmem:[%s385_s0 + $0x48] sm:$0xff]  ;;  %v24_v36 = vld [vmem:[%s385_s0 + $0x50] sm:$0xff] }
   0x5   :  { %v60_v13 = vadd.f32 %v242_v2, %v37_v3  ;;  %v41_v14 = vmul.f32 %v237_v1, %v18_v10  ;;  %v61_v18 = vadd.f32 %v242_v2, %v38_v7  ;;  %v62_v19 = vadd.f32 %v242_v2, %v39_v8  ;;  %v22_v30 = vld [vmem:[%s385_s0 + $0x40] sm:$0xff]  ;;  %v25_v37 = vld [vmem:[%s385_s0 + $0x58] sm:$0xff]  ;;  %v27_v43 = vld [vmem:[%s385_s0 + $0x68] sm:$0xff] }
   0x6   :  { %v63_v20 = vadd.f32 %v242_v2, %v40_v9  ;;  %v65_v24 = vadd.f32 %v242_v2, %v42_v15  ;;  %v66_v25 = vadd.f32 %v242_v2, %v43_v16  ;;  %v67_v29 = vadd.f32 %v242_v2, %v44_v21  ;;  %v26_v42 = vld [vmem:[%s385_s0 + $0x60] sm:$0xff]  ;;  %v28_v44 = vld [vmem:[%s385_s0 + $0x70] sm:$0xff]  ;;  %v29_v49 = vld [vmem:[%s385_s0 + $0x78] sm:$0xff] }
   0x7   :  { %v76_v22 = vmax.f32 %v60_v13, 0.0  ;;  %v64_v23 = vadd.f32 %v242_v2, %v41_v14  ;;  %v77_v26 = vmax.f32 %v61_v18, 0.0  ;;  %v78_v27 = vmax.f32 %v62_v19, 0.0 }
   0x8   :  { %v79_v28 = vmax.f32 %v63_v20, 0.0  ;;  %v81_v33 = vmax.f32 %v65_v24, 0.0  ;;  %v82_v34 = vmax.f32 %v66_v25, 0.0  ;;  %v83_v41 = vmax.f32 %v67_v29, 0.0 }
   0x9   :  { %v195_v31 = vpack.c.bf16 %v76_v22, %v76_v22  ;;  %v80_v32 = vmax.f32 %v64_v23, 0.0  ;;  %v196_v38 = vpack.c.bf16 %v77_v26, %v77_v26  ;;  %v197_v39 = vpack.c.bf16 %v78_v27, %v78_v27 }
   0xa   :  { %v198_v40 = vpack.c.bf16 %v79_v28, %v79_v28  ;;  %v200_v46 = vpack.c.bf16 %v81_v33, %v81_v33  ;;  %v201_v47 = vpack.c.bf16 %v82_v34, %v82_v34  ;;  %v45_v48 = vmul.f32 %v237_v1, %v22_v30 }
   0xb   :  { %157 = vst.msk [vmem:[%s388_s3] sm:$0xf] %vm156_vm0, %v195_v31  ;;  %v199_v45 = vpack.c.bf16 %v80_v32, %v80_v32  ;;  %158 = vst.msk [vmem:[%s388_s3 + $0x4] sm:$0xf] %vm156_vm0, %v196_v38  ;;  %v202_v50 = vpack.c.bf16 %v83_v41, %v83_v41  ;;  %v46_v51 = vmul.f32 %v237_v1, %v23_v35 }
   0xc   :  { %159 = vst.msk [vmem:[%s388_s3 + $0x8] sm:$0xf] %vm156_vm0, %v197_v39  ;;  %160 = vst.msk [vmem:[%s388_s3 + $0xc] sm:$0xf] %vm156_vm0, %v198_v40  ;;  %v47_v52 = vmul.f32 %v237_v1, %v24_v36  ;;  %v48_v53 = vmul.f32 %v237_v1, %v25_v37  ;;  %v68_v54 = vadd.f32 %v242_v2, %v45_v48 }
   0xd   :  { %161 = vst.msk [vmem:[%s388_s3 + $0x10] sm:$0xf] %vm156_vm0, %v199_v45  ;;  %162 = vst.msk [vmem:[%s388_s3 + $0x14] sm:$0xf] %vm156_vm0, %v200_v46  ;;  %v49_v55 = vmul.f32 %v237_v1, %v26_v42  ;;  %v50_v56 = vmul.f32 %v237_v1, %v27_v43  ;;  %v51_v57 = vmul.f32 %v237_v1, %v28_v44 }
   0xe   :  { %163 = vst.msk [vmem:[%s388_s3 + $0x18] sm:$0xf] %vm156_vm0, %v201_v47  ;;  %164 = vst.msk [vmem:[%s388_s3 + $0x1c] sm:$0xf] %vm156_vm0, %v202_v50  ;;  %v69_v58 = vadd.f32 %v242_v2, %v46_v51  ;;  %v70_v59 = vadd.f32 %v242_v2, %v47_v52  ;;  %v71_v60 = vadd.f32 %v242_v2, %v48_v53  ;;  %v84_v62 = vmax.f32 %v68_v54, 0.0 }
   0xf   :  { %v52_v61 = vmul.f32 %v237_v1, %v29_v49  ;;  %v72_v63 = vadd.f32 %v242_v2, %v49_v55  ;;  %v73_v0 = vadd.f32 %v242_v2, %v50_v56  ;;  %v74_v3 = vadd.f32 %v242_v2, %v51_v57 }
  0x10   :  { %v85_v4 = vmax.f32 %v69_v58, 0.0  ;;  %v86_v5 = vmax.f32 %v70_v59, 0.0  ;;  %v87_v6 = vmax.f32 %v71_v60, 0.0  ;;  %v203_v8 = vpack.c.bf16 %v84_v62, %v84_v62 }
  0x11   :  { %v75_v7 = vadd.f32 %v242_v2, %v52_v61  ;;  %v88_v9 = vmax.f32 %v72_v63, 0.0  ;;  %v89_v10 = vmax.f32 %v73_v0, 0.0  ;;  %v90_v11 = vmax.f32 %v74_v3, 0.0 }
  0x12   :  { %v204_v12 = vpack.c.bf16 %v85_v4, %v85_v4  ;;  %v205_v13 = vpack.c.bf16 %v86_v5, %v86_v5  ;;  %v206_v14 = vpack.c.bf16 %v87_v6, %v87_v6  ;;  %165 = vst.msk [vmem:[%s388_s3 + $0x20] sm:$0xf] %vm156_vm0, %v203_v8 }
  0x13   :  { %v91_v1 = vmax.f32 %v75_v7, 0.0  ;;  %v207_v15 = vpack.c.bf16 %v88_v9, %v88_v9  ;;  %v208_v16 = vpack.c.bf16 %v89_v10, %v89_v10  ;;  %v209_v17 = vpack.c.bf16 %v90_v11, %v90_v11 }
  0x14   :  { %166 = vst.msk [vmem:[%s388_s3 + $0x24] sm:$0xf] %vm156_vm0, %v204_v12  ;;  %167 = vst.msk [vmem:[%s388_s3 + $0x28] sm:$0xf] %vm156_vm0, %v205_v13 }
  0x15   :  { %168 = vst.msk [vmem:[%s388_s3 + $0x2c] sm:$0xf] %vm156_vm0, %v206_v14  ;;  %v210_v2 = vpack.c.bf16 %v91_v1, %v91_v1  ;;  %169 = vst.msk [vmem:[%s388_s3 + $0x30] sm:$0xf] %vm156_vm0, %v207_v15 }
  0x16   :  { %170 = vst.msk [vmem:[%s388_s3 + $0x34] sm:$0xf] %vm156_vm0, %v208_v16  ;;  %171 = vst.msk [vmem:[%s388_s3 + $0x38] sm:$0xf] %vm156_vm0, %v209_v17 }
  0x17   :  { %172 = vst.msk [vmem:[%s388_s3 + $0x3c] sm:$0xf] %vm156_vm0, %v210_v2 }

// kernel: net_forward.32
= control target key start
LH: loop header
LB: loop body
LE: loop exit
PB: predicated region body
PF: predicated region fallthrough
CT: control target
= control target key end

     0   :  { %10 = vsyncpa [#allocation3], 0  ;;  %s1816_s0 = inlined_call_operand.vmem [shape: bf16[512,147], index: 0, kind: input, shape index: {}]   ;;  %s1817_s1 = inlined_call_operand.vmem [shape: bf16[147,64], index: 1, kind: input, shape index: {}]   ;;  %s1818_s2 = inlined_call_operand.vmem [shape: f32[512,64], index: 2, kind: output, shape index: {0}]   ;;  %s1819_s3 = inlined_call_operand.hbm [shape: f32[2,1,64], index: 3, kind: output, shape index: {1}]   ;;  %s1820_s4 = inlined_call_operand.hbm [shape: f32[2,1,64], index: 4, kind: output, shape index: {2}]  }
   0x1   :  { %12 = vsyncpa [#allocation3 + $0x1], 0 }
   0x2   :  { %13 = vsyncpa [#allocation5], 0 }
   0x3   :  { %15 = vsyncpa [#allocation5 + $0x1], 0  ;;  %s1363_s15 = smov 0   ;;  %s1365_s16 = smov 0  }
   0x4   :  { %s1367_s17 = smov 0   ;;  %s1369_s18 = smov 0  }
   0x5 LB: > { %s1384_s19 = sadd.s32 4294967295, %s1332_s18   ;;  %s1046_s20 = sadd.s32 4294967294, %s1332_s18   ;;  %s1332_s18 = sphi %s1369_s18, %s1826_s18   ;;  %s1328_s17 = sphi %s1367_s17, %s1825_s17   ;;  %s1324_s16 = sphi %s1365_s16, %s1824_s16   ;;  %s1320_s15 = sphi %s1363_s15, %s1823_s15  }
   0x6   : > { %s1388_s21 = sadd.s32 1, %s1332_s18   ;;  %s101_s22 = sadd.s32 1, %s1328_s17 }
   0x7   : > { %s98_s23 = ssub.s32 %s1332_s18, %s1388_s21  ;;  %p111_p0 = scmp.ne.s32.totalorder %s1328_s17, %s1324_s16 }
   0x8   : > { %p99_p1 = scmp.eq.s32.totalorder %s98_s23, 0  ;;  %p112_p2 = scmp.eq.s32.totalorder %s1384_s19, 1 }
   0x9   : > { %p117_p3 = scmp.ne.s32.totalorder %s1324_s16, %s1320_s15  ;;  %p118_p4 = scmp.eq.s32.totalorder %s1046_s20, 1 }
   0xa   : > { %s1399_s24 = scalar_select %p99_p1, %s1328_s17, %s101_s22  }
   0xb   : > { %p1401_p5 = por %p112_p2, %p111_p0  ;;  %p1405_p6 = por %p118_p4, %p117_p3 }
   0xc   : > { %p1049_p7 = scmp.ge.s32.totalorder %s1332_s18, 1  ;;  %p175_p8 = scmp.lt.s32.totalorder %s1332_s18, 3 }
   0xe   : > { %p176_p9 = pnand %p1049_p7, %p175_p8 }
   0xf   : > { %s1050_s7 = sshll.u32 (!%p176_p9), %s1384_s19, 5  ;;  %s1336_s9 = smov (!%p176_p9), [#allocation2]  }
  0x10   : > { %179 = sbr.rel (%p176_p9) target bundleno = 397 (0x18d), region = 28  ;;  %p211_p10 = scmp.lt.s32.totalorder (!%p176_p9), %s1050_s7, 63 }
  0x11   : > { %s1246_s11 = sshll.u32 (!%p176_p9), %s1336_s9, 4  ;;  %s1247_s11 = int_to_ptr.vmem [resolvable:$false] %s1246_s11 }
  0x12   : > { %s1248_s12 = scalar_lea.vmem (!%p176_p9), %s1247_s11, 32 }
  0x15   : > { %v1184_v0 = vld [vmem:[%s1817_s1 + $0x38] sm:$0xff]   ;;  %v1334_v1 = vmov 0   ;;  %v1185_v2 = vld [vmem:[%s1817_s1 + $0x30] sm:$0xff]   ;;  %v1186_v3 = vld [vmem:[%s1817_s1 + $0x28] sm:$0xff]   ;;  %s1828_s7 = smov (!%p211_p10, %s1050_s7), 63  ;;  %vm476_vm0 = vcmask 154624  }
  0x16   : > { %532 = vmatprep.subr.bf16.mxu0 %v1334_v1  ;;  %1118 = vmatprep.subr.bf16.mxu1 %v1334_v1  ;;  %v1187_v4 = vld [vmem:[%s1817_s1 + $0x20] sm:$0xff]   ;;  %s1117_s10 = sshll.u32 %s1828_s7, 3  ;;  %v1188_v5 = vld [vmem:[%s1817_s1 + $0x18] sm:$0xff]   ;;  %v1189_v7 = vld [vmem:[%s1817_s1 + $0x10] sm:$0xff]   ;;  %vm525_vm1 = vcmask 1040384   ;;  %vm526_vm2 = vcmask 1041408  }
  0x17   : > { %533 = vmatpush1.bf16.msra.mxu0 %v1184_v0  ;;  %1128 = vmatpush1.bf16.msra.mxu1 %v1184_v0  ;;  %s1432_s13 = scalar_lea.vmem %s1816_s0, %s1117_s10  ;;  %v1190_v9 = vld [vmem:[%s1817_s1 + $0x8] sm:$0xff]   ;;  %v1335_v10 = vmov 65535   ;;  %v1191_v12 = vld [vmem:[%s1817_s1] sm:$0xff]   ;;  %s1505_s14 = scalar_lea.vmem %s1818_s2, %s1117_s10  ;;  %vm693_vm3 = vcmask 523264   ;;  %vm795_vm4 = vcmask 516096  }
  0x18   : > { %534 = vmatprep.subr.bf16.mxu0 %v1334_v1  ;;  %1119 = vmatprep.subr.bf16.mxu1 %v1334_v1  ;;  %v1196_v6 = vld [vmem:[%s1432_s13 + $0x4] ss:$8 sps:$4 sm:$0xff]   ;;  %v527_v11 = vsel %vm525_vm1, 4294967295, %v1335_v10  ;;  %v1192_v13 = vld [vmem:[%s1817_s1 + $0x48] ss:$0 sps:$4 sm:$0x33]  }
  0x19   : > { %1097 = vmatprep.mubr.msk.bf16.mxu0 %vm476_vm0, %v1196_v6  ;;  %v1208_v8 = vld [vmem:[%s1432_s13 + $0x84] ss:$8 sps:$4 sm:$0xff]   ;;  %v528_v14 = vsel %vm526_vm2, %v527_v11, 0  ;;  %v1194_v17 = vld [vmem:[%s1432_s13] ss:$8 sps:$4 sm:$0xff]   ;;  %s1732_s7 = sand.u32 1, %s1324_s16  }
  0x1a   : > { %1105 = vmatprep.mubr.msk.bf16.mxu1 %vm476_vm0, %v1208_v8  ;;  %v530_v15 = vand.u32 %v1192_v13, %v528_v14  ;;  %v1193_v16 = vld [vmem:[%s1817_s1 + $0x40] sm:$0xff]   ;;  %v1197_v19 = vld [vmem:[%s1432_s13 + $0x14] ss:$8 sps:$4 sm:$0xff]   ;;  %v1199_v21 = vld [vmem:[%s1432_s13 + $0x10] ss:$8 sps:$4 sm:$0xff]   ;;  %s1113_s10 = sshll.u32 %s1384_s19, 4 }
  0x1b   : > { %535 = vmatpush1.bf16.msra.mxu0 %v1185_v2  ;;  %1129 = vmatpush1.bf16.msra.mxu1 %v1185_v2  ;;  %v1206_v18 = vld [vmem:[%s1432_s13 + $0x80] ss:$8 sps:$4 sm:$0xff]   ;;  %v1212_v20 = vld [vmem:[%s1432_s13 + $0x94] ss:$8 sps:$4 sm:$0xff]   ;;  %v1214_v22 = vld [vmem:[%s1432_s13 + $0x90] ss:$8 sps:$4 sm:$0xff]   ;;  %s1742_s29 = scalar_lea.hbm %s1819_s3, %s1113_s10  ;;  %s1750_s5 = scalar_lea.hbm %s1820_s4, %s1113_s10 }
  0x1c   : > { %536 = vmatprep.subr.bf16.mxu0 %v1334_v1  ;;  %1120 = vmatprep.subr.bf16.mxu1 %v1334_v1  ;;  %v1200_v23 = vld [vmem:[%s1432_s13 + $0x24] ss:$8 sps:$4 sm:$0xff]   ;;  %v1202_v25 = vld [vmem:[%s1432_s13 + $0x20] ss:$8 sps:$4 sm:$0xff]   ;;  %v1203_v27 = vld [vmem:[%s1432_s13 + $0x34] ss:$8 sps:$4 sm:$0xff]  }
  0x1d   : > { %v1218_v24 = vld [vmem:[%s1432_s13 + $0xa4] ss:$8 sps:$4 sm:$0xff]   ;;  %v1220_v26 = vld [vmem:[%s1432_s13 + $0xa0] ss:$8 sps:$4 sm:$0xff]   ;;  %v1224_v28 = vld [vmem:[%s1432_s13 + $0xb4] ss:$8 sps:$4 sm:$0xff]  }
  0x1e   : > { %v1205_v29 = vld [vmem:[%s1432_s13 + $0x30] ss:$8 sps:$4 sm:$0xff]   ;;  %v1209_v31 = vld [vmem:[%s1432_s13 + $0x44] ss:$8 sps:$4 sm:$0xff]   ;;  %v1211_v33 = vld [vmem:[%s1432_s13 + $0x40] ss:$8 sps:$4 sm:$0xff]  }
  0x1f   : > { %537 = vmatpush1.bf16.msra.mxu0 %v1186_v3  ;;  %1130 = vmatpush1.bf16.msra.mxu1 %v1186_v3  ;;  %v1226_v30 = vld [vmem:[%s1432_s13 + $0xb0] ss:$8 sps:$4 sm:$0xff]   ;;  %v1230_v32 = vld [vmem:[%s1432_s13 + $0xc4] ss:$8 sps:$4 sm:$0xff]   ;;  %v1232_v34 = vld [vmem:[%s1432_s13 + $0xc0] ss:$8 sps:$4 sm:$0xff]  }
  0x20   : > { %538 = vmatprep.subr.bf16.mxu0 %v1334_v1  ;;  %1121 = vmatprep.subr.bf16.mxu1 %v1334_v1  ;;  %v1215_v35 = vld [vmem:[%s1432_s13 + $0x54] ss:$8 sps:$4 sm:$0xff]   ;;  %v1217_v37 = vld [vmem:[%s1432_s13 + $0x50] ss:$8 sps:$4 sm:$0xff]   ;;  %v1221_v39 = vld [vmem:[%s1432_s13 + $0x64] ss:$8 sps:$4 sm:$0xff]  }
  0x21   : > { %v1233_v36 = vld [vmem:[%s1432_s13 + $0xd4] ss:$8 sps:$4 sm:$0xff]   ;;  %v1235_v38 = vld [vmem:[%s1432_s13 + $0xd0] ss:$8 sps:$4 sm:$0xff]   ;;  %v1236_v40 = vld [vmem:[%s1432_s13 + $0xe4] ss:$8 sps:$4 sm:$0xff]  }
  0x22   : > { %v1223_v41 = vld [vmem:[%s1432_s13 + $0x60] ss:$8 sps:$4 sm:$0xff]   ;;  %v1227_v43 = vld [vmem:[%s1432_s13 + $0x74] ss:$8 sps:$4 sm:$0xff]   ;;  %v1229_v45 = vld [vmem:[%s1432_s13 + $0x70] ss:$8 sps:$4 sm:$0xff]  }
  0x23   : > { %539 = vmatpush1.bf16.msra.mxu0 %v1187_v4  ;;  %1131 = vmatpush1.bf16.msra.mxu1 %v1187_v4  ;;  %v1238_v42 = vld [vmem:[%s1432_s13 + $0xe0] ss:$8 sps:$4 sm:$0xff]   ;;  %v1239_v44 = vld [vmem:[%s1432_s13 + $0xf4] ss:$8 sps:$4 sm:$0xff]   ;;  %v1241_v46 = vld [vmem:[%s1432_s13 + $0xf0] ss:$8 sps:$4 sm:$0xff]  }
  0x24   : > { %540 = vmatprep.subr.bf16.mxu0 %v1334_v1  ;;  %1122 = vmatprep.subr.bf16.mxu1 %v1334_v1  ;;  %s203_s13 = scalar_lea.vmem [#allocation2], %s1732_s7  ;;  %s209_s22 = scalar_lea.vmem [#allocation4], %s1732_s7 }
  0x25   : > { %s925_s20 = sshll.u32 %s203_s13, 4  ;;  %s938_s23 = sshll.u32 %s209_s22, 4  ;;  %s1744_s20 = int_to_ptr.vmem [resolvable:$true] %s925_s20  ;;  %s1752_s23 = int_to_ptr.vmem [resolvable:$true] %s938_s23 }
  0x26   : > { %s905_s6 = scalar_lea.sflag [#allocation3], %s1732_s7  ;;  %s1242_s8 = scalar_lea.vmem %s1744_s20, 16 }
  0x27   : > { %541 = vmatpush1.bf16.msra.mxu0 %v1188_v5  ;;  %1132 = vmatpush1.bf16.msra.mxu1 %v1188_v5  ;;  %p1243_p11 = scmp.ne.s32.totalorder %s1744_s20, %s1242_s8  ;;  %p1249_p0 = scmp.lt.s32.totalorder %s1744_s20, %s1247_s11 }
  0x28   : > { %542 = vmatprep.subr.bf16.mxu0 %v1334_v1  ;;  %1123 = vmatprep.subr.bf16.mxu1 %v1334_v1  ;;  %p1250_p1 = scmp.lt.s32.totalorder %s1248_s12, %s1242_s8 }
  0x29   : > { %p1244_p12 = pnand %p1243_p11, %p1401_p5 }
  0x2a   : > { %p1251_p2 = por %p1250_p1, %p1249_p0 }
  0x2b   : > { %543 = vmatpush1.bf16.msra.mxu0 %v1189_v7  ;;  %1133 = vmatpush1.bf16.msra.mxu1 %v1189_v7  ;;  %p1245_p13 = pneg %p1244_p12 }
  0x2c   : > { %544 = vmatprep.subr.bf16.mxu0 %v1334_v1  ;;  %1124 = vmatprep.subr.bf16.mxu1 %v1334_v1 }
  0x2d   : > { %p1252_p3 = pnand %p1251_p2, %p1245_p13 }
  0x2f   : > { %545 = vmatpush1.bf16.msra.mxu0 %v1190_v9  ;;  %1134 = vmatpush1.bf16.msra.mxu1 %v1190_v9 }
  0x30   : > { %546 = vmatprep.subr.bf16.mxu0 %v1334_v1  ;;  %1125 = vmatprep.subr.bf16.mxu1 %v1334_v1 }
  0x33   : > { %547 = vmatpush1.bf16.msra.mxu0 %v1191_v12  ;;  %1135 = vmatpush1.bf16.msra.mxu1 %v1191_v12 }
  0x34   : > { %560 = vmatprep.subr.bf16.mxu0 %v1334_v1  ;;  %1126 = vmatprep.subr.bf16.mxu1 %v1334_v1 }
  0x37   : > { %561 = vmatpush2.bf16.msra.mxu0 %v530_v15  ;;  %1136 = vmatpush2.bf16.msra.mxu1 %v530_v15 }
  0x38   : > { %562 = vmatprep.subr.bf16.mxu0 %v1334_v1  ;;  %1127 = vmatprep.subr.bf16.mxu1 %v1334_v1 }
  0x3b   : > { %563 = vmatpush2.bf16.msra.mxu0 %v1193_v16  ;;  %1137 = vmatpush2.bf16.msra.mxu1 %v1193_v16 }
  0x3e   : > { %565 = vmatmul.mubr.bf16.vlgmr.msra.gmra.mxu0 %v1194_v17  ;;  %629 = vmatmul.mubr.bf16.vlgmr.msra.gmra.mxu1 %v1206_v18 }
  0x3f   : > { %1098 = vmatprep.mubr.msk.bf16.mxu0 %vm476_vm0, %v1197_v19  ;;  %1106 = vmatprep.mubr.msk.bf16.mxu1 %vm476_vm0, %v1212_v20 }
  0x46   : > { %573 = vmatmul.mubr.bf16.gmra.mxu0 %v1199_v21  ;;  %637 = vmatmul.mubr.bf16.gmra.mxu1 %v1214_v22 }
  0x47   : > { %1099 = vmatprep.mubr.msk.bf16.mxu0 %vm476_vm0, %v1200_v23  ;;  %1107 = vmatprep.mubr.msk.bf16.mxu1 %vm476_vm0, %v1218_v24 }
  0x4e   : > { %581 = vmatmul.mubr.bf16.gmra.mxu0 %v1202_v25  ;;  %645 = vmatmul.mubr.bf16.gmra.mxu1 %v1220_v26 }
  0x4f   : > { %1100 = vmatprep.mubr.msk.bf16.mxu0 %vm476_vm0, %v1203_v27  ;;  %1108 = vmatprep.mubr.msk.bf16.mxu1 %vm476_vm0, %v1224_v28 }
  0x56   : > { %589 = vmatmul.mubr.bf16.gmra.mxu0 %v1205_v29  ;;  %653 = vmatmul.mubr.bf16.gmra.mxu1 %v1226_v30 }
  0x57   : > { %1101 = vmatprep.mubr.msk.bf16.mxu0 %vm476_vm0, %v1209_v31  ;;  %1109 = vmatprep.mubr.msk.bf16.mxu1 %vm476_vm0, %v1230_v32 }
  0x5e   : > { %597 = vmatmul.mubr.bf16.gmra.mxu0 %v1211_v33  ;;  %661 = vmatmul.mubr.bf16.gmra.mxu1 %v1232_v34 }
  0x5f   : > { %1102 = vmatprep.mubr.msk.bf16.mxu0 %vm476_vm0, %v1215_v35  ;;  %1110 = vmatprep.mubr.msk.bf16.mxu1 %vm476_vm0, %v1233_v36 }
  0x66   : > { %605 = vmatmul.mubr.bf16.gmra.mxu0 %v1217_v37  ;;  %669 = vmatmul.mubr.bf16.gmra.mxu1 %v1235_v38 }
  0x67   : > { %1103 = vmatprep.mubr.msk.bf16.mxu0 %vm476_vm0, %v1221_v39  ;;  %1111 = vmatprep.mubr.msk.bf16.mxu1 %vm476_vm0, %v1236_v40 }
  0x6e   : > { %613 = vmatmul.mubr.bf16.gmra.mxu0 %v1223_v41  ;;  %677 = vmatmul.mubr.bf16.gmra.mxu1 %v1238_v42 }
  0x6f   : > { %1104 = vmatprep.mubr.msk.bf16.mxu0 %vm476_vm0, %v1227_v43  ;;  %1112 = vmatprep.mubr.msk.bf16.mxu1 %vm476_vm0, %v1239_v44 }
  0x76   : > { %621 = vmatmul.mubr.bf16.gmra.mxu0 %v1229_v45  ;;  %685 = vmatmul.mubr.bf16.gmra.mxu1 %v1241_v46 }
  0xfe   : > { %v566_v47 = vpop.f32.mrf.mxu0  ;;  %v1507_v48 = vpop.f32.mrf.mxu1 }
  0xff   : > { %694 = vst.msk [vmem:[%s1505_s14] sm:$0xff] %vm693_vm3, %v566_v47  ;;  %710 = vst.msk [vmem:[%s1505_s14 + $0x80] sm:$0xff] %vm693_vm3, %v1507_v48  ;;  %v797_v16 = vmul.f32 %v566_v47, %v566_v47  ;;  %v726_v21 = vsel %vm693_vm3, %v566_v47, 0.0 }
 0x100   : > { %v568_v49 = vpop.f32.mrf.mxu0  ;;  %v632_v50 = vpop.f32.mrf.mxu1 }
 0x101   : > { %v829_v28 = vsel %vm693_vm3, %v797_v16, 0.0 }
 0x102   : > { %v569_v51 = vpop.f32.mrf.mxu0  ;;  %v1514_v52 = vpop.f32.mrf.mxu1 }
 0x103   : > { %695 = vst.msk [vmem:[%s1505_s14 + $0x8] sm:$0xff] %vm693_vm3, %v569_v51  ;;  %711 = vst.msk [vmem:[%s1505_s14 + $0x88] sm:$0xff] %vm693_vm3, %v1514_v52  ;;  %v798_v13 = vmul.f32 %v569_v51, %v569_v51  ;;  %v727_v17 = vsel %vm693_vm3, %v569_v51, 0.0 }
 0x104   : > { %v571_v53 = vpop.f32.mrf.mxu0  ;;  %v635_v54 = vpop.f32.mrf.mxu1  ;;  %v728_v25 = vadd.f32 %v727_v17, %v726_v21 }
 0x105   : > { %v830_v22 = vsel %vm693_vm3, %v798_v13, 0.0 }
 0x106   : > { %v574_v55 = vpop.f32.mrf.mxu0  ;;  %v1521_v56 = vpop.f32.mrf.mxu1  ;;  %v831_v32 = vadd.f32 %v830_v22, %v829_v28 }
 0x107   : > { %696 = vst.msk [vmem:[%s1505_s14 + $0x10] sm:$0xff] %vm693_vm3, %v574_v55  ;;  %712 = vst.msk [vmem:[%s1505_s14 + $0x90] sm:$0xff] %vm693_vm3, %v1521_v56  ;;  %v799_v18 = vmul.f32 %v574_v55, %v574_v55  ;;  %v729_v23 = vsel %vm693_vm3, %v574_v55, 0.0 }
 0x108   : > { %v576_v57 = vpop.f32.mrf.mxu0  ;;  %v640_v58 = vpop.f32.mrf.mxu1  ;;  %v730_v33 = vadd.f32 %v729_v23, %v728_v25 }
 0x109   : > { %v832_v29 = vsel %vm693_vm3, %v799_v18, 0.0 }
 0x10a   : > { %v577_v59 = vpop.f32.mrf.mxu0  ;;  %v1528_v60 = vpop.f32.mrf.mxu1  ;;  %v833_v39 = vadd.f32 %v832_v29, %v831_v32 }
 0x10b   : > { %697 = vst.msk [vmem:[%s1505_s14 + $0x18] sm:$0xff] %vm693_vm3, %v577_v59  ;;  %713 = vst.msk [vmem:[%s1505_s14 + $0x98] sm:$0xff] %vm693_vm3, %v1528_v60  ;;  %v800_v24 = vmul.f32 %v577_v59, %v577_v59  ;;  %v731_v30 = vsel %vm693_vm3, %v577_v59, 0.0 }
 0x10c   : > { %v579_v61 = vpop.f32.mrf.mxu0  ;;  %v643_v62 = vpop.f32.mrf.mxu1  ;;  %v732_v40 = vadd.f32 %v731_v30, %v730_v33 }
 0x10d   : > { %v834_v36 = vsel %vm693_vm3, %v800_v24, 0.0 }
 0x10e   : > { %v582_v63 = vpop.f32.mrf.mxu0  ;;  %v1535_v0 = vpop.f32.mrf.mxu1  ;;  %v835_v46 = vadd.f32 %v834_v36, %v833_v39 }
 0x10f   : > { %698 = vst.msk [vmem:[%s1505_s14 + $0x20] sm:$0xff] %vm693_vm3, %v582_v63  ;;  %714 = vst.msk [vmem:[%s1505_s14 + $0xa0] sm:$0xff] %vm693_vm3, %v1535_v0  ;;  %v801_v31 = vmul.f32 %v582_v63, %v582_v63  ;;  %v733_v37 = vsel %vm693_vm3, %v582_v63, 0.0 }
 0x110   : > { %v584_v1 = vpop.f32.mrf.mxu0  ;;  %v648_v2 = vpop.f32.mrf.mxu1  ;;  %v734_v47 = vadd.f32 %v733_v37, %v732_v40 }
 0x111   : > { %v836_v43 = vsel %vm693_vm3, %v801_v31, 0.0 }
 0x112   : > { %v585_v3 = vpop.f32.mrf.mxu0  ;;  %v1542_v4 = vpop.f32.mrf.mxu1  ;;  %v837_v55 = vadd.f32 %v836_v43, %v835_v46 }
 0x113   : > { %699 = vst.msk [vmem:[%s1505_s14 + $0x28] sm:$0xff] %vm693_vm3, %v585_v3  ;;  %715 = vst.msk [vmem:[%s1505_s14 + $0xa8] sm:$0xff] %vm693_vm3, %v1542_v4  ;;  %v802_v38 = vmul.f32 %v585_v3, %v585_v3  ;;  %v735_v44 = vsel %vm693_vm3, %v585_v3, 0.0 }
 0x114   : > { %v587_v5 = vpop.f32.mrf.mxu0  ;;  %v651_v6 = vpop.f32.mrf.mxu1  ;;  %v736_v57 = vadd.f32 %v735_v44, %v734_v47 }
 0x115   : > { %v838_v51 = vsel %vm693_vm3, %v802_v38, 0.0 }
 0x116   : > { %v590_v7 = vpop.f32.mrf.mxu0  ;;  %v1549_v8 = vpop.f32.mrf.mxu1  ;;  %v839_v1 = vadd.f32 %v838_v51, %v837_v55 }
 0x117   : > { %700 = vst.msk [vmem:[%s1505_s14 + $0x30] sm:$0xff] %vm693_vm3, %v590_v7  ;;  %716 = vst.msk [vmem:[%s1505_s14 + $0xb0] sm:$0xff] %vm693_vm3, %v1549_v8  ;;  %v803_v45 = vmul.f32 %v590_v7, %v590_v7  ;;  %v737_v53 = vsel %vm693_vm3, %v590_v7, 0.0 }
 0x118   : > { %v592_v9 = vpop.f32.mrf.mxu0  ;;  %v656_v10 = vpop.f32.mrf.mxu1  ;;  %v738_v2 = vadd.f32 %v737_v53, %v736_v57 }
 0x119   : > { %v840_v61 = vsel %vm693_vm3, %v803_v45, 0.0 }
 0x11a   : > { %v593_v11 = vpop.f32.mrf.mxu0  ;;  %v1556_v12 = vpop.f32.mrf.mxu1  ;;  %v841_v10 = vadd.f32 %v840_v61, %v839_v1 }
 0x11b   : > { %701 = vst.msk [vmem:[%s1505_s14 + $0x38] sm:$0xff] %vm693_vm3, %v593_v11  ;;  %717 = vst.msk [vmem:[%s1505_s14 + $0xb8] sm:$0xff] %vm693_vm3, %v1556_v12  ;;  %v804_v54 = vmul.f32 %v593_v11, %v593_v11  ;;  %v739_v62 = vsel %vm693_vm3, %v593_v11, 0.0 }
 0x11c   : > { %v595_v14 = vpop.f32.mrf.mxu0  ;;  %v659_v15 = vpop.f32.mrf.mxu1  ;;  %v740_v11 = vadd.f32 %v739_v62, %v738_v2 }
 0x11d   : > { %v842_v6 = vsel %vm693_vm3, %v804_v54, 0.0 }
 0x11e   : > { %v598_v19 = vpop.f32.mrf.mxu0  ;;  %v1564_v20 = vpop.f32.mrf.mxu1  ;;  %v843_v18 = vadd.f32 %v842_v6, %v841_v10 }
 0x11f   : > { %702 = vst.msk [vmem:[%s1505_s14 + $0x40] sm:$0xff] %vm693_vm3, %v598_v19  ;;  %718 = vst.msk [vmem:[%s1505_s14 + $0xc0] sm:$0xff] %vm693_vm3, %v1564_v20  ;;  %v805_v63 = vmul.f32 %v598_v19, %v598_v19  ;;  %v741_v7 = vsel %vm693_vm3, %v598_v19, 0.0 }
 0x120   : > { %v600_v26 = vpop.f32.mrf.mxu0  ;;  %v664_v27 = vpop.f32.mrf.mxu1  ;;  %v742_v21 = vadd.f32 %v741_v7, %v740_v11  ;;  %v813_v7 = vmul.f32 %v1507_v48, %v1507_v48 }
 0x121   : > { %v844_v15 = vsel %vm693_vm3, %v805_v63, 0.0 }
 0x122   : > { %v601_v34 = vpop.f32.mrf.mxu0  ;;  %v1577_v35 = vpop.f32.mrf.mxu1  ;;  %v845_v26 = vadd.f32 %v844_v15, %v843_v18 }
 0x123   : > { %703 = vst.msk [vmem:[%s1505_s14 + $0x48] sm:$0xff] %vm693_vm3, %v601_v34  ;;  %719 = vst.msk [vmem:[%s1505_s14 + $0xc8] sm:$0xff] %vm693_vm3, %v1577_v35  ;;  %v806_v9 = vmul.f32 %v601_v34, %v601_v34  ;;  %v743_v16 = vsel %vm693_vm3, %v601_v34, 0.0 }
 0x124   : > { %v603_v41 = vpop.f32.mrf.mxu0  ;;  %v667_v42 = vpop.f32.mrf.mxu1  ;;  %v744_v27 = vadd.f32 %v743_v16, %v742_v21  ;;  %v757_v16 = vsel %vm693_vm3, %v1507_v48, 0.0  ;;  %v761_v48 = vsel %vm693_vm3, %v1521_v56, 0.0 }
 0x125   : > { %v846_v23 = vsel %vm693_vm3, %v806_v9, 0.0 }
 0x126   : > { %v606_v49 = vpop.f32.mrf.mxu0  ;;  %v1588_v50 = vpop.f32.mrf.mxu1  ;;  %v847_v33 = vadd.f32 %v846_v23, %v845_v26  ;;  %v860_v23 = vsel %vm693_vm3, %v813_v7, 0.0 }
 0x127   : > { %704 = vst.msk [vmem:[%s1505_s14 + $0x50] sm:$0xff] %vm693_vm3, %v606_v49  ;;  %720 = vst.msk [vmem:[%s1505_s14 + $0xd0] sm:$0xff] %vm693_vm3, %v1588_v50  ;;  %v807_v17 = vmul.f32 %v606_v49, %v606_v49  ;;  %v745_v24 = vsel %vm693_vm3, %v606_v49, 0.0 }
 0x128   : > { %v608_v58 = vpop.f32.mrf.mxu0  ;;  %v672_v59 = vpop.f32.mrf.mxu1  ;;  %v746_v34 = vadd.f32 %v745_v24, %v744_v27  ;;  %v759_v24 = vsel %vm693_vm3, %v1514_v52, 0.0 }
 0x129   : > { %v848_v30 = vsel %vm693_vm3, %v807_v17, 0.0  ;;  %v814_v17 = vmul.f32 %v1514_v52, %v1514_v52  ;;  %v763_v52 = vsel %vm693_vm3, %v1528_v60, 0.0 }
 0x12a   : > { %v609_v3 = vpop.f32.mrf.mxu0  ;;  %v1599_v5 = vpop.f32.mrf.mxu1  ;;  %v849_v41 = vadd.f32 %v848_v30, %v847_v33  ;;  %v817_v33 = vmul.f32 %v1535_v0, %v1535_v0 }
 0x12b   : > { %705 = vst.msk [vmem:[%s1505_s14 + $0x58] sm:$0xff] %vm693_vm3, %v609_v3  ;;  %721 = vst.msk [vmem:[%s1505_s14 + $0xd8] sm:$0xff] %vm693_vm3, %v1599_v5  ;;  %v808_v25 = vmul.f32 %v609_v3, %v609_v3  ;;  %v747_v31 = vsel %vm693_vm3, %v609_v3, 0.0 }
 0x12c   : > { %v611_v13 = vpop.f32.mrf.mxu0  ;;  %v675_v14 = vpop.f32.mrf.mxu1  ;;  %v748_v42 = vadd.f32 %v747_v31, %v746_v34 }
 0x12d   : > { %v850_v38 = vsel %vm693_vm3, %v808_v25, 0.0  ;;  %v815_v25 = vmul.f32 %v1521_v56, %v1521_v56  ;;  %v765_v56 = vsel %vm693_vm3, %v1535_v0, 0.0  ;;  %v769_v0 = vsel %vm693_vm3, %v1549_v8, 0.0 }
 0x12e   : > { %v614_v19 = vpop.f32.mrf.mxu0  ;;  %v1610_v22 = vpop.f32.mrf.mxu1  ;;  %v851_v47 = vadd.f32 %v850_v38, %v849_v41 }
 0x12f   : > { %706 = vst.msk [vmem:[%s1505_s14 + $0x60] sm:$0xff] %vm693_vm3, %v614_v19  ;;  %722 = vst.msk [vmem:[%s1505_s14 + $0xe0] sm:$0xff] %vm693_vm3, %v1610_v22  ;;  %v809_v32 = vmul.f32 %v614_v19, %v614_v19  ;;  %v749_v39 = vsel %vm693_vm3, %v614_v19, 0.0 }
 0x130   : > { %v616_v28 = vpop.f32.mrf.mxu0  ;;  %v680_v29 = vpop.f32.mrf.mxu1  ;;  %v750_v49 = vadd.f32 %v749_v39, %v748_v42  ;;  %v818_v39 = vmul.f32 %v1542_v4, %v1542_v4  ;;  %v868_v42 = vsel %vm693_vm3, %v817_v33, 0.0 }
 0x131   : > { %v852_v45 = vsel %vm693_vm3, %v809_v32, 0.0  ;;  %v862_v28 = vsel %vm693_vm3, %v814_v17, 0.0  ;;  %v816_v29 = vmul.f32 %v1528_v60, %v1528_v60  ;;  %v864_v32 = vsel %vm693_vm3, %v815_v25, 0.0 }
 0x132   : > { %v617_v36 = vpop.f32.mrf.mxu0  ;;  %v1621_v37 = vpop.f32.mrf.mxu1  ;;  %v853_v58 = vadd.f32 %v852_v45, %v851_v47  ;;  %v767_v60 = vsel %vm693_vm3, %v1542_v4, 0.0  ;;  %v820_v47 = vmul.f32 %v1556_v12, %v1556_v12  ;;  %v771_v4 = vsel %vm693_vm3, %v1556_v12, 0.0 }
 0x133   : > { %707 = vst.msk [vmem:[%s1505_s14 + $0x68] sm:$0xff] %vm693_vm3, %v617_v36  ;;  %v810_v40 = vmul.f32 %v617_v36, %v617_v36  ;;  %723 = vst.msk [vmem:[%s1505_s14 + $0xe8] sm:$0xff] %vm693_vm3, %v1621_v37  ;;  %v751_v46 = vsel %vm693_vm3, %v617_v36, 0.0  ;;  %v866_v38 = vsel %vm693_vm3, %v816_v29, 0.0  ;;  %v775_v12 = vsel %vm693_vm3, %v1577_v35, 0.0 }
 0x134   : > { %v619_v43 = vpop.f32.mrf.mxu0  ;;  %v683_v44 = vpop.f32.mrf.mxu1  ;;  %v752_v59 = vadd.f32 %v751_v46, %v750_v49  ;;  %v870_v46 = vsel %vm693_vm3, %v818_v39, 0.0 }
 0x135   : > { %v854_v54 = vsel %vm693_vm3, %v810_v40, 0.0  ;;  %v819_v43 = vmul.f32 %v1549_v8, %v1549_v8  ;;  %v773_v8 = vsel %vm693_vm3, %v1564_v20, 0.0 }
 0x136   : > { %v622_v51 = vpop.f32.mrf.mxu0  ;;  %v1632_v53 = vpop.f32.mrf.mxu1  ;;  %v855_v1 = vadd.f32 %v854_v54, %v853_v58 }
 0x137   : > { %708 = vst.msk [vmem:[%s1505_s14 + $0x70] sm:$0xff] %vm693_vm3, %v622_v51  ;;  %v753_v55 = vsel %vm693_vm3, %v622_v51, 0.0  ;;  %v811_v57 = vmul.f32 %v622_v51, %v622_v51  ;;  %724 = vst.msk [vmem:[%s1505_s14 + $0xf0] sm:$0xff] %vm693_vm3, %v1632_v53  ;;  %v872_v54 = vsel %vm693_vm3, %v819_v43, 0.0  ;;  %v827_v25 = vmul.f32 %v1632_v53, %v1632_v53 }
 0x138   : > { %v624_v61 = vpop.f32.mrf.mxu0  ;;  %v688_v62 = vpop.f32.mrf.mxu1  ;;  %v754_v2 = vadd.f32 %v753_v55, %v752_v59  ;;  %v821_v55 = vmul.f32 %v1564_v20, %v1564_v20  ;;  %v874_v59 = vsel %vm693_vm3, %v820_v47, 0.0  ;;  %v777_v20 = vsel %vm693_vm3, %v1588_v50, 0.0 }
 0x139   : > { %v856_v63 = vsel %vm693_vm3, %v811_v57, 0.0  ;;  %v822_v61 = vmul.f32 %v1577_v35, %v1577_v35  ;;  %v779_v35 = vsel %vm693_vm3, %v1599_v5, 0.0 }
 0x13a   : > { %v625_v3 = vpop.f32.mrf.mxu0  ;;  %v1642_v6 = vpop.f32.mrf.mxu1  ;;  %v857_v11 = vadd.f32 %v856_v63, %v855_v1  ;;  %v876_v1 = vsel %vm693_vm3, %v821_v55, 0.0 }
 0x13b   : > { %709 = vst.msk [vmem:[%s1505_s14 + $0x78] sm:$0xff] %vm693_vm3, %v625_v3  ;;  %v755_v9 = vsel %vm693_vm3, %v625_v3, 0.0  ;;  %v812_v10 = vmul.f32 %v625_v3, %v625_v3  ;;  %725 = vst.msk [vmem:[%s1505_s14 + $0xf8] sm:$0xff] %vm693_vm3, %v1642_v6 }
 0x13c   : > { %v756_v13 = vadd.f32 %v755_v9, %v754_v2  ;;  %v627_v14 = vpop.f32.mrf.mxu0  ;;  %v691_v15 = vpop.f32.mrf.mxu1  ;;  %v823_v2 = vmul.f32 %v1588_v50, %v1588_v50  ;;  %v878_v9 = vsel %vm693_vm3, %v822_v61, 0.0  ;;  %v781_v50 = vsel %vm693_vm3, %v1610_v22, 0.0 }
 0x13d   : > { %v858_v18 = vsel %vm693_vm3, %v812_v10, 0.0  ;;  %v824_v10 = vmul.f32 %v1599_v5, %v1599_v5  ;;  %v825_v15 = vmul.f32 %v1610_v22, %v1610_v22  ;;  %v783_v5 = vsel %vm693_vm3, %v1621_v37, 0.0 }
 0x13e   : > { %v758_v21 = vadd.f32 %v757_v16, %v756_v13  ;;  %v859_v19 = vadd.f32 %v858_v18, %v857_v11  ;;  %v880_v14 = vsel %vm693_vm3, %v823_v2, 0.0  ;;  %v785_v22 = vsel %vm693_vm3, %v1632_v53, 0.0 }
 0x13f   : > { %v882_v18 = vsel %vm693_vm3, %v824_v10, 0.0 }
 0x140   : > { %v760_v26 = vadd.f32 %v759_v24, %v758_v21  ;;  %v861_v27 = vadd.f32 %v860_v23, %v859_v19  ;;  %v826_v21 = vmul.f32 %v1621_v37, %v1621_v37  ;;  %v884_v24 = vsel %vm693_vm3, %v825_v15, 0.0 }
 0x141   : > { %v787_v37 = vsel %vm693_vm3, %v1642_v6, 0.0 }
 0x142   : > { %v762_v30 = vadd.f32 %v761_v48, %v760_v26  ;;  %v863_v31 = vadd.f32 %v862_v28, %v861_v27  ;;  %v886_v28 = vsel %vm693_vm3, %v826_v21, 0.0  ;;  %v828_v48 = vmul.f32 %v1642_v6, %v1642_v6 }
 0x144   : > { %v764_v34 = vadd.f32 %v763_v52, %v762_v30  ;;  %v865_v36 = vadd.f32 %v864_v32, %v863_v31  ;;  %v888_v31 = vsel %vm693_vm3, %v827_v25, 0.0  ;;  %v890_v33 = vsel %vm693_vm3, %v828_v48, 0.0 }
 0x146   : > { %v867_v40 = vadd.f32 %v866_v38, %v865_v36  ;;  %v766_v41 = vadd.f32 %v765_v56, %v764_v34 }
 0x148   : > { %v768_v44 = vadd.f32 %v767_v60, %v766_v41  ;;  %v869_v45 = vadd.f32 %v868_v42, %v867_v40 }
 0x14a   : > { %v770_v49 = vadd.f32 %v769_v0, %v768_v44  ;;  %v871_v51 = vadd.f32 %v870_v46, %v869_v45 }
 0x14c   : > { %v772_v57 = vadd.f32 %v771_v4, %v770_v49  ;;  %v873_v58 = vadd.f32 %v872_v54, %v871_v51 }
 0x14e   : > { %v774_v62 = vadd.f32 %v773_v8, %v772_v57  ;;  %v875_v63 = vadd.f32 %v874_v59, %v873_v58 }
 0x150   : > { %v776_v3 = vadd.f32 %v775_v12, %v774_v62  ;;  %v877_v7 = vadd.f32 %v876_v1, %v875_v63 }
 0x152   : > { %v879_v11 = vadd.f32 %v878_v9, %v877_v7  ;;  %v778_v13 = vadd.f32 %v777_v20, %v776_v3 }
 0x154   : > { %v881_v16 = vadd.f32 %v880_v14, %v879_v11  ;;  %v780_v17 = vadd.f32 %v779_v35, %v778_v13 }
 0x156   : > { %v883_v19 = vadd.f32 %v882_v18, %v881_v16  ;;  %v782_v23 = vadd.f32 %v781_v50, %v780_v17 }
 0x158   : > { %v885_v26 = vadd.f32 %v884_v24, %v883_v19  ;;  %v784_v27 = vadd.f32 %v783_v5, %v782_v23 }
 0x15a   : > { %v887_v29 = vadd.f32 %v886_v28, %v885_v26  ;;  %v786_v30 = vadd.f32 %v785_v22, %v784_v27 }
 0x15c   : > { %v889_v32 = vadd.f32 %v888_v31, %v887_v29  ;;  %v788_v52 = vadd.f32 %v787_v37, %v786_v30 }
 0x15e   : > { %v789_v34 = vrot.slane %v788_v52, 4  ;;  %v891_v36 = vadd.f32 %v890_v33, %v889_v32 }
 0x160   : > { %v790_v53 = vadd.f32 %v789_v34, %v788_v52  ;;  %v892_v38 = vrot.slane %v891_v36, 4 }
 0x162   : > { %v791_v56 = vrot.slane %v790_v53, 2  ;;  %v893_v39 = vadd.f32 %v892_v38, %v891_v36 }
 0x164   : > { %v792_v40 = vadd.f32 %v791_v56, %v790_v53  ;;  %v894_v41 = vrot.slane %v893_v39, 2 }
 0x166   : > { %v793_v6 = vrot.slane %v792_v40, 1  ;;  %v895_v42 = vadd.f32 %v894_v41, %v893_v39 }
 0x168   : > { %v794_v60 = vadd.f32 %v793_v6, %v792_v40  ;;  %v896_v43 = vrot.slane %v895_v42, 1 }
 0x16a   : > { %796 = vst.msk [vmem:[%s203_s13] sm:$0x1] %vm795_vm4, %v794_v60  ;;  %v897_v44 = vadd.f32 %v896_v43, %v895_v42 }
 0x16b   : > { %1255 = shalt.err (!%p1252_p3)
}
 0x16c   : > { %s1256_s14 = scalar_lea.hbm %s1742_s29, 16  ;;  %s1260_s27 = scalar_lea.hbm %s1819_s3, 32 }
 0x16d   : > { %p1257_p4 = scmp.ne.s32.totalorder %s1742_s29, %s1256_s14  ;;  %p1261_p9 = scmp.lt.s32.totalorder %s1742_s29, %s1819_s3 }
 0x16e   : > { %p1262_p10 = scmp.lt.s32.totalorder %s1260_s27, %s1256_s14 }
 0x16f   : > { %p1258_p7 = pnand %p1257_p4, %p1401_p5 }
 0x170   : > { %p1263_p11 = por %p1262_p10, %p1261_p9 }
 0x171   : > { %p1259_p8 = pneg %p1258_p7 }
 0x173   : > { %p1264_p12 = pnand %p1263_p11, %p1259_p8 }
 0x175   : > { %1267 = shalt.err (!%p1264_p12)
}
 0x176   : > { %1138 = dma.vmem_to_hbm [thread:$0]  (%p1401_p5), %s1744_s20, 16, %s1742_s29, %s905_s6   ;;  %898 = vst.msk [vmem:[%s209_s22] sm:$0x1] %vm795_vm4, %v897_v44 }
 0x177   : > { %s909_s30 = scalar_lea.sflag [#allocation5], %s1732_s7  ;;  %s1268_s8 = scalar_lea.vmem %s1752_s23, 16 }
 0x178   : > { %p1269_p13 = scmp.ne.s32.totalorder %s1752_s23, %s1268_s8  ;;  %s1337_s9 = smov [#allocation4]  }
 0x179   : > { %s1272_s11 = sshll.u32 %s1337_s9, 4  ;;  %s1273_s11 = int_to_ptr.vmem [resolvable:$false] %s1272_s11 }
 0x17a   : > { %p1270_p0 = pnand %p1269_p13, %p1401_p5  ;;  %s1274_s12 = scalar_lea.vmem %s1273_s11, 32 }
 0x17b   : > { %p1275_p2 = scmp.lt.s32.totalorder %s1752_s23, %s1273_s11  ;;  %p1276_p3 = scmp.lt.s32.totalorder %s1274_s12, %s1268_s8 }
 0x17c   : > { %p1271_p1 = pneg %p1270_p0 }
 0x17d   : > { %p1277_p4 = por %p1276_p3, %p1275_p2 }
 0x17f   : > { %p1278_p7 = pnand %p1277_p4, %p1271_p1 }
 0x181   : > { %1281 = shalt.err (!%p1278_p7)
}
 0x182   : > { %s1282_s20 = scalar_lea.hbm %s1750_s5, 16  ;;  %s1286_s29 = scalar_lea.hbm %s1820_s4, 32 }
 0x183   : > { %p1283_p8 = scmp.ne.s32.totalorder %s1750_s5, %s1282_s20  ;;  %p1287_p11 = scmp.lt.s32.totalorder %s1750_s5, %s1820_s4 }
 0x184   : > { %p1288_p12 = scmp.lt.s32.totalorder %s1286_s29, %s1282_s20 }
 0x185   : > { %p1284_p9 = pnand %p1283_p8, %p1401_p5 }
 0x186   : > { %p1289_p13 = por %p1288_p12, %p1287_p11 }
 0x187   : > { %p1285_p10 = pneg %p1284_p9 }
 0x189   : > { %p1290_p0 = pnand %p1289_p13, %p1285_p10 }
 0x18b   : > { %1293 = shalt.err (!%p1290_p0)
}
 0x18c   : > { %1139 = dma.vmem_to_hbm [thread:$0]  (%p1401_p5), %s1752_s23, 16, %s1750_s5, %s909_s30  }
 0x18d PF: > { %p1149_p1 = scmp.ge.s32.totalorder %s1332_s18, 2  ;;  %s958_s10 = sand.u32 1, %s1320_s15  }
 0x18e   : > { %s959_s13 = scalar_lea.sflag [#allocation3], %s958_s10 }
 0x18f   : > { %p1143_p2 = pnand %p1149_p1, %p1405_p6 }
 0x191   : > { %p1144_p3 = pneg %p1143_p2 }
 0x193   : > { %1311 = dma.done.wait (%p1144_p3), %s959_s13, 16  }
 0x194   : > { %1313 = vsyncadd (%p1144_p3), %s959_s13, 4294967280  ;;  %s967_s27 = scalar_lea.sflag [#allocation5], %s958_s10 }
 0x195   : > { %1315 = dma.done.wait (%p1144_p3), %s967_s27, 16  }
 0x196   : > { %1317 = vsyncadd (%p1144_p3), %s967_s27, 4294967280  ;;  %p18_p5 = scmp.ge.s32.totalorder %s1388_s21, 4   ;;  %s1823_s15 = smov %s1324_s16 }
 0x197   : > { %s1824_s16 = smov %s1328_s17  ;;  %s1825_s17 = smov %s1399_s24 }
 0x198   : > { %s1826_s18 = smov %s1388_s21  ;;  %20 = sbr.rel (!%p18_p5) target bundleno = 5 (0x5), region = 92 }
 0x19d   :  { %971 = vsyncpa [#allocation3], 1 }
 0x19e   :  { %973 = vsyncpa [#allocation3 + $0x1], 1 }
 0x19f   :  { %974 = vsyncpa [#allocation5], 1 }
 0x1a0   :  { %976 = vsyncpa [#allocation5 + $0x1], 1 }

// kernel: net_forward.35
= control target key start
LH: loop header
LB: loop body
LE: loop exit
PB: predicated region body
PF: predicated region fallthrough
CT: control target
= control target key end

     0   :  { %vm551_vm0 = vcmask 523264   ;;  %vm920_vm1 = vcmask 516096   ;;  %s1786_s1 = inlined_call_operand.vmem [shape: bf16[576,64], index: 1, kind: input, shape index: {}]   ;;  %s1787_s0 = inlined_call_operand.vmem [shape: bf16[128,576], index: 0, kind: input, shape index: {}]   ;;  %s1788_s2 = inlined_call_operand.vmem [shape: f32[128,64], index: 2, kind: output, shape index: {0}]   ;;  %s1789_s3 = inlined_call_operand.vmem [shape: f32[1,1,64], index: 3, kind: output, shape index: {1}]   ;;  %s1790_s4 = inlined_call_operand.vmem [shape: f32[1,1,64], index: 4, kind: output, shape index: {2}]  }
   0x1   :  { %v1244_v0 = vld [vmem:[%s1786_s1 + $0x78] sm:$0xff]   ;;  %v1248_v4 = vld [vmem:[%s1786_s1 + $0x70] sm:$0xff]   ;;  %v1252_v8 = vld [vmem:[%s1786_s1 + $0x68] sm:$0xff]  }
   0x2   :  { %v1245_v1 = vld [vmem:[%s1786_s1 + $0xf8] sm:$0xff]   ;;  %1072 = vmatprep.subr.bf16.mxu0 %v1244_v0  ;;  %v1249_v5 = vld [vmem:[%s1786_s1 + $0xf0] sm:$0xff]   ;;  %v1253_v9 = vld [vmem:[%s1786_s1 + $0xe8] sm:$0xff]  }
   0x3   :  { %v1246_v2 = vld [vmem:[%s1786_s1 + $0x38] sm:$0xff]   ;;  %1136 = vmatprep.subr.bf16.mxu1 %v1245_v1  ;;  %v1250_v6 = vld [vmem:[%s1786_s1 + $0x30] sm:$0xff]   ;;  %v1254_v10 = vld [vmem:[%s1786_s1 + $0x28] sm:$0xff]  }
   0x4   :  { %v1247_v3 = vld [vmem:[%s1786_s1 + $0xb8] sm:$0xff]   ;;  %1073 = vmatpush3.bf16.msra.mxu0 %v1246_v2  ;;  %v1251_v7 = vld [vmem:[%s1786_s1 + $0xb0] sm:$0xff]   ;;  %v1255_v11 = vld [vmem:[%s1786_s1 + $0xa8] sm:$0xff]  }
   0x5   :  { %1137 = vmatpush3.bf16.msra.mxu1 %v1247_v3  ;;  %1074 = vmatprep.subr.bf16.mxu0 %v1248_v4  ;;  %v1256_v12 = vld [vmem:[%s1786_s1 + $0x60] sm:$0xff]   ;;  %v1260_v16 = vld [vmem:[%s1786_s1 + $0x58] sm:$0xff]   ;;  %v1264_v20 = vld [vmem:[%s1786_s1 + $0x50] sm:$0xff]  }
   0x6   :  { %1138 = vmatprep.subr.bf16.mxu1 %v1249_v5  ;;  %v1257_v13 = vld [vmem:[%s1786_s1 + $0xe0] sm:$0xff]   ;;  %v1261_v17 = vld [vmem:[%s1786_s1 + $0xd8] sm:$0xff]   ;;  %v1265_v21 = vld [vmem:[%s1786_s1 + $0xd0] sm:$0xff]  }
   0x7   :  { %v1258_v14 = vld [vmem:[%s1786_s1 + $0x20] sm:$0xff]   ;;  %v1262_v18 = vld [vmem:[%s1786_s1 + $0x18] sm:$0xff]   ;;  %v1266_v22 = vld [vmem:[%s1786_s1 + $0x10] sm:$0xff]  }
   0x8   :  { %1075 = vmatpush3.bf16.msra.mxu0 %v1250_v6  ;;  %v1259_v15 = vld [vmem:[%s1786_s1 + $0xa0] sm:$0xff]   ;;  %v1263_v19 = vld [vmem:[%s1786_s1 + $0x98] sm:$0xff]   ;;  %v1267_v23 = vld [vmem:[%s1786_s1 + $0x90] sm:$0xff]  }
   0x9   :  { %1139 = vmatpush3.bf16.msra.mxu1 %v1251_v7  ;;  %1076 = vmatprep.subr.bf16.mxu0 %v1252_v8  ;;  %v1268_v24 = vld [vmem:[%s1786_s1 + $0x48] sm:$0xff]   ;;  %v1272_v28 = vld [vmem:[%s1786_s1 + $0x40] sm:$0xff]   ;;  %v1282_v36 = vld [vmem:[%s1786_s1 + $0x118] sm:$0xff]  }
   0xa   :  { %1140 = vmatprep.subr.bf16.mxu1 %v1253_v9  ;;  %v1269_v25 = vld [vmem:[%s1786_s1 + $0xc8] sm:$0xff]   ;;  %v1273_v29 = vld [vmem:[%s1786_s1 + $0xc0] sm:$0xff]   ;;  %v1295_v42 = vld [vmem:[%s1786_s1 + $0x110] sm:$0xff]  }
   0xb   :  { %v1270_v26 = vld [vmem:[%s1786_s1 + $0x8] sm:$0xff]   ;;  %v1274_v30 = vld [vmem:[%s1786_s1] sm:$0xff]   ;;  %v1291_v43 = vld [vmem:[%s1787_s0 + $0x5c] ss:$20 sps:$4 sm:$0xff]  }
   0xc   :  { %1077 = vmatpush3.bf16.msra.mxu0 %v1254_v10  ;;  %v1271_v27 = vld [vmem:[%s1786_s1 + $0x88] sm:$0xff]   ;;  %v1275_v31 = vld [vmem:[%s1786_s1 + $0x80] sm:$0xff]   ;;  %v1296_v47 = vld [vmem:[%s1787_s0 + $0x7c] ss:$20 sps:$4 sm:$0xff]  }
   0xd   :  { %1141 = vmatpush3.bf16.msra.mxu1 %v1255_v11  ;;  %1078 = vmatprep.subr.bf16.mxu0 %v1256_v12  ;;  %v1276_v32 = vld [vmem:[%s1787_s0] ss:$20 sps:$4 sm:$0xff]   ;;  %v1278_v33 = vld [vmem:[%s1787_s0 + $0x4] ss:$20 sps:$4 sm:$0xff]   ;;  %v1279_v34 = vld [vmem:[%s1787_s0 + $0x8] ss:$20 sps:$4 sm:$0xff]  }
   0xe   :  { %1142 = vmatprep.subr.bf16.mxu1 %v1257_v13  ;;  %v1281_v35 = vld [vmem:[%s1787_s0 + $0xc] ss:$20 sps:$4 sm:$0xff]   ;;  %608 = vmatprep.mubr.bf16.mxu0 %v1278_v33  ;;  %v1285_v38 = vld [vmem:[%s1787_s0 + $0x34] ss:$20 sps:$4 sm:$0xff]   ;;  %v1288_v40 = vld [vmem:[%s1787_s0 + $0x30] ss:$20 sps:$4 sm:$0xff]  }
   0xf   :  { %705 = vmatprep.mubr.bf16.mxu1 %v1281_v35  ;;  %v1283_v37 = vld [vmem:[%s1787_s0 + $0x2c] ss:$20 sps:$4 sm:$0xff]   ;;  %v1287_v39 = vld [vmem:[%s1787_s0 + $0x28] ss:$20 sps:$4 sm:$0xff]   ;;  %v1293_v44 = vld [vmem:[%s1787_s0 + $0x50] ss:$20 sps:$4 sm:$0xff]  }
  0x10   :  { %1079 = vmatpush3.bf16.msra.mxu0 %v1258_v14  ;;  %v1289_v41 = vld [vmem:[%s1787_s0 + $0x54] ss:$20 sps:$4 sm:$0xff]   ;;  %v1294_v45 = vld [vmem:[%s1787_s0 + $0x58] ss:$20 sps:$4 sm:$0xff]   ;;  %v1321_v49 = vld [vmem:[%s1786_s1 + $0x100] sm:$0xff]  }
  0x11   :  { %1143 = vmatpush3.bf16.msra.mxu1 %v1259_v15  ;;  %1080 = vmatprep.subr.bf16.mxu0 %v1260_v16  ;;  %v1308_v46 = vld [vmem:[%s1786_s1 + $0x108] sm:$0xff]   ;;  %v1298_v48 = vld [vmem:[%s1787_s0 + $0x84] ss:$20 sps:$4 sm:$0xff]   ;;  %v1301_v51 = vld [vmem:[%s1787_s0 + $0x80] ss:$20 sps:$4 sm:$0xff]  }
  0x12   :  { %1144 = vmatprep.subr.bf16.mxu1 %v1261_v17  ;;  %v1300_v50 = vld [vmem:[%s1787_s0 + $0x78] ss:$20 sps:$4 sm:$0xff]   ;;  %v1306_v54 = vld [vmem:[%s1787_s0 + $0xa0] ss:$20 sps:$4 sm:$0xff]   ;;  %v1307_v55 = vld [vmem:[%s1787_s0 + $0xa8] ss:$20 sps:$4 sm:$0xff]  }
  0x13   :  { %v1302_v52 = vld [vmem:[%s1787_s0 + $0xa4] ss:$20 sps:$4 sm:$0xff]   ;;  %v1304_v53 = vld [vmem:[%s1787_s0 + $0xac] ss:$20 sps:$4 sm:$0xff]   ;;  %v1311_v57 = vld [vmem:[%s1787_s0 + $0xd4] ss:$20 sps:$4 sm:$0xff]  }
  0x14   :  { %1081 = vmatpush3.bf16.msra.mxu0 %v1262_v18  ;;  %v1309_v56 = vld [vmem:[%s1787_s0 + $0xcc] ss:$20 sps:$4 sm:$0xff]   ;;  %v1313_v58 = vld [vmem:[%s1787_s0 + $0xc8] ss:$20 sps:$4 sm:$0xff]   ;;  %v1314_v59 = vld [vmem:[%s1787_s0 + $0xd0] ss:$20 sps:$4 sm:$0xff]  }
  0x15   :  { %1145 = vmatpush3.bf16.msra.mxu1 %v1263_v19  ;;  %1082 = vmatprep.subr.bf16.mxu0 %v1264_v20  ;;  %v1315_v60 = vld [vmem:[%s1787_s0 + $0xf4] ss:$20 sps:$4 sm:$0xff]   ;;  %v1317_v61 = vld [vmem:[%s1787_s0 + $0xfc] ss:$20 sps:$4 sm:$0xff]   ;;  %v1320_v63 = vld [vmem:[%s1787_s0 + $0xf8] ss:$20 sps:$4 sm:$0xff]  }
  0x16   :  { %1146 = vmatprep.subr.bf16.mxu1 %v1265_v21  ;;  %v1319_v62 = vld [vmem:[%s1787_s0 + $0xf0] ss:$20 sps:$4 sm:$0xff]   ;;  %v1326_v2 = vld [vmem:[%s1787_s0 + $0x118] ss:$20 sps:$4 sm:$0xff]   ;;  %v1327_v3 = vld [vmem:[%s1787_s0 + $0x120] ss:$20 sps:$4 sm:$0xff]  }
  0x17   :  { %v1322_v0 = vld [vmem:[%s1787_s0 + $0x11c] ss:$20 sps:$4 sm:$0xff]   ;;  %v1324_v1 = vld [vmem:[%s1787_s0 + $0x124] ss:$20 sps:$4 sm:$0xff]   ;;  %v1332_v8 = vld [vmem:[%s1787_s0 + $0x60] ss:$20 sps:$4 sm:$0xff]  }
  0x18   :  { %1083 = vmatpush3.bf16.msra.mxu0 %v1266_v22  ;;  %v1328_v4 = vld [vmem:[%s1787_s0 + $0x10] ss:$20 sps:$4 sm:$0xff]   ;;  %v1330_v6 = vld [vmem:[%s1787_s0 + $0x38] ss:$20 sps:$4 sm:$0xff]   ;;  %v1333_v9 = vld [vmem:[%s1787_s0 + $0x100] ss:$20 sps:$4 sm:$0xff]  }
  0x19   :  { %1147 = vmatpush3.bf16.msra.mxu1 %v1267_v23  ;;  %1084 = vmatprep.subr.bf16.mxu0 %v1268_v24  ;;  %v1329_v5 = vld [vmem:[%s1787_s0 + $0xb0] ss:$20 sps:$4 sm:$0xff]   ;;  %v1331_v7 = vld [vmem:[%s1787_s0 + $0xd8] ss:$20 sps:$4 sm:$0xff]   ;;  %v1334_v10 = vld [vmem:[%s1787_s0 + $0x88] ss:$20 sps:$4 sm:$0xff]  }
  0x1a   :  { %1148 = vmatprep.subr.bf16.mxu1 %v1269_v25  ;;  %v1335_v11 = vld [vmem:[%s1787_s0 + $0x128] ss:$20 sps:$4 sm:$0xff]  }
  0x1c   :  { %1085 = vmatpush3.bf16.msra.mxu0 %v1270_v26 }
  0x1d   :  { %1149 = vmatpush3.bf16.msra.mxu1 %v1271_v27  ;;  %1086 = vmatprep.subr.bf16.mxu0 %v1272_v28 }
  0x1e   :  { %1150 = vmatprep.subr.bf16.mxu1 %v1273_v29 }
  0x20   :  { %1087 = vmatpush3.bf16.msra.mxu0 %v1274_v30 }
  0x21   :  { %1151 = vmatpush3.bf16.msra.mxu1 %v1275_v31  ;;  %1212 = vmatprep.subr.bf16.mxu0 %v1282_v36 }
  0x22   :  { %1236 = vmatprep.subr.bf16.mxu1 %v1282_v36 }
  0x23   :  { %609 = vmatmul.mubr.bf16.vlgmr.msra.gmra.mxu0 %v1276_v32 }
  0x24   :  { %706 = vmatmul.mubr.bf16.vlgmr.msra.gmra.mxu1 %v1279_v34  ;;  %1213 = vmatpush3.bf16.msra.mxu0 %v1282_v36 }
  0x25   :  { %616 = vmatprep.mubr.bf16.mxu0 %v1283_v37  ;;  %713 = vmatprep.mubr.bf16.mxu1 %v1285_v38 }
  0x26   :  { %1240 = vmatpush3.bf16.msra.mxu1 %v1282_v36  ;;  %1214 = vmatprep.subr.bf16.mxu0 %v1295_v42 }
  0x27   :  { %1237 = vmatprep.subr.bf16.mxu1 %v1295_v42 }
  0x28   :  { %1215 = vmatpush3.bf16.msra.mxu0 %v1295_v42 }
  0x29   :  { %1216 = vmatprep.subr.bf16.mxu0 %v1308_v46 }
  0x2a   :  { %1241 = vmatpush3.bf16.msra.mxu1 %v1295_v42 }
  0x2b   :  { %617 = vmatmul.mubr.bf16.gmra.mxu0 %v1287_v39  ;;  %1238 = vmatprep.subr.bf16.mxu1 %v1308_v46 }
  0x2c   :  { %714 = vmatmul.mubr.bf16.gmra.mxu1 %v1288_v40  ;;  %624 = vmatprep.mubr.bf16.mxu0 %v1289_v41 }
  0x2d   :  { %721 = vmatprep.mubr.bf16.mxu1 %v1291_v43  ;;  %1217 = vmatpush3.bf16.msra.mxu0 %v1308_v46 }
  0x2e   :  { %1242 = vmatpush3.bf16.msra.mxu1 %v1308_v46  ;;  %1218 = vmatprep.subr.bf16.mxu0 %v1321_v49 }
  0x2f   :  { %1239 = vmatprep.subr.bf16.mxu1 %v1321_v49 }
  0x31   :  { %1219 = vmatpush3.bf16.msra.mxu0 %v1321_v49 }
  0x32   :  { %1243 = vmatpush3.bf16.msra.mxu1 %v1321_v49 }
  0x33   :  { %625 = vmatmul.mubr.bf16.gmra.mxu0 %v1293_v44 }
  0x34   :  { %722 = vmatmul.mubr.bf16.gmra.mxu1 %v1294_v45  ;;  %632 = vmatprep.mubr.bf16.mxu0 %v1296_v47 }
  0x35   :  { %729 = vmatprep.mubr.bf16.mxu1 %v1298_v48 }
  0x3b   :  { %633 = vmatmul.mubr.bf16.gmra.mxu0 %v1300_v50 }
  0x3c   :  { %730 = vmatmul.mubr.bf16.gmra.mxu1 %v1301_v51  ;;  %640 = vmatprep.mubr.bf16.mxu0 %v1302_v52 }
  0x3d   :  { %737 = vmatprep.mubr.bf16.mxu1 %v1304_v53 }
  0x43   :  { %641 = vmatmul.mubr.bf16.gmra.mxu0 %v1306_v54 }
  0x44   :  { %738 = vmatmul.mubr.bf16.gmra.mxu1 %v1307_v55  ;;  %648 = vmatprep.mubr.bf16.mxu0 %v1309_v56 }
  0x45   :  { %745 = vmatprep.mubr.bf16.mxu1 %v1311_v57 }
  0x4b   :  { %649 = vmatmul.mubr.bf16.gmra.mxu0 %v1313_v58 }
  0x4c   :  { %746 = vmatmul.mubr.bf16.gmra.mxu1 %v1314_v59  ;;  %656 = vmatprep.mubr.bf16.mxu0 %v1315_v60 }
  0x4d   :  { %753 = vmatprep.mubr.bf16.mxu1 %v1317_v61 }
  0x53   :  { %657 = vmatmul.mubr.bf16.gmra.mxu0 %v1319_v62 }
  0x54   :  { %754 = vmatmul.mubr.bf16.gmra.mxu1 %v1320_v63  ;;  %664 = vmatprep.mubr.bf16.mxu0 %v1322_v0 }
  0x55   :  { %761 = vmatprep.mubr.bf16.mxu1 %v1324_v1 }
  0x5b   :  { %665 = vmatmul.mubr.bf16.gmra.mxu0 %v1326_v2 }
  0x5c   :  { %762 = vmatmul.mubr.bf16.gmra.mxu1 %v1327_v3  ;;  %1220 = vmatprep.mubr.msk.bf16.mxu0 %vm551_vm0, %v1328_v4 }
  0x5d   :  { %1228 = vmatprep.mubr.msk.bf16.mxu1 %vm551_vm0, %v1329_v5 }
  0x63   :  { %1221 = vmatmul.mubr.msk.bf16.vlgmr.msra.gmra.mxu0 %vm551_vm0, %v1330_v6 }
  0x64   :  { %1229 = vmatmul.mubr.msk.bf16.vlgmr.msra.gmra.mxu1 %vm551_vm0, %v1331_v7  ;;  %1224 = vmatprep.mubr.msk.bf16.mxu0 %vm551_vm0, %v1332_v8 }
  0x65   :  { %1232 = vmatprep.mubr.msk.bf16.mxu1 %vm551_vm0, %v1333_v9 }
  0x6b   :  { %1225 = vmatmul.mubr.msk.bf16.gmra.mxu0 %vm551_vm0, %v1334_v10 }
  0x6c   :  { %1233 = vmatmul.mubr.msk.bf16.gmra.mxu1 %vm551_vm0, %v1335_v11 }
  0xe3   :  { %v1088_v12 = vpop.f32.mrf.mxu0 }
  0xe4   :  { %v1152_v13 = vpop.f32.mrf.mxu1 }
  0xe5   :  { %v1089_v14 = vpop.f32.mrf.mxu0 }
  0xe6   :  { %v1153_v15 = vpop.f32.mrf.mxu1  ;;  %v1090_v6 = vadd.f32 %v1089_v14, %v1088_v12 }
  0xe7   :  { %v1091_v16 = vpop.f32.mrf.mxu0  ;;  %v1154_v7 = vadd.f32 %v1153_v15, %v1152_v13 }
  0xe8   :  { %v1155_v17 = vpop.f32.mrf.mxu1 }
  0xe9   :  { %v1092_v18 = vpop.f32.mrf.mxu0 }
  0xea   :  { %v1156_v19 = vpop.f32.mrf.mxu1  ;;  %v1093_v9 = vadd.f32 %v1092_v18, %v1091_v16 }
  0xeb   :  { %v1094_v20 = vpop.f32.mrf.mxu0  ;;  %v1157_v10 = vadd.f32 %v1156_v19, %v1155_v17 }
  0xec   :  { %v1158_v21 = vpop.f32.mrf.mxu1 }
  0xed   :  { %v1095_v22 = vpop.f32.mrf.mxu0  ;;  %v711_v15 = vadd.f32 %v1157_v10, %v1093_v9 }
  0xee   :  { %v1159_v23 = vpop.f32.mrf.mxu1  ;;  %v1096_v11 = vadd.f32 %v1095_v22, %v1094_v20 }
  0xef   :  { %v1097_v24 = vpop.f32.mrf.mxu0 }
  0xf0   :  { %v1161_v25 = vpop.f32.mrf.mxu1 }
  0xf1   :  { %v1098_v26 = vpop.f32.mrf.mxu0 }
  0xf2   :  { %v1162_v27 = vpop.f32.mrf.mxu1 }
  0xf3   :  { %v1597_v28 = vpop.f32.mrf.mxu0  ;;  %v1163_v12 = vadd.f32 %v1162_v27, %v1161_v25 }
  0xf4   :  { %v1599_v29 = vpop.f32.mrf.mxu1 }
  0xf5   :  { %v1101_v30 = vpop.f32.mrf.mxu0 }
  0xf6   :  { %v1601_v31 = vpop.f32.mrf.mxu1  ;;  %v1102_v16 = vadd.f32 %v1101_v30, %v1597_v28 }
  0xf7   :  { %v1603_v32 = vpop.f32.mrf.mxu0 }
  0xf8   :  { %v1605_v33 = vpop.f32.mrf.mxu1 }
  0xf9   :  { %1791 = vst [vmem:[#allocation2_spill] sm:$0xff] %v1605_v33  ;;  %v1607_v34 = vpop.f32.mrf.mxu0 }
  0xfa   :  { %1792 = vst [vmem:[#allocation3_spill] sm:$0xff] %v1607_v34  ;;  %v1609_v35 = vpop.f32.mrf.mxu1  ;;  %v1099_v34 = vadd.f32 %v1098_v26, %v1097_v24 }
  0xfb   :  { %1793 = vst [vmem:[#allocation4_spill] sm:$0xff] %v1609_v35  ;;  %v1106_v36 = vpop.f32.mrf.mxu0 }
  0xfc   :  { %v1170_v37 = vpop.f32.mrf.mxu1 }
  0xfd   :  { %v1107_v38 = vpop.f32.mrf.mxu0 }
  0xfe   :  { %v1171_v39 = vpop.f32.mrf.mxu1  ;;  %v1108_v22 = vadd.f32 %v1107_v38, %v1106_v36 }
  0xff   :  { %v1611_v40 = vpop.f32.mrf.mxu0 }
 0x100   :  { %1794 = vst [vmem:[#allocation5_spill] sm:$0xff] %v1611_v40  ;;  %v1613_v41 = vpop.f32.mrf.mxu1 }
 0x101   :  { %1795 = vst [vmem:[#allocation6_spill] sm:$0xff] %v1613_v41  ;;  %v1615_v42 = vpop.f32.mrf.mxu0 }
 0x102   :  { %1796 = vst [vmem:[#allocation7_spill] sm:$0xff] %v1615_v42  ;;  %v1617_v43 = vpop.f32.mrf.mxu1 }
 0x103   :  { %1797 = vst [vmem:[#allocation8_spill] sm:$0xff] %v1617_v43  ;;  %v1112_v44 = vpop.f32.mrf.mxu0  ;;  %v1160_v43 = vadd.f32 %v1159_v23, %v1158_v21  ;;  %v1166_v21 = vadd.f32 %v1601_v31, %v1599_v29  ;;  %v1172_v23 = vadd.f32 %v1171_v39, %v1170_v37  ;;  %v719_v29 = vadd.f32 %v1163_v12, %v1099_v34 }
 0x104   :  { %v1176_v45 = vpop.f32.mrf.mxu1 }
 0x105   :  { %v1113_v46 = vpop.f32.mrf.mxu0  ;;  %v716_v14 = vadd.f32 %v1160_v43, %v1096_v11 }
 0x106   :  { %v1177_v47 = vpop.f32.mrf.mxu1 }
 0x107   :  { %v1115_v48 = vpop.f32.mrf.mxu0 }
 0x108   :  { %v1179_v49 = vpop.f32.mrf.mxu1 }
 0x109   :  { %v1116_v50 = vpop.f32.mrf.mxu0 }
 0x10a   :  { %v1180_v51 = vpop.f32.mrf.mxu1 }
 0x10b   :  { %v1118_v52 = vpop.f32.mrf.mxu0 }
 0x10c   :  { %v1182_v53 = vpop.f32.mrf.mxu1 }
 0x10d   :  { %v1119_v54 = vpop.f32.mrf.mxu0 }
 0x10e   :  { %v1183_v55 = vpop.f32.mrf.mxu1  ;;  %v1120_v42 = vadd.f32 %v1119_v54, %v1118_v52  ;;  %v1805_v52 = vld [vmem:[#allocation5_spill] sm:$0xff] }
 0x10f   :  { %v1121_v56 = vpop.f32.mrf.mxu0  ;;  %v1184_v40 = vadd.f32 %v1183_v55, %v1182_v53  ;;  %v1806_v53 = vld [vmem:[#allocation7_spill] sm:$0xff] }
 0x110   :  { %v1185_v57 = vpop.f32.mrf.mxu1  ;;  %v1111_v54 = vadd.f32 %v1806_v53, %v1805_v52 }
 0x111   :  { %v1122_v58 = vpop.f32.mrf.mxu0  ;;  %v748_v20 = vadd.f32 %v1184_v40, %v1120_v42  ;;  %v1802_v40 = vld [vmem:[#allocation3_spill] sm:$0xff] }
 0x112   :  { %v1186_v59 = vpop.f32.mrf.mxu1  ;;  %v1123_v17 = vadd.f32 %v1122_v58, %v1121_v56  ;;  %v1651_v42 = vadd.f32 %v1802_v40, %v1603_v32  ;;  %v1807_v58 = vld [vmem:[#allocation6_spill] sm:$0xff] }
 0x113   :  { %v1124_v60 = vpop.f32.mrf.mxu0  ;;  %v1187_v18 = vadd.f32 %v1186_v59, %v1185_v57  ;;  %v732_v57 = vadd.f32 %v1172_v23, %v1108_v22  ;;  %v1808_v59 = vld [vmem:[#allocation8_spill] sm:$0xff] }
 0x114   :  { %v1188_v61 = vpop.f32.mrf.mxu1 }
 0x115   :  { %v1125_v62 = vpop.f32.mrf.mxu0  ;;  %v751_v39 = vadd.f32 %v1187_v18, %v1123_v17 }
 0x116   :  { %v1189_v63 = vpop.f32.mrf.mxu1  ;;  %v1126_v27 = vadd.f32 %v1125_v62, %v1124_v60  ;;  %v1175_v60 = vadd.f32 %v1808_v59, %v1807_v58 }
 0x117   :  { %v1619_v0 = vpop.f32.mrf.mxu0  ;;  %v1190_v43 = vadd.f32 %v1189_v63, %v1188_v61 }
 0x118   :  { %1798 = vst [vmem:[#allocation9_spill] sm:$0xff] %v1619_v0  ;;  %v1621_v1 = vpop.f32.mrf.mxu1 }
 0x119   :  { %1799 = vst [vmem:[#allocation10_spill] sm:$0xff] %v1621_v1  ;;  %v1623_v2 = vpop.f32.mrf.mxu0  ;;  %v1114_v1 = vadd.f32 %v1113_v46, %v1112_v44  ;;  %v1117_v46 = vadd.f32 %v1116_v50, %v1115_v48  ;;  %v1803_v48 = vld [vmem:[#allocation2_spill] sm:$0xff] }
 0x11a   :  { %1800 = vst [vmem:[#allocation11_spill] sm:$0xff] %v1623_v2  ;;  %v1625_v3 = vpop.f32.mrf.mxu1  ;;  %v1178_v2 = vadd.f32 %v1177_v47, %v1176_v45  ;;  %v1181_v47 = vadd.f32 %v1180_v51, %v1179_v49  ;;  %v1804_v49 = vld [vmem:[#allocation4_spill] sm:$0xff]  ;;  %v724_v51 = vadd.f32 %v1166_v21, %v1102_v16 }
 0x11b   :  { %1801 = vst [vmem:[#allocation12_spill] sm:$0xff] %v1625_v3  ;;  %v1130_v4 = vpop.f32.mrf.mxu0  ;;  %v708_v3 = vadd.f32 %v1154_v7, %v1090_v6  ;;  %v1169_v50 = vadd.f32 %v1804_v49, %v1803_v48 }
 0x11c   :  { %v1194_v5 = vpop.f32.mrf.mxu1  ;;  %v740_v26 = vadd.f32 %v1178_v2, %v1114_v1  ;;  %v743_v56 = vadd.f32 %v1181_v47, %v1117_v46  ;;  %v756_v1 = vadd.f32 %v1190_v43, %v1126_v27  ;;  %v735_v43 = vadd.f32 %v1175_v60, %v1111_v54 }
 0x11d   :  { %v1131_v8 = vpop.f32.mrf.mxu0  ;;  %v727_v49 = vadd.f32 %v1169_v50, %v1651_v42 }
 0x11e   :  { %v1195_v41 = vpop.f32.mrf.mxu1  ;;  %v1132_v31 = vadd.f32 %v1131_v8, %v1130_v4 }
 0x11f   :  { %v1627_v35 = vpop.f32.mrf.mxu0  ;;  %v1196_v36 = vadd.f32 %v1195_v41, %v1194_v5  ;;  %v1809_v2 = vld [vmem:[#allocation9_spill] sm:$0xff] }
 0x120   :  { %v1629_v0 = vpop.f32.mrf.mxu1 }
 0x121   :  { %v1631_v33 = vpop.f32.mrf.mxu0  ;;  %v764_v8 = vadd.f32 %v1196_v36, %v1132_v31 }
 0x122   :  { %v1198_v13 = vpop.f32.mrf.mxu1 }
 0x123   :  { %v1222_v19 = vpop.f32.mrf.mxu0  ;;  %v1199_v16 = vadd.f32 %v1198_v13, %v1629_v0  ;;  %v1811_v0 = vld [vmem:[#allocation10_spill] sm:$0xff]  ;;  %v1812_v13 = vld [vmem:[#allocation12_spill] sm:$0xff] }
 0x124   :  { %v813_v44 = vadd.f32 %v1222_v19, %v716_v14  ;;  %v1230_v45 = vpop.f32.mrf.mxu1  ;;  %v1193_v23 = vadd.f32 %v1812_v13, %v1811_v0 }
 0x125   :  { %v1636_v24 = vadd.f32 %v1230_v45, %v748_v20  ;;  %v804_v25 = vpop.f32.mrf.mxu0 }
 0x126   :  { %869 = vst.msk [vmem:[%s1788_s2 + $0x10] sm:$0xff] %vm551_vm0, %v813_v44  ;;  %v805_v28 = vadd.f32 %v804_v25, %v708_v3  ;;  %v836_v30 = vpop.f32.mrf.mxu1  ;;  %v1810_v3 = vld [vmem:[#allocation11_spill] sm:$0xff]  ;;  %v924_v5 = vmul.f32 %v813_v44, %v813_v44  ;;  %v886_v17 = vsel %vm551_vm0, %v813_v44, 0.0 }
 0x127   :  { %877 = vst.msk [vmem:[%s1788_s2 + $0x50] sm:$0xff] %vm551_vm0, %v1636_v24  ;;  %v1647_v37 = vadd.f32 %v836_v30, %v740_v26  ;;  %v1223_v38 = vpop.f32.mrf.mxu0  ;;  %v1129_v4 = vadd.f32 %v1810_v3, %v1809_v2 }
 0x128   :  { %867 = vst.msk [vmem:[%s1788_s2] sm:$0xff] %vm551_vm0, %v805_v28  ;;  %v816_v34 = vadd.f32 %v1223_v38, %v719_v29  ;;  %v1231_v41 = vpop.f32.mrf.mxu1  ;;  %v922_v61 = vmul.f32 %v805_v28, %v805_v28  ;;  %v883_v9 = vsel %vm551_vm0, %v805_v28, 0.0  ;;  %v941_v25 = vsel %vm551_vm0, %v924_v5, 0.0 }
 0x129   :  { %875 = vst.msk [vmem:[%s1788_s2 + $0x40] sm:$0xff] %vm551_vm0, %v1647_v37  ;;  %v1666_v32 = vadd.f32 %v1231_v41, %v751_v39  ;;  %v807_v55 = vpop.f32.mrf.mxu0  ;;  %v759_v53 = vadd.f32 %v1193_v23, %v1129_v4  ;;  %v930_v2 = vmul.f32 %v1647_v37, %v1647_v37 }
 0x12a   :  { %870 = vst.msk [vmem:[%s1788_s2 + $0x18] sm:$0xff] %vm551_vm0, %v816_v34  ;;  %v808_v62 = vadd.f32 %v807_v55, %v711_v15  ;;  %v839_v63 = vpop.f32.mrf.mxu1  ;;  %v1135_v15 = vadd.f32 %v1631_v33, %v1627_v35  ;;  %v938_v20 = vsel %vm551_vm0, %v922_v61, 0.0  ;;  %v925_v21 = vmul.f32 %v816_v34, %v816_v34 }
 0x12b   :  { %878 = vst.msk [vmem:[%s1788_s2 + $0x58] sm:$0xff] %vm551_vm0, %v1666_v32  ;;  %v1681_v6 = vadd.f32 %v839_v63, %v743_v56  ;;  %v1226_v7 = vpop.f32.mrf.mxu0  ;;  %v888_v26 = vsel %vm551_vm0, %v816_v34, 0.0  ;;  %v904_v0 = vsel %vm551_vm0, %v1666_v32, 0.0 }
 0x12c   :  { %868 = vst.msk [vmem:[%s1788_s2 + $0x8] sm:$0xff] %vm551_vm0, %v808_v62  ;;  %v884_v10 = vsel %vm551_vm0, %v808_v62, 0.0  ;;  %v923_v11 = vmul.f32 %v808_v62, %v808_v62  ;;  %v829_v12 = vadd.f32 %v1226_v7, %v732_v57  ;;  %v1234_v14 = vpop.f32.mrf.mxu1  ;;  %v767_v36 = vadd.f32 %v1199_v16, %v1135_v15 }
 0x12d   :  { %v885_v18 = vadd.f32 %v884_v10, %v883_v9  ;;  %876 = vst.msk [vmem:[%s1788_s2 + $0x48] sm:$0xff] %vm551_vm0, %v1681_v6  ;;  %v820_v19 = vpop.f32.mrf.mxu0  ;;  %v1704_v33 = vadd.f32 %v1234_v14, %v764_v8  ;;  %v943_v39 = vsel %vm551_vm0, %v925_v21, 0.0  ;;  %v898_v8 = vsel %vm551_vm0, %v1647_v37, 0.0 }
 0x12e   :  { %v939_v22 = vsel %vm551_vm0, %v923_v11, 0.0  ;;  %873 = vst.msk [vmem:[%s1788_s2 + $0x30] sm:$0xff] %vm551_vm0, %v829_v12  ;;  %v852_v35 = vpop.f32.mrf.mxu1  ;;  %v821_v46 = vadd.f32 %v820_v19, %v724_v51  ;;  %v928_v50 = vmul.f32 %v829_v12, %v829_v12  ;;  %v894_v60 = vsel %vm551_vm0, %v829_v12, 0.0 }
 0x12f   :  { %v887_v44 = vadd.f32 %v886_v17, %v885_v18  ;;  %v940_v45 = vadd.f32 %v939_v22, %v938_v20  ;;  %v1227_v47 = vpop.f32.mrf.mxu0  ;;  %881 = vst.msk [vmem:[%s1788_s2 + $0x70] sm:$0xff] %vm551_vm0, %v1704_v33  ;;  %v853_v27 = vadd.f32 %v852_v35, %v756_v1  ;;  %v931_v9 = vmul.f32 %v1681_v6, %v1681_v6 }
 0x130   :  { %v1235_v28 = vpop.f32.mrf.mxu1  ;;  %871 = vst.msk [vmem:[%s1788_s2 + $0x20] sm:$0xff] %vm551_vm0, %v821_v46  ;;  %v926_v31 = vmul.f32 %v821_v46, %v821_v46  ;;  %v890_v40 = vsel %vm551_vm0, %v821_v46, 0.0  ;;  %v832_v48 = vadd.f32 %v1227_v47, %v735_v43  ;;  %v949_v3 = vsel %vm551_vm0, %v928_v50, 0.0 }
 0x131   :  { %v942_v30 = vadd.f32 %v941_v25, %v940_v45  ;;  %v889_v29 = vadd.f32 %v888_v26, %v887_v44  ;;  %v823_v38 = vpop.f32.mrf.mxu0  ;;  %879 = vst.msk [vmem:[%s1788_s2 + $0x60] sm:$0xff] %vm551_vm0, %v853_v27  ;;  %v864_v52 = vadd.f32 %v1235_v28, %v767_v36  ;;  %v932_v14 = vmul.f32 %v1636_v24, %v1636_v24 }
 0x132   :  { %v855_v34 = vpop.f32.mrf.mxu1  ;;  %v945_v54 = vsel %vm551_vm0, %v926_v31, 0.0  ;;  %874 = vst.msk [vmem:[%s1788_s2 + $0x38] sm:$0xff] %vm551_vm0, %v832_v48  ;;  %v824_v55 = vadd.f32 %v823_v38, %v727_v49  ;;  %v929_v61 = vmul.f32 %v832_v48, %v832_v48  ;;  %v896_v4 = vsel %vm551_vm0, %v832_v48, 0.0 }
 0x133   :  { %v891_v41 = vadd.f32 %v890_v40, %v889_v29  ;;  %v944_v51 = vadd.f32 %v943_v39, %v942_v30  ;;  %882 = vst.msk [vmem:[%s1788_s2 + $0x78] sm:$0xff] %vm551_vm0, %v864_v52  ;;  %v856_v42 = vadd.f32 %v855_v34, %v759_v53  ;;  %v953_v15 = vsel %vm551_vm0, %v930_v2, 0.0 }
 0x134   :  { %872 = vst.msk [vmem:[%s1788_s2 + $0x28] sm:$0xff] %vm551_vm0, %v824_v55  ;;  %v892_v57 = vsel %vm551_vm0, %v824_v55, 0.0  ;;  %v927_v58 = vmul.f32 %v824_v55, %v824_v55  ;;  %v951_v10 = vsel %vm551_vm0, %v929_v61, 0.0  ;;  %v900_v16 = vsel %vm551_vm0, %v1681_v6, 0.0 }
 0x135   :  { %v946_v56 = vadd.f32 %v945_v54, %v944_v51  ;;  %v893_v59 = vadd.f32 %v892_v57, %v891_v41  ;;  %880 = vst.msk [vmem:[%s1788_s2 + $0x68] sm:$0xff] %vm551_vm0, %v856_v42  ;;  %v902_v37 = vsel %vm551_vm0, %v1636_v24, 0.0  ;;  %v933_v19 = vmul.f32 %v1666_v32, %v1666_v32 }
 0x136   :  { %v947_v62 = vsel %vm551_vm0, %v927_v58, 0.0  ;;  %v955_v20 = vsel %vm551_vm0, %v931_v9, 0.0  ;;  %v957_v35 = vsel %vm551_vm0, %v932_v14, 0.0  ;;  %v934_v13 = vmul.f32 %v853_v27, %v853_v27 }
 0x137   :  { %v895_v63 = vadd.f32 %v894_v60, %v893_v59  ;;  %v948_v1 = vadd.f32 %v947_v62, %v946_v56  ;;  %v959_v44 = vsel %vm551_vm0, %v933_v19, 0.0  ;;  %v906_v45 = vsel %vm551_vm0, %v853_v27, 0.0 }
 0x138   :  { %v935_v24 = vmul.f32 %v856_v42, %v856_v42  ;;  %v936_v25 = vmul.f32 %v1704_v33, %v1704_v33  ;;  %v961_v26 = vsel %vm551_vm0, %v934_v13, 0.0  ;;  %v908_v43 = vsel %vm551_vm0, %v856_v42, 0.0 }
 0x139   :  { %v897_v5 = vadd.f32 %v896_v4, %v895_v63  ;;  %v950_v7 = vadd.f32 %v949_v3, %v948_v1  ;;  %v910_v32 = vsel %vm551_vm0, %v1704_v33, 0.0  ;;  %v937_v29 = vmul.f32 %v864_v52, %v864_v52 }
 0x13a   :  { %v963_v31 = vsel %vm551_vm0, %v935_v24, 0.0  ;;  %v965_v38 = vsel %vm551_vm0, %v936_v25, 0.0  ;;  %v912_v39 = vsel %vm551_vm0, %v864_v52, 0.0 }
 0x13b   :  { %v899_v11 = vadd.f32 %v898_v8, %v897_v5  ;;  %v952_v12 = vadd.f32 %v951_v10, %v950_v7  ;;  %v967_v49 = vsel %vm551_vm0, %v937_v29, 0.0 }
 0x13d   :  { %v954_v17 = vadd.f32 %v953_v15, %v952_v12  ;;  %v901_v18 = vadd.f32 %v900_v16, %v899_v11 }
 0x13f   :  { %v903_v21 = vadd.f32 %v902_v37, %v901_v18  ;;  %v956_v22 = vadd.f32 %v955_v20, %v954_v17 }
 0x141   :  { %v905_v23 = vadd.f32 %v904_v0, %v903_v21  ;;  %v958_v6 = vadd.f32 %v957_v35, %v956_v22 }
 0x143   :  { %v907_v46 = vadd.f32 %v906_v45, %v905_v23  ;;  %v960_v47 = vadd.f32 %v959_v44, %v958_v6 }
 0x145   :  { %v909_v28 = vadd.f32 %v908_v43, %v907_v46  ;;  %v962_v30 = vadd.f32 %v961_v26, %v960_v47 }
 0x147   :  { %v911_v36 = vadd.f32 %v910_v32, %v909_v28  ;;  %v964_v27 = vadd.f32 %v963_v31, %v962_v30 }
 0x149   :  { %v913_v40 = vadd.f32 %v912_v39, %v911_v36  ;;  %v966_v48 = vadd.f32 %v965_v38, %v964_v27 }
 0x14b   :  { %v914_v34 = vrot.slane %v913_v40, 4  ;;  %v968_v41 = vadd.f32 %v967_v49, %v966_v48 }
 0x14d   :  { %v915_v51 = vadd.f32 %v914_v34, %v913_v40  ;;  %v969_v53 = vrot.slane %v968_v41, 4 }
 0x14f   :  { %v916_v54 = vrot.slane %v915_v51, 2  ;;  %v970_v55 = vadd.f32 %v969_v53, %v968_v41 }
 0x151   :  { %v917_v33 = vadd.f32 %v916_v54, %v915_v51  ;;  %v971_v56 = vrot.slane %v970_v55, 2 }
 0x153   :  { %v918_v42 = vrot.slane %v917_v33, 1  ;;  %v972_v50 = vadd.f32 %v971_v56, %v970_v55 }
 0x155   :  { %v919_v57 = vadd.f32 %v918_v42, %v917_v33  ;;  %v973_v58 = vrot.slane %v972_v50, 1 }
 0x157   :  { %921 = vst.msk [vmem:[%s1789_s3] sm:$0x1] %vm920_vm1, %v919_v57  ;;  %v974_v52 = vadd.f32 %v973_v58, %v972_v50 }
 0x159   :  { %975 = vst.msk [vmem:[%s1790_s4] sm:$0x1] %vm920_vm1, %v974_v52 }

// kernel: net_forward.38
= control target key start
LH: loop header
LB: loop body
LE: loop exit
PB: predicated region body
PF: predicated region fallthrough
CT: control target
= control target key end

     0   :  { %vm207_vm0 = vcmask 519168   ;;  %s504_s0 = inlined_call_operand.vmem [shape: f32[128,64], index: 0, kind: input, shape index: {}]   ;;  %s505_s1 = inlined_call_operand.vmem [shape: bf16[128,64], index: 1, kind: input, shape index: {}]   ;;  %s506_s2 = inlined_call_operand.vmem [shape: f32[1,64], index: 2, kind: input, shape index: {}]   ;;  %s507_s3 = inlined_call_operand.vmem [shape: f32[1,64], index: 3, kind: input, shape index: {}]   ;;  %s508_s4 = inlined_call_operand.vmem [shape: bf16[128,64], index: 4, kind: output, shape index: {}]  }
   0x1   :  { %v17_v0 = vld [vmem:[%s504_s0] sm:$0xff]  ;;  %v18_v5 = vld [vmem:[%s504_s0 + $0x8] sm:$0xff]  ;;  %v19_v6 = vld [vmem:[%s504_s0 + $0x10] sm:$0xff] }
   0x2   :  { %v332_v1 = vld [vmem:[%s506_s2] ss:$0 sm:$0xff]  ;;  %v294_v11 = vld [vmem:[%s505_s1 + $0x8] sm:$0xff]   ;;  %v20_v12 = vld [vmem:[%s504_s0 + $0x18] sm:$0xff] }
   0x3   :  { %v337_v2 = vld [vmem:[%s507_s3] ss:$0 sm:$0xff]  ;;  %v40_v3 = vmul.f32 %v332_v1, %v17_v0  ;;  %v41_v8 = vmul.f32 %v332_v1, %v18_v5  ;;  %v42_v10 = vmul.f32 %v332_v1, %v19_v6  ;;  %v268_v15 = vunpack.c.l.bf16 %v294_v11  ;;  %v295_v18 = vld [vmem:[%s505_s1 + $0x10] sm:$0xff]   ;;  %v22_v19 = vld [vmem:[%s504_s0 + $0x28] sm:$0xff] }
   0x4   :  { %v263_v4 = vld [vmem:[%s505_s1] sm:$0xff]   ;;  %v43_v16 = vmul.f32 %v332_v1, %v20_v12  ;;  %v269_v17 = vunpack.c.h.bf16 %v294_v11  ;;  %v23_v20 = vld [vmem:[%s504_s0 + $0x30] sm:$0xff]  ;;  %v272_v24 = vunpack.c.l.bf16 %v295_v18  ;;  %v296_v25 = vld [vmem:[%s505_s1 + $0x18] sm:$0xff]   ;;  %v45_v28 = vmul.f32 %v332_v1, %v22_v19 }
   0x5   :  { %v264_v7 = vunpack.c.l.bf16 %v263_v4  ;;  %v265_v9 = vunpack.c.h.bf16 %v263_v4  ;;  %v21_v13 = vld [vmem:[%s504_s0 + $0x20] sm:$0xff]  ;;  %v63_v14 = vadd.f32 %v337_v2, %v40_v3  ;;  %v64_v21 = vadd.f32 %v337_v2, %v41_v8  ;;  %v24_v34 = vld [vmem:[%s504_s0 + $0x38] sm:$0xff]  ;;  %v26_v53 = vld [vmem:[%s504_s0 + $0x48] sm:$0xff] }
   0x6   :  { %v65_v22 = vadd.f32 %v337_v2, %v42_v10  ;;  %v44_v23 = vmul.f32 %v332_v1, %v21_v13  ;;  %v66_v27 = vadd.f32 %v337_v2, %v43_v16  ;;  %v273_v29 = vunpack.c.h.bf16 %v295_v18  ;;  %v25_v47 = vld [vmem:[%s504_s0 + $0x40] sm:$0xff]  ;;  %v27_v58 = vld [vmem:[%s504_s0 + $0x50] sm:$0xff]  ;;  %v298_v59 = vld [vmem:[%s505_s1 + $0x28] sm:$0xff]  }
   0x7   :  { %v111_v26 = vadd.f32 %v264_v7, %v63_v14  ;;  %v112_v30 = vadd.f32 %v265_v9, %v64_v21  ;;  %v46_v33 = vmul.f32 %v332_v1, %v23_v20  ;;  %v68_v37 = vadd.f32 %v337_v2, %v45_v28  ;;  %v297_v48 = vld [vmem:[%s505_s1 + $0x20] sm:$0xff]   ;;  %v28_v0 = vld [vmem:[%s504_s0 + $0x58] sm:$0xff]  ;;  %v299_v8 = vld [vmem:[%s505_s1 + $0x30] sm:$0xff]  }
   0x8   :  { %v113_v31 = vadd.f32 %v268_v15, %v65_v22  ;;  %v67_v32 = vadd.f32 %v337_v2, %v44_v23  ;;  %v114_v36 = vadd.f32 %v269_v17, %v66_v27  ;;  %v276_v38 = vunpack.c.l.bf16 %v296_v25  ;;  %v29_v7 = vld [vmem:[%s504_s0 + $0x60] sm:$0xff]  ;;  %v30_v13 = vld [vmem:[%s504_s0 + $0x68] sm:$0xff]  ;;  %v31_v22 = vld [vmem:[%s504_s0 + $0x70] sm:$0xff] }
   0x9   :  { %v127_v35 = vmax.f32 %v111_v26, 0.0  ;;  %v128_v39 = vmax.f32 %v112_v30, 0.0  ;;  %v69_v42 = vadd.f32 %v337_v2, %v46_v33  ;;  %v116_v45 = vadd.f32 %v273_v29, %v68_v37  ;;  %v300_v27 = vld [vmem:[%s505_s1 + $0x38] sm:$0xff]  }
   0xa   :  { %v129_v40 = vmax.f32 %v113_v31, 0.0  ;;  %v115_v41 = vadd.f32 %v272_v24, %v67_v32  ;;  %v130_v44 = vmax.f32 %v114_v36, 0.0  ;;  %v47_v46 = vmul.f32 %v332_v1, %v24_v34  ;;  %v32_v36 = vld [vmem:[%s504_s0 + $0x78] sm:$0xff] }
   0xb   :  { %v246_v43 = vpack.c.bf16 %v127_v35, %v127_v35  ;;  %v247_v49 = vpack.c.bf16 %v128_v39, %v128_v39  ;;  %v117_v52 = vadd.f32 %v276_v38, %v69_v42  ;;  %v132_v55 = vmax.f32 %v116_v45, 0.0 }
   0xc   :  { %v248_v50 = vpack.c.bf16 %v129_v40, %v129_v40  ;;  %v131_v51 = vmax.f32 %v115_v41, 0.0  ;;  %v249_v54 = vpack.c.bf16 %v130_v44, %v130_v44  ;;  %v70_v56 = vadd.f32 %v337_v2, %v47_v46 }
   0xd   :  { %208 = vst.msk [vmem:[%s508_s4] sm:$0xf] %vm207_vm0, %v246_v43  ;;  %v277_v57 = vunpack.c.h.bf16 %v296_v25  ;;  %209 = vst.msk [vmem:[%s508_s4 + $0x4] sm:$0xf] %vm207_vm0, %v247_v49  ;;  %v133_v61 = vmax.f32 %v117_v52, 0.0  ;;  %v48_v62 = vmul.f32 %v332_v1, %v25_v47  ;;  %v280_v63 = vunpack.c.l.bf16 %v297_v48 }
   0xe   :  { %210 = vst.msk [vmem:[%s508_s4 + $0x8] sm:$0xf] %vm207_vm0, %v248_v50  ;;  %v250_v60 = vpack.c.bf16 %v131_v51, %v131_v51  ;;  %211 = vst.msk [vmem:[%s508_s4 + $0xc] sm:$0xf] %vm207_vm0, %v249_v54  ;;  %v251_v3 = vpack.c.bf16 %v132_v55, %v132_v55  ;;  %v49_v5 = vmul.f32 %v332_v1, %v26_v53  ;;  %v281_v6 = vunpack.c.h.bf16 %v297_v48 }
   0xf   :  { %v118_v4 = vadd.f32 %v277_v57, %v70_v56  ;;  %v252_v9 = vpack.c.bf16 %v133_v61, %v133_v61  ;;  %v71_v10 = vadd.f32 %v337_v2, %v48_v62  ;;  %v50_v11 = vmul.f32 %v332_v1, %v27_v58 }
  0x10   :  { %212 = vst.msk [vmem:[%s508_s4 + $0x10] sm:$0xf] %vm207_vm0, %v250_v60  ;;  %v284_v12 = vunpack.c.l.bf16 %v298_v59  ;;  %213 = vst.msk [vmem:[%s508_s4 + $0x14] sm:$0xf] %vm207_vm0, %v251_v3  ;;  %v72_v15 = vadd.f32 %v337_v2, %v49_v5  ;;  %v51_v16 = vmul.f32 %v332_v1, %v28_v0  ;;  %v285_v17 = vunpack.c.h.bf16 %v298_v59 }
  0x11   :  { %v134_v14 = vmax.f32 %v118_v4, 0.0  ;;  %214 = vst.msk [vmem:[%s508_s4 + $0x18] sm:$0xf] %vm207_vm0, %v252_v9  ;;  %v119_v18 = vadd.f32 %v280_v63, %v71_v10  ;;  %v73_v19 = vadd.f32 %v337_v2, %v50_v11  ;;  %v52_v20 = vmul.f32 %v332_v1, %v29_v7 }
  0x12   :  { %v288_v21 = vunpack.c.l.bf16 %v299_v8  ;;  %v120_v24 = vadd.f32 %v281_v6, %v72_v15  ;;  %v74_v25 = vadd.f32 %v337_v2, %v51_v16  ;;  %v53_v26 = vmul.f32 %v332_v1, %v30_v13 }
  0x13   :  { %v253_v23 = vpack.c.bf16 %v134_v14, %v134_v14  ;;  %v135_v28 = vmax.f32 %v119_v18, 0.0  ;;  %v121_v29 = vadd.f32 %v284_v12, %v73_v19  ;;  %v75_v30 = vadd.f32 %v337_v2, %v52_v20 }
  0x14   :  { %v289_v31 = vunpack.c.h.bf16 %v299_v8  ;;  %v136_v32 = vmax.f32 %v120_v24, 0.0  ;;  %v122_v33 = vadd.f32 %v285_v17, %v74_v25  ;;  %v76_v34 = vadd.f32 %v337_v2, %v53_v26 }
  0x15   :  { %215 = vst.msk [vmem:[%s508_s4 + $0x1c] sm:$0xf] %vm207_vm0, %v253_v23  ;;  %v54_v35 = vmul.f32 %v332_v1, %v31_v22  ;;  %v254_v37 = vpack.c.bf16 %v135_v28, %v135_v28  ;;  %v137_v38 = vmax.f32 %v121_v29, 0.0  ;;  %v123_v39 = vadd.f32 %v288_v21, %v75_v30 }
  0x16   :  { %v292_v40 = vunpack.c.l.bf16 %v300_v27  ;;  %v255_v41 = vpack.c.bf16 %v136_v32, %v136_v32  ;;  %v138_v42 = vmax.f32 %v122_v33, 0.0  ;;  %v124_v43 = vadd.f32 %v289_v31, %v76_v34 }
  0x17   :  { %v77_v44 = vadd.f32 %v337_v2, %v54_v35  ;;  %216 = vst.msk [vmem:[%s508_s4 + $0x20] sm:$0xf] %vm207_vm0, %v254_v37  ;;  %v256_v45 = vpack.c.bf16 %v137_v38, %v137_v38  ;;  %v139_v46 = vmax.f32 %v123_v39, 0.0  ;;  %v55_v47 = vmul.f32 %v332_v1, %v32_v36 }
  0x18   :  { %v293_v48 = vunpack.c.h.bf16 %v300_v27  ;;  %217 = vst.msk [vmem:[%s508_s4 + $0x24] sm:$0xf] %vm207_vm0, %v255_v41  ;;  %v257_v49 = vpack.c.bf16 %v138_v42, %v138_v42  ;;  %v140_v50 = vmax.f32 %v124_v43, 0.0 }
  0x19   :  { %v125_v51 = vadd.f32 %v292_v40, %v77_v44  ;;  %218 = vst.msk [vmem:[%s508_s4 + $0x28] sm:$0xf] %vm207_vm0, %v256_v45  ;;  %v258_v52 = vpack.c.bf16 %v139_v46, %v139_v46  ;;  %v78_v53 = vadd.f32 %v337_v2, %v55_v47 }
  0x1a   :  { %219 = vst.msk [vmem:[%s508_s4 + $0x2c] sm:$0xf] %vm207_vm0, %v257_v49  ;;  %v259_v1 = vpack.c.bf16 %v140_v50, %v140_v50 }
  0x1b   :  { %v141_v54 = vmax.f32 %v125_v51, 0.0  ;;  %220 = vst.msk [vmem:[%s508_s4 + $0x30] sm:$0xf] %vm207_vm0, %v258_v52  ;;  %v126_v55 = vadd.f32 %v293_v48, %v78_v53 }
  0x1c   :  { %221 = vst.msk [vmem:[%s508_s4 + $0x34] sm:$0xf] %vm207_vm0, %v259_v1 }
  0x1d   :  { %v260_v56 = vpack.c.bf16 %v141_v54, %v141_v54  ;;  %v142_v2 = vmax.f32 %v126_v55, 0.0 }
  0x1f   :  { %222 = vst.msk [vmem:[%s508_s4 + $0x38] sm:$0xf] %vm207_vm0, %v260_v56  ;;  %v261_v57 = vpack.c.bf16 %v142_v2, %v142_v2 }
  0x21   :  { %223 = vst.msk [vmem:[%s508_s4 + $0x3c] sm:$0xf] %vm207_vm0, %v261_v57 }

// kernel: net_forward.46
= control target key start
LH: loop header
LB: loop body
LE: loop exit
PB: predicated region body
PF: predicated region fallthrough
CT: control target
= control target key end

     0   :  { %v24_v0 = vlaneseq  ;;  %s172_s1 = inlined_call_operand.vmem [shape: f32[1,256], index: 1, kind: input, shape index: {}]   ;;  %s173_s2 = inlined_call_operand.vmem [shape: f32[1,256], index: 2, kind: input, shape index: {}]   ;;  %s174_s0 = inlined_call_operand.vmem [shape: f32[32,256], index: 0, kind: input, shape index: {}]   ;;  %s175_s3 = inlined_call_operand.vmem [shape: bf16[32,256], index: 3, kind: output, shape index: {}]  }
   0x1   :  { %v22_v2 = vld [vmem:[%s172_s1] sm:$0x3]  ;;  %v15_v5 = vld [vmem:[%s174_s0 + $0x8] sm:$0xff]  ;;  %v16_v8 = vld [vmem:[%s174_s0 + $0x10] sm:$0xff] }
   0x2   :  { %v25_v1 = vshrl.u32 %v24_v0, 7  ;;  %v42_v3 = vld [vmem:[%s173_s2] sm:$0x3]  ;;  %v17_v9 = vld [vmem:[%s174_s0 + $0x18] sm:$0xff]  ;;  %v19_v15 = vld [vmem:[%s174_s0 + $0x28] sm:$0xff] }
   0x3   :  { %v14_v4 = vld [vmem:[%s174_s0] sm:$0xff]  ;;  %v20_v16 = vld [vmem:[%s174_s0 + $0x30] sm:$0xff]  ;;  %v21_v17 = vld [vmem:[%s174_s0 + $0x38] sm:$0xff] }
   0x4   :  { %v26_v6 = vsub.s32 0, %v25_v1  ;;  %v30_v7 = vsub.s32 1, %v25_v1  ;;  %v18_v10 = vld [vmem:[%s174_s0 + $0x20] sm:$0xff] }
   0x6   :  { %v27_v11 = vrot.slane %v22_v2, %v26_v6  ;;  %v31_v12 = vrot.slane %v22_v2, %v30_v7  ;;  %v47_v13 = vrot.slane %v42_v3, %v26_v6  ;;  %v51_v14 = vrot.slane %v42_v3, %v30_v7 }
   0x8   :  { %v34_v18 = vmul.f32 %v27_v11, %v14_v4  ;;  %v35_v19 = vmul.f32 %v31_v12, %v15_v5  ;;  %v36_v20 = vmul.f32 %v27_v11, %v16_v8  ;;  %v37_v21 = vmul.f32 %v31_v12, %v17_v9 }
   0x9   :  { %v38_v22 = vmul.f32 %v27_v11, %v18_v10  ;;  %v39_v23 = vmul.f32 %v31_v12, %v19_v15  ;;  %v40_v24 = vmul.f32 %v27_v11, %v20_v16  ;;  %v41_v25 = vmul.f32 %v31_v12, %v21_v17 }
   0xa   :  { %v54_v26 = vadd.f32 %v47_v13, %v34_v18  ;;  %v55_v27 = vadd.f32 %v51_v14, %v35_v19  ;;  %v56_v28 = vadd.f32 %v47_v13, %v36_v20  ;;  %v57_v29 = vadd.f32 %v51_v14, %v37_v21 }
   0xb   :  { %v58_v30 = vadd.f32 %v47_v13, %v38_v22  ;;  %v59_v31 = vadd.f32 %v51_v14, %v39_v23  ;;  %v60_v32 = vadd.f32 %v47_v13, %v40_v24  ;;  %v61_v33 = vadd.f32 %v51_v14, %v41_v25 }
   0xc   :  { %v62_v34 = vmax.f32 %v54_v26, 0.0  ;;  %v63_v35 = vmax.f32 %v55_v27, 0.0  ;;  %v64_v36 = vmax.f32 %v56_v28, 0.0  ;;  %v65_v37 = vmax.f32 %v57_v29, 0.0 }
   0xd   :  { %v66_v38 = vmax.f32 %v58_v30, 0.0  ;;  %v67_v39 = vmax.f32 %v59_v31, 0.0  ;;  %v68_v40 = vmax.f32 %v60_v32, 0.0  ;;  %v69_v41 = vmax.f32 %v61_v33, 0.0 }
   0xe   :  { %v106_v42 = vpack.c.bf16 %v63_v35, %v62_v34  ;;  %v107_v43 = vpack.c.bf16 %v65_v37, %v64_v36 }
   0xf   :  { %v108_v44 = vpack.c.bf16 %v67_v39, %v66_v38  ;;  %v109_v45 = vpack.c.bf16 %v69_v41, %v68_v40 }
  0x10   :  { %94 = vst [vmem:[%s175_s3] sm:$0xff] %v106_v42  ;;  %95 = vst [vmem:[%s175_s3 + $0x8] sm:$0xff] %v107_v43 }
  0x11   :  { %96 = vst [vmem:[%s175_s3 + $0x10] sm:$0xff] %v108_v44  ;;  %97 = vst [vmem:[%s175_s3 + $0x18] sm:$0xff] %v109_v45 }

// kernel: net_forward.45
= control target key start
LH: loop header
LB: loop body
LE: loop exit
PB: predicated region body
PF: predicated region fallthrough
CT: control target
= control target key end

     0   :  { %vm509_vm0 = vcmask 523264   ;;  %s1300_s1 = inlined_call_operand.vmem [shape: bf16[576,256], index: 1, kind: input, shape index: {}]   ;;  %s1301_s0 = inlined_call_operand.vmem [shape: bf16[32,576], index: 0, kind: input, shape index: {}]   ;;  %s1302_s2 = inlined_call_operand.vmem [shape: f32[32,256], index: 2, kind: output, shape index: {0}]   ;;  %s1303_s3 = inlined_call_operand.vmem [shape: f32[1,1,256], index: 3, kind: output, shape index: {1}]   ;;  %s1304_s4 = inlined_call_operand.vmem [shape: f32[1,1,256], index: 4, kind: output, shape index: {2}]  }
   0x1   :  { %v875_v0 = vld [vmem:[%s1300_s1 + $0x74] ss:$8 sps:$4 sm:$0xff]   ;;  %v879_v2 = vld [vmem:[%s1300_s1 + $0x70] ss:$8 sps:$4 sm:$0xff]   ;;  %v881_v4 = vld [vmem:[%s1300_s1 + $0x64] ss:$8 sps:$4 sm:$0xff]  }
   0x2   :  { %v877_v1 = vld [vmem:[%s1300_s1 + $0x174] ss:$8 sps:$4 sm:$0xff]   ;;  %516 = vmatprep.subr.bf16.mxu0 %v875_v0  ;;  %v880_v3 = vld [vmem:[%s1300_s1 + $0x170] ss:$8 sps:$4 sm:$0xff]   ;;  %v883_v5 = vld [vmem:[%s1300_s1 + $0x164] ss:$8 sps:$4 sm:$0xff]  }
   0x3   :  { %569 = vmatprep.subr.bf16.mxu1 %v877_v1  ;;  %517 = vmatpush1.bf16.msra.mxu0 %v879_v2  ;;  %v885_v6 = vld [vmem:[%s1300_s1 + $0x60] ss:$8 sps:$4 sm:$0xff]   ;;  %v887_v8 = vld [vmem:[%s1300_s1 + $0x54] ss:$8 sps:$4 sm:$0xff]   ;;  %v891_v10 = vld [vmem:[%s1300_s1 + $0x50] ss:$8 sps:$4 sm:$0xff]  }
   0x4   :  { %570 = vmatpush1.bf16.msra.mxu1 %v880_v3  ;;  %518 = vmatprep.subr.bf16.mxu0 %v881_v4  ;;  %v886_v7 = vld [vmem:[%s1300_s1 + $0x160] ss:$8 sps:$4 sm:$0xff]   ;;  %v889_v9 = vld [vmem:[%s1300_s1 + $0x154] ss:$8 sps:$4 sm:$0xff]   ;;  %v892_v11 = vld [vmem:[%s1300_s1 + $0x150] ss:$8 sps:$4 sm:$0xff]  }
   0x5   :  { %571 = vmatprep.subr.bf16.mxu1 %v883_v5  ;;  %v893_v12 = vld [vmem:[%s1300_s1 + $0x44] ss:$8 sps:$4 sm:$0xff]   ;;  %v897_v14 = vld [vmem:[%s1300_s1 + $0x40] ss:$8 sps:$4 sm:$0xff]   ;;  %v899_v16 = vld [vmem:[%s1300_s1 + $0x34] ss:$8 sps:$4 sm:$0xff]  }
   0x6   :  { %v895_v13 = vld [vmem:[%s1300_s1 + $0x144] ss:$8 sps:$4 sm:$0xff]   ;;  %v898_v15 = vld [vmem:[%s1300_s1 + $0x140] ss:$8 sps:$4 sm:$0xff]   ;;  %v901_v17 = vld [vmem:[%s1300_s1 + $0x134] ss:$8 sps:$4 sm:$0xff]  }
   0x7   :  { %519 = vmatpush1.bf16.msra.mxu0 %v885_v6  ;;  %v903_v18 = vld [vmem:[%s1300_s1 + $0x30] ss:$8 sps:$4 sm:$0xff]   ;;  %v905_v20 = vld [vmem:[%s1300_s1 + $0x24] ss:$8 sps:$4 sm:$0xff]   ;;  %v909_v22 = vld [vmem:[%s1300_s1 + $0x20] ss:$8 sps:$4 sm:$0xff]  }
   0x8   :  { %572 = vmatpush1.bf16.msra.mxu1 %v886_v7  ;;  %520 = vmatprep.subr.bf16.mxu0 %v887_v8  ;;  %v904_v19 = vld [vmem:[%s1300_s1 + $0x130] ss:$8 sps:$4 sm:$0xff]   ;;  %v907_v21 = vld [vmem:[%s1300_s1 + $0x124] ss:$8 sps:$4 sm:$0xff]   ;;  %v910_v23 = vld [vmem:[%s1300_s1 + $0x120] ss:$8 sps:$4 sm:$0xff]  }
   0x9   :  { %573 = vmatprep.subr.bf16.mxu1 %v889_v9  ;;  %v911_v24 = vld [vmem:[%s1300_s1 + $0x14] ss:$8 sps:$4 sm:$0xff]   ;;  %v915_v26 = vld [vmem:[%s1300_s1 + $0x10] ss:$8 sps:$4 sm:$0xff]   ;;  %v917_v28 = vld [vmem:[%s1300_s1 + $0x4] ss:$8 sps:$4 sm:$0xff]  }
   0xa   :  { %v913_v25 = vld [vmem:[%s1300_s1 + $0x114] ss:$8 sps:$4 sm:$0xff]   ;;  %v916_v27 = vld [vmem:[%s1300_s1 + $0x110] ss:$8 sps:$4 sm:$0xff]   ;;  %v919_v29 = vld [vmem:[%s1300_s1 + $0x104] ss:$8 sps:$4 sm:$0xff]  }
   0xb   :  { %521 = vmatpush1.bf16.msra.mxu0 %v891_v10  ;;  %v921_v30 = vld [vmem:[%s1300_s1] ss:$8 sps:$4 sm:$0xff]   ;;  %v923_v32 = vld [vmem:[%s1300_s1 + $0xf4] ss:$8 sps:$4 sm:$0xff]   ;;  %v927_v34 = vld [vmem:[%s1300_s1 + $0xf0] ss:$8 sps:$4 sm:$0xff]  }
   0xc   :  { %574 = vmatpush1.bf16.msra.mxu1 %v892_v11  ;;  %522 = vmatprep.subr.bf16.mxu0 %v893_v12  ;;  %v922_v31 = vld [vmem:[%s1300_s1 + $0x100] ss:$8 sps:$4 sm:$0xff]   ;;  %v925_v33 = vld [vmem:[%s1300_s1 + $0x1f4] ss:$8 sps:$4 sm:$0xff]   ;;  %v928_v35 = vld [vmem:[%s1300_s1 + $0x1f0] ss:$8 sps:$4 sm:$0xff]  }
   0xd   :  { %575 = vmatprep.subr.bf16.mxu1 %v895_v13  ;;  %v929_v36 = vld [vmem:[%s1300_s1 + $0xe4] ss:$8 sps:$4 sm:$0xff]   ;;  %v933_v38 = vld [vmem:[%s1300_s1 + $0xe0] ss:$8 sps:$4 sm:$0xff]   ;;  %v935_v40 = vld [vmem:[%s1300_s1 + $0xd4] ss:$8 sps:$4 sm:$0xff]  }
   0xe   :  { %v931_v37 = vld [vmem:[%s1300_s1 + $0x1e4] ss:$8 sps:$4 sm:$0xff]   ;;  %v934_v39 = vld [vmem:[%s1300_s1 + $0x1e0] ss:$8 sps:$4 sm:$0xff]   ;;  %v937_v41 = vld [vmem:[%s1300_s1 + $0x1d4] ss:$8 sps:$4 sm:$0xff]  }
   0xf   :  { %523 = vmatpush1.bf16.msra.mxu0 %v897_v14  ;;  %v939_v42 = vld [vmem:[%s1300_s1 + $0xd0] ss:$8 sps:$4 sm:$0xff]   ;;  %v941_v44 = vld [vmem:[%s1300_s1 + $0xc4] ss:$8 sps:$4 sm:$0xff]   ;;  %v945_v46 = vld [vmem:[%s1300_s1 + $0xc0] ss:$8 sps:$4 sm:$0xff]  }
  0x10   :  { %576 = vmatpush1.bf16.msra.mxu1 %v898_v15  ;;  %524 = vmatprep.subr.bf16.mxu0 %v899_v16  ;;  %v940_v43 = vld [vmem:[%s1300_s1 + $0x1d0] ss:$8 sps:$4 sm:$0xff]   ;;  %v943_v45 = vld [vmem:[%s1300_s1 + $0x1c4] ss:$8 sps:$4 sm:$0xff]   ;;  %v946_v47 = vld [vmem:[%s1300_s1 + $0x1c0] ss:$8 sps:$4 sm:$0xff]  }
  0x11   :  { %577 = vmatprep.subr.bf16.mxu1 %v901_v17  ;;  %v947_v48 = vld [vmem:[%s1300_s1 + $0xb4] ss:$8 sps:$4 sm:$0xff]   ;;  %v973_v49 = vld [vmem:[%s1301_s0 + $0x4] ss:$20 sps:$4 sm:$0xff]   ;;  %v976_v51 = vld [vmem:[%s1301_s0 + $0xc] ss:$20 sps:$4 sm:$0xff]  }
  0x12   :  { %v949_v50 = vld [vmem:[%s1300_s1 + $0x1b4] ss:$8 sps:$4 sm:$0xff]   ;;  %548 = vmatprep.mubr.bf16.mxu0 %v973_v49  ;;  %v951_v52 = vld [vmem:[%s1300_s1 + $0xb0] ss:$8 sps:$4 sm:$0xff]   ;;  %601 = vmatprep.mubr.bf16.mxu1 %v976_v51  ;;  %v953_v54 = vld [vmem:[%s1300_s1 + $0xa4] ss:$8 sps:$4 sm:$0xff]  }
  0x13   :  { %525 = vmatpush1.bf16.msra.mxu0 %v903_v18  ;;  %v952_v53 = vld [vmem:[%s1300_s1 + $0x1b0] ss:$8 sps:$4 sm:$0xff]   ;;  %v955_v55 = vld [vmem:[%s1300_s1 + $0x1a4] ss:$8 sps:$4 sm:$0xff]   ;;  %v957_v56 = vld [vmem:[%s1300_s1 + $0xa0] ss:$8 sps:$4 sm:$0xff]  }
  0x14   :  { %578 = vmatpush1.bf16.msra.mxu1 %v904_v19  ;;  %526 = vmatprep.subr.bf16.mxu0 %v905_v20  ;;  %v958_v57 = vld [vmem:[%s1300_s1 + $0x1a0] ss:$8 sps:$4 sm:$0xff]   ;;  %v959_v58 = vld [vmem:[%s1300_s1 + $0x94] ss:$8 sps:$4 sm:$0xff]   ;;  %v963_v60 = vld [vmem:[%s1300_s1 + $0x90] ss:$8 sps:$4 sm:$0xff]  }
  0x15   :  { %579 = vmatprep.subr.bf16.mxu1 %v907_v21  ;;  %v961_v59 = vld [vmem:[%s1300_s1 + $0x194] ss:$8 sps:$4 sm:$0xff]   ;;  %v964_v61 = vld [vmem:[%s1300_s1 + $0x190] ss:$8 sps:$4 sm:$0xff]   ;;  %v965_v62 = vld [vmem:[%s1300_s1 + $0x84] ss:$8 sps:$4 sm:$0xff]  }
  0x16   :  { %v967_v63 = vld [vmem:[%s1300_s1 + $0x184] ss:$8 sps:$4 sm:$0xff]   ;;  %v969_v0 = vld [vmem:[%s1300_s1 + $0x80] ss:$8 sps:$4 sm:$0xff]   ;;  %v979_v2 = vld [vmem:[%s1300_s1 + $0x234] ss:$8 sps:$4 sm:$0xff]  }
  0x17   :  { %527 = vmatpush1.bf16.msra.mxu0 %v909_v22  ;;  %v970_v1 = vld [vmem:[%s1300_s1 + $0x180] ss:$8 sps:$4 sm:$0xff]   ;;  %v977_v5 = vld [vmem:[%s1300_s1 + $0x230] ss:$8 sps:$4 sm:$0xff]   ;;  %v982_v6 = vld [vmem:[%s1300_s1 + $0x224] ss:$8 sps:$4 sm:$0xff]  }
  0x18   :  { %580 = vmatpush1.bf16.msra.mxu1 %v910_v23  ;;  %528 = vmatprep.subr.bf16.mxu0 %v911_v24  ;;  %v971_v3 = vld [vmem:[%s1301_s0] ss:$20 sps:$4 sm:$0xff]   ;;  %v974_v4 = vld [vmem:[%s1301_s0 + $0x8] ss:$20 sps:$4 sm:$0xff]   ;;  %v988_v12 = vld [vmem:[%s1301_s0 + $0x30] ss:$20 sps:$4 sm:$0xff]  }
  0x19   :  { %581 = vmatprep.subr.bf16.mxu1 %v913_v25  ;;  %v983_v7 = vld [vmem:[%s1301_s0 + $0x2c] ss:$20 sps:$4 sm:$0xff]   ;;  %v985_v8 = vld [vmem:[%s1301_s0 + $0x34] ss:$20 sps:$4 sm:$0xff]   ;;  %v989_v13 = vld [vmem:[%s1300_s1 + $0x210] ss:$8 sps:$4 sm:$0xff]  }
  0x1a   :  { %v980_v9 = vld [vmem:[%s1300_s1 + $0x220] ss:$8 sps:$4 sm:$0xff]   ;;  %v991_v10 = vld [vmem:[%s1300_s1 + $0x214] ss:$8 sps:$4 sm:$0xff]   ;;  %v994_v14 = vld [vmem:[%s1300_s1 + $0x204] ss:$8 sps:$4 sm:$0xff]  }
  0x1b   :  { %529 = vmatpush1.bf16.msra.mxu0 %v915_v26  ;;  %v987_v11 = vld [vmem:[%s1301_s0 + $0x28] ss:$20 sps:$4 sm:$0xff]   ;;  %v997_v16 = vmov 0   ;;  %v995_v17 = vld [vmem:[%s1301_s0 + $0x10] ss:$20 sps:$4 sm:$0xff]  }
  0x1c   :  { %582 = vmatpush1.bf16.msra.mxu1 %v916_v27  ;;  %530 = vmatprep.subr.bf16.mxu0 %v917_v28  ;;  %v992_v15 = vld [vmem:[%s1300_s1 + $0x200] ss:$8 sps:$4 sm:$0xff]   ;;  %v996_v18 = vld [vmem:[%s1301_s0 + $0x38] ss:$20 sps:$4 sm:$0xff]  }
  0x1d   :  { %583 = vmatprep.subr.bf16.mxu1 %v919_v29 }
  0x1f   :  { %531 = vmatpush1.bf16.msra.mxu0 %v921_v30 }
  0x20   :  { %584 = vmatpush1.bf16.msra.mxu1 %v922_v31  ;;  %532 = vmatprep.subr.bf16.mxu0 %v923_v32 }
  0x21   :  { %585 = vmatprep.subr.bf16.mxu1 %v925_v33 }
  0x23   :  { %533 = vmatpush2.bf16.msra.mxu0 %v927_v34 }
  0x24   :  { %586 = vmatpush2.bf16.msra.mxu1 %v928_v35  ;;  %534 = vmatprep.subr.bf16.mxu0 %v929_v36 }
  0x25   :  { %587 = vmatprep.subr.bf16.mxu1 %v931_v37 }
  0x27   :  { %535 = vmatpush2.bf16.msra.mxu0 %v933_v38 }
  0x28   :  { %588 = vmatpush2.bf16.msra.mxu1 %v934_v39  ;;  %536 = vmatprep.subr.bf16.mxu0 %v935_v40 }
  0x29   :  { %589 = vmatprep.subr.bf16.mxu1 %v937_v41 }
  0x2b   :  { %537 = vmatpush2.bf16.msra.mxu0 %v939_v42 }
  0x2c   :  { %590 = vmatpush2.bf16.msra.mxu1 %v940_v43  ;;  %538 = vmatprep.subr.bf16.mxu0 %v941_v44 }
  0x2d   :  { %591 = vmatprep.subr.bf16.mxu1 %v943_v45 }
  0x2f   :  { %539 = vmatpush2.bf16.msra.mxu0 %v945_v46 }
  0x30   :  { %592 = vmatpush2.bf16.msra.mxu1 %v946_v47  ;;  %540 = vmatprep.subr.bf16.mxu0 %v947_v48 }
  0x31   :  { %593 = vmatprep.subr.bf16.mxu1 %v949_v50 }
  0x33   :  { %541 = vmatpush2.bf16.msra.mxu0 %v951_v52 }
  0x34   :  { %594 = vmatpush2.bf16.msra.mxu1 %v952_v53  ;;  %542 = vmatprep.subr.bf16.mxu0 %v953_v54 }
  0x35   :  { %595 = vmatprep.subr.bf16.mxu1 %v955_v55 }
  0x37   :  { %543 = vmatpush2.bf16.msra.mxu0 %v957_v56 }
  0x38   :  { %596 = vmatpush2.bf16.msra.mxu1 %v958_v57  ;;  %544 = vmatprep.subr.bf16.mxu0 %v959_v58 }
  0x39   :  { %597 = vmatprep.subr.bf16.mxu1 %v961_v59 }
  0x3b   :  { %545 = vmatpush2.bf16.msra.mxu0 %v963_v60 }
  0x3c   :  { %598 = vmatpush2.bf16.msra.mxu1 %v964_v61  ;;  %546 = vmatprep.subr.bf16.mxu0 %v965_v62 }
  0x3d   :  { %599 = vmatprep.subr.bf16.mxu1 %v967_v63 }
  0x3f   :  { %547 = vmatpush2.bf16.msra.mxu0 %v969_v0 }
  0x40   :  { %600 = vmatpush2.bf16.msra.mxu1 %v970_v1  ;;  %630 = vmatprep.subr.bf16.mxu0 %v979_v2 }
  0x41   :  { %865 = vmatprep.subr.bf16.mxu1 %v979_v2 }
  0x42   :  { %549 = vmatmul.mubr.bf16.vlgmr.msra.gmra.mxu0 %v971_v3 }
  0x43   :  { %602 = vmatmul.mubr.bf16.vlgmr.msra.gmra.mxu1 %v974_v4  ;;  %631 = vmatpush1.bf16.msra.mxu0 %v977_v5 }
  0x44   :  { %869 = vmatpush1.bf16.msra.mxu1 %v977_v5  ;;  %632 = vmatprep.subr.bf16.mxu0 %v982_v6 }
  0x45   :  { %866 = vmatprep.subr.bf16.mxu1 %v982_v6  ;;  %558 = vmatprep.mubr.bf16.mxu0 %v983_v7 }
  0x46   :  { %611 = vmatprep.mubr.bf16.mxu1 %v985_v8 }
  0x47   :  { %633 = vmatpush1.bf16.msra.mxu0 %v980_v9 }
  0x48   :  { %870 = vmatpush1.bf16.msra.mxu1 %v980_v9  ;;  %634 = vmatprep.subr.bf16.mxu0 %v991_v10 }
  0x49   :  { %867 = vmatprep.subr.bf16.mxu1 %v991_v10 }
  0x4a   :  { %559 = vmatmul.mubr.bf16.gmra.mxu0 %v987_v11 }
  0x4b   :  { %612 = vmatmul.mubr.bf16.gmra.mxu1 %v988_v12  ;;  %635 = vmatpush1.bf16.msra.mxu0 %v989_v13 }
  0x4c   :  { %871 = vmatpush1.bf16.msra.mxu1 %v989_v13  ;;  %636 = vmatprep.subr.bf16.mxu0 %v994_v14 }
  0x4d   :  { %868 = vmatprep.subr.bf16.mxu1 %v994_v14  ;;  %654 = vmatprep.mubr.bf16.mxu0 %v997_v16 }
  0x4e   :  { %664 = vmatprep.mubr.bf16.mxu1 %v997_v16 }
  0x4f   :  { %637 = vmatpush1.bf16.msra.mxu0 %v992_v15 }
  0x50   :  { %872 = vmatpush1.bf16.msra.mxu1 %v992_v15 }
  0x52   :  { %863 = vmatmul.mubr.msk.bf16.vlgmr.msra.gmra.mxu0 %vm509_vm0, %v995_v17 }
  0x53   :  { %864 = vmatmul.mubr.msk.bf16.vlgmr.msra.gmra.mxu1 %vm509_vm0, %v996_v18 }
 0x102   :  { %v550_v19 = vpop.f32.mrf.mxu0 }
 0x103   :  { %v603_v20 = vpop.f32.mrf.mxu1 }
 0x104   :  { %v552_v21 = vpop.f32.mrf.mxu0  ;;  %v604_v35 = vadd.f32 %v603_v20, %v550_v19  ;;  %v998_v19 = vmov 1966171168  }
 0x105   :  { %v605_v22 = vpop.f32.mrf.mxu1  ;;  %v705_v20 = vunpack.c.l.s4 %v998_v19 }
 0x106   :  { %v554_v23 = vpop.f32.mrf.mxu0  ;;  %v606_v39 = vadd.f32 %v605_v22, %v552_v21  ;;  %v707_v21 = vlaneseq }
 0x107   :  { %v607_v24 = vpop.f32.mrf.mxu1 }
 0x108   :  { %v556_v25 = vpop.f32.mrf.mxu0  ;;  %v608_v45 = vadd.f32 %v607_v24, %v554_v23  ;;  %vm721_vm1 = vcmp.lt.s32.totalorder %v707_v21, 256 }
 0x109   :  { %v609_v26 = vpop.f32.mrf.mxu1 }
 0x10a   :  { %v560_v27 = vpop.f32.mrf.mxu0  ;;  %v610_v51 = vadd.f32 %v609_v26, %v556_v25 }
 0x10b   :  { %v613_v28 = vpop.f32.mrf.mxu1 }
 0x10c   :  { %v562_v29 = vpop.f32.mrf.mxu0  ;;  %v614_v36 = vadd.f32 %v613_v28, %v560_v27 }
 0x10d   :  { %v615_v30 = vpop.f32.mrf.mxu1 }
 0x10e   :  { %v564_v31 = vpop.f32.mrf.mxu0  ;;  %v616_v40 = vadd.f32 %v615_v30, %v562_v29  ;;  %v706_v30 = vunpack.c.0.s8 %v705_v20 }
 0x10f   :  { %v617_v32 = vpop.f32.mrf.mxu1 }
 0x110   :  { %v566_v33 = vpop.f32.mrf.mxu0  ;;  %v618_v46 = vadd.f32 %v617_v32, %v564_v31  ;;  %v708_v31 = vshrl.u32 %v707_v21, 7 }
 0x111   :  { %v619_v34 = vpop.f32.mrf.mxu1 }
 0x112   :  { %v656_v37 = vpop.f32.mrf.mxu0  ;;  %v620_v54 = vadd.f32 %v619_v34, %v566_v33 }
 0x113   :  { %v666_v38 = vpop.f32.mrf.mxu1  ;;  %v657_v41 = vadd.f32 %v656_v37, %v604_v35 }
 0x114   :  { %v667_v42 = vadd.f32 %v666_v38, %v614_v36  ;;  %v658_v43 = vpop.f32.mrf.mxu0 }
 0x115   :  { %v668_v44 = vpop.f32.mrf.mxu1  ;;  %675 = vst [vmem:[%s1302_s2] sm:$0xff] %v657_v41  ;;  %v659_v47 = vadd.f32 %v658_v43, %v606_v39  ;;  %v724_v57 = vmul.f32 %v657_v41, %v657_v41 }
 0x116   :  { %679 = vst [vmem:[%s1302_s2 + $0x20] sm:$0xff] %v667_v42  ;;  %v669_v48 = vadd.f32 %v668_v44, %v616_v40  ;;  %v660_v49 = vpop.f32.mrf.mxu0  ;;  %v728_v61 = vmul.f32 %v667_v42, %v667_v42 }
 0x117   :  { %v670_v50 = vpop.f32.mrf.mxu1  ;;  %676 = vst [vmem:[%s1302_s2 + $0x8] sm:$0xff] %v659_v47  ;;  %v661_v52 = vadd.f32 %v660_v49, %v608_v45  ;;  %v725_v62 = vmul.f32 %v659_v47, %v659_v47 }
 0x118   :  { %680 = vst [vmem:[%s1302_s2 + $0x28] sm:$0xff] %v669_v48  ;;  %v671_v53 = vadd.f32 %v670_v50, %v618_v46  ;;  %v662_v55 = vpop.f32.mrf.mxu0  ;;  %v729_v4 = vmul.f32 %v669_v48, %v669_v48 }
 0x119   :  { %v672_v56 = vpop.f32.mrf.mxu1  ;;  %677 = vst [vmem:[%s1302_s2 + $0x10] sm:$0xff] %v661_v52  ;;  %v683_v58 = vadd.f32 %v661_v52, %v657_v41  ;;  %v726_v59 = vmul.f32 %v661_v52, %v661_v52  ;;  %v663_v60 = vadd.f32 %v662_v55, %v610_v51  ;;  %v709_v41 = vsub.s32 %v706_v30, %v708_v31 }
 0x11a   :  { %681 = vst [vmem:[%s1302_s2 + $0x30] sm:$0xff] %v671_v53  ;;  %v673_v63 = vadd.f32 %v672_v56, %v620_v54  ;;  %v730_v5 = vmul.f32 %v671_v53, %v671_v53 }
 0x11b   :  { %v732_v0 = vadd.f32 %v726_v59, %v724_v57  ;;  %v684_v1 = vadd.f32 %v683_v58, %v667_v42  ;;  %678 = vst [vmem:[%s1302_s2 + $0x18] sm:$0xff] %v663_v60  ;;  %v692_v2 = vadd.f32 %v663_v60, %v659_v47  ;;  %v727_v3 = vmul.f32 %v663_v60, %v663_v60 }
 0x11c   :  { %682 = vst [vmem:[%s1302_s2 + $0x38] sm:$0xff] %v673_v63  ;;  %v731_v10 = vmul.f32 %v673_v63, %v673_v63 }
 0x11d   :  { %v685_v6 = vadd.f32 %v684_v1, %v671_v53  ;;  %v733_v7 = vadd.f32 %v732_v0, %v728_v61  ;;  %v741_v8 = vadd.f32 %v727_v3, %v725_v62  ;;  %v693_v9 = vadd.f32 %v692_v2, %v669_v48 }
 0x11f   :  { %v686_v11 = vrot.slane %v685_v6, 4  ;;  %v734_v12 = vadd.f32 %v733_v7, %v730_v5  ;;  %v694_v13 = vadd.f32 %v693_v9, %v673_v63  ;;  %v742_v14 = vadd.f32 %v741_v8, %v729_v4 }
 0x121   :  { %v687_v15 = vadd.f32 %v686_v11, %v685_v6  ;;  %v735_v16 = vrot.slane %v734_v12, 4  ;;  %v695_v17 = vrot.slane %v694_v13, 4  ;;  %v743_v18 = vadd.f32 %v742_v14, %v731_v10 }
 0x123   :  { %v688_v22 = vrot.slane %v687_v15, 2  ;;  %v736_v23 = vadd.f32 %v735_v16, %v734_v12  ;;  %v696_v24 = vadd.f32 %v695_v17, %v694_v13  ;;  %v744_v25 = vrot.slane %v743_v18, 4 }
 0x125   :  { %v689_v26 = vadd.f32 %v688_v22, %v687_v15  ;;  %v737_v27 = vrot.slane %v736_v23, 2  ;;  %v697_v28 = vrot.slane %v696_v24, 2  ;;  %v745_v29 = vadd.f32 %v744_v25, %v743_v18 }
 0x127   :  { %v690_v32 = vrot.slane %v689_v26, 1  ;;  %v738_v33 = vadd.f32 %v737_v27, %v736_v23  ;;  %v698_v34 = vadd.f32 %v697_v28, %v696_v24  ;;  %v746_v35 = vrot.slane %v745_v29, 2 }
 0x129   :  { %v739_v36 = vrot.slane %v738_v33, 1  ;;  %v699_v37 = vrot.slane %v698_v34, 1  ;;  %v747_v38 = vadd.f32 %v746_v35, %v745_v29  ;;  %v691_v39 = vadd.f32 %v690_v32, %v689_v26 }
 0x12b   :  { %v700_v40 = vadd.f32 %v699_v37, %v698_v34  ;;  %v748_v42 = vrot.slane %v747_v38, 1  ;;  %v740_v43 = vadd.f32 %v739_v36, %v738_v33 }
 0x12d   :  { %v703_v44 = vcombine.low %v691_v39, %v700_v40  ;;  %v749_v45 = vadd.f32 %v748_v42, %v747_v38 }
 0x12f   :  { %v710_v46 = vrot.slane %v703_v44, %v709_v41  ;;  %v752_v47 = vcombine.low %v740_v43, %v749_v45 }
 0x131   :  { %v717_v48 = vrot.slane %v710_v46, %v709_v41  ;;  %v759_v49 = vrot.slane %v752_v47, %v709_v41 }
 0x133   :  { %723 = vst.msk [vmem:[%s1303_s3] sm:$0x3] %vm721_vm1, %v717_v48  ;;  %v766_v50 = vrot.slane %v759_v49, %v709_v41 }
 0x135   :  { %768 = vst.msk [vmem:[%s1304_s4] sm:$0x3] %vm721_vm1, %v766_v50 }

// kernel: net_forward.44
= control target key start
LH: loop header
LB: loop body
LE: loop exit
PB: predicated region body
PF: predicated region fallthrough
CT: control target
= control target key end

     0   :  { %v24_v0 = vlaneseq  ;;  %s164_s1 = inlined_call_operand.vmem [shape: f32[1,256], index: 1, kind: input, shape index: {}]   ;;  %s165_s2 = inlined_call_operand.vmem [shape: f32[1,256], index: 2, kind: input, shape index: {}]   ;;  %s166_s0 = inlined_call_operand.vmem [shape: f32[32,256], index: 0, kind: input, shape index: {}]   ;;  %s167_s3 = inlined_call_operand.vmem [shape: bf16[32,256], index: 3, kind: output, shape index: {}]  }
   0x1   :  { %v22_v2 = vld [vmem:[%s164_s1] sm:$0x3]  ;;  %v15_v5 = vld [vmem:[%s166_s0 + $0x8] sm:$0xff]  ;;  %v16_v8 = vld [vmem:[%s166_s0 + $0x10] sm:$0xff] }
   0x2   :  { %v25_v1 = vshrl.u32 %v24_v0, 7  ;;  %v42_v3 = vld [vmem:[%s165_s2] sm:$0x3]  ;;  %v17_v9 = vld [vmem:[%s166_s0 + $0x18] sm:$0xff]  ;;  %v19_v15 = vld [vmem:[%s166_s0 + $0x28] sm:$0xff] }
   0x3   :  { %v14_v4 = vld [vmem:[%s166_s0] sm:$0xff]  ;;  %v20_v16 = vld [vmem:[%s166_s0 + $0x30] sm:$0xff]  ;;  %v21_v17 = vld [vmem:[%s166_s0 + $0x38] sm:$0xff] }
   0x4   :  { %v26_v6 = vsub.s32 0, %v25_v1  ;;  %v30_v7 = vsub.s32 1, %v25_v1  ;;  %v18_v10 = vld [vmem:[%s166_s0 + $0x20] sm:$0xff] }
   0x6   :  { %v27_v11 = vrot.slane %v22_v2, %v26_v6  ;;  %v31_v12 = vrot.slane %v22_v2, %v30_v7  ;;  %v47_v13 = vrot.slane %v42_v3, %v26_v6  ;;  %v51_v14 = vrot.slane %v42_v3, %v30_v7 }
   0x8   :  { %v34_v18 = vmul.f32 %v27_v11, %v14_v4  ;;  %v35_v19 = vmul.f32 %v31_v12, %v15_v5  ;;  %v36_v20 = vmul.f32 %v27_v11, %v16_v8  ;;  %v37_v21 = vmul.f32 %v31_v12, %v17_v9 }
   0x9   :  { %v38_v22 = vmul.f32 %v27_v11, %v18_v10  ;;  %v39_v23 = vmul.f32 %v31_v12, %v19_v15  ;;  %v40_v24 = vmul.f32 %v27_v11, %v20_v16  ;;  %v41_v25 = vmul.f32 %v31_v12, %v21_v17 }
   0xa   :  { %v54_v26 = vadd.f32 %v47_v13, %v34_v18  ;;  %v55_v27 = vadd.f32 %v51_v14, %v35_v19  ;;  %v56_v28 = vadd.f32 %v47_v13, %v36_v20  ;;  %v57_v29 = vadd.f32 %v51_v14, %v37_v21 }
   0xb   :  { %v58_v30 = vadd.f32 %v47_v13, %v38_v22  ;;  %v59_v31 = vadd.f32 %v51_v14, %v39_v23  ;;  %v60_v32 = vadd.f32 %v47_v13, %v40_v24  ;;  %v61_v33 = vadd.f32 %v51_v14, %v41_v25 }
   0xc   :  { %v98_v34 = vpack.c.bf16 %v55_v27, %v54_v26  ;;  %v99_v35 = vpack.c.bf16 %v57_v29, %v56_v28 }
   0xd   :  { %v100_v36 = vpack.c.bf16 %v59_v31, %v58_v30  ;;  %v101_v37 = vpack.c.bf16 %v61_v33, %v60_v32 }
   0xe   :  { %86 = vst [vmem:[%s167_s3] sm:$0xff] %v98_v34  ;;  %87 = vst [vmem:[%s167_s3 + $0x8] sm:$0xff] %v99_v35 }
   0xf   :  { %88 = vst [vmem:[%s167_s3 + $0x10] sm:$0xff] %v100_v36  ;;  %89 = vst [vmem:[%s167_s3 + $0x18] sm:$0xff] %v101_v37 }

// kernel: net_forward.43
= control target key start
LH: loop header
LB: loop body
LE: loop exit
PB: predicated region body
PF: predicated region fallthrough
CT: control target
= control target key end

     0   :  { %v279_v1 = vmov 0   ;;  %vm77_vm0 = vcmask 523264   ;;  %v280_v43 = vmov 1966171168   ;;  %v169_v45 = vlaneseq  ;;  %s366_s1 = inlined_call_operand.vmem [shape: bf16[64,256], index: 1, kind: input, shape index: {}]   ;;  %s367_s0 = inlined_call_operand.vmem [shape: bf16[32,64], index: 0, kind: input, shape index: {}]   ;;  %s368_s2 = inlined_call_operand.vmem [shape: f32[32,256], index: 2, kind: output, shape index: {0}]   ;;  %s369_s3 = inlined_call_operand.vmem [shape: f32[1,1,256], index: 3, kind: output, shape index: {1}]   ;;  %s370_s4 = inlined_call_operand.vmem [shape: f32[1,1,256], index: 4, kind: output, shape index: {2}]  }
   0x1   :  { %v265_v0 = vld [vmem:[%s366_s1 + $0x34] ss:$8 sps:$4 sm:$0xff]   ;;  %116 = vmatprep.mubr.bf16.mxu0 %v279_v1  ;;  %126 = vmatprep.mubr.bf16.mxu1 %v279_v1  ;;  %v267_v2 = vld [vmem:[%s366_s1 + $0x30] ss:$8 sps:$4 sm:$0xff]   ;;  %v268_v3 = vld [vmem:[%s366_s1 + $0x24] ss:$8 sps:$4 sm:$0xff]   ;;  %v167_v44 = vunpack.c.l.s4 %v280_v43 }
   0x2   :  { %92 = vmatprep.subr.bf16.mxu0 %v265_v0  ;;  %255 = vmatprep.subr.bf16.mxu1 %v265_v0  ;;  %v270_v4 = vld [vmem:[%s366_s1 + $0x20] ss:$8 sps:$4 sm:$0xff]   ;;  %v271_v5 = vld [vmem:[%s366_s1 + $0x14] ss:$8 sps:$4 sm:$0xff]   ;;  %v273_v6 = vld [vmem:[%s366_s1 + $0x10] ss:$8 sps:$4 sm:$0xff]  }
   0x3   :  { %93 = vmatpush1.bf16.msra.mxu0 %v267_v2  ;;  %259 = vmatpush1.bf16.msra.mxu1 %v267_v2  ;;  %v274_v7 = vld [vmem:[%s366_s1 + $0x4] ss:$8 sps:$4 sm:$0xff]   ;;  %v276_v8 = vld [vmem:[%s366_s1] ss:$8 sps:$4 sm:$0xff]   ;;  %v168_v54 = vunpack.c.0.s8 %v167_v44  ;;  %v170_v55 = vshrl.u32 %v169_v45, 7  ;;  %vm183_vm1 = vcmp.lt.s32.totalorder %v169_v45, 256 }
   0x4   :  { %94 = vmatprep.subr.bf16.mxu0 %v268_v3  ;;  %256 = vmatprep.subr.bf16.mxu1 %v268_v3  ;;  %v277_v9 = vld [vmem:[%s367_s0] sm:$0xff]   ;;  %v278_v10 = vld [vmem:[%s367_s0 + $0x8] sm:$0xff]  }
   0x5   :  { %v171_v1 = vsub.s32 %v168_v54, %v170_v55 }
   0x7   :  { %95 = vmatpush1.bf16.msra.mxu0 %v270_v4  ;;  %260 = vmatpush1.bf16.msra.mxu1 %v270_v4 }
   0x8   :  { %96 = vmatprep.subr.bf16.mxu0 %v271_v5  ;;  %257 = vmatprep.subr.bf16.mxu1 %v271_v5 }
   0xb   :  { %97 = vmatpush1.bf16.msra.mxu0 %v273_v6  ;;  %261 = vmatpush1.bf16.msra.mxu1 %v273_v6 }
   0xc   :  { %98 = vmatprep.subr.bf16.mxu0 %v274_v7  ;;  %258 = vmatprep.subr.bf16.mxu1 %v274_v7 }
   0xf   :  { %99 = vmatpush1.bf16.msra.mxu0 %v276_v8  ;;  %262 = vmatpush1.bf16.msra.mxu1 %v276_v8 }
  0x12   :  { %253 = vmatmul.mubr.msk.bf16.vlgmr.msra.gmra.mxu0 %vm77_vm0, %v277_v9  ;;  %254 = vmatmul.mubr.msk.bf16.vlgmr.msra.gmra.mxu1 %vm77_vm0, %v278_v10 }
  0xd2   :  { %v118_v11 = vpop.f32.mrf.mxu0  ;;  %v128_v12 = vpop.f32.mrf.mxu1 }
  0xd3   :  { %137 = vst [vmem:[%s368_s2] sm:$0xff] %v118_v11  ;;  %141 = vst [vmem:[%s368_s2 + $0x20] sm:$0xff] %v128_v12  ;;  %v186_v17 = vmul.f32 %v118_v11, %v118_v11  ;;  %v190_v20 = vmul.f32 %v128_v12, %v128_v12 }
  0xd4   :  { %v120_v13 = vpop.f32.mrf.mxu0  ;;  %v130_v14 = vpop.f32.mrf.mxu1 }
  0xd5   :  { %138 = vst [vmem:[%s368_s2 + $0x8] sm:$0xff] %v120_v13  ;;  %142 = vst [vmem:[%s368_s2 + $0x28] sm:$0xff] %v130_v14  ;;  %v187_v21 = vmul.f32 %v120_v13, %v120_v13  ;;  %v191_v28 = vmul.f32 %v130_v14, %v130_v14 }
  0xd6   :  { %v122_v15 = vpop.f32.mrf.mxu0  ;;  %v132_v16 = vpop.f32.mrf.mxu1 }
  0xd7   :  { %139 = vst [vmem:[%s368_s2 + $0x10] sm:$0xff] %v122_v15  ;;  %v145_v18 = vadd.f32 %v122_v15, %v118_v11  ;;  %v188_v19 = vmul.f32 %v122_v15, %v122_v15  ;;  %143 = vst [vmem:[%s368_s2 + $0x30] sm:$0xff] %v132_v16  ;;  %v192_v29 = vmul.f32 %v132_v16, %v132_v16 }
  0xd8   :  { %v124_v22 = vpop.f32.mrf.mxu0  ;;  %v134_v23 = vpop.f32.mrf.mxu1 }
  0xd9   :  { %v194_v24 = vadd.f32 %v188_v19, %v186_v17  ;;  %v146_v25 = vadd.f32 %v145_v18, %v128_v12  ;;  %140 = vst [vmem:[%s368_s2 + $0x18] sm:$0xff] %v124_v22  ;;  %v154_v26 = vadd.f32 %v124_v22, %v120_v13  ;;  %v189_v27 = vmul.f32 %v124_v22, %v124_v22 }
  0xda   :  { %144 = vst [vmem:[%s368_s2 + $0x38] sm:$0xff] %v134_v23  ;;  %v193_v34 = vmul.f32 %v134_v23, %v134_v23 }
  0xdb   :  { %v147_v30 = vadd.f32 %v146_v25, %v132_v16  ;;  %v195_v31 = vadd.f32 %v194_v24, %v190_v20  ;;  %v203_v32 = vadd.f32 %v189_v27, %v187_v21  ;;  %v155_v33 = vadd.f32 %v154_v26, %v130_v14 }
  0xdd   :  { %v148_v35 = vrot.slane %v147_v30, 4  ;;  %v196_v36 = vadd.f32 %v195_v31, %v192_v29  ;;  %v156_v37 = vadd.f32 %v155_v33, %v134_v23  ;;  %v204_v38 = vadd.f32 %v203_v32, %v191_v28 }
  0xdf   :  { %v149_v39 = vadd.f32 %v148_v35, %v147_v30  ;;  %v197_v40 = vrot.slane %v196_v36, 4  ;;  %v157_v41 = vrot.slane %v156_v37, 4  ;;  %v205_v42 = vadd.f32 %v204_v38, %v193_v34 }
  0xe1   :  { %v150_v46 = vrot.slane %v149_v39, 2  ;;  %v198_v47 = vadd.f32 %v197_v40, %v196_v36  ;;  %v158_v48 = vadd.f32 %v157_v41, %v156_v37  ;;  %v206_v49 = vrot.slane %v205_v42, 4 }
  0xe3   :  { %v151_v50 = vadd.f32 %v150_v46, %v149_v39  ;;  %v199_v51 = vrot.slane %v198_v47, 2  ;;  %v159_v52 = vrot.slane %v158_v48, 2  ;;  %v207_v53 = vadd.f32 %v206_v49, %v205_v42 }
  0xe5   :  { %v152_v56 = vrot.slane %v151_v50, 1  ;;  %v200_v57 = vadd.f32 %v199_v51, %v198_v47  ;;  %v160_v58 = vadd.f32 %v159_v52, %v158_v48  ;;  %v208_v59 = vrot.slane %v207_v53, 2 }
  0xe7   :  { %v201_v60 = vrot.slane %v200_v57, 1  ;;  %v161_v61 = vrot.slane %v160_v58, 1  ;;  %v209_v62 = vadd.f32 %v208_v59, %v207_v53  ;;  %v153_v63 = vadd.f32 %v152_v56, %v151_v50 }
  0xe9   :  { %v162_v0 = vadd.f32 %v161_v61, %v160_v58  ;;  %v210_v2 = vrot.slane %v209_v62, 1  ;;  %v202_v3 = vadd.f32 %v201_v60, %v200_v57 }
  0xeb   :  { %v165_v4 = vcombine.low %v153_v63, %v162_v0  ;;  %v211_v5 = vadd.f32 %v210_v2, %v209_v62 }
  0xed   :  { %v172_v6 = vrot.slane %v165_v4, %v171_v1  ;;  %v214_v7 = vcombine.low %v202_v3, %v211_v5 }
  0xef   :  { %v179_v8 = vrot.slane %v172_v6, %v171_v1  ;;  %v221_v9 = vrot.slane %v214_v7, %v171_v1 }
  0xf1   :  { %185 = vst.msk [vmem:[%s369_s3] sm:$0x3] %vm183_vm1, %v179_v8  ;;  %v228_v10 = vrot.slane %v221_v9, %v171_v1 }
  0xf3   :  { %230 = vst.msk [vmem:[%s370_s4] sm:$0x3] %vm183_vm1, %v228_v10 }

// kernel: net_forward.48
= control target key start
LH: loop header
LB: loop body
LE: loop exit
PB: predicated region body
PF: predicated region fallthrough
CT: control target
= control target key end

     0   :  { %v27_v0 = vlaneseq  ;;  %s212_s0 = inlined_call_operand.vmem [shape: f32[32,256], index: 0, kind: input, shape index: {}]   ;;  %s213_s1 = inlined_call_operand.vmem [shape: bf16[32,256], index: 1, kind: input, shape index: {}]   ;;  %s214_s2 = inlined_call_operand.vmem [shape: f32[1,256], index: 2, kind: input, shape index: {}]   ;;  %s215_s3 = inlined_call_operand.vmem [shape: f32[1,256], index: 3, kind: input, shape index: {}]   ;;  %s216_s4 = inlined_call_operand.vmem [shape: bf16[32,256], index: 4, kind: output, shape index: {}]  }
   0x1   :  { %v65_v2 = vld [vmem:[%s213_s1] sm:$0xff]  ;;  %v66_v6 = vld [vmem:[%s213_s1 + $0x8] sm:$0xff]  ;;  %v19_v10 = vld [vmem:[%s212_s0 + $0x10] sm:$0xff] }
   0x2   :  { %v28_v1 = vshrl.u32 %v27_v0, 7  ;;  %v17_v3 = vld [vmem:[%s212_s0] sm:$0xff]  ;;  %v18_v7 = vld [vmem:[%s212_s0 + $0x8] sm:$0xff]  ;;  %v67_v11 = vld [vmem:[%s213_s1 + $0x10] sm:$0xff]  ;;  %v69_v12 = vunpack.c.l.bf16 %v65_v2  ;;  %v70_v13 = vunpack.c.h.bf16 %v65_v2  ;;  %v71_v15 = vunpack.c.l.bf16 %v66_v6 }
   0x3   :  { %v25_v4 = vld [vmem:[%s214_s2] sm:$0x3]  ;;  %v20_v14 = vld [vmem:[%s212_s0 + $0x18] sm:$0xff]  ;;  %v72_v16 = vunpack.c.h.bf16 %v66_v6  ;;  %v22_v23 = vld [vmem:[%s212_s0 + $0x28] sm:$0xff]  ;;  %v73_v26 = vunpack.c.l.bf16 %v67_v11  ;;  %v74_v27 = vunpack.c.h.bf16 %v67_v11 }
   0x4   :  { %v45_v5 = vld [vmem:[%s215_s3] sm:$0x3]  ;;  %v29_v8 = vsub.s32 0, %v28_v1  ;;  %v33_v9 = vsub.s32 1, %v28_v1  ;;  %v68_v18 = vld [vmem:[%s213_s1 + $0x18] sm:$0xff]  ;;  %v23_v24 = vld [vmem:[%s212_s0 + $0x30] sm:$0xff] }
   0x5   :  { %v21_v17 = vld [vmem:[%s212_s0 + $0x20] sm:$0xff]  ;;  %v24_v25 = vld [vmem:[%s212_s0 + $0x38] sm:$0xff]  ;;  %v75_v28 = vunpack.c.l.bf16 %v68_v18  ;;  %v76_v29 = vunpack.c.h.bf16 %v68_v18 }
   0x6   :  { %v30_v19 = vrot.slane %v25_v4, %v29_v8  ;;  %v34_v20 = vrot.slane %v25_v4, %v33_v9  ;;  %v50_v21 = vrot.slane %v45_v5, %v29_v8  ;;  %v54_v22 = vrot.slane %v45_v5, %v33_v9 }
   0x8   :  { %v37_v30 = vmul.f32 %v30_v19, %v17_v3  ;;  %v38_v31 = vmul.f32 %v34_v20, %v18_v7  ;;  %v39_v32 = vmul.f32 %v30_v19, %v19_v10  ;;  %v40_v33 = vmul.f32 %v34_v20, %v20_v14 }
   0x9   :  { %v41_v34 = vmul.f32 %v30_v19, %v21_v17  ;;  %v42_v35 = vmul.f32 %v34_v20, %v22_v23  ;;  %v43_v36 = vmul.f32 %v30_v19, %v23_v24  ;;  %v44_v37 = vmul.f32 %v34_v20, %v24_v25 }
   0xa   :  { %v57_v38 = vadd.f32 %v50_v21, %v37_v30  ;;  %v58_v39 = vadd.f32 %v54_v22, %v38_v31  ;;  %v59_v40 = vadd.f32 %v50_v21, %v39_v32  ;;  %v60_v41 = vadd.f32 %v54_v22, %v40_v33 }
   0xb   :  { %v61_v42 = vadd.f32 %v50_v21, %v41_v34  ;;  %v62_v43 = vadd.f32 %v54_v22, %v42_v35  ;;  %v63_v44 = vadd.f32 %v50_v21, %v43_v36  ;;  %v64_v45 = vadd.f32 %v54_v22, %v44_v37 }
   0xc   :  { %v77_v46 = vadd.f32 %v69_v12, %v57_v38  ;;  %v78_v47 = vadd.f32 %v70_v13, %v58_v39  ;;  %v79_v48 = vadd.f32 %v71_v15, %v59_v40  ;;  %v80_v49 = vadd.f32 %v72_v16, %v60_v41 }
   0xd   :  { %v81_v50 = vadd.f32 %v73_v26, %v61_v42  ;;  %v82_v51 = vadd.f32 %v74_v27, %v62_v43  ;;  %v83_v52 = vadd.f32 %v75_v28, %v63_v44  ;;  %v84_v53 = vadd.f32 %v76_v29, %v64_v45 }
   0xe   :  { %v85_v54 = vmax.f32 %v77_v46, 0.0  ;;  %v86_v55 = vmax.f32 %v78_v47, 0.0  ;;  %v87_v56 = vmax.f32 %v79_v48, 0.0  ;;  %v88_v57 = vmax.f32 %v80_v49, 0.0 }
   0xf   :  { %v89_v58 = vmax.f32 %v81_v50, 0.0  ;;  %v90_v59 = vmax.f32 %v82_v51, 0.0  ;;  %v91_v60 = vmax.f32 %v83_v52, 0.0  ;;  %v92_v61 = vmax.f32 %v84_v53, 0.0 }
  0x10   :  { %v129_v62 = vpack.c.bf16 %v86_v55, %v85_v54  ;;  %v130_v63 = vpack.c.bf16 %v88_v57, %v87_v56 }
  0x11   :  { %v131_v0 = vpack.c.bf16 %v90_v59, %v89_v58  ;;  %v132_v1 = vpack.c.bf16 %v92_v61, %v91_v60 }
  0x12   :  { %117 = vst [vmem:[%s216_s4] sm:$0xff] %v129_v62  ;;  %118 = vst [vmem:[%s216_s4 + $0x8] sm:$0xff] %v130_v63 }
  0x13   :  { %119 = vst [vmem:[%s216_s4 + $0x10] sm:$0xff] %v131_v0  ;;  %120 = vst [vmem:[%s216_s4 + $0x18] sm:$0xff] %v132_v1 }

// kernel: net_forward.47
= control target key start
LH: loop header
LB: loop body
LE: loop exit
PB: predicated region body
PF: predicated region fallthrough
CT: control target
= control target key end

     0   :  { %s4427_s1 = inlined_call_operand.vmem [shape: bf16[2304,256], index: 1, kind: input, shape index: {}]   ;;  %s4428_s0 = inlined_call_operand.vmem [shape: bf16[32,2304], index: 0, kind: input, shape index: {}]   ;;  %s4429_s2 = inlined_call_operand.vmem [shape: f32[32,256], index: 2, kind: output, shape index: {0}]   ;;  %s4430_s3 = inlined_call_operand.vmem [shape: f32[1,1,256], index: 3, kind: output, shape index: {1}]   ;;  %s4431_s4 = inlined_call_operand.vmem [shape: f32[1,1,256], index: 4, kind: output, shape index: {2}]  }
   0x1   :  { %v2898_v0 = vld [vmem:[%s4427_s1 + $0x74] ss:$8 sps:$4 sm:$0xff]   ;;  %v2902_v2 = vld [vmem:[%s4427_s1 + $0x70] ss:$8 sps:$4 sm:$0xff]   ;;  %v2904_v4 = vld [vmem:[%s4427_s1 + $0x64] ss:$8 sps:$4 sm:$0xff]  }
   0x2   :  { %v2900_v1 = vld [vmem:[%s4427_s1 + $0x174] ss:$8 sps:$4 sm:$0xff]   ;;  %1958 = vmatprep.subr.bf16.mxu0 %v2898_v0  ;;  %v2903_v3 = vld [vmem:[%s4427_s1 + $0x170] ss:$8 sps:$4 sm:$0xff]   ;;  %v2906_v5 = vld [vmem:[%s4427_s1 + $0x164] ss:$8 sps:$4 sm:$0xff]  }
   0x3   :  { %2011 = vmatprep.subr.bf16.mxu1 %v2900_v1  ;;  %1959 = vmatpush1.bf16.msra.mxu0 %v2902_v2  ;;  %v2908_v6 = vld [vmem:[%s4427_s1 + $0x60] ss:$8 sps:$4 sm:$0xff]   ;;  %v2910_v8 = vld [vmem:[%s4427_s1 + $0x54] ss:$8 sps:$4 sm:$0xff]   ;;  %v2914_v10 = vld [vmem:[%s4427_s1 + $0x50] ss:$8 sps:$4 sm:$0xff]  }
   0x4   :  { %2012 = vmatpush1.bf16.msra.mxu1 %v2903_v3  ;;  %1960 = vmatprep.subr.bf16.mxu0 %v2904_v4  ;;  %v2909_v7 = vld [vmem:[%s4427_s1 + $0x160] ss:$8 sps:$4 sm:$0xff]   ;;  %v2912_v9 = vld [vmem:[%s4427_s1 + $0x154] ss:$8 sps:$4 sm:$0xff]   ;;  %v2915_v11 = vld [vmem:[%s4427_s1 + $0x150] ss:$8 sps:$4 sm:$0xff]  }
   0x5   :  { %2013 = vmatprep.subr.bf16.mxu1 %v2906_v5  ;;  %v2916_v12 = vld [vmem:[%s4427_s1 + $0x44] ss:$8 sps:$4 sm:$0xff]   ;;  %v2920_v14 = vld [vmem:[%s4427_s1 + $0x40] ss:$8 sps:$4 sm:$0xff]   ;;  %v2922_v16 = vld [vmem:[%s4427_s1 + $0x34] ss:$8 sps:$4 sm:$0xff]  }
   0x6   :  { %v2918_v13 = vld [vmem:[%s4427_s1 + $0x144] ss:$8 sps:$4 sm:$0xff]   ;;  %v2921_v15 = vld [vmem:[%s4427_s1 + $0x140] ss:$8 sps:$4 sm:$0xff]   ;;  %v2924_v17 = vld [vmem:[%s4427_s1 + $0x134] ss:$8 sps:$4 sm:$0xff]  }
   0x7   :  { %1961 = vmatpush1.bf16.msra.mxu0 %v2908_v6  ;;  %v2926_v18 = vld [vmem:[%s4427_s1 + $0x30] ss:$8 sps:$4 sm:$0xff]   ;;  %v2928_v20 = vld [vmem:[%s4427_s1 + $0x24] ss:$8 sps:$4 sm:$0xff]   ;;  %v2932_v22 = vld [vmem:[%s4427_s1 + $0x20] ss:$8 sps:$4 sm:$0xff]  }
   0x8   :  { %2014 = vmatpush1.bf16.msra.mxu1 %v2909_v7  ;;  %1962 = vmatprep.subr.bf16.mxu0 %v2910_v8  ;;  %v2927_v19 = vld [vmem:[%s4427_s1 + $0x130] ss:$8 sps:$4 sm:$0xff]   ;;  %v2930_v21 = vld [vmem:[%s4427_s1 + $0x124] ss:$8 sps:$4 sm:$0xff]   ;;  %v2933_v23 = vld [vmem:[%s4427_s1 + $0x120] ss:$8 sps:$4 sm:$0xff]  }
   0x9   :  { %2015 = vmatprep.subr.bf16.mxu1 %v2912_v9  ;;  %v2934_v24 = vld [vmem:[%s4427_s1 + $0x14] ss:$8 sps:$4 sm:$0xff]   ;;  %v2938_v26 = vld [vmem:[%s4427_s1 + $0x10] ss:$8 sps:$4 sm:$0xff]   ;;  %v2940_v28 = vld [vmem:[%s4427_s1 + $0x4] ss:$8 sps:$4 sm:$0xff]  }
   0xa   :  { %v2936_v25 = vld [vmem:[%s4427_s1 + $0x114] ss:$8 sps:$4 sm:$0xff]   ;;  %v2939_v27 = vld [vmem:[%s4427_s1 + $0x110] ss:$8 sps:$4 sm:$0xff]   ;;  %v2942_v29 = vld [vmem:[%s4427_s1 + $0x104] ss:$8 sps:$4 sm:$0xff]  }
   0xb   :  { %1963 = vmatpush1.bf16.msra.mxu0 %v2914_v10  ;;  %v2944_v30 = vld [vmem:[%s4427_s1] ss:$8 sps:$4 sm:$0xff]   ;;  %v2946_v32 = vld [vmem:[%s4427_s1 + $0xf4] ss:$8 sps:$4 sm:$0xff]   ;;  %v2950_v34 = vld [vmem:[%s4427_s1 + $0xf0] ss:$8 sps:$4 sm:$0xff]  }
   0xc   :  { %2016 = vmatpush1.bf16.msra.mxu1 %v2915_v11  ;;  %1964 = vmatprep.subr.bf16.mxu0 %v2916_v12  ;;  %v2945_v31 = vld [vmem:[%s4427_s1 + $0x100] ss:$8 sps:$4 sm:$0xff]   ;;  %v2948_v33 = vld [vmem:[%s4427_s1 + $0x1f4] ss:$8 sps:$4 sm:$0xff]   ;;  %v2951_v35 = vld [vmem:[%s4427_s1 + $0x1f0] ss:$8 sps:$4 sm:$0xff]  }
   0xd   :  { %2017 = vmatprep.subr.bf16.mxu1 %v2918_v13  ;;  %v2952_v36 = vld [vmem:[%s4427_s1 + $0xe4] ss:$8 sps:$4 sm:$0xff]   ;;  %v2956_v38 = vld [vmem:[%s4427_s1 + $0xe0] ss:$8 sps:$4 sm:$0xff]   ;;  %v2958_v40 = vld [vmem:[%s4427_s1 + $0xd4] ss:$8 sps:$4 sm:$0xff]  }
   0xe   :  { %v2954_v37 = vld [vmem:[%s4427_s1 + $0x1e4] ss:$8 sps:$4 sm:$0xff]   ;;  %v2957_v39 = vld [vmem:[%s4427_s1 + $0x1e0] ss:$8 sps:$4 sm:$0xff]   ;;  %v2960_v41 = vld [vmem:[%s4427_s1 + $0x1d4] ss:$8 sps:$4 sm:$0xff]  }
   0xf   :  { %1965 = vmatpush1.bf16.msra.mxu0 %v2920_v14  ;;  %v2962_v42 = vld [vmem:[%s4427_s1 + $0xd0] ss:$8 sps:$4 sm:$0xff]   ;;  %v2964_v44 = vld [vmem:[%s4427_s1 + $0xc4] ss:$8 sps:$4 sm:$0xff]   ;;  %v2968_v46 = vld [vmem:[%s4427_s1 + $0xc0] ss:$8 sps:$4 sm:$0xff]  }
  0x10   :  { %2018 = vmatpush1.bf16.msra.mxu1 %v2921_v15  ;;  %1966 = vmatprep.subr.bf16.mxu0 %v2922_v16  ;;  %v2963_v43 = vld [vmem:[%s4427_s1 + $0x1d0] ss:$8 sps:$4 sm:$0xff]   ;;  %v2966_v45 = vld [vmem:[%s4427_s1 + $0x1c4] ss:$8 sps:$4 sm:$0xff]   ;;  %v2969_v47 = vld [vmem:[%s4427_s1 + $0x1c0] ss:$8 sps:$4 sm:$0xff]  }
  0x11   :  { %2019 = vmatprep.subr.bf16.mxu1 %v2924_v17  ;;  %v2970_v48 = vld [vmem:[%s4427_s1 + $0xb4] ss:$8 sps:$4 sm:$0xff]   ;;  %v2996_v49 = vld [vmem:[%s4428_s0 + $0x4] ss:$72 sps:$4 sm:$0xff]   ;;  %v2974_v52 = vld [vmem:[%s4427_s1 + $0xb0] ss:$8 sps:$4 sm:$0xff]  }
  0x12   :  { %v2972_v50 = vld [vmem:[%s4427_s1 + $0x1b4] ss:$8 sps:$4 sm:$0xff]   ;;  %1990 = vmatprep.mubr.bf16.mxu0 %v2996_v49  ;;  %v2975_v53 = vld [vmem:[%s4427_s1 + $0x1b0] ss:$8 sps:$4 sm:$0xff]   ;;  %v2976_v54 = vld [vmem:[%s4427_s1 + $0xa4] ss:$8 sps:$4 sm:$0xff]  }
  0x13   :  { %1967 = vmatpush1.bf16.msra.mxu0 %v2926_v18  ;;  %v2999_v51 = vld [vmem:[%s4428_s0 + $0xc] ss:$72 sps:$4 sm:$0xff]   ;;  %v2980_v56 = vld [vmem:[%s4427_s1 + $0xa0] ss:$8 sps:$4 sm:$0xff]   ;;  %v2986_v60 = vld [vmem:[%s4427_s1 + $0x90] ss:$8 sps:$4 sm:$0xff]  }
  0x14   :  { %2020 = vmatpush1.bf16.msra.mxu1 %v2927_v19  ;;  %1968 = vmatprep.subr.bf16.mxu0 %v2928_v20  ;;  %v2978_v55 = vld [vmem:[%s4427_s1 + $0x1a4] ss:$8 sps:$4 sm:$0xff]   ;;  %v2981_v57 = vld [vmem:[%s4427_s1 + $0x1a0] ss:$8 sps:$4 sm:$0xff]   ;;  %v2982_v58 = vld [vmem:[%s4427_s1 + $0x94] ss:$8 sps:$4 sm:$0xff]  }
  0x15   :  { %2021 = vmatprep.subr.bf16.mxu1 %v2930_v21  ;;  %2043 = vmatprep.mubr.bf16.mxu1 %v2999_v51  ;;  %v2984_v59 = vld [vmem:[%s4427_s1 + $0x194] ss:$8 sps:$4 sm:$0xff]   ;;  %v2987_v61 = vld [vmem:[%s4427_s1 + $0x190] ss:$8 sps:$4 sm:$0xff]   ;;  %v2988_v62 = vld [vmem:[%s4427_s1 + $0x84] ss:$8 sps:$4 sm:$0xff]  }
  0x16   :  { %v2990_v63 = vld [vmem:[%s4427_s1 + $0x184] ss:$8 sps:$4 sm:$0xff]   ;;  %v2992_v0 = vld [vmem:[%s4427_s1 + $0x80] ss:$8 sps:$4 sm:$0xff]   ;;  %v3002_v2 = vld [vmem:[%s4427_s1 + $0x274] ss:$8 sps:$4 sm:$0xff]  }
  0x17   :  { %1969 = vmatpush1.bf16.msra.mxu0 %v2932_v22  ;;  %v2993_v1 = vld [vmem:[%s4427_s1 + $0x180] ss:$8 sps:$4 sm:$0xff]   ;;  %v3005_v3 = vld [vmem:[%s4427_s1 + $0x374] ss:$8 sps:$4 sm:$0xff]   ;;  %v3000_v6 = vld [vmem:[%s4427_s1 + $0x270] ss:$8 sps:$4 sm:$0xff]  }
  0x18   :  { %2022 = vmatpush1.bf16.msra.mxu1 %v2933_v23  ;;  %1970 = vmatprep.subr.bf16.mxu0 %v2934_v24  ;;  %v2994_v4 = vld [vmem:[%s4428_s0] ss:$72 sps:$4 sm:$0xff]   ;;  %v3003_v7 = vld [vmem:[%s4427_s1 + $0x370] ss:$8 sps:$4 sm:$0xff]   ;;  %v3008_v8 = vld [vmem:[%s4427_s1 + $0x264] ss:$8 sps:$4 sm:$0xff]  }
  0x19   :  { %2023 = vmatprep.subr.bf16.mxu1 %v2936_v25  ;;  %v2997_v5 = vld [vmem:[%s4428_s0 + $0x8] ss:$72 sps:$4 sm:$0xff]   ;;  %v3011_v9 = vld [vmem:[%s4427_s1 + $0x364] ss:$8 sps:$4 sm:$0xff]   ;;  %v3014_v12 = vld [vmem:[%s4427_s1 + $0x254] ss:$8 sps:$4 sm:$0xff]  }
  0x1a   :  { %v3006_v10 = vld [vmem:[%s4427_s1 + $0x260] ss:$8 sps:$4 sm:$0xff]   ;;  %v3017_v13 = vld [vmem:[%s4427_s1 + $0x354] ss:$8 sps:$4 sm:$0xff]   ;;  %v3012_v14 = vld [vmem:[%s4427_s1 + $0x250] ss:$8 sps:$4 sm:$0xff]  }
  0x1b   :  { %1971 = vmatpush1.bf16.msra.mxu0 %v2938_v26  ;;  %v3009_v11 = vld [vmem:[%s4427_s1 + $0x360] ss:$8 sps:$4 sm:$0xff]   ;;  %v3015_v15 = vld [vmem:[%s4427_s1 + $0x350] ss:$8 sps:$4 sm:$0xff]   ;;  %v3020_v16 = vld [vmem:[%s4427_s1 + $0x244] ss:$8 sps:$4 sm:$0xff]  }
  0x1c   :  { %2024 = vmatpush1.bf16.msra.mxu1 %v2939_v27  ;;  %1972 = vmatprep.subr.bf16.mxu0 %v2940_v28  ;;  %v3023_v17 = vld [vmem:[%s4427_s1 + $0x344] ss:$8 sps:$4 sm:$0xff]   ;;  %v3018_v18 = vld [vmem:[%s4427_s1 + $0x240] ss:$8 sps:$4 sm:$0xff]   ;;  %v3026_v20 = vld [vmem:[%s4427_s1 + $0x234] ss:$8 sps:$4 sm:$0xff]  }
  0x1d   :  { %2025 = vmatprep.subr.bf16.mxu1 %v2942_v29  ;;  %v3021_v19 = vld [vmem:[%s4427_s1 + $0x340] ss:$8 sps:$4 sm:$0xff]   ;;  %v3029_v21 = vld [vmem:[%s4427_s1 + $0x334] ss:$8 sps:$4 sm:$0xff]   ;;  %v3024_v22 = vld [vmem:[%s4427_s1 + $0x230] ss:$8 sps:$4 sm:$0xff]  }
  0x1e   :  { %v3027_v23 = vld [vmem:[%s4427_s1 + $0x330] ss:$8 sps:$4 sm:$0xff]   ;;  %v3032_v24 = vld [vmem:[%s4427_s1 + $0x224] ss:$8 sps:$4 sm:$0xff]   ;;  %v3078_v26 = vld [vmem:[%s4428_s0 + $0x94] ss:$72 sps:$4 sm:$0xff]  }
  0x1f   :  { %1973 = vmatpush1.bf16.msra.mxu0 %v2944_v30  ;;  %v3035_v25 = vld [vmem:[%s4427_s1 + $0x324] ss:$8 sps:$4 sm:$0xff]   ;;  %v3082_v28 = vld [vmem:[%s4428_s0 + $0x90] ss:$72 sps:$4 sm:$0xff]   ;;  %v3030_v30 = vld [vmem:[%s4427_s1 + $0x220] ss:$8 sps:$4 sm:$0xff]  }
  0x20   :  { %2026 = vmatpush1.bf16.msra.mxu1 %v2945_v31  ;;  %1974 = vmatprep.subr.bf16.mxu0 %v2946_v32  ;;  %v3080_v27 = vld [vmem:[%s4428_s0 + $0x9c] ss:$72 sps:$4 sm:$0xff]   ;;  %v3083_v29 = vld [vmem:[%s4428_s0 + $0x98] ss:$72 sps:$4 sm:$0xff]  }
  0x21   :  { %2027 = vmatprep.subr.bf16.mxu1 %v2948_v33  ;;  %v3033_v31 = vld [vmem:[%s4427_s1 + $0x320] ss:$8 sps:$4 sm:$0xff]   ;;  %v3038_v32 = vld [vmem:[%s4427_s1 + $0x214] ss:$8 sps:$4 sm:$0xff]  }
  0x22   :  { %v3041_v33 = vld [vmem:[%s4427_s1 + $0x314] ss:$8 sps:$4 sm:$0xff]   ;;  %v3057_v49 = vld [vmem:[%s4427_s1 + $0x3e0] ss:$8 sps:$4 sm:$0xff]  }
  0x23   :  { %1975 = vmatpush2.bf16.msra.mxu0 %v2950_v34  ;;  %v3036_v34 = vld [vmem:[%s4427_s1 + $0x210] ss:$8 sps:$4 sm:$0xff]   ;;  %v3065_v51 = vld [vmem:[%s4427_s1 + $0x3d4] ss:$8 sps:$4 sm:$0xff]  }
  0x24   :  { %2028 = vmatpush2.bf16.msra.mxu1 %v2951_v35  ;;  %1976 = vmatprep.subr.bf16.mxu0 %v2952_v36  ;;  %v3039_v35 = vld [vmem:[%s4427_s1 + $0x310] ss:$8 sps:$4 sm:$0xff]   ;;  %v3044_v36 = vld [vmem:[%s4427_s1 + $0x204] ss:$8 sps:$4 sm:$0xff]  }
  0x25   :  { %2029 = vmatprep.subr.bf16.mxu1 %v2954_v37  ;;  %v3047_v37 = vld [vmem:[%s4427_s1 + $0x304] ss:$8 sps:$4 sm:$0xff]  }
  0x27   :  { %1977 = vmatpush2.bf16.msra.mxu0 %v2956_v38  ;;  %v3042_v38 = vld [vmem:[%s4427_s1 + $0x200] ss:$8 sps:$4 sm:$0xff]  }
  0x28   :  { %2030 = vmatpush2.bf16.msra.mxu1 %v2957_v39  ;;  %1978 = vmatprep.subr.bf16.mxu0 %v2958_v40  ;;  %v3045_v39 = vld [vmem:[%s4427_s1 + $0x300] ss:$8 sps:$4 sm:$0xff]   ;;  %v3050_v40 = vld [vmem:[%s4427_s1 + $0x2f4] ss:$8 sps:$4 sm:$0xff]  }
  0x29   :  { %2031 = vmatprep.subr.bf16.mxu1 %v2960_v41  ;;  %v3104_v41 = vld [vmem:[%s4428_s0 + $0x14] ss:$72 sps:$4 sm:$0xff]  }
  0x2b   :  { %1979 = vmatpush2.bf16.msra.mxu0 %v2962_v42  ;;  %v3053_v42 = vld [vmem:[%s4427_s1 + $0x3f4] ss:$8 sps:$4 sm:$0xff]  }
  0x2c   :  { %2032 = vmatpush2.bf16.msra.mxu1 %v2963_v43  ;;  %1980 = vmatprep.subr.bf16.mxu0 %v2964_v44  ;;  %v3107_v43 = vld [vmem:[%s4428_s0 + $0x1c] ss:$72 sps:$4 sm:$0xff]   ;;  %v3048_v44 = vld [vmem:[%s4427_s1 + $0x2f0] ss:$8 sps:$4 sm:$0xff]  }
  0x2d   :  { %2033 = vmatprep.subr.bf16.mxu1 %v2966_v45  ;;  %v3051_v45 = vld [vmem:[%s4427_s1 + $0x3f0] ss:$8 sps:$4 sm:$0xff]  }
  0x2f   :  { %1981 = vmatpush2.bf16.msra.mxu0 %v2968_v46  ;;  %v3056_v46 = vld [vmem:[%s4427_s1 + $0x2e4] ss:$8 sps:$4 sm:$0xff]  }
  0x30   :  { %2034 = vmatpush2.bf16.msra.mxu1 %v2969_v47  ;;  %1982 = vmatprep.subr.bf16.mxu0 %v2970_v48  ;;  %v3059_v47 = vld [vmem:[%s4427_s1 + $0x3e4] ss:$8 sps:$4 sm:$0xff]   ;;  %v3054_v48 = vld [vmem:[%s4427_s1 + $0x2e0] ss:$8 sps:$4 sm:$0xff]  }
  0x31   :  { %2035 = vmatprep.subr.bf16.mxu1 %v2972_v50  ;;  %v3062_v50 = vld [vmem:[%s4427_s1 + $0x2d4] ss:$8 sps:$4 sm:$0xff]  }
  0x33   :  { %1983 = vmatpush2.bf16.msra.mxu0 %v2974_v52  ;;  %v3060_v52 = vld [vmem:[%s4427_s1 + $0x2d0] ss:$8 sps:$4 sm:$0xff]  }
  0x34   :  { %2036 = vmatpush2.bf16.msra.mxu1 %v2975_v53  ;;  %1984 = vmatprep.subr.bf16.mxu0 %v2976_v54  ;;  %v3063_v53 = vld [vmem:[%s4427_s1 + $0x3d0] ss:$8 sps:$4 sm:$0xff]   ;;  %v3068_v54 = vld [vmem:[%s4427_s1 + $0x2c4] ss:$8 sps:$4 sm:$0xff]  }
  0x35   :  { %2037 = vmatprep.subr.bf16.mxu1 %v2978_v55  ;;  %v3071_v55 = vld [vmem:[%s4427_s1 + $0x3c4] ss:$8 sps:$4 sm:$0xff]  }
  0x37   :  { %1985 = vmatpush2.bf16.msra.mxu0 %v2980_v56  ;;  %v3066_v56 = vld [vmem:[%s4427_s1 + $0x2c0] ss:$8 sps:$4 sm:$0xff]  }
  0x38   :  { %2038 = vmatpush2.bf16.msra.mxu1 %v2981_v57  ;;  %1986 = vmatprep.subr.bf16.mxu0 %v2982_v58  ;;  %v3069_v57 = vld [vmem:[%s4427_s1 + $0x3c0] ss:$8 sps:$4 sm:$0xff]   ;;  %v3074_v58 = vld [vmem:[%s4427_s1 + $0x2b4] ss:$8 sps:$4 sm:$0xff]  }
  0x39   :  { %2039 = vmatprep.subr.bf16.mxu1 %v2984_v59  ;;  %v3077_v59 = vld [vmem:[%s4427_s1 + $0x3b4] ss:$8 sps:$4 sm:$0xff]  }
  0x3b   :  { %1987 = vmatpush2.bf16.msra.mxu0 %v2986_v60  ;;  %v3072_v60 = vld [vmem:[%s4427_s1 + $0x2b0] ss:$8 sps:$4 sm:$0xff]  }
  0x3c   :  { %2040 = vmatpush2.bf16.msra.mxu1 %v2987_v61  ;;  %1988 = vmatprep.subr.bf16.mxu0 %v2988_v62  ;;  %v3075_v61 = vld [vmem:[%s4427_s1 + $0x3b0] ss:$8 sps:$4 sm:$0xff]   ;;  %v3086_v62 = vld [vmem:[%s4427_s1 + $0x2a4] ss:$8 sps:$4 sm:$0xff]  }
  0x3d   :  { %2041 = vmatprep.subr.bf16.mxu1 %v2990_v63  ;;  %v3089_v63 = vld [vmem:[%s4427_s1 + $0x3a4] ss:$8 sps:$4 sm:$0xff]  }
  0x3f   :  { %1989 = vmatpush2.bf16.msra.mxu0 %v2992_v0  ;;  %v3084_v0 = vld [vmem:[%s4427_s1 + $0x2a0] ss:$8 sps:$4 sm:$0xff]  }
  0x40   :  { %2042 = vmatpush2.bf16.msra.mxu1 %v2993_v1  ;;  %2064 = vmatprep.subr.bf16.mxu0 %v3002_v2  ;;  %v3087_v1 = vld [vmem:[%s4427_s1 + $0x3a0] ss:$8 sps:$4 sm:$0xff]   ;;  %v3092_v2 = vld [vmem:[%s4427_s1 + $0x294] ss:$8 sps:$4 sm:$0xff]  }
  0x41   :  { %2117 = vmatprep.subr.bf16.mxu1 %v3005_v3  ;;  %v3095_v3 = vld [vmem:[%s4427_s1 + $0x394] ss:$8 sps:$4 sm:$0xff]  }
  0x42   :  { %1991 = vmatmul.mubr.bf16.vlgmr.msra.gmra.mxu0 %v2994_v4  ;;  %v3090_v4 = vld [vmem:[%s4427_s1 + $0x290] ss:$8 sps:$4 sm:$0xff]  }
  0x43   :  { %2044 = vmatmul.mubr.bf16.vlgmr.msra.gmra.mxu1 %v2997_v5  ;;  %2065 = vmatpush1.bf16.msra.mxu0 %v3000_v6  ;;  %v3093_v5 = vld [vmem:[%s4427_s1 + $0x390] ss:$8 sps:$4 sm:$0xff]   ;;  %v3098_v6 = vld [vmem:[%s4427_s1 + $0x284] ss:$8 sps:$4 sm:$0xff]  }
  0x44   :  { %2118 = vmatpush1.bf16.msra.mxu1 %v3003_v7  ;;  %2066 = vmatprep.subr.bf16.mxu0 %v3008_v8  ;;  %v3101_v7 = vld [vmem:[%s4427_s1 + $0x384] ss:$8 sps:$4 sm:$0xff]   ;;  %v3096_v8 = vld [vmem:[%s4427_s1 + $0x280] ss:$8 sps:$4 sm:$0xff]  }
  0x45   :  { %2119 = vmatprep.subr.bf16.mxu1 %v3011_v9  ;;  %2000 = vmatprep.mubr.bf16.mxu0 %v3078_v26  ;;  %v3099_v9 = vld [vmem:[%s4427_s1 + $0x380] ss:$8 sps:$4 sm:$0xff]   ;;  %v3126_v26 = vld [vmem:[%s4427_s1 + $0x550] ss:$8 sps:$4 sm:$0xff]  }
  0x46   :  { %2053 = vmatprep.mubr.bf16.mxu1 %v3080_v27  ;;  %v3131_v27 = vld [vmem:[%s4428_s0 + $0xa8] ss:$72 sps:$4 sm:$0xff]  }
  0x47   :  { %2067 = vmatpush1.bf16.msra.mxu0 %v3006_v10  ;;  %v3110_v10 = vld [vmem:[%s4427_s1 + $0x474] ss:$8 sps:$4 sm:$0xff]  }
  0x48   :  { %2120 = vmatpush1.bf16.msra.mxu1 %v3009_v11  ;;  %2068 = vmatprep.subr.bf16.mxu0 %v3014_v12  ;;  %v3113_v11 = vld [vmem:[%s4427_s1 + $0x574] ss:$8 sps:$4 sm:$0xff]   ;;  %v3102_v12 = vld [vmem:[%s4428_s0 + $0x10] ss:$72 sps:$4 sm:$0xff]  }
  0x49   :  { %2121 = vmatprep.subr.bf16.mxu1 %v3017_v13  ;;  %v3105_v13 = vld [vmem:[%s4428_s0 + $0x18] ss:$72 sps:$4 sm:$0xff]  }
  0x4a   :  { %2001 = vmatmul.mubr.bf16.gmra.mxu0 %v3082_v28  ;;  %v3134_v28 = vld [vmem:[%s4427_s1 + $0x444] ss:$8 sps:$4 sm:$0xff]  }
  0x4b   :  { %2069 = vmatpush1.bf16.msra.mxu0 %v3012_v14  ;;  %2054 = vmatmul.mubr.bf16.gmra.mxu1 %v3083_v29  ;;  %v3108_v14 = vld [vmem:[%s4427_s1 + $0x470] ss:$8 sps:$4 sm:$0xff]   ;;  %v3137_v29 = vld [vmem:[%s4427_s1 + $0x544] ss:$8 sps:$4 sm:$0xff]  }
  0x4c   :  { %2122 = vmatpush1.bf16.msra.mxu1 %v3015_v15  ;;  %2070 = vmatprep.subr.bf16.mxu0 %v3020_v16  ;;  %v3111_v15 = vld [vmem:[%s4427_s1 + $0x570] ss:$8 sps:$4 sm:$0xff]   ;;  %v3116_v16 = vld [vmem:[%s4427_s1 + $0x464] ss:$8 sps:$4 sm:$0xff]  }
  0x4d   :  { %2123 = vmatprep.subr.bf16.mxu1 %v3023_v17  ;;  %2096 = vmatprep.mubr.bf16.mxu0 %v3104_v41  ;;  %v3119_v17 = vld [vmem:[%s4427_s1 + $0x564] ss:$8 sps:$4 sm:$0xff]   ;;  %v3147_v41 = vld [vmem:[%s4427_s1 + $0x520] ss:$8 sps:$4 sm:$0xff]  }
  0x4e   :  { %2149 = vmatprep.mubr.bf16.mxu1 %v3107_v43  ;;  %v3155_v43 = vld [vmem:[%s4427_s1 + $0x514] ss:$8 sps:$4 sm:$0xff]  }
  0x4f   :  { %2071 = vmatpush1.bf16.msra.mxu0 %v3018_v18  ;;  %v3120_v18 = vld [vmem:[%s4428_s0 + $0xa4] ss:$72 sps:$4 sm:$0xff]  }
  0x50   :  { %2124 = vmatpush1.bf16.msra.mxu1 %v3021_v19  ;;  %2072 = vmatprep.subr.bf16.mxu0 %v3026_v20  ;;  %v3129_v19 = vld [vmem:[%s4428_s0 + $0xac] ss:$72 sps:$4 sm:$0xff]   ;;  %v3114_v20 = vld [vmem:[%s4427_s1 + $0x460] ss:$8 sps:$4 sm:$0xff]  }
  0x51   :  { %2125 = vmatprep.subr.bf16.mxu1 %v3029_v21  ;;  %v3117_v21 = vld [vmem:[%s4427_s1 + $0x560] ss:$8 sps:$4 sm:$0xff]  }
  0x53   :  { %2073 = vmatpush1.bf16.msra.mxu0 %v3024_v22  ;;  %v3125_v22 = vld [vmem:[%s4427_s1 + $0x454] ss:$8 sps:$4 sm:$0xff]  }
  0x54   :  { %2126 = vmatpush1.bf16.msra.mxu1 %v3027_v23  ;;  %2074 = vmatprep.subr.bf16.mxu0 %v3032_v24  ;;  %v3128_v23 = vld [vmem:[%s4427_s1 + $0x554] ss:$8 sps:$4 sm:$0xff]   ;;  %v3122_v24 = vld [vmem:[%s4428_s0 + $0xa0] ss:$72 sps:$4 sm:$0xff]  }
  0x55   :  { %2127 = vmatprep.subr.bf16.mxu1 %v3035_v25  ;;  %v3123_v25 = vld [vmem:[%s4427_s1 + $0x450] ss:$8 sps:$4 sm:$0xff]  }
  0x57   :  { %2075 = vmatpush1.bf16.msra.mxu0 %v3030_v30  ;;  %v3132_v30 = vld [vmem:[%s4427_s1 + $0x440] ss:$8 sps:$4 sm:$0xff]  }
  0x58   :  { %2128 = vmatpush1.bf16.msra.mxu1 %v3033_v31  ;;  %2076 = vmatprep.subr.bf16.mxu0 %v3038_v32  ;;  %v3135_v31 = vld [vmem:[%s4427_s1 + $0x540] ss:$8 sps:$4 sm:$0xff]   ;;  %v3140_v32 = vld [vmem:[%s4427_s1 + $0x434] ss:$8 sps:$4 sm:$0xff]  }
  0x59   :  { %2129 = vmatprep.subr.bf16.mxu1 %v3041_v33  ;;  %v3212_v33 = vld [vmem:[%s4428_s0 + $0x24] ss:$72 sps:$4 sm:$0xff]  }
  0x5b   :  { %2077 = vmatpush1.bf16.msra.mxu0 %v3036_v34  ;;  %v3143_v34 = vld [vmem:[%s4427_s1 + $0x534] ss:$8 sps:$4 sm:$0xff]  }
  0x5c   :  { %2130 = vmatpush1.bf16.msra.mxu1 %v3039_v35  ;;  %2078 = vmatprep.subr.bf16.mxu0 %v3044_v36  ;;  %v3215_v35 = vld [vmem:[%s4428_s0 + $0x2c] ss:$72 sps:$4 sm:$0xff]   ;;  %v3138_v36 = vld [vmem:[%s4427_s1 + $0x430] ss:$8 sps:$4 sm:$0xff]  }
  0x5d   :  { %2131 = vmatprep.subr.bf16.mxu1 %v3047_v37  ;;  %v3141_v37 = vld [vmem:[%s4427_s1 + $0x530] ss:$8 sps:$4 sm:$0xff]  }
  0x5f   :  { %2079 = vmatpush1.bf16.msra.mxu0 %v3042_v38  ;;  %v3146_v38 = vld [vmem:[%s4427_s1 + $0x424] ss:$8 sps:$4 sm:$0xff]  }
  0x60   :  { %2132 = vmatpush1.bf16.msra.mxu1 %v3045_v39  ;;  %2080 = vmatprep.subr.bf16.mxu0 %v3050_v40  ;;  %v3149_v39 = vld [vmem:[%s4427_s1 + $0x524] ss:$8 sps:$4 sm:$0xff]   ;;  %v3144_v40 = vld [vmem:[%s4427_s1 + $0x420] ss:$8 sps:$4 sm:$0xff]  }
  0x61   :  { %2133 = vmatprep.subr.bf16.mxu1 %v3053_v42  ;;  %v3152_v42 = vld [vmem:[%s4427_s1 + $0x414] ss:$8 sps:$4 sm:$0xff]  }
  0x63   :  { %2081 = vmatpush2.bf16.msra.mxu0 %v3048_v44  ;;  %v3150_v44 = vld [vmem:[%s4427_s1 + $0x410] ss:$8 sps:$4 sm:$0xff]  }
  0x64   :  { %2134 = vmatpush2.bf16.msra.mxu1 %v3051_v45  ;;  %2082 = vmatprep.subr.bf16.mxu0 %v3056_v46  ;;  %v3153_v45 = vld [vmem:[%s4427_s1 + $0x510] ss:$8 sps:$4 sm:$0xff]   ;;  %v3158_v46 = vld [vmem:[%s4427_s1 + $0x404] ss:$8 sps:$4 sm:$0xff]  }
  0x65   :  { %2135 = vmatprep.subr.bf16.mxu1 %v3059_v47  ;;  %v3161_v47 = vld [vmem:[%s4427_s1 + $0x504] ss:$8 sps:$4 sm:$0xff]  }
  0x67   :  { %2083 = vmatpush2.bf16.msra.mxu0 %v3054_v48  ;;  %v3156_v48 = vld [vmem:[%s4427_s1 + $0x400] ss:$8 sps:$4 sm:$0xff]  }
  0x68   :  { %2136 = vmatpush2.bf16.msra.mxu1 %v3057_v49  ;;  %2084 = vmatprep.subr.bf16.mxu0 %v3062_v50  ;;  %v3159_v49 = vld [vmem:[%s4427_s1 + $0x500] ss:$8 sps:$4 sm:$0xff]   ;;  %v3164_v50 = vld [vmem:[%s4427_s1 + $0x4f4] ss:$8 sps:$4 sm:$0xff]  }
  0x69   :  { %2137 = vmatprep.subr.bf16.mxu1 %v3065_v51  ;;  %v3167_v51 = vld [vmem:[%s4427_s1 + $0x5f4] ss:$8 sps:$4 sm:$0xff]  }
  0x6b   :  { %2085 = vmatpush2.bf16.msra.mxu0 %v3060_v52  ;;  %v3162_v52 = vld [vmem:[%s4427_s1 + $0x4f0] ss:$8 sps:$4 sm:$0xff]  }
  0x6c   :  { %2138 = vmatpush2.bf16.msra.mxu1 %v3063_v53  ;;  %2086 = vmatprep.subr.bf16.mxu0 %v3068_v54  ;;  %v3165_v53 = vld [vmem:[%s4427_s1 + $0x5f0] ss:$8 sps:$4 sm:$0xff]   ;;  %v3170_v54 = vld [vmem:[%s4427_s1 + $0x4e4] ss:$8 sps:$4 sm:$0xff]  }
  0x6d   :  { %2139 = vmatprep.subr.bf16.mxu1 %v3071_v55  ;;  %v3173_v55 = vld [vmem:[%s4427_s1 + $0x5e4] ss:$8 sps:$4 sm:$0xff]  }
  0x6f   :  { %2087 = vmatpush2.bf16.msra.mxu0 %v3066_v56  ;;  %v3168_v56 = vld [vmem:[%s4427_s1 + $0x4e0] ss:$8 sps:$4 sm:$0xff]  }
  0x70   :  { %2140 = vmatpush2.bf16.msra.mxu1 %v3069_v57  ;;  %2088 = vmatprep.subr.bf16.mxu0 %v3074_v58  ;;  %v3171_v57 = vld [vmem:[%s4427_s1 + $0x5e0] ss:$8 sps:$4 sm:$0xff]   ;;  %v3176_v58 = vld [vmem:[%s4427_s1 + $0x4d4] ss:$8 sps:$4 sm:$0xff]  }
  0x71   :  { %2141 = vmatprep.subr.bf16.mxu1 %v3077_v59  ;;  %v3179_v59 = vld [vmem:[%s4427_s1 + $0x5d4] ss:$8 sps:$4 sm:$0xff]  }
  0x73   :  { %2089 = vmatpush2.bf16.msra.mxu0 %v3072_v60  ;;  %v3174_v60 = vld [vmem:[%s4427_s1 + $0x4d0] ss:$8 sps:$4 sm:$0xff]  }
  0x74   :  { %2142 = vmatpush2.bf16.msra.mxu1 %v3075_v61  ;;  %2090 = vmatprep.subr.bf16.mxu0 %v3086_v62  ;;  %v3177_v61 = vld [vmem:[%s4427_s1 + $0x5d0] ss:$8 sps:$4 sm:$0xff]   ;;  %v3182_v62 = vld [vmem:[%s4427_s1 + $0x4c4] ss:$8 sps:$4 sm:$0xff]  }
  0x75   :  { %2143 = vmatprep.subr.bf16.mxu1 %v3089_v63  ;;  %v3185_v63 = vld [vmem:[%s4427_s1 + $0x5c4] ss:$8 sps:$4 sm:$0xff]  }
  0x77   :  { %2091 = vmatpush2.bf16.msra.mxu0 %v3084_v0  ;;  %v3180_v0 = vld [vmem:[%s4427_s1 + $0x4c0] ss:$8 sps:$4 sm:$0xff]  }
  0x78   :  { %2144 = vmatpush2.bf16.msra.mxu1 %v3087_v1  ;;  %2092 = vmatprep.subr.bf16.mxu0 %v3092_v2  ;;  %v3183_v1 = vld [vmem:[%s4427_s1 + $0x5c0] ss:$8 sps:$4 sm:$0xff]   ;;  %v3188_v2 = vld [vmem:[%s4427_s1 + $0x4b4] ss:$8 sps:$4 sm:$0xff]  }
  0x79   :  { %2145 = vmatprep.subr.bf16.mxu1 %v3095_v3  ;;  %v3191_v3 = vld [vmem:[%s4427_s1 + $0x5b4] ss:$8 sps:$4 sm:$0xff]  }
  0x7b   :  { %2093 = vmatpush2.bf16.msra.mxu0 %v3090_v4  ;;  %v3186_v4 = vld [vmem:[%s4427_s1 + $0x4b0] ss:$8 sps:$4 sm:$0xff]  }
  0x7c   :  { %2146 = vmatpush2.bf16.msra.mxu1 %v3093_v5  ;;  %2094 = vmatprep.subr.bf16.mxu0 %v3098_v6  ;;  %v3189_v5 = vld [vmem:[%s4427_s1 + $0x5b0] ss:$8 sps:$4 sm:$0xff]   ;;  %v3194_v6 = vld [vmem:[%s4427_s1 + $0x4a4] ss:$8 sps:$4 sm:$0xff]  }
  0x7d   :  { %2147 = vmatprep.subr.bf16.mxu1 %v3101_v7  ;;  %v3197_v7 = vld [vmem:[%s4427_s1 + $0x5a4] ss:$8 sps:$4 sm:$0xff]  }
  0x7f   :  { %2095 = vmatpush2.bf16.msra.mxu0 %v3096_v8  ;;  %v3192_v8 = vld [vmem:[%s4427_s1 + $0x4a0] ss:$8 sps:$4 sm:$0xff]  }
  0x80   :  { %2148 = vmatpush2.bf16.msra.mxu1 %v3099_v9  ;;  %2170 = vmatprep.subr.bf16.mxu0 %v3110_v10  ;;  %v3195_v9 = vld [vmem:[%s4427_s1 + $0x5a0] ss:$8 sps:$4 sm:$0xff]   ;;  %v3200_v10 = vld [vmem:[%s4427_s1 + $0x494] ss:$8 sps:$4 sm:$0xff]  }
  0x81   :  { %2223 = vmatprep.subr.bf16.mxu1 %v3113_v11  ;;  %v3203_v11 = vld [vmem:[%s4427_s1 + $0x594] ss:$8 sps:$4 sm:$0xff]  }
  0x82   :  { %2097 = vmatmul.mubr.bf16.vlgmr.msra.gmra.mxu0 %v3102_v12  ;;  %v3198_v12 = vld [vmem:[%s4427_s1 + $0x490] ss:$8 sps:$4 sm:$0xff]  }
  0x83   :  { %2150 = vmatmul.mubr.bf16.vlgmr.msra.gmra.mxu1 %v3105_v13  ;;  %2171 = vmatpush1.bf16.msra.mxu0 %v3108_v14  ;;  %v3201_v13 = vld [vmem:[%s4427_s1 + $0x590] ss:$8 sps:$4 sm:$0xff]   ;;  %v3206_v14 = vld [vmem:[%s4427_s1 + $0x484] ss:$8 sps:$4 sm:$0xff]  }
  0x84   :  { %2224 = vmatpush1.bf16.msra.mxu1 %v3111_v15  ;;  %2172 = vmatprep.subr.bf16.mxu0 %v3116_v16  ;;  %v3209_v15 = vld [vmem:[%s4427_s1 + $0x584] ss:$8 sps:$4 sm:$0xff]   ;;  %v3204_v16 = vld [vmem:[%s4427_s1 + $0x480] ss:$8 sps:$4 sm:$0xff]  }
  0x85   :  { %2225 = vmatprep.subr.bf16.mxu1 %v3119_v17  ;;  %2106 = vmatprep.mubr.bf16.mxu0 %v3120_v18  ;;  %v3207_v17 = vld [vmem:[%s4427_s1 + $0x580] ss:$8 sps:$4 sm:$0xff]   ;;  %v3218_v18 = vld [vmem:[%s4427_s1 + $0x674] ss:$8 sps:$4 sm:$0xff]  }
  0x86   :  { %2159 = vmatprep.mubr.bf16.mxu1 %v3129_v19  ;;  %v3221_v19 = vld [vmem:[%s4427_s1 + $0x774] ss:$8 sps:$4 sm:$0xff]  }
  0x87   :  { %2173 = vmatpush1.bf16.msra.mxu0 %v3114_v20  ;;  %v3210_v20 = vld [vmem:[%s4428_s0 + $0x20] ss:$72 sps:$4 sm:$0xff]  }
  0x88   :  { %2226 = vmatpush1.bf16.msra.mxu1 %v3117_v21  ;;  %2174 = vmatprep.subr.bf16.mxu0 %v3125_v22  ;;  %v3213_v21 = vld [vmem:[%s4428_s0 + $0x28] ss:$72 sps:$4 sm:$0xff]  }
  0x89   :  { %2227 = vmatprep.subr.bf16.mxu1 %v3128_v23  ;;  %v3216_v22 = vld [vmem:[%s4427_s1 + $0x670] ss:$8 sps:$4 sm:$0xff]  }
  0x8a   :  { %2107 = vmatmul.mubr.bf16.gmra.mxu0 %v3122_v24  ;;  %v3219_v23 = vld [vmem:[%s4427_s1 + $0x770] ss:$8 sps:$4 sm:$0xff]   ;;  %v3224_v24 = vld [vmem:[%s4427_s1 + $0x664] ss:$8 sps:$4 sm:$0xff]  }
  0x8b   :  { %2160 = vmatmul.mubr.bf16.gmra.mxu1 %v3131_v27  ;;  %2175 = vmatpush1.bf16.msra.mxu0 %v3123_v25  ;;  %v3227_v25 = vld [vmem:[%s4427_s1 + $0x764] ss:$8 sps:$4 sm:$0xff]  }
  0x8c   :  { %2228 = vmatpush1.bf16.msra.mxu1 %v3126_v26  ;;  %2176 = vmatprep.subr.bf16.mxu0 %v3134_v28  ;;  %v3228_v26 = vld [vmem:[%s4428_s0 + $0xb4] ss:$72 sps:$4 sm:$0xff]   ;;  %v3222_v28 = vld [vmem:[%s4427_s1 + $0x660] ss:$8 sps:$4 sm:$0xff]  }
  0x8d   :  { %2229 = vmatprep.subr.bf16.mxu1 %v3137_v29  ;;  %2202 = vmatprep.mubr.bf16.mxu0 %v3212_v33  ;;  %v3237_v27 = vld [vmem:[%s4428_s0 + $0xbc] ss:$72 sps:$4 sm:$0xff]   ;;  %v3225_v29 = vld [vmem:[%s4427_s1 + $0x760] ss:$8 sps:$4 sm:$0xff]   ;;  %v3231_v33 = vld [vmem:[%s4427_s1 + $0x650] ss:$8 sps:$4 sm:$0xff]  }
  0x8e   :  { %2255 = vmatprep.mubr.bf16.mxu1 %v3215_v35  ;;  %v3239_v35 = vld [vmem:[%s4428_s0 + $0xb8] ss:$72 sps:$4 sm:$0xff]  }
  0x8f   :  { %2177 = vmatpush1.bf16.msra.mxu0 %v3132_v30  ;;  %v3233_v30 = vld [vmem:[%s4427_s1 + $0x654] ss:$8 sps:$4 sm:$0xff]  }
  0x90   :  { %2230 = vmatpush1.bf16.msra.mxu1 %v3135_v31  ;;  %2178 = vmatprep.subr.bf16.mxu0 %v3140_v32  ;;  %v3236_v31 = vld [vmem:[%s4427_s1 + $0x754] ss:$8 sps:$4 sm:$0xff]   ;;  %v3230_v32 = vld [vmem:[%s4428_s0 + $0xb0] ss:$72 sps:$4 sm:$0xff]  }
  0x91   :  { %2231 = vmatprep.subr.bf16.mxu1 %v3143_v34  ;;  %v3234_v34 = vld [vmem:[%s4427_s1 + $0x750] ss:$8 sps:$4 sm:$0xff]  }
  0x93   :  { %2179 = vmatpush1.bf16.msra.mxu0 %v3138_v36  ;;  %v3242_v36 = vld [vmem:[%s4427_s1 + $0x644] ss:$8 sps:$4 sm:$0xff]  }
  0x94   :  { %2232 = vmatpush1.bf16.msra.mxu1 %v3141_v37  ;;  %2180 = vmatprep.subr.bf16.mxu0 %v3146_v38  ;;  %v3245_v37 = vld [vmem:[%s4427_s1 + $0x744] ss:$8 sps:$4 sm:$0xff]   ;;  %v3320_v38 = vld [vmem:[%s4428_s0 + $0x34] ss:$72 sps:$4 sm:$0xff]  }
  0x95   :  { %2233 = vmatprep.subr.bf16.mxu1 %v3149_v39  ;;  %v3323_v39 = vld [vmem:[%s4428_s0 + $0x3c] ss:$72 sps:$4 sm:$0xff]  }
  0x97   :  { %2181 = vmatpush1.bf16.msra.mxu0 %v3144_v40  ;;  %v3240_v40 = vld [vmem:[%s4427_s1 + $0x640] ss:$8 sps:$4 sm:$0xff]  }
  0x98   :  { %2234 = vmatpush1.bf16.msra.mxu1 %v3147_v41  ;;  %2182 = vmatprep.subr.bf16.mxu0 %v3152_v42  ;;  %v3243_v41 = vld [vmem:[%s4427_s1 + $0x740] ss:$8 sps:$4 sm:$0xff]   ;;  %v3248_v42 = vld [vmem:[%s4427_s1 + $0x634] ss:$8 sps:$4 sm:$0xff]  }
  0x99   :  { %2235 = vmatprep.subr.bf16.mxu1 %v3155_v43  ;;  %v3251_v43 = vld [vmem:[%s4427_s1 + $0x734] ss:$8 sps:$4 sm:$0xff]  }
  0x9b   :  { %2183 = vmatpush1.bf16.msra.mxu0 %v3150_v44  ;;  %v3246_v44 = vld [vmem:[%s4427_s1 + $0x630] ss:$8 sps:$4 sm:$0xff]  }
  0x9c   :  { %2236 = vmatpush1.bf16.msra.mxu1 %v3153_v45  ;;  %2184 = vmatprep.subr.bf16.mxu0 %v3158_v46  ;;  %v3249_v45 = vld [vmem:[%s4427_s1 + $0x730] ss:$8 sps:$4 sm:$0xff]   ;;  %v3254_v46 = vld [vmem:[%s4427_s1 + $0x624] ss:$8 sps:$4 sm:$0xff]  }
  0x9d   :  { %2237 = vmatprep.subr.bf16.mxu1 %v3161_v47  ;;  %v3257_v47 = vld [vmem:[%s4427_s1 + $0x724] ss:$8 sps:$4 sm:$0xff]  }
  0x9f   :  { %2185 = vmatpush1.bf16.msra.mxu0 %v3156_v48  ;;  %v3252_v48 = vld [vmem:[%s4427_s1 + $0x620] ss:$8 sps:$4 sm:$0xff]  }
  0xa0   :  { %2238 = vmatpush1.bf16.msra.mxu1 %v3159_v49  ;;  %2186 = vmatprep.subr.bf16.mxu0 %v3164_v50  ;;  %v3255_v49 = vld [vmem:[%s4427_s1 + $0x720] ss:$8 sps:$4 sm:$0xff]   ;;  %v3260_v50 = vld [vmem:[%s4427_s1 + $0x614] ss:$8 sps:$4 sm:$0xff]  }
  0xa1   :  { %2239 = vmatprep.subr.bf16.mxu1 %v3167_v51  ;;  %v3263_v51 = vld [vmem:[%s4427_s1 + $0x714] ss:$8 sps:$4 sm:$0xff]  }
  0xa3   :  { %2187 = vmatpush2.bf16.msra.mxu0 %v3162_v52  ;;  %v3258_v52 = vld [vmem:[%s4427_s1 + $0x610] ss:$8 sps:$4 sm:$0xff]  }
  0xa4   :  { %2240 = vmatpush2.bf16.msra.mxu1 %v3165_v53  ;;  %2188 = vmatprep.subr.bf16.mxu0 %v3170_v54  ;;  %v3261_v53 = vld [vmem:[%s4427_s1 + $0x710] ss:$8 sps:$4 sm:$0xff]   ;;  %v3266_v54 = vld [vmem:[%s4427_s1 + $0x604] ss:$8 sps:$4 sm:$0xff]  }
  0xa5   :  { %2241 = vmatprep.subr.bf16.mxu1 %v3173_v55  ;;  %v3269_v55 = vld [vmem:[%s4427_s1 + $0x704] ss:$8 sps:$4 sm:$0xff]  }
  0xa7   :  { %2189 = vmatpush2.bf16.msra.mxu0 %v3168_v56  ;;  %v3264_v56 = vld [vmem:[%s4427_s1 + $0x600] ss:$8 sps:$4 sm:$0xff]  }
  0xa8   :  { %2242 = vmatpush2.bf16.msra.mxu1 %v3171_v57  ;;  %2190 = vmatprep.subr.bf16.mxu0 %v3176_v58  ;;  %v3267_v57 = vld [vmem:[%s4427_s1 + $0x700] ss:$8 sps:$4 sm:$0xff]   ;;  %v3272_v58 = vld [vmem:[%s4427_s1 + $0x6f4] ss:$8 sps:$4 sm:$0xff]  }
  0xa9   :  { %2243 = vmatprep.subr.bf16.mxu1 %v3179_v59  ;;  %v3275_v59 = vld [vmem:[%s4427_s1 + $0x7f4] ss:$8 sps:$4 sm:$0xff]  }
  0xab   :  { %2191 = vmatpush2.bf16.msra.mxu0 %v3174_v60  ;;  %v3270_v60 = vld [vmem:[%s4427_s1 + $0x6f0] ss:$8 sps:$4 sm:$0xff]  }
  0xac   :  { %2244 = vmatpush2.bf16.msra.mxu1 %v3177_v61  ;;  %2192 = vmatprep.subr.bf16.mxu0 %v3182_v62  ;;  %v3273_v61 = vld [vmem:[%s4427_s1 + $0x7f0] ss:$8 sps:$4 sm:$0xff]   ;;  %v3278_v62 = vld [vmem:[%s4427_s1 + $0x6e4] ss:$8 sps:$4 sm:$0xff]  }
  0xad   :  { %2245 = vmatprep.subr.bf16.mxu1 %v3185_v63  ;;  %v3281_v63 = vld [vmem:[%s4427_s1 + $0x7e4] ss:$8 sps:$4 sm:$0xff]  }
  0xaf   :  { %2193 = vmatpush2.bf16.msra.mxu0 %v3180_v0  ;;  %v3276_v0 = vld [vmem:[%s4427_s1 + $0x6e0] ss:$8 sps:$4 sm:$0xff]  }
  0xb0   :  { %2246 = vmatpush2.bf16.msra.mxu1 %v3183_v1  ;;  %2194 = vmatprep.subr.bf16.mxu0 %v3188_v2  ;;  %v3279_v1 = vld [vmem:[%s4427_s1 + $0x7e0] ss:$8 sps:$4 sm:$0xff]   ;;  %v3284_v2 = vld [vmem:[%s4427_s1 + $0x6d4] ss:$8 sps:$4 sm:$0xff]  }
  0xb1   :  { %2247 = vmatprep.subr.bf16.mxu1 %v3191_v3  ;;  %v3287_v3 = vld [vmem:[%s4427_s1 + $0x7d4] ss:$8 sps:$4 sm:$0xff]  }
  0xb3   :  { %2195 = vmatpush2.bf16.msra.mxu0 %v3186_v4  ;;  %v3282_v4 = vld [vmem:[%s4427_s1 + $0x6d0] ss:$8 sps:$4 sm:$0xff]  }
  0xb4   :  { %2248 = vmatpush2.bf16.msra.mxu1 %v3189_v5  ;;  %2196 = vmatprep.subr.bf16.mxu0 %v3194_v6  ;;  %v3285_v5 = vld [vmem:[%s4427_s1 + $0x7d0] ss:$8 sps:$4 sm:$0xff]   ;;  %v3290_v6 = vld [vmem:[%s4427_s1 + $0x6c4] ss:$8 sps:$4 sm:$0xff]  }
  0xb5   :  { %2249 = vmatprep.subr.bf16.mxu1 %v3197_v7  ;;  %v3293_v7 = vld [vmem:[%s4427_s1 + $0x7c4] ss:$8 sps:$4 sm:$0xff]  }
  0xb7   :  { %2197 = vmatpush2.bf16.msra.mxu0 %v3192_v8  ;;  %v3288_v8 = vld [vmem:[%s4427_s1 + $0x6c0] ss:$8 sps:$4 sm:$0xff]  }
  0xb8   :  { %2250 = vmatpush2.bf16.msra.mxu1 %v3195_v9  ;;  %2198 = vmatprep.subr.bf16.mxu0 %v3200_v10  ;;  %v3291_v9 = vld [vmem:[%s4427_s1 + $0x7c0] ss:$8 sps:$4 sm:$0xff]   ;;  %v3296_v10 = vld [vmem:[%s4427_s1 + $0x6b4] ss:$8 sps:$4 sm:$0xff]  }
  0xb9   :  { %2251 = vmatprep.subr.bf16.mxu1 %v3203_v11  ;;  %v3299_v11 = vld [vmem:[%s4427_s1 + $0x7b4] ss:$8 sps:$4 sm:$0xff]  }
  0xbb   :  { %2199 = vmatpush2.bf16.msra.mxu0 %v3198_v12  ;;  %v3294_v12 = vld [vmem:[%s4427_s1 + $0x6b0] ss:$8 sps:$4 sm:$0xff]  }
  0xbc   :  { %2252 = vmatpush2.bf16.msra.mxu1 %v3201_v13  ;;  %2200 = vmatprep.subr.bf16.mxu0 %v3206_v14  ;;  %v3297_v13 = vld [vmem:[%s4427_s1 + $0x7b0] ss:$8 sps:$4 sm:$0xff]   ;;  %v3302_v14 = vld [vmem:[%s4427_s1 + $0x6a4] ss:$8 sps:$4 sm:$0xff]  }
  0xbd   :  { %2253 = vmatprep.subr.bf16.mxu1 %v3209_v15  ;;  %v3305_v15 = vld [vmem:[%s4427_s1 + $0x7a4] ss:$8 sps:$4 sm:$0xff]  }
  0xbf   :  { %2201 = vmatpush2.bf16.msra.mxu0 %v3204_v16  ;;  %v3300_v16 = vld [vmem:[%s4427_s1 + $0x6a0] ss:$8 sps:$4 sm:$0xff]  }
  0xc0   :  { %2254 = vmatpush2.bf16.msra.mxu1 %v3207_v17  ;;  %2276 = vmatprep.subr.bf16.mxu0 %v3218_v18  ;;  %v3303_v17 = vld [vmem:[%s4427_s1 + $0x7a0] ss:$8 sps:$4 sm:$0xff]   ;;  %v3308_v18 = vld [vmem:[%s4427_s1 + $0x694] ss:$8 sps:$4 sm:$0xff]  }
  0xc1   :  { %2329 = vmatprep.subr.bf16.mxu1 %v3221_v19  ;;  %v3311_v19 = vld [vmem:[%s4427_s1 + $0x794] ss:$8 sps:$4 sm:$0xff]  }
  0xc2   :  { %2203 = vmatmul.mubr.bf16.vlgmr.msra.gmra.mxu0 %v3210_v20  ;;  %v3306_v20 = vld [vmem:[%s4427_s1 + $0x690] ss:$8 sps:$4 sm:$0xff]  }
  0xc3   :  { %2256 = vmatmul.mubr.bf16.vlgmr.msra.gmra.mxu1 %v3213_v21  ;;  %2277 = vmatpush1.bf16.msra.mxu0 %v3216_v22  ;;  %v3309_v21 = vld [vmem:[%s4427_s1 + $0x790] ss:$8 sps:$4 sm:$0xff]   ;;  %v3314_v22 = vld [vmem:[%s4427_s1 + $0x684] ss:$8 sps:$4 sm:$0xff]  }
  0xc4   :  { %2330 = vmatpush1.bf16.msra.mxu1 %v3219_v23  ;;  %2278 = vmatprep.subr.bf16.mxu0 %v3224_v24  ;;  %v3317_v23 = vld [vmem:[%s4427_s1 + $0x784] ss:$8 sps:$4 sm:$0xff]   ;;  %v3312_v24 = vld [vmem:[%s4427_s1 + $0x680] ss:$8 sps:$4 sm:$0xff]  }
  0xc5   :  { %2331 = vmatprep.subr.bf16.mxu1 %v3227_v25  ;;  %2212 = vmatprep.mubr.bf16.mxu0 %v3228_v26  ;;  %v3315_v25 = vld [vmem:[%s4427_s1 + $0x780] ss:$8 sps:$4 sm:$0xff]   ;;  %v3326_v26 = vld [vmem:[%s4427_s1 + $0x874] ss:$8 sps:$4 sm:$0xff]  }
  0xc6   :  { %2265 = vmatprep.mubr.bf16.mxu1 %v3237_v27  ;;  %v3318_v27 = vld [vmem:[%s4428_s0 + $0x30] ss:$72 sps:$4 sm:$0xff]  }
  0xc7   :  { %2279 = vmatpush1.bf16.msra.mxu0 %v3222_v28  ;;  %v3321_v28 = vld [vmem:[%s4428_s0 + $0x38] ss:$72 sps:$4 sm:$0xff]  }
  0xc8   :  { %2332 = vmatpush1.bf16.msra.mxu1 %v3225_v29  ;;  %2280 = vmatprep.subr.bf16.mxu0 %v3233_v30  ;;  %v3324_v29 = vld [vmem:[%s4427_s1 + $0x870] ss:$8 sps:$4 sm:$0xff]   ;;  %v3329_v30 = vld [vmem:[%s4427_s1 + $0x864] ss:$8 sps:$4 sm:$0xff]  }
  0xc9   :  { %2333 = vmatprep.subr.bf16.mxu1 %v3236_v31  ;;  %v3330_v31 = vld [vmem:[%s4428_s0 + $0xc4] ss:$72 sps:$4 sm:$0xff]  }
  0xca   :  { %2213 = vmatmul.mubr.bf16.gmra.mxu0 %v3230_v32  ;;  %v3336_v32 = vld [vmem:[%s4428_s0 + $0xcc] ss:$72 sps:$4 sm:$0xff]  }
  0xcb   :  { %2266 = vmatmul.mubr.bf16.gmra.mxu1 %v3239_v35  ;;  %2281 = vmatpush1.bf16.msra.mxu0 %v3231_v33  ;;  %v3327_v33 = vld [vmem:[%s4427_s1 + $0x860] ss:$8 sps:$4 sm:$0xff]  }
  0xcc   :  { %2334 = vmatpush1.bf16.msra.mxu1 %v3234_v34  ;;  %2282 = vmatprep.subr.bf16.mxu0 %v3242_v36  ;;  %v3335_v34 = vld [vmem:[%s4427_s1 + $0x854] ss:$8 sps:$4 sm:$0xff]   ;;  %v3332_v35 = vld [vmem:[%s4428_s0 + $0xc0] ss:$72 sps:$4 sm:$0xff]  }
  0xcd   :  { %2335 = vmatprep.subr.bf16.mxu1 %v3245_v37  ;;  %2308 = vmatprep.mubr.bf16.mxu0 %v3320_v38  ;;  %v3338_v36 = vld [vmem:[%s4428_s0 + $0xc8] ss:$72 sps:$4 sm:$0xff]   ;;  %v3341_v38 = vld [vmem:[%s4427_s1 + $0x844] ss:$8 sps:$4 sm:$0xff]  }
  0xce   :  { %2361 = vmatprep.mubr.bf16.mxu1 %v3323_v39  ;;  %v3333_v37 = vld [vmem:[%s4427_s1 + $0x850] ss:$8 sps:$4 sm:$0xff]   ;;  %v3380_v39 = vld [vmem:[%s4428_s0 + $0x44] ss:$72 sps:$4 sm:$0xff]  }
  0xcf   :  { %2283 = vmatpush1.bf16.msra.mxu0 %v3240_v40  ;;  %v3383_v40 = vld [vmem:[%s4428_s0 + $0xd4] ss:$72 sps:$4 sm:$0xff]  }
  0xd0   :  { %2336 = vmatpush1.bf16.msra.mxu1 %v3243_v41  ;;  %2284 = vmatprep.subr.bf16.mxu0 %v3248_v42  ;;  %v3339_v41 = vld [vmem:[%s4427_s1 + $0x840] ss:$8 sps:$4 sm:$0xff]   ;;  %v3344_v42 = vld [vmem:[%s4427_s1 + $0x834] ss:$8 sps:$4 sm:$0xff]  }
  0xd1   :  { %2337 = vmatprep.subr.bf16.mxu1 %v3251_v43  ;;  %v3342_v43 = vld [vmem:[%s4427_s1 + $0x830] ss:$8 sps:$4 sm:$0xff]  }
  0xd3   :  { %2285 = vmatpush1.bf16.msra.mxu0 %v3246_v44  ;;  %v3347_v44 = vld [vmem:[%s4427_s1 + $0x824] ss:$8 sps:$4 sm:$0xff]  }
  0xd4   :  { %2338 = vmatpush1.bf16.msra.mxu1 %v3249_v45  ;;  %2286 = vmatprep.subr.bf16.mxu0 %v3254_v46  ;;  %v3345_v45 = vld [vmem:[%s4427_s1 + $0x820] ss:$8 sps:$4 sm:$0xff]   ;;  %v3350_v46 = vld [vmem:[%s4427_s1 + $0x814] ss:$8 sps:$4 sm:$0xff]  }
  0xd5   :  { %2339 = vmatprep.subr.bf16.mxu1 %v3257_v47  ;;  %v3348_v47 = vld [vmem:[%s4427_s1 + $0x810] ss:$8 sps:$4 sm:$0xff]  }
  0xd7   :  { %2287 = vmatpush1.bf16.msra.mxu0 %v3252_v48  ;;  %v3353_v48 = vld [vmem:[%s4427_s1 + $0x804] ss:$8 sps:$4 sm:$0xff]  }
  0xd8   :  { %2340 = vmatpush1.bf16.msra.mxu1 %v3255_v49  ;;  %2288 = vmatprep.subr.bf16.mxu0 %v3260_v50  ;;  %v3351_v49 = vld [vmem:[%s4427_s1 + $0x800] ss:$8 sps:$4 sm:$0xff]   ;;  %v3356_v50 = vld [vmem:[%s4427_s1 + $0x8f4] ss:$8 sps:$4 sm:$0xff]  }
  0xd9   :  { %2341 = vmatprep.subr.bf16.mxu1 %v3263_v51  ;;  %v3354_v51 = vld [vmem:[%s4427_s1 + $0x8f0] ss:$8 sps:$4 sm:$0xff]  }
  0xdb   :  { %2289 = vmatpush1.bf16.msra.mxu0 %v3258_v52  ;;  %v3359_v52 = vld [vmem:[%s4427_s1 + $0x8e4] ss:$8 sps:$4 sm:$0xff]  }
  0xdc   :  { %2342 = vmatpush1.bf16.msra.mxu1 %v3261_v53  ;;  %2290 = vmatprep.subr.bf16.mxu0 %v3266_v54  ;;  %v3357_v53 = vld [vmem:[%s4427_s1 + $0x8e0] ss:$8 sps:$4 sm:$0xff]   ;;  %v3362_v54 = vld [vmem:[%s4427_s1 + $0x8d4] ss:$8 sps:$4 sm:$0xff]  }
  0xdd   :  { %2343 = vmatprep.subr.bf16.mxu1 %v3269_v55  ;;  %v3360_v55 = vld [vmem:[%s4427_s1 + $0x8d0] ss:$8 sps:$4 sm:$0xff]  }
  0xdf   :  { %2291 = vmatpush1.bf16.msra.mxu0 %v3264_v56  ;;  %v3365_v56 = vld [vmem:[%s4427_s1 + $0x8c4] ss:$8 sps:$4 sm:$0xff]  }
  0xe0   :  { %2344 = vmatpush1.bf16.msra.mxu1 %v3267_v57  ;;  %2292 = vmatprep.subr.bf16.mxu0 %v3272_v58  ;;  %v3363_v57 = vld [vmem:[%s4427_s1 + $0x8c0] ss:$8 sps:$4 sm:$0xff]   ;;  %v3368_v58 = vld [vmem:[%s4427_s1 + $0x8b4] ss:$8 sps:$4 sm:$0xff]  }
  0xe1   :  { %2345 = vmatprep.subr.bf16.mxu1 %v3275_v59  ;;  %v3366_v59 = vld [vmem:[%s4427_s1 + $0x8b0] ss:$8 sps:$4 sm:$0xff]  }
  0xe3   :  { %2293 = vmatpush2.bf16.msra.mxu0 %v3270_v60  ;;  %v3371_v60 = vld [vmem:[%s4427_s1 + $0x8a4] ss:$8 sps:$4 sm:$0xff]  }
  0xe4   :  { %2346 = vmatpush2.bf16.msra.mxu1 %v3273_v61  ;;  %2294 = vmatprep.subr.bf16.mxu0 %v3278_v62  ;;  %v3369_v61 = vld [vmem:[%s4427_s1 + $0x8a0] ss:$8 sps:$4 sm:$0xff]   ;;  %v3374_v62 = vld [vmem:[%s4427_s1 + $0x894] ss:$8 sps:$4 sm:$0xff]  }
  0xe5   :  { %2347 = vmatprep.subr.bf16.mxu1 %v3281_v63  ;;  %v3372_v63 = vld [vmem:[%s4427_s1 + $0x890] ss:$8 sps:$4 sm:$0xff]  }
  0xe7   :  { %2295 = vmatpush2.bf16.msra.mxu0 %v3276_v0  ;;  %v3377_v0 = vld [vmem:[%s4427_s1 + $0x884] ss:$8 sps:$4 sm:$0xff]  }
  0xe8   :  { %2348 = vmatpush2.bf16.msra.mxu1 %v3279_v1  ;;  %2296 = vmatprep.subr.bf16.mxu0 %v3284_v2  ;;  %v3375_v1 = vld [vmem:[%s4427_s1 + $0x880] ss:$8 sps:$4 sm:$0xff]  }
  0xe9   :  { %2349 = vmatprep.subr.bf16.mxu1 %v3287_v3  ;;  %v3378_v2 = vld [vmem:[%s4428_s0 + $0x40] ss:$72 sps:$4 sm:$0xff]   ;;  %v3381_v3 = vld [vmem:[%s4428_s0 + $0xd0] ss:$72 sps:$4 sm:$0xff]  }
  0xeb   :  { %2297 = vmatpush2.bf16.msra.mxu0 %v3282_v4 }
  0xec   :  { %2350 = vmatpush2.bf16.msra.mxu1 %v3285_v5  ;;  %2298 = vmatprep.subr.bf16.mxu0 %v3290_v6 }
  0xed   :  { %2351 = vmatprep.subr.bf16.mxu1 %v3293_v7 }
  0xef   :  { %2299 = vmatpush2.bf16.msra.mxu0 %v3288_v8 }
  0xf0   :  { %2352 = vmatpush2.bf16.msra.mxu1 %v3291_v9  ;;  %2300 = vmatprep.subr.bf16.mxu0 %v3296_v10 }
  0xf1   :  { %2353 = vmatprep.subr.bf16.mxu1 %v3299_v11 }
  0xf3   :  { %2301 = vmatpush2.bf16.msra.mxu0 %v3294_v12 }
  0xf4   :  { %2354 = vmatpush2.bf16.msra.mxu1 %v3297_v13  ;;  %2302 = vmatprep.subr.bf16.mxu0 %v3302_v14 }
  0xf5   :  { %2355 = vmatprep.subr.bf16.mxu1 %v3305_v15 }
  0xf7   :  { %2303 = vmatpush2.bf16.msra.mxu0 %v3300_v16 }
  0xf8   :  { %2356 = vmatpush2.bf16.msra.mxu1 %v3303_v17  ;;  %2304 = vmatprep.subr.bf16.mxu0 %v3308_v18 }
  0xf9   :  { %2357 = vmatprep.subr.bf16.mxu1 %v3311_v19 }
  0xfb   :  { %2305 = vmatpush2.bf16.msra.mxu0 %v3306_v20 }
  0xfc   :  { %2358 = vmatpush2.bf16.msra.mxu1 %v3309_v21  ;;  %2306 = vmatprep.subr.bf16.mxu0 %v3314_v22 }
  0xfd   :  { %2359 = vmatprep.subr.bf16.mxu1 %v3317_v23 }
  0xff   :  { %2307 = vmatpush2.bf16.msra.mxu0 %v3312_v24 }
 0x100   :  { %2360 = vmatpush2.bf16.msra.mxu1 %v3315_v25  ;;  %2382 = vmatprep.subr.bf16.mxu0 %v3326_v26 }
 0x101   :  { %2865 = vmatprep.subr.bf16.mxu1 %v3326_v26 }
 0x102   :  { %2309 = vmatmul.mubr.bf16.vlgmr.msra.gmra.mxu0 %v3318_v27  ;;  %v1992_v4 = vpop.f32.mrf.mxu0 }
 0x103   :  { %2362 = vmatmul.mubr.bf16.vlgmr.msra.gmra.mxu1 %v3321_v28  ;;  %2383 = vmatpush1.bf16.msra.mxu0 %v3324_v29  ;;  %v2045_v6 = vpop.f32.mrf.mxu1 }
 0x104   :  { %2881 = vmatpush1.bf16.msra.mxu1 %v3324_v29  ;;  %2384 = vmatprep.subr.bf16.mxu0 %v3329_v30  ;;  %v1994_v5 = vpop.f32.mrf.mxu0 }
 0x105   :  { %2866 = vmatprep.subr.bf16.mxu1 %v3329_v30  ;;  %2318 = vmatprep.mubr.bf16.mxu0 %v3330_v31  ;;  %v2047_v8 = vpop.f32.mrf.mxu1 }
 0x106   :  { %2371 = vmatprep.mubr.bf16.mxu1 %v3336_v32  ;;  %v1996_v7 = vpop.f32.mrf.mxu0 }
 0x107   :  { %2385 = vmatpush1.bf16.msra.mxu0 %v3327_v33  ;;  %v2049_v10 = vpop.f32.mrf.mxu1 }
 0x108   :  { %2882 = vmatpush1.bf16.msra.mxu1 %v3327_v33  ;;  %2386 = vmatprep.subr.bf16.mxu0 %v3335_v34  ;;  %v1998_v9 = vpop.f32.mrf.mxu0 }
 0x109   :  { %2867 = vmatprep.subr.bf16.mxu1 %v3335_v34  ;;  %v2051_v12 = vpop.f32.mrf.mxu1 }
 0x10a   :  { %2319 = vmatmul.mubr.bf16.gmra.mxu0 %v3332_v35  ;;  %v2002_v11 = vpop.f32.mrf.mxu0 }
 0x10b   :  { %2372 = vmatmul.mubr.bf16.gmra.mxu1 %v3338_v36  ;;  %2387 = vmatpush1.bf16.msra.mxu0 %v3333_v37  ;;  %v2055_v14 = vpop.f32.mrf.mxu1 }
 0x10c   :  { %2883 = vmatpush1.bf16.msra.mxu1 %v3333_v37  ;;  %2388 = vmatprep.subr.bf16.mxu0 %v3341_v38  ;;  %v2004_v13 = vpop.f32.mrf.mxu0 }
 0x10d   :  { %2868 = vmatprep.subr.bf16.mxu1 %v3341_v38  ;;  %2414 = vmatprep.mubr.bf16.mxu0 %v3380_v39  ;;  %v2057_v16 = vpop.f32.mrf.mxu1 }
 0x10e   :  { %2424 = vmatprep.mubr.bf16.mxu1 %v3383_v40  ;;  %v2006_v15 = vpop.f32.mrf.mxu0 }
 0x10f   :  { %2389 = vmatpush1.bf16.msra.mxu0 %v3339_v41  ;;  %v2059_v18 = vpop.f32.mrf.mxu1 }
 0x110   :  { %2884 = vmatpush1.bf16.msra.mxu1 %v3339_v41  ;;  %2390 = vmatprep.subr.bf16.mxu0 %v3344_v42  ;;  %v2008_v17 = vpop.f32.mrf.mxu0 }
 0x111   :  { %2869 = vmatprep.subr.bf16.mxu1 %v3344_v42  ;;  %v2061_v20 = vpop.f32.mrf.mxu1 }
 0x113   :  { %2391 = vmatpush1.bf16.msra.mxu0 %v3342_v43 }
 0x114   :  { %2885 = vmatpush1.bf16.msra.mxu1 %v3342_v43  ;;  %2392 = vmatprep.subr.bf16.mxu0 %v3347_v44 }
 0x115   :  { %2870 = vmatprep.subr.bf16.mxu1 %v3347_v44 }
 0x117   :  { %2393 = vmatpush1.bf16.msra.mxu0 %v3345_v45 }
 0x118   :  { %2886 = vmatpush1.bf16.msra.mxu1 %v3345_v45  ;;  %2394 = vmatprep.subr.bf16.mxu0 %v3350_v46 }
 0x119   :  { %2871 = vmatprep.subr.bf16.mxu1 %v3350_v46 }
 0x11b   :  { %2395 = vmatpush1.bf16.msra.mxu0 %v3348_v47 }
 0x11c   :  { %2887 = vmatpush1.bf16.msra.mxu1 %v3348_v47  ;;  %2396 = vmatprep.subr.bf16.mxu0 %v3353_v48 }
 0x11d   :  { %2872 = vmatprep.subr.bf16.mxu1 %v3353_v48 }
 0x11f   :  { %2397 = vmatpush1.bf16.msra.mxu0 %v3351_v49 }
 0x120   :  { %2888 = vmatpush1.bf16.msra.mxu1 %v3351_v49  ;;  %2398 = vmatprep.subr.bf16.mxu0 %v3356_v50 }
 0x121   :  { %2873 = vmatprep.subr.bf16.mxu1 %v3356_v50 }
 0x123   :  { %2399 = vmatpush2.bf16.msra.mxu0 %v3354_v51 }
 0x124   :  { %2889 = vmatpush2.bf16.msra.mxu1 %v3354_v51  ;;  %2400 = vmatprep.subr.bf16.mxu0 %v3359_v52 }
 0x125   :  { %2874 = vmatprep.subr.bf16.mxu1 %v3359_v52 }
 0x127   :  { %2401 = vmatpush2.bf16.msra.mxu0 %v3357_v53 }
 0x128   :  { %2890 = vmatpush2.bf16.msra.mxu1 %v3357_v53  ;;  %2402 = vmatprep.subr.bf16.mxu0 %v3362_v54 }
 0x129   :  { %2875 = vmatprep.subr.bf16.mxu1 %v3362_v54 }
 0x12b   :  { %2403 = vmatpush2.bf16.msra.mxu0 %v3360_v55 }
 0x12c   :  { %2891 = vmatpush2.bf16.msra.mxu1 %v3360_v55  ;;  %2404 = vmatprep.subr.bf16.mxu0 %v3365_v56 }
 0x12d   :  { %2876 = vmatprep.subr.bf16.mxu1 %v3365_v56 }
 0x12f   :  { %2405 = vmatpush2.bf16.msra.mxu0 %v3363_v57 }
 0x130   :  { %2892 = vmatpush2.bf16.msra.mxu1 %v3363_v57  ;;  %2406 = vmatprep.subr.bf16.mxu0 %v3368_v58 }
 0x131   :  { %2877 = vmatprep.subr.bf16.mxu1 %v3368_v58  ;;  %v2046_v58 = vadd.f32 %v2045_v6, %v1992_v4 }
 0x133   :  { %2407 = vmatpush2.bf16.msra.mxu0 %v3366_v59 }
 0x134   :  { %2893 = vmatpush2.bf16.msra.mxu1 %v3366_v59  ;;  %2408 = vmatprep.subr.bf16.mxu0 %v3371_v60  ;;  %v2056_v59 = vadd.f32 %v2055_v14, %v2002_v11 }
 0x135   :  { %2878 = vmatprep.subr.bf16.mxu1 %v3371_v60  ;;  %v2048_v60 = vadd.f32 %v2047_v8, %v1994_v5  ;;  %v2062_v8 = vadd.f32 %v2061_v20, %v2008_v17 }
 0x137   :  { %2409 = vmatpush2.bf16.msra.mxu0 %v3369_v61 }
 0x138   :  { %2894 = vmatpush2.bf16.msra.mxu1 %v3369_v61  ;;  %2410 = vmatprep.subr.bf16.mxu0 %v3374_v62 }
 0x139   :  { %2879 = vmatprep.subr.bf16.mxu1 %v3374_v62  ;;  %v2058_v62 = vadd.f32 %v2057_v16, %v2004_v13 }
 0x13b   :  { %2411 = vmatpush2.bf16.msra.mxu0 %v3372_v63 }
 0x13c   :  { %2895 = vmatpush2.bf16.msra.mxu1 %v3372_v63  ;;  %2412 = vmatprep.subr.bf16.mxu0 %v3377_v0 }
 0x13d   :  { %2880 = vmatprep.subr.bf16.mxu1 %v3377_v0 }
 0x13f   :  { %2413 = vmatpush2.bf16.msra.mxu0 %v3375_v1 }
 0x140   :  { %2896 = vmatpush2.bf16.msra.mxu1 %v3375_v1 }
 0x142   :  { %2415 = vmatmul.mubr.bf16.vlgmr.msra.gmra.mxu0 %v3378_v2  ;;  %v2098_v19 = vpop.f32.mrf.mxu0 }
 0x143   :  { %2425 = vmatmul.mubr.bf16.vlgmr.msra.gmra.mxu1 %v3381_v3  ;;  %v2151_v22 = vpop.f32.mrf.mxu1  ;;  %v2099_v63 = vadd.f32 %v2098_v19, %v2046_v58  ;;  %v2050_v3 = vadd.f32 %v2049_v10, %v1996_v7 }
 0x144   :  { %v2100_v21 = vpop.f32.mrf.mxu0 }
 0x145   :  { %v2153_v24 = vpop.f32.mrf.mxu1  ;;  %v2101_v1 = vadd.f32 %v2100_v21, %v2048_v60  ;;  %v2152_v6 = vadd.f32 %v2151_v22, %v2099_v63 }
 0x146   :  { %v2102_v23 = vpop.f32.mrf.mxu0 }
 0x147   :  { %v2155_v26 = vpop.f32.mrf.mxu1  ;;  %v2103_v11 = vadd.f32 %v2102_v23, %v2050_v3  ;;  %v2154_v13 = vadd.f32 %v2153_v24, %v2101_v1 }
 0x148   :  { %v2104_v25 = vpop.f32.mrf.mxu0 }
 0x149   :  { %v2157_v28 = vpop.f32.mrf.mxu1  ;;  %v2156_v7 = vadd.f32 %v2155_v26, %v2103_v11 }
 0x14a   :  { %v2108_v27 = vpop.f32.mrf.mxu0 }
 0x14b   :  { %v2161_v30 = vpop.f32.mrf.mxu1  ;;  %v2109_v0 = vadd.f32 %v2108_v27, %v2056_v59 }
 0x14c   :  { %v2110_v29 = vpop.f32.mrf.mxu0 }
 0x14d   :  { %v2163_v32 = vpop.f32.mrf.mxu1  ;;  %v2162_v14 = vadd.f32 %v2161_v30, %v2109_v0 }
 0x14e   :  { %v2112_v31 = vpop.f32.mrf.mxu0 }
 0x14f   :  { %v2165_v34 = vpop.f32.mrf.mxu1 }
 0x150   :  { %v2114_v33 = vpop.f32.mrf.mxu0 }
 0x151   :  { %v2167_v36 = vpop.f32.mrf.mxu1  ;;  %v2115_v59 = vadd.f32 %v2114_v33, %v2062_v8 }
 0x182   :  { %v2204_v35 = vpop.f32.mrf.mxu0 }
 0x183   :  { %v2257_v37 = vpop.f32.mrf.mxu1  ;;  %v2205_v58 = vadd.f32 %v2204_v35, %v2152_v6 }
 0x184   :  { %v2206_v38 = vpop.f32.mrf.mxu0 }
 0x185   :  { %v2259_v39 = vpop.f32.mrf.mxu1  ;;  %v2207_v21 = vadd.f32 %v2206_v38, %v2154_v13 }
 0x186   :  { %v2208_v40 = vpop.f32.mrf.mxu0 }
 0x187   :  { %v4382_v41 = vpop.f32.mrf.mxu1  ;;  %v2260_v30 = vadd.f32 %v2259_v39, %v2207_v21 }
 0x188   :  { %4432 = vst [vmem:[#allocation2_spill] sm:$0xff] %v4382_v41  ;;  %v2210_v42 = vpop.f32.mrf.mxu0  ;;  %v2052_v41 = vadd.f32 %v2051_v12, %v1998_v9  ;;  %v2258_v12 = vadd.f32 %v2257_v37, %v2205_v58 }
 0x189   :  { %v4384_v43 = vpop.f32.mrf.mxu1 }
 0x18a   :  { %4433 = vst [vmem:[#allocation3_spill] sm:$0xff] %v4384_v43  ;;  %v2214_v44 = vpop.f32.mrf.mxu0  ;;  %v2060_v43 = vadd.f32 %v2059_v18, %v2006_v15  ;;  %v2105_v16 = vadd.f32 %v2104_v25, %v2052_v41  ;;  %v2209_v18 = vadd.f32 %v2208_v40, %v2156_v7 }
 0x18b   :  { %v2267_v45 = vpop.f32.mrf.mxu1  ;;  %v2215_v27 = vadd.f32 %v2214_v44, %v2162_v14 }
 0x18c   :  { %v2216_v46 = vpop.f32.mrf.mxu0  ;;  %v2113_v5 = vadd.f32 %v2112_v31, %v2060_v43  ;;  %v2158_v9 = vadd.f32 %v2157_v28, %v2105_v16 }
 0x18d   :  { %v2269_v47 = vpop.f32.mrf.mxu1  ;;  %v2268_v22 = vadd.f32 %v2267_v45, %v2215_v27 }
 0x18e   :  { %v2218_v48 = vpop.f32.mrf.mxu0  ;;  %v2166_v10 = vadd.f32 %v2165_v34, %v2113_v5  ;;  %v2211_v17 = vadd.f32 %v2210_v42, %v2158_v9 }
 0x18f   :  { %v2271_v49 = vpop.f32.mrf.mxu1  ;;  %v4437_v38 = vld [vmem:[#allocation2_spill] sm:$0xff] }
 0x190   :  { %v2220_v50 = vpop.f32.mrf.mxu0  ;;  %v2219_v23 = vadd.f32 %v2218_v48, %v2166_v10  ;;  %v2262_v41 = vadd.f32 %v4437_v38, %v2209_v18  ;;  %v3384_v38 = vmov 1966171168  }
 0x191   :  { %v4386_v51 = vpop.f32.mrf.mxu1  ;;  %v4438_v43 = vld [vmem:[#allocation3_spill] sm:$0xff] }
 0x192   :  { %4434 = vst [vmem:[#allocation4_spill] sm:$0xff] %v4386_v51  ;;  %v2111_v51 = vadd.f32 %v2110_v29, %v2058_v62  ;;  %v2168_v29 = vadd.f32 %v2167_v36, %v2115_v59  ;;  %v2272_v26 = vadd.f32 %v2271_v49, %v2219_v23  ;;  %v2264_v28 = vadd.f32 %v4438_v43, %v2211_v17 }
 0x194   :  { %v2164_v19 = vadd.f32 %v2163_v32, %v2111_v51  ;;  %v2221_v33 = vadd.f32 %v2220_v50, %v2168_v29 }
 0x196   :  { %v2217_v15 = vadd.f32 %v2216_v46, %v2164_v19 }
 0x198   :  { %v2270_v25 = vadd.f32 %v2269_v47, %v2217_v15 }
 0x199   :  { %v4439_v42 = vld [vmem:[#allocation4_spill] sm:$0xff] }
 0x19a   :  { %v2274_v46 = vadd.f32 %v4439_v42, %v2221_v33 }
 0x1c2   :  { %v2310_v52 = vpop.f32.mrf.mxu0 }
 0x1c3   :  { %v2363_v53 = vpop.f32.mrf.mxu1  ;;  %v2311_v31 = vadd.f32 %v2310_v52, %v2258_v12 }
 0x1c4   :  { %v2312_v54 = vpop.f32.mrf.mxu0 }
 0x1c5   :  { %v2365_v55 = vpop.f32.mrf.mxu1  ;;  %v2313_v35 = vadd.f32 %v2312_v54, %v2260_v30  ;;  %v2364_v44 = vadd.f32 %v2363_v53, %v2311_v31 }
 0x1c6   :  { %v2314_v56 = vpop.f32.mrf.mxu0 }
 0x1c7   :  { %v4388_v57 = vpop.f32.mrf.mxu1  ;;  %v2315_v45 = vadd.f32 %v2314_v56, %v2262_v41  ;;  %v2366_v48 = vadd.f32 %v2365_v55, %v2313_v35  ;;  %v2465_v41 = vunpack.c.l.s4 %v3384_v38 }
 0x1c8   :  { %4435 = vst [vmem:[#allocation5_spill] sm:$0xff] %v4388_v57  ;;  %v2316_v61 = vpop.f32.mrf.mxu0 }
 0x1c9   :  { %v4390_v2 = vpop.f32.mrf.mxu1  ;;  %v2317_v52 = vadd.f32 %v2316_v61, %v2264_v28 }
 0x1ca   :  { %4436 = vst [vmem:[#allocation6_spill] sm:$0xff] %v4390_v2  ;;  %v2320_v57 = vpop.f32.mrf.mxu0 }
 0x1cb   :  { %v2373_v4 = vpop.f32.mrf.mxu1  ;;  %v2321_v32 = vadd.f32 %v2320_v57, %v2268_v22 }
 0x1cc   :  { %v2322_v60 = vpop.f32.mrf.mxu0 }
 0x1cd   :  { %v2375_v2 = vpop.f32.mrf.mxu1  ;;  %v2323_v34 = vadd.f32 %v2322_v60, %v2270_v25  ;;  %v2374_v36 = vadd.f32 %v2373_v4, %v2321_v32 }
 0x1ce   :  { %v2324_v20 = vpop.f32.mrf.mxu0 }
 0x1cf   :  { %v2377_v24 = vpop.f32.mrf.mxu1  ;;  %v2325_v39 = vadd.f32 %v2324_v20, %v2272_v26  ;;  %v2376_v50 = vadd.f32 %v2375_v2, %v2323_v34  ;;  %v4440_v0 = vld [vmem:[#allocation5_spill] sm:$0xff]  ;;  %v2467_v26 = vlaneseq }
 0x1d0   :  { %v2326_v37 = vpop.f32.mrf.mxu0  ;;  %v2368_v1 = vadd.f32 %v4440_v0, %v2315_v45 }
 0x1d1   :  { %v2379_v40 = vpop.f32.mrf.mxu1  ;;  %v2327_v62 = vadd.f32 %v2326_v37, %v2274_v46  ;;  %v2378_v3 = vadd.f32 %v2377_v24, %v2325_v39  ;;  %v4441_v2 = vld [vmem:[#allocation6_spill] sm:$0xff]  ;;  %v2466_v39 = vunpack.c.0.s8 %v2465_v41  ;;  %v2468_v42 = vshrl.u32 %v2467_v26, 7 }
 0x1d2   :  { %v2370_v4 = vadd.f32 %v4441_v2, %v2317_v52  ;;  %vm2481_vm0 = vcmp.lt.s32.totalorder %v2467_v26, 256 }
 0x1d3   :  { %v2380_v14 = vadd.f32 %v2379_v40, %v2327_v62 }
 0x202   :  { %v2416_v47 = vpop.f32.mrf.mxu0 }
 0x203   :  { %v2426_v51 = vpop.f32.mrf.mxu1  ;;  %v2417_v54 = vadd.f32 %v2416_v47, %v2364_v44 }
 0x204   :  { %v2427_v57 = vadd.f32 %v2426_v51, %v2374_v36  ;;  %v2418_v49 = vpop.f32.mrf.mxu0 }
 0x205   :  { %v2428_v63 = vpop.f32.mrf.mxu1  ;;  %2435 = vst [vmem:[%s4429_s2] sm:$0xff] %v2417_v54  ;;  %v2419_v53 = vadd.f32 %v2418_v49, %v2366_v48  ;;  %v2484_v13 = vmul.f32 %v2417_v54, %v2417_v54  ;;  %v2469_v49 = vsub.s32 %v2466_v39, %v2468_v42 }
 0x206   :  { %2439 = vst [vmem:[%s4429_s2 + $0x20] sm:$0xff] %v2427_v57  ;;  %v2429_v55 = vadd.f32 %v2428_v63, %v2376_v50  ;;  %v2420_v56 = vpop.f32.mrf.mxu0  ;;  %v2488_v27 = vmul.f32 %v2427_v57, %v2427_v57 }
 0x207   :  { %v2430_v61 = vpop.f32.mrf.mxu1  ;;  %2436 = vst [vmem:[%s4429_s2 + $0x8] sm:$0xff] %v2419_v53  ;;  %v2421_v6 = vadd.f32 %v2420_v56, %v2368_v1  ;;  %v2485_v59 = vmul.f32 %v2419_v53, %v2419_v53 }
 0x208   :  { %2440 = vst [vmem:[%s4429_s2 + $0x28] sm:$0xff] %v2429_v55  ;;  %v2431_v11 = vadd.f32 %v2430_v61, %v2378_v3  ;;  %v2422_v5 = vpop.f32.mrf.mxu0  ;;  %v2489_v9 = vmul.f32 %v2429_v55, %v2429_v55 }
 0x209   :  { %v2432_v8 = vpop.f32.mrf.mxu1  ;;  %2437 = vst [vmem:[%s4429_s2 + $0x10] sm:$0xff] %v2421_v6  ;;  %v2443_v16 = vadd.f32 %v2421_v6, %v2417_v54  ;;  %v2486_v19 = vmul.f32 %v2421_v6, %v2421_v6  ;;  %v2423_v58 = vadd.f32 %v2422_v5, %v2370_v4 }
 0x20a   :  { %2441 = vst [vmem:[%s4429_s2 + $0x30] sm:$0xff] %v2431_v11  ;;  %v2433_v21 = vadd.f32 %v2432_v8, %v2380_v14  ;;  %v2490_v12 = vmul.f32 %v2431_v11, %v2431_v11 }
 0x20b   :  { %v2492_v60 = vadd.f32 %v2486_v19, %v2484_v13  ;;  %v2444_v7 = vadd.f32 %v2443_v16, %v2427_v57  ;;  %2438 = vst [vmem:[%s4429_s2 + $0x18] sm:$0xff] %v2423_v58  ;;  %v2452_v10 = vadd.f32 %v2423_v58, %v2419_v53  ;;  %v2487_v15 = vmul.f32 %v2423_v58, %v2423_v58 }
 0x20c   :  { %2442 = vst [vmem:[%s4429_s2 + $0x38] sm:$0xff] %v2433_v21  ;;  %v2491_v30 = vmul.f32 %v2433_v21, %v2433_v21 }
 0x20d   :  { %v2445_v18 = vadd.f32 %v2444_v7, %v2431_v11  ;;  %v2493_v22 = vadd.f32 %v2492_v60, %v2488_v27  ;;  %v2501_v23 = vadd.f32 %v2487_v15, %v2485_v59  ;;  %v2453_v29 = vadd.f32 %v2452_v10, %v2429_v55 }
 0x20f   :  { %v2446_v17 = vrot.slane %v2445_v18, 4  ;;  %v2494_v20 = vadd.f32 %v2493_v22, %v2490_v12  ;;  %v2454_v24 = vadd.f32 %v2453_v29, %v2433_v21  ;;  %v2502_v25 = vadd.f32 %v2501_v23, %v2489_v9 }
 0x211   :  { %v2447_v31 = vadd.f32 %v2446_v17, %v2445_v18  ;;  %v2495_v32 = vrot.slane %v2494_v20, 4  ;;  %v2455_v33 = vrot.slane %v2454_v24, 4  ;;  %v2503_v35 = vadd.f32 %v2502_v25, %v2491_v30 }
 0x213   :  { %v2448_v34 = vrot.slane %v2447_v31, 2  ;;  %v2496_v43 = vadd.f32 %v2495_v32, %v2494_v20  ;;  %v2456_v28 = vadd.f32 %v2455_v33, %v2454_v24  ;;  %v2504_v37 = vrot.slane %v2503_v35, 4 }
 0x215   :  { %v2449_v40 = vadd.f32 %v2448_v34, %v2447_v31  ;;  %v2497_v44 = vrot.slane %v2496_v43, 2  ;;  %v2457_v45 = vrot.slane %v2456_v28, 2  ;;  %v2505_v36 = vadd.f32 %v2504_v37, %v2503_v35 }
 0x217   :  { %v2450_v46 = vrot.slane %v2449_v40, 1  ;;  %v2498_v48 = vadd.f32 %v2497_v44, %v2496_v43  ;;  %v2458_v47 = vadd.f32 %v2457_v45, %v2456_v28  ;;  %v2506_v51 = vrot.slane %v2505_v36, 2 }
 0x219   :  { %v2499_v52 = vrot.slane %v2498_v48, 1  ;;  %v2459_v50 = vrot.slane %v2458_v47, 1  ;;  %v2507_v54 = vadd.f32 %v2506_v51, %v2505_v36  ;;  %v2451_v57 = vadd.f32 %v2450_v46, %v2449_v40 }
 0x21b   :  { %v2460_v62 = vadd.f32 %v2459_v50, %v2458_v47  ;;  %v2508_v63 = vrot.slane %v2507_v54, 1  ;;  %v2500_v0 = vadd.f32 %v2499_v52, %v2498_v48 }
 0x21d   :  { %v2463_v1 = vcombine.low %v2451_v57, %v2460_v62  ;;  %v2509_v3 = vadd.f32 %v2508_v63, %v2507_v54 }
 0x21f   :  { %v2470_v53 = vrot.slane %v2463_v1, %v2469_v49  ;;  %v2512_v55 = vcombine.low %v2500_v0, %v2509_v3 }
 0x221   :  { %v2477_v56 = vrot.slane %v2470_v53, %v2469_v49  ;;  %v2519_v61 = vrot.slane %v2512_v55, %v2469_v49 }
 0x223   :  { %2483 = vst.msk [vmem:[%s4430_s3] sm:$0x3] %vm2481_vm0, %v2477_v56  ;;  %v2526_v2 = vrot.slane %v2519_v61, %v2469_v49 }
 0x225   :  { %2528 = vst.msk [vmem:[%s4431_s4] sm:$0x3] %vm2481_vm0, %v2526_v2 }

// kernel: net_forward.56
= control target key start
LH: loop header
LB: loop body
LE: loop exit
PB: predicated region body
PF: predicated region fallthrough
CT: control target
= control target key end

     0   :  { %v18_v0 = vlaneseq  ;;  %s96_s1 = inlined_call_operand.vmem [shape: f32[1,256], index: 1, kind: input, shape index: {}]   ;;  %s97_s2 = inlined_call_operand.vmem [shape: f32[1,256], index: 2, kind: input, shape index: {}]   ;;  %s98_s0 = inlined_call_operand.vmem [shape: f32[8,256], index: 0, kind: input, shape index: {}]   ;;  %s99_s3 = inlined_call_operand.vmem [shape: bf16[8,256], index: 3, kind: output, shape index: {}]  }
   0x1   :  { %v16_v2 = vld [vmem:[%s96_s1] sm:$0x3]  ;;  %v15_v7 = vld [vmem:[%s98_s0 + $0x8] sm:$0xff] }
   0x2   :  { %v19_v1 = vshrl.u32 %v18_v0, 7  ;;  %v30_v3 = vld [vmem:[%s97_s2] sm:$0x3] }
   0x3   :  { %v14_v6 = vld [vmem:[%s98_s0] sm:$0xff] }
   0x4   :  { %v20_v4 = vsub.s32 0, %v19_v1  ;;  %v24_v5 = vsub.s32 1, %v19_v1 }
   0x6   :  { %v21_v8 = vrot.slane %v16_v2, %v20_v4  ;;  %v25_v9 = vrot.slane %v16_v2, %v24_v5  ;;  %v35_v10 = vrot.slane %v30_v3, %v20_v4  ;;  %v39_v11 = vrot.slane %v30_v3, %v24_v5 }
   0x8   :  { %v28_v12 = vmul.f32 %v21_v8, %v14_v6  ;;  %v29_v13 = vmul.f32 %v25_v9, %v15_v7 }
   0xa   :  { %v42_v14 = vadd.f32 %v35_v10, %v28_v12  ;;  %v43_v15 = vadd.f32 %v39_v11, %v29_v13 }
   0xc   :  { %v44_v16 = vmax.f32 %v42_v14, 0.0  ;;  %v45_v17 = vmax.f32 %v43_v15, 0.0 }
   0xe   :  { %v60_v18 = vpack.c.bf16 %v45_v17, %v44_v16 }
  0x10   :  { %54 = vst [vmem:[%s99_s3] sm:$0xff] %v60_v18 }

// kernel: net_forward.54
= control target key start
LH: loop header
LB: loop body
LE: loop exit
PB: predicated region body
PF: predicated region fallthrough
CT: control target
= control target key end

     0   :  { %v18_v0 = vlaneseq  ;;  %s94_s1 = inlined_call_operand.vmem [shape: f32[1,256], index: 1, kind: input, shape index: {}]   ;;  %s95_s2 = inlined_call_operand.vmem [shape: f32[1,256], index: 2, kind: input, shape index: {}]   ;;  %s96_s0 = inlined_call_operand.vmem [shape: f32[8,256], index: 0, kind: input, shape index: {}]   ;;  %s97_s3 = inlined_call_operand.vmem [shape: bf16[8,256], index: 3, kind: output, shape index: {}]  }
   0x1   :  { %v16_v2 = vld [vmem:[%s94_s1] sm:$0x3]  ;;  %v15_v7 = vld [vmem:[%s96_s0 + $0x8] sm:$0xff] }
   0x2   :  { %v19_v1 = vshrl.u32 %v18_v0, 7  ;;  %v30_v3 = vld [vmem:[%s95_s2] sm:$0x3] }
   0x3   :  { %v14_v6 = vld [vmem:[%s96_s0] sm:$0xff] }
   0x4   :  { %v20_v4 = vsub.s32 0, %v19_v1  ;;  %v24_v5 = vsub.s32 1, %v19_v1 }
   0x6   :  { %v21_v8 = vrot.slane %v16_v2, %v20_v4  ;;  %v25_v9 = vrot.slane %v16_v2, %v24_v5  ;;  %v35_v10 = vrot.slane %v30_v3, %v20_v4  ;;  %v39_v11 = vrot.slane %v30_v3, %v24_v5 }
   0x8   :  { %v28_v12 = vmul.f32 %v21_v8, %v14_v6  ;;  %v29_v13 = vmul.f32 %v25_v9, %v15_v7 }
   0xa   :  { %v42_v14 = vadd.f32 %v35_v10, %v28_v12  ;;  %v43_v15 = vadd.f32 %v39_v11, %v29_v13 }
   0xc   :  { %v58_v16 = vpack.c.bf16 %v43_v15, %v42_v14 }
   0xe   :  { %52 = vst [vmem:[%s97_s3] sm:$0xff] %v58_v16 }

// kernel: net_forward.53
= control target key start
LH: loop header
LB: loop body
LE: loop exit
PB: predicated region body
PF: predicated region fallthrough
CT: control target
= control target key end

     0   :  { %v422_v43 = vmov 1966171168   ;;  %v275_v45 = vlaneseq  ;;  %s559_s1 = inlined_call_operand.vmem [shape: bf16[256,256], index: 1, kind: input, shape index: {}]   ;;  %s560_s0 = inlined_call_operand.vmem [shape: bf16[8,256], index: 0, kind: input, shape index: {}]   ;;  %s561_s2 = inlined_call_operand.vmem [shape: f32[8,256], index: 2, kind: output, shape index: {0}]   ;;  %s562_s3 = inlined_call_operand.vmem [shape: f32[1,1,256], index: 3, kind: output, shape index: {1}]   ;;  %s563_s4 = inlined_call_operand.vmem [shape: f32[1,1,256], index: 4, kind: output, shape index: {2}]  }
   0x1   :  { %v372_v0 = vld [vmem:[%s559_s1 + $0x74] ss:$8 sps:$4 sm:$0xff]   ;;  %v374_v1 = vld [vmem:[%s559_s1 + $0x70] ss:$8 sps:$4 sm:$0xff]   ;;  %v375_v2 = vld [vmem:[%s559_s1 + $0x64] ss:$8 sps:$4 sm:$0xff]   ;;  %v273_v44 = vunpack.c.l.s4 %v422_v43 }
   0x2   :  { %214 = vmatprep.subr.bf16.mxu0 %v372_v0  ;;  %v377_v3 = vld [vmem:[%s559_s1 + $0x60] ss:$8 sps:$4 sm:$0xff]   ;;  %v378_v4 = vld [vmem:[%s559_s1 + $0x54] ss:$8 sps:$4 sm:$0xff]   ;;  %v380_v5 = vld [vmem:[%s559_s1 + $0x50] ss:$8 sps:$4 sm:$0xff]  }
   0x3   :  { %215 = vmatpush1.bf16.msra.mxu0 %v374_v1  ;;  %v381_v6 = vld [vmem:[%s559_s1 + $0x44] ss:$8 sps:$4 sm:$0xff]   ;;  %v383_v7 = vld [vmem:[%s559_s1 + $0x40] ss:$8 sps:$4 sm:$0xff]   ;;  %v384_v8 = vld [vmem:[%s559_s1 + $0x34] ss:$8 sps:$4 sm:$0xff]   ;;  %v274_v56 = vunpack.c.0.s8 %v273_v44 }
   0x4   :  { %216 = vmatprep.subr.bf16.mxu0 %v375_v2  ;;  %v386_v9 = vld [vmem:[%s559_s1 + $0x30] ss:$8 sps:$4 sm:$0xff]   ;;  %v387_v10 = vld [vmem:[%s559_s1 + $0x24] ss:$8 sps:$4 sm:$0xff]   ;;  %v389_v11 = vld [vmem:[%s559_s1 + $0x20] ss:$8 sps:$4 sm:$0xff]  }
   0x5   :  { %v390_v12 = vld [vmem:[%s559_s1 + $0x14] ss:$8 sps:$4 sm:$0xff]   ;;  %v14_v13 = vld [vmem:[%s560_s0] sm:$0xff]  ;;  %v392_v15 = vld [vmem:[%s559_s1 + $0x10] ss:$8 sps:$4 sm:$0xff]   ;;  %v276_v57 = vshrl.u32 %v275_v45, 7 }
   0x6   :  { %v338_v14 = vcombine.high %v14_v13, %v14_v13  ;;  %v393_v16 = vld [vmem:[%s559_s1 + $0x4] ss:$8 sps:$4 sm:$0xff]   ;;  %v395_v17 = vld [vmem:[%s559_s1] ss:$8 sps:$4 sm:$0xff]   ;;  %v396_v18 = vld [vmem:[%s559_s1 + $0xf4] ss:$8 sps:$4 sm:$0xff]   ;;  %v337_v34 = vcombine.low %v14_v13, %v14_v13 }
   0x7   :  { %217 = vmatpush1.bf16.msra.mxu0 %v377_v3  ;;  %v398_v19 = vld [vmem:[%s559_s1 + $0xf0] ss:$8 sps:$4 sm:$0xff]   ;;  %v399_v20 = vld [vmem:[%s559_s1 + $0xe4] ss:$8 sps:$4 sm:$0xff]   ;;  %v401_v21 = vld [vmem:[%s559_s1 + $0xe0] ss:$8 sps:$4 sm:$0xff]   ;;  %v277_v3 = vsub.s32 %v274_v56, %v276_v57 }
   0x8   :  { %218 = vmatprep.subr.bf16.mxu0 %v378_v4  ;;  %246 = vmatprep.mubr.bf16.mxu0 %v338_v14  ;;  %v402_v22 = vld [vmem:[%s559_s1 + $0xd4] ss:$8 sps:$4 sm:$0xff]   ;;  %v404_v23 = vld [vmem:[%s559_s1 + $0xd0] ss:$8 sps:$4 sm:$0xff]   ;;  %v405_v24 = vld [vmem:[%s559_s1 + $0xc4] ss:$8 sps:$4 sm:$0xff]  }
   0x9   :  { %v407_v25 = vld [vmem:[%s559_s1 + $0xc0] ss:$8 sps:$4 sm:$0xff]   ;;  %v408_v26 = vld [vmem:[%s559_s1 + $0xb4] ss:$8 sps:$4 sm:$0xff]   ;;  %v410_v27 = vld [vmem:[%s559_s1 + $0xb0] ss:$8 sps:$4 sm:$0xff]  }
   0xa   :  { %v411_v28 = vld [vmem:[%s559_s1 + $0xa4] ss:$8 sps:$4 sm:$0xff]   ;;  %v413_v29 = vld [vmem:[%s559_s1 + $0xa0] ss:$8 sps:$4 sm:$0xff]   ;;  %v414_v30 = vld [vmem:[%s559_s1 + $0x94] ss:$8 sps:$4 sm:$0xff]  }
   0xb   :  { %219 = vmatpush1.bf16.msra.mxu0 %v380_v5  ;;  %v416_v31 = vld [vmem:[%s559_s1 + $0x90] ss:$8 sps:$4 sm:$0xff]   ;;  %v417_v32 = vld [vmem:[%s559_s1 + $0x84] ss:$8 sps:$4 sm:$0xff]   ;;  %v419_v33 = vld [vmem:[%s559_s1 + $0x80] ss:$8 sps:$4 sm:$0xff]  }
   0xc   :  { %220 = vmatprep.subr.bf16.mxu0 %v381_v6  ;;  %vm289_vm0 = vcmp.lt.s32.totalorder %v275_v45, 256 }
   0xf   :  { %221 = vmatpush1.bf16.msra.mxu0 %v383_v7 }
  0x10   :  { %222 = vmatprep.subr.bf16.mxu0 %v384_v8 }
  0x13   :  { %223 = vmatpush1.bf16.msra.mxu0 %v386_v9 }
  0x14   :  { %224 = vmatprep.subr.bf16.mxu0 %v387_v10 }
  0x17   :  { %225 = vmatpush1.bf16.msra.mxu0 %v389_v11 }
  0x18   :  { %226 = vmatprep.subr.bf16.mxu0 %v390_v12 }
  0x1b   :  { %227 = vmatpush1.bf16.msra.mxu0 %v392_v15 }
  0x1c   :  { %228 = vmatprep.subr.bf16.mxu0 %v393_v16 }
  0x1f   :  { %229 = vmatpush1.bf16.msra.mxu0 %v395_v17 }
  0x20   :  { %230 = vmatprep.subr.bf16.mxu0 %v396_v18 }
  0x23   :  { %231 = vmatpush2.bf16.msra.mxu0 %v398_v19 }
  0x24   :  { %232 = vmatprep.subr.bf16.mxu0 %v399_v20 }
  0x27   :  { %233 = vmatpush2.bf16.msra.mxu0 %v401_v21 }
  0x28   :  { %234 = vmatprep.subr.bf16.mxu0 %v402_v22 }
  0x2b   :  { %235 = vmatpush2.bf16.msra.mxu0 %v404_v23 }
  0x2c   :  { %236 = vmatprep.subr.bf16.mxu0 %v405_v24 }
  0x2f   :  { %237 = vmatpush2.bf16.msra.mxu0 %v407_v25 }
  0x30   :  { %238 = vmatprep.subr.bf16.mxu0 %v408_v26 }
  0x33   :  { %239 = vmatpush2.bf16.msra.mxu0 %v410_v27 }
  0x34   :  { %240 = vmatprep.subr.bf16.mxu0 %v411_v28 }
  0x37   :  { %241 = vmatpush2.bf16.msra.mxu0 %v413_v29 }
  0x38   :  { %242 = vmatprep.subr.bf16.mxu0 %v414_v30 }
  0x3b   :  { %243 = vmatpush2.bf16.msra.mxu0 %v416_v31 }
  0x3c   :  { %244 = vmatprep.subr.bf16.mxu0 %v417_v32 }
  0x3f   :  { %245 = vmatpush2.bf16.msra.mxu0 %v419_v33 }
  0x42   :  { %247 = vmatmul.mubr.bf16.vlgmr.msra.gmra.mxu0 %v337_v34 }
 0x102   :  { %v248_v35 = vpop.f32.mrf.mxu0 }
 0x103   :  { %255 = vst [vmem:[%s561_s2] sm:$0xff] %v248_v35  ;;  %v257_v36 = vrot.slane %v248_v35, 4  ;;  %v292_v37 = vmul.f32 %v248_v35, %v248_v35 }
 0x104   :  { %v250_v38 = vpop.f32.mrf.mxu0 }
 0x105   :  { %v258_v39 = vadd.f32 %v257_v36, %v248_v35  ;;  %v294_v40 = vrot.slane %v292_v37, 4  ;;  %256 = vst [vmem:[%s561_s2 + $0x8] sm:$0xff] %v250_v38  ;;  %v263_v41 = vrot.slane %v250_v38, 4  ;;  %v293_v42 = vmul.f32 %v250_v38, %v250_v38 }
 0x106   :  { %v252_v46 = vpop.f32.mrf.mxu0 }
 0x107   :  { %v259_v47 = vrot.slane %v258_v39, 2  ;;  %v295_v48 = vadd.f32 %v294_v40, %v292_v37  ;;  %v264_v49 = vadd.f32 %v263_v41, %v250_v38  ;;  %v300_v50 = vrot.slane %v293_v42, 4 }
 0x108   :  { %v253_v51 = vpop.f32.mrf.mxu0 }
 0x109   :  { %v260_v52 = vadd.f32 %v259_v47, %v258_v39  ;;  %v296_v53 = vrot.slane %v295_v48, 2  ;;  %v265_v54 = vrot.slane %v264_v49, 2  ;;  %v301_v55 = vadd.f32 %v300_v50, %v293_v42 }
 0x10b   :  { %v261_v58 = vrot.slane %v260_v52, 1  ;;  %v297_v59 = vadd.f32 %v296_v53, %v295_v48  ;;  %v266_v60 = vadd.f32 %v265_v54, %v264_v49  ;;  %v302_v61 = vrot.slane %v301_v55, 2 }
 0x10d   :  { %v298_v62 = vrot.slane %v297_v59, 1  ;;  %v267_v63 = vrot.slane %v266_v60, 1  ;;  %v303_v0 = vadd.f32 %v302_v61, %v301_v55  ;;  %v262_v1 = vadd.f32 %v261_v58, %v260_v52 }
 0x10f   :  { %v268_v2 = vadd.f32 %v267_v63, %v266_v60  ;;  %v304_v4 = vrot.slane %v303_v0, 1  ;;  %v299_v5 = vadd.f32 %v298_v62, %v297_v59 }
 0x111   :  { %v271_v6 = vcombine.low %v262_v1, %v268_v2  ;;  %v305_v7 = vadd.f32 %v304_v4, %v303_v0 }
 0x113   :  { %v278_v8 = vrot.slane %v271_v6, %v277_v3  ;;  %v308_v9 = vcombine.low %v299_v5, %v305_v7 }
 0x115   :  { %v285_v10 = vrot.slane %v278_v8, %v277_v3  ;;  %v315_v11 = vrot.slane %v308_v9, %v277_v3 }
 0x117   :  { %291 = vst.msk [vmem:[%s562_s3] sm:$0x3] %vm289_vm0, %v285_v10  ;;  %v322_v12 = vrot.slane %v315_v11, %v277_v3 }
 0x119   :  { %324 = vst.msk [vmem:[%s563_s4] sm:$0x3] %vm289_vm0, %v322_v12 }

// kernel: net_forward.58
= control target key start
LH: loop header
LB: loop body
LE: loop exit
PB: predicated region body
PF: predicated region fallthrough
CT: control target
= control target key end

     0   :  { %v21_v0 = vlaneseq  ;;  %s112_s2 = inlined_call_operand.vmem [shape: f32[1,256], index: 2, kind: input, shape index: {}]   ;;  %s113_s3 = inlined_call_operand.vmem [shape: f32[1,256], index: 3, kind: input, shape index: {}]   ;;  %s114_s0 = inlined_call_operand.vmem [shape: f32[8,256], index: 0, kind: input, shape index: {}]   ;;  %s115_s1 = inlined_call_operand.vmem [shape: bf16[8,256], index: 1, kind: input, shape index: {}]   ;;  %s116_s4 = inlined_call_operand.vmem [shape: bf16[8,256], index: 4, kind: output, shape index: {}]  }
   0x1   :  { %v19_v2 = vld [vmem:[%s112_s2] sm:$0x3]  ;;  %v18_v7 = vld [vmem:[%s114_s0 + $0x8] sm:$0xff] }
   0x2   :  { %v22_v1 = vshrl.u32 %v21_v0, 7  ;;  %v33_v3 = vld [vmem:[%s113_s3] sm:$0x3] }
   0x3   :  { %v17_v6 = vld [vmem:[%s114_s0] sm:$0xff] }
   0x4   :  { %v23_v4 = vsub.s32 0, %v22_v1  ;;  %v27_v5 = vsub.s32 1, %v22_v1  ;;  %v47_v8 = vld [vmem:[%s115_s1] sm:$0xff] }
   0x5   :  { %v48_v15 = vunpack.c.l.bf16 %v47_v8  ;;  %v49_v16 = vunpack.c.h.bf16 %v47_v8 }
   0x6   :  { %v24_v9 = vrot.slane %v19_v2, %v23_v4  ;;  %v28_v10 = vrot.slane %v19_v2, %v27_v5  ;;  %v38_v11 = vrot.slane %v33_v3, %v23_v4  ;;  %v42_v12 = vrot.slane %v33_v3, %v27_v5 }
   0x8   :  { %v31_v13 = vmul.f32 %v24_v9, %v17_v6  ;;  %v32_v14 = vmul.f32 %v28_v10, %v18_v7 }
   0xa   :  { %v45_v17 = vadd.f32 %v38_v11, %v31_v13  ;;  %v46_v18 = vadd.f32 %v42_v12, %v32_v14 }
   0xc   :  { %v50_v19 = vadd.f32 %v48_v15, %v45_v17  ;;  %v51_v20 = vadd.f32 %v49_v16, %v46_v18 }
   0xe   :  { %v52_v21 = vmax.f32 %v50_v19, 0.0  ;;  %v53_v22 = vmax.f32 %v51_v20, 0.0 }
  0x10   :  { %v68_v23 = vpack.c.bf16 %v53_v22, %v52_v21 }
  0x12   :  { %62 = vst [vmem:[%s116_s4] sm:$0xff] %v68_v23 }

// kernel: net_forward.55
= control target key start
LH: loop header
LB: loop body
LE: loop exit
PB: predicated region body
PF: predicated region fallthrough
CT: control target
= control target key end

     0   :  { %s3999_s1 = inlined_call_operand.vmem [shape: bf16[2304,256], index: 1, kind: input, shape index: {}]   ;;  %s4000_s0 = inlined_call_operand.vmem [shape: bf16[8,2304], index: 0, kind: input, shape index: {}]   ;;  %s4001_s2 = inlined_call_operand.vmem [shape: f32[8,256], index: 2, kind: output, shape index: {0}]   ;;  %s4002_s3 = inlined_call_operand.vmem [shape: f32[1,1,256], index: 3, kind: output, shape index: {1}]   ;;  %s4003_s4 = inlined_call_operand.vmem [shape: f32[1,1,256], index: 4, kind: output, shape index: {2}]  }
   0x1   :  { %v2572_v0 = vld [vmem:[%s3999_s1 + $0x74] ss:$8 sps:$4 sm:$0xff]   ;;  %v2576_v2 = vld [vmem:[%s3999_s1 + $0x70] ss:$8 sps:$4 sm:$0xff]   ;;  %v2578_v4 = vld [vmem:[%s3999_s1 + $0x64] ss:$8 sps:$4 sm:$0xff]  }
   0x2   :  { %v2574_v1 = vld [vmem:[%s3999_s1 + $0x174] ss:$8 sps:$4 sm:$0xff]   ;;  %1814 = vmatprep.subr.bf16.mxu0 %v2572_v0  ;;  %v2577_v3 = vld [vmem:[%s3999_s1 + $0x170] ss:$8 sps:$4 sm:$0xff]   ;;  %v2580_v5 = vld [vmem:[%s3999_s1 + $0x164] ss:$8 sps:$4 sm:$0xff]  }
   0x3   :  { %1855 = vmatprep.subr.bf16.mxu1 %v2574_v1  ;;  %1815 = vmatpush1.bf16.msra.mxu0 %v2576_v2  ;;  %v2582_v6 = vld [vmem:[%s3999_s1 + $0x60] ss:$8 sps:$4 sm:$0xff]   ;;  %v2584_v8 = vld [vmem:[%s3999_s1 + $0x54] ss:$8 sps:$4 sm:$0xff]   ;;  %v2588_v10 = vld [vmem:[%s3999_s1 + $0x50] ss:$8 sps:$4 sm:$0xff]  }
   0x4   :  { %1856 = vmatpush1.bf16.msra.mxu1 %v2577_v3  ;;  %1816 = vmatprep.subr.bf16.mxu0 %v2578_v4  ;;  %v2583_v7 = vld [vmem:[%s3999_s1 + $0x160] ss:$8 sps:$4 sm:$0xff]   ;;  %v2586_v9 = vld [vmem:[%s3999_s1 + $0x154] ss:$8 sps:$4 sm:$0xff]   ;;  %v2589_v11 = vld [vmem:[%s3999_s1 + $0x150] ss:$8 sps:$4 sm:$0xff]  }
   0x5   :  { %1857 = vmatprep.subr.bf16.mxu1 %v2580_v5  ;;  %v2590_v12 = vld [vmem:[%s3999_s1 + $0x44] ss:$8 sps:$4 sm:$0xff]   ;;  %v2594_v14 = vld [vmem:[%s3999_s1 + $0x40] ss:$8 sps:$4 sm:$0xff]   ;;  %v2596_v16 = vld [vmem:[%s3999_s1 + $0x34] ss:$8 sps:$4 sm:$0xff]  }
   0x6   :  { %v2592_v13 = vld [vmem:[%s3999_s1 + $0x144] ss:$8 sps:$4 sm:$0xff]   ;;  %v2595_v15 = vld [vmem:[%s3999_s1 + $0x140] ss:$8 sps:$4 sm:$0xff]   ;;  %v2598_v17 = vld [vmem:[%s3999_s1 + $0x134] ss:$8 sps:$4 sm:$0xff]  }
   0x7   :  { %1817 = vmatpush1.bf16.msra.mxu0 %v2582_v6  ;;  %v2600_v18 = vld [vmem:[%s3999_s1 + $0x30] ss:$8 sps:$4 sm:$0xff]   ;;  %v2602_v20 = vld [vmem:[%s3999_s1 + $0x24] ss:$8 sps:$4 sm:$0xff]   ;;  %v2606_v22 = vld [vmem:[%s3999_s1 + $0x20] ss:$8 sps:$4 sm:$0xff]  }
   0x8   :  { %1858 = vmatpush1.bf16.msra.mxu1 %v2583_v7  ;;  %1818 = vmatprep.subr.bf16.mxu0 %v2584_v8  ;;  %v2601_v19 = vld [vmem:[%s3999_s1 + $0x130] ss:$8 sps:$4 sm:$0xff]   ;;  %v2604_v21 = vld [vmem:[%s3999_s1 + $0x124] ss:$8 sps:$4 sm:$0xff]   ;;  %v2607_v23 = vld [vmem:[%s3999_s1 + $0x120] ss:$8 sps:$4 sm:$0xff]  }
   0x9   :  { %1859 = vmatprep.subr.bf16.mxu1 %v2586_v9  ;;  %v2608_v24 = vld [vmem:[%s3999_s1 + $0x14] ss:$8 sps:$4 sm:$0xff]   ;;  %v2612_v26 = vld [vmem:[%s3999_s1 + $0x10] ss:$8 sps:$4 sm:$0xff]   ;;  %v2614_v28 = vld [vmem:[%s3999_s1 + $0x4] ss:$8 sps:$4 sm:$0xff]  }
   0xa   :  { %v2610_v25 = vld [vmem:[%s3999_s1 + $0x114] ss:$8 sps:$4 sm:$0xff]   ;;  %v2613_v27 = vld [vmem:[%s3999_s1 + $0x110] ss:$8 sps:$4 sm:$0xff]   ;;  %v2616_v29 = vld [vmem:[%s3999_s1 + $0x104] ss:$8 sps:$4 sm:$0xff]  }
   0xb   :  { %1819 = vmatpush1.bf16.msra.mxu0 %v2588_v10  ;;  %v2618_v30 = vld [vmem:[%s3999_s1] ss:$8 sps:$4 sm:$0xff]   ;;  %v2620_v32 = vld [vmem:[%s3999_s1 + $0xf4] ss:$8 sps:$4 sm:$0xff]   ;;  %v2624_v34 = vld [vmem:[%s3999_s1 + $0xf0] ss:$8 sps:$4 sm:$0xff]  }
   0xc   :  { %1860 = vmatpush1.bf16.msra.mxu1 %v2589_v11  ;;  %1820 = vmatprep.subr.bf16.mxu0 %v2590_v12  ;;  %v2619_v31 = vld [vmem:[%s3999_s1 + $0x100] ss:$8 sps:$4 sm:$0xff]   ;;  %v2622_v33 = vld [vmem:[%s3999_s1 + $0x1f4] ss:$8 sps:$4 sm:$0xff]   ;;  %v2625_v35 = vld [vmem:[%s3999_s1 + $0x1f0] ss:$8 sps:$4 sm:$0xff]  }
   0xd   :  { %1861 = vmatprep.subr.bf16.mxu1 %v2592_v13  ;;  %v2626_v36 = vld [vmem:[%s3999_s1 + $0xe4] ss:$8 sps:$4 sm:$0xff]   ;;  %v2630_v38 = vld [vmem:[%s3999_s1 + $0xe0] ss:$8 sps:$4 sm:$0xff]   ;;  %v2632_v40 = vld [vmem:[%s3999_s1 + $0xd4] ss:$8 sps:$4 sm:$0xff]  }
   0xe   :  { %v2628_v37 = vld [vmem:[%s3999_s1 + $0x1e4] ss:$8 sps:$4 sm:$0xff]   ;;  %v2631_v39 = vld [vmem:[%s3999_s1 + $0x1e0] ss:$8 sps:$4 sm:$0xff]   ;;  %v2634_v41 = vld [vmem:[%s3999_s1 + $0x1d4] ss:$8 sps:$4 sm:$0xff]  }
   0xf   :  { %1821 = vmatpush1.bf16.msra.mxu0 %v2594_v14  ;;  %v2636_v42 = vld [vmem:[%s3999_s1 + $0xd0] ss:$8 sps:$4 sm:$0xff]   ;;  %v2638_v44 = vld [vmem:[%s3999_s1 + $0xc4] ss:$8 sps:$4 sm:$0xff]   ;;  %v2642_v49 = vld [vmem:[%s3999_s1 + $0xc0] ss:$8 sps:$4 sm:$0xff]  }
  0x10   :  { %1862 = vmatpush1.bf16.msra.mxu1 %v2595_v15  ;;  %1822 = vmatprep.subr.bf16.mxu0 %v2596_v16  ;;  %v2637_v43 = vld [vmem:[%s3999_s1 + $0x1d0] ss:$8 sps:$4 sm:$0xff]   ;;  %v2640_v45 = vld [vmem:[%s3999_s1 + $0x1c4] ss:$8 sps:$4 sm:$0xff]   ;;  %v2643_v50 = vld [vmem:[%s3999_s1 + $0x1c0] ss:$8 sps:$4 sm:$0xff]  }
  0x11   :  { %1863 = vmatprep.subr.bf16.mxu1 %v2598_v17  ;;  %v14_v46 = vld [vmem:[%s4000_s0] sm:$0xff]  ;;  %v15_v48 = vld [vmem:[%s4000_s0 + $0x8] sm:$0xff]  ;;  %v2644_v52 = vld [vmem:[%s3999_s1 + $0xb4] ss:$8 sps:$4 sm:$0xff]  }
  0x12   :  { %v2266_v47 = vcombine.high %v14_v46, %v14_v46  ;;  %v2268_v51 = vcombine.high %v15_v48, %v15_v48  ;;  %v2646_v53 = vld [vmem:[%s3999_s1 + $0x1b4] ss:$8 sps:$4 sm:$0xff]   ;;  %v2648_v54 = vld [vmem:[%s3999_s1 + $0xb0] ss:$8 sps:$4 sm:$0xff]   ;;  %v2650_v56 = vld [vmem:[%s3999_s1 + $0xa4] ss:$8 sps:$4 sm:$0xff]   ;;  %v2265_v6 = vcombine.low %v14_v46, %v14_v46  ;;  %v2267_v7 = vcombine.low %v15_v48, %v15_v48 }
  0x13   :  { %1823 = vmatpush1.bf16.msra.mxu0 %v2600_v18  ;;  %v2649_v55 = vld [vmem:[%s3999_s1 + $0x1b0] ss:$8 sps:$4 sm:$0xff]   ;;  %v2652_v57 = vld [vmem:[%s3999_s1 + $0x1a4] ss:$8 sps:$4 sm:$0xff]   ;;  %v2654_v58 = vld [vmem:[%s3999_s1 + $0xa0] ss:$8 sps:$4 sm:$0xff]  }
  0x14   :  { %1864 = vmatpush1.bf16.msra.mxu1 %v2601_v19  ;;  %1824 = vmatprep.subr.bf16.mxu0 %v2602_v20  ;;  %v2655_v59 = vld [vmem:[%s3999_s1 + $0x1a0] ss:$8 sps:$4 sm:$0xff]   ;;  %v2656_v60 = vld [vmem:[%s3999_s1 + $0x94] ss:$8 sps:$4 sm:$0xff]   ;;  %v2660_v62 = vld [vmem:[%s3999_s1 + $0x90] ss:$8 sps:$4 sm:$0xff]  }
  0x15   :  { %1865 = vmatprep.subr.bf16.mxu1 %v2604_v21  ;;  %1846 = vmatprep.mubr.bf16.mxu0 %v2266_v47  ;;  %v2658_v61 = vld [vmem:[%s3999_s1 + $0x194] ss:$8 sps:$4 sm:$0xff]   ;;  %v2661_v63 = vld [vmem:[%s3999_s1 + $0x190] ss:$8 sps:$4 sm:$0xff]   ;;  %v2662_v0 = vld [vmem:[%s3999_s1 + $0x84] ss:$8 sps:$4 sm:$0xff]  }
  0x16   :  { %1887 = vmatprep.mubr.bf16.mxu1 %v2268_v51  ;;  %v2664_v1 = vld [vmem:[%s3999_s1 + $0x184] ss:$8 sps:$4 sm:$0xff]   ;;  %v2666_v2 = vld [vmem:[%s3999_s1 + $0x80] ss:$8 sps:$4 sm:$0xff]   ;;  %v2674_v4 = vld [vmem:[%s3999_s1 + $0x274] ss:$8 sps:$4 sm:$0xff]  }
  0x17   :  { %1825 = vmatpush1.bf16.msra.mxu0 %v2606_v22  ;;  %v2667_v3 = vld [vmem:[%s3999_s1 + $0x180] ss:$8 sps:$4 sm:$0xff]   ;;  %v2677_v5 = vld [vmem:[%s3999_s1 + $0x374] ss:$8 sps:$4 sm:$0xff]   ;;  %v2672_v8 = vld [vmem:[%s3999_s1 + $0x270] ss:$8 sps:$4 sm:$0xff]  }
  0x18   :  { %1866 = vmatpush1.bf16.msra.mxu1 %v2607_v23  ;;  %1826 = vmatprep.subr.bf16.mxu0 %v2608_v24  ;;  %v2675_v9 = vld [vmem:[%s3999_s1 + $0x370] ss:$8 sps:$4 sm:$0xff]   ;;  %v2680_v10 = vld [vmem:[%s3999_s1 + $0x264] ss:$8 sps:$4 sm:$0xff]   ;;  %v2678_v12 = vld [vmem:[%s3999_s1 + $0x260] ss:$8 sps:$4 sm:$0xff]  }
  0x19   :  { %1867 = vmatprep.subr.bf16.mxu1 %v2610_v25  ;;  %v2683_v11 = vld [vmem:[%s3999_s1 + $0x364] ss:$8 sps:$4 sm:$0xff]   ;;  %v2681_v13 = vld [vmem:[%s3999_s1 + $0x360] ss:$8 sps:$4 sm:$0xff]   ;;  %v2686_v14 = vld [vmem:[%s3999_s1 + $0x254] ss:$8 sps:$4 sm:$0xff]  }
  0x1a   :  { %v2689_v15 = vld [vmem:[%s3999_s1 + $0x354] ss:$8 sps:$4 sm:$0xff]   ;;  %v2684_v16 = vld [vmem:[%s3999_s1 + $0x250] ss:$8 sps:$4 sm:$0xff]   ;;  %v2692_v18 = vld [vmem:[%s3999_s1 + $0x244] ss:$8 sps:$4 sm:$0xff]  }
  0x1b   :  { %1827 = vmatpush1.bf16.msra.mxu0 %v2612_v26  ;;  %v2687_v17 = vld [vmem:[%s3999_s1 + $0x350] ss:$8 sps:$4 sm:$0xff]   ;;  %v2695_v19 = vld [vmem:[%s3999_s1 + $0x344] ss:$8 sps:$4 sm:$0xff]   ;;  %v2690_v20 = vld [vmem:[%s3999_s1 + $0x240] ss:$8 sps:$4 sm:$0xff]  }
  0x1c   :  { %1868 = vmatpush1.bf16.msra.mxu1 %v2613_v27  ;;  %1828 = vmatprep.subr.bf16.mxu0 %v2614_v28  ;;  %v2693_v21 = vld [vmem:[%s3999_s1 + $0x340] ss:$8 sps:$4 sm:$0xff]   ;;  %v2698_v22 = vld [vmem:[%s3999_s1 + $0x234] ss:$8 sps:$4 sm:$0xff]   ;;  %v2696_v24 = vld [vmem:[%s3999_s1 + $0x230] ss:$8 sps:$4 sm:$0xff]  }
  0x1d   :  { %1869 = vmatprep.subr.bf16.mxu1 %v2616_v29  ;;  %v2701_v23 = vld [vmem:[%s3999_s1 + $0x334] ss:$8 sps:$4 sm:$0xff]   ;;  %v2699_v25 = vld [vmem:[%s3999_s1 + $0x330] ss:$8 sps:$4 sm:$0xff]   ;;  %v2704_v26 = vld [vmem:[%s3999_s1 + $0x224] ss:$8 sps:$4 sm:$0xff]  }
  0x1e   :  { %v2707_v27 = vld [vmem:[%s3999_s1 + $0x324] ss:$8 sps:$4 sm:$0xff]   ;;  %v2702_v28 = vld [vmem:[%s3999_s1 + $0x220] ss:$8 sps:$4 sm:$0xff]   ;;  %v2737_v51 = vld [vmem:[%s3999_s1 + $0x3d4] ss:$8 sps:$4 sm:$0xff]  }
  0x1f   :  { %1829 = vmatpush1.bf16.msra.mxu0 %v2618_v30  ;;  %v2705_v29 = vld [vmem:[%s3999_s1 + $0x320] ss:$8 sps:$4 sm:$0xff]   ;;  %v2710_v30 = vld [vmem:[%s3999_s1 + $0x214] ss:$8 sps:$4 sm:$0xff]   ;;  %v2728_v46 = vld [vmem:[%s3999_s1 + $0x2e4] ss:$8 sps:$4 sm:$0xff]  }
  0x20   :  { %1870 = vmatpush1.bf16.msra.mxu1 %v2619_v31  ;;  %1830 = vmatprep.subr.bf16.mxu0 %v2620_v32  ;;  %v2713_v31 = vld [vmem:[%s3999_s1 + $0x314] ss:$8 sps:$4 sm:$0xff]   ;;  %v2731_v47 = vld [vmem:[%s3999_s1 + $0x3e4] ss:$8 sps:$4 sm:$0xff]   ;;  %v2726_v48 = vld [vmem:[%s3999_s1 + $0x2e0] ss:$8 sps:$4 sm:$0xff]  }
  0x21   :  { %1871 = vmatprep.subr.bf16.mxu1 %v2622_v33  ;;  %v3327_v32 = vld [vmem:[%s4000_s0 + $0x10] sm:$0xff] }
  0x22   :  { %v2708_v33 = vld [vmem:[%s3999_s1 + $0x210] ss:$8 sps:$4 sm:$0xff]  }
  0x23   :  { %1831 = vmatpush2.bf16.msra.mxu0 %v2624_v34  ;;  %v2711_v34 = vld [vmem:[%s3999_s1 + $0x310] ss:$8 sps:$4 sm:$0xff]  }
  0x24   :  { %1872 = vmatpush2.bf16.msra.mxu1 %v2625_v35  ;;  %1832 = vmatprep.subr.bf16.mxu0 %v2626_v36  ;;  %v2270_v35 = vcombine.high %v3327_v32, %v3327_v32  ;;  %v3340_v36 = vld [vmem:[%s4000_s0 + $0x18] sm:$0xff] }
  0x25   :  { %1873 = vmatprep.subr.bf16.mxu1 %v2628_v37  ;;  %v2716_v37 = vld [vmem:[%s3999_s1 + $0x204] ss:$8 sps:$4 sm:$0xff]  }
  0x27   :  { %1833 = vmatpush2.bf16.msra.mxu0 %v2630_v38  ;;  %v2272_v38 = vcombine.high %v3340_v36, %v3340_v36 }
  0x28   :  { %1874 = vmatpush2.bf16.msra.mxu1 %v2631_v39  ;;  %1834 = vmatprep.subr.bf16.mxu0 %v2632_v40  ;;  %v2719_v39 = vld [vmem:[%s3999_s1 + $0x304] ss:$8 sps:$4 sm:$0xff]   ;;  %v2714_v40 = vld [vmem:[%s3999_s1 + $0x200] ss:$8 sps:$4 sm:$0xff]  }
  0x29   :  { %1875 = vmatprep.subr.bf16.mxu1 %v2634_v41  ;;  %v2717_v41 = vld [vmem:[%s3999_s1 + $0x300] ss:$8 sps:$4 sm:$0xff]  }
  0x2b   :  { %1835 = vmatpush2.bf16.msra.mxu0 %v2636_v42  ;;  %v2722_v42 = vld [vmem:[%s3999_s1 + $0x2f4] ss:$8 sps:$4 sm:$0xff]  }
  0x2c   :  { %1876 = vmatpush2.bf16.msra.mxu1 %v2637_v43  ;;  %1836 = vmatprep.subr.bf16.mxu0 %v2638_v44  ;;  %v2725_v43 = vld [vmem:[%s3999_s1 + $0x3f4] ss:$8 sps:$4 sm:$0xff]   ;;  %v2720_v44 = vld [vmem:[%s3999_s1 + $0x2f0] ss:$8 sps:$4 sm:$0xff]  }
  0x2d   :  { %1877 = vmatprep.subr.bf16.mxu1 %v2640_v45  ;;  %v2723_v45 = vld [vmem:[%s3999_s1 + $0x3f0] ss:$8 sps:$4 sm:$0xff]  }
  0x2f   :  { %1837 = vmatpush2.bf16.msra.mxu0 %v2642_v49  ;;  %v2729_v49 = vld [vmem:[%s3999_s1 + $0x3e0] ss:$8 sps:$4 sm:$0xff]  }
  0x30   :  { %1878 = vmatpush2.bf16.msra.mxu1 %v2643_v50  ;;  %1838 = vmatprep.subr.bf16.mxu0 %v2644_v52  ;;  %v2734_v50 = vld [vmem:[%s3999_s1 + $0x2d4] ss:$8 sps:$4 sm:$0xff]   ;;  %v2732_v52 = vld [vmem:[%s3999_s1 + $0x2d0] ss:$8 sps:$4 sm:$0xff]  }
  0x31   :  { %1879 = vmatprep.subr.bf16.mxu1 %v2646_v53  ;;  %v2735_v53 = vld [vmem:[%s3999_s1 + $0x3d0] ss:$8 sps:$4 sm:$0xff]  }
  0x33   :  { %1839 = vmatpush2.bf16.msra.mxu0 %v2648_v54  ;;  %v2740_v54 = vld [vmem:[%s3999_s1 + $0x2c4] ss:$8 sps:$4 sm:$0xff]  }
  0x34   :  { %1880 = vmatpush2.bf16.msra.mxu1 %v2649_v55  ;;  %1840 = vmatprep.subr.bf16.mxu0 %v2650_v56  ;;  %v2743_v55 = vld [vmem:[%s3999_s1 + $0x3c4] ss:$8 sps:$4 sm:$0xff]   ;;  %v2738_v56 = vld [vmem:[%s3999_s1 + $0x2c0] ss:$8 sps:$4 sm:$0xff]  }
  0x35   :  { %1881 = vmatprep.subr.bf16.mxu1 %v2652_v57  ;;  %v2741_v57 = vld [vmem:[%s3999_s1 + $0x3c0] ss:$8 sps:$4 sm:$0xff]  }
  0x37   :  { %1841 = vmatpush2.bf16.msra.mxu0 %v2654_v58  ;;  %v2746_v58 = vld [vmem:[%s3999_s1 + $0x2b4] ss:$8 sps:$4 sm:$0xff]  }
  0x38   :  { %1882 = vmatpush2.bf16.msra.mxu1 %v2655_v59  ;;  %1842 = vmatprep.subr.bf16.mxu0 %v2656_v60  ;;  %v2749_v59 = vld [vmem:[%s3999_s1 + $0x3b4] ss:$8 sps:$4 sm:$0xff]   ;;  %v2744_v60 = vld [vmem:[%s3999_s1 + $0x2b0] ss:$8 sps:$4 sm:$0xff]  }
  0x39   :  { %1883 = vmatprep.subr.bf16.mxu1 %v2658_v61  ;;  %v2747_v61 = vld [vmem:[%s3999_s1 + $0x3b0] ss:$8 sps:$4 sm:$0xff]  }
  0x3b   :  { %1843 = vmatpush2.bf16.msra.mxu0 %v2660_v62  ;;  %v2752_v62 = vld [vmem:[%s3999_s1 + $0x2a4] ss:$8 sps:$4 sm:$0xff]  }
  0x3c   :  { %1884 = vmatpush2.bf16.msra.mxu1 %v2661_v63  ;;  %1844 = vmatprep.subr.bf16.mxu0 %v2662_v0  ;;  %v2755_v63 = vld [vmem:[%s3999_s1 + $0x3a4] ss:$8 sps:$4 sm:$0xff]   ;;  %v2750_v0 = vld [vmem:[%s3999_s1 + $0x2a0] ss:$8 sps:$4 sm:$0xff]  }
  0x3d   :  { %1885 = vmatprep.subr.bf16.mxu1 %v2664_v1  ;;  %v2753_v1 = vld [vmem:[%s3999_s1 + $0x3a0] ss:$8 sps:$4 sm:$0xff]  }
  0x3f   :  { %1845 = vmatpush2.bf16.msra.mxu0 %v2666_v2  ;;  %v2758_v2 = vld [vmem:[%s3999_s1 + $0x294] ss:$8 sps:$4 sm:$0xff]  }
  0x40   :  { %1886 = vmatpush2.bf16.msra.mxu1 %v2667_v3  ;;  %1896 = vmatprep.subr.bf16.mxu0 %v2674_v4  ;;  %v2761_v3 = vld [vmem:[%s3999_s1 + $0x394] ss:$8 sps:$4 sm:$0xff]   ;;  %v2756_v4 = vld [vmem:[%s3999_s1 + $0x290] ss:$8 sps:$4 sm:$0xff]  }
  0x41   :  { %1937 = vmatprep.subr.bf16.mxu1 %v2677_v5  ;;  %v2759_v5 = vld [vmem:[%s3999_s1 + $0x390] ss:$8 sps:$4 sm:$0xff]  }
  0x42   :  { %1847 = vmatmul.mubr.bf16.vlgmr.msra.gmra.mxu0 %v2265_v6  ;;  %v2764_v6 = vld [vmem:[%s3999_s1 + $0x284] ss:$8 sps:$4 sm:$0xff]  }
  0x43   :  { %1888 = vmatmul.mubr.bf16.vlgmr.msra.gmra.mxu1 %v2267_v7  ;;  %1897 = vmatpush1.bf16.msra.mxu0 %v2672_v8  ;;  %v2767_v7 = vld [vmem:[%s3999_s1 + $0x384] ss:$8 sps:$4 sm:$0xff]   ;;  %v2762_v8 = vld [vmem:[%s3999_s1 + $0x280] ss:$8 sps:$4 sm:$0xff]  }
  0x44   :  { %1938 = vmatpush1.bf16.msra.mxu1 %v2675_v9  ;;  %1898 = vmatprep.subr.bf16.mxu0 %v2680_v10  ;;  %v2765_v9 = vld [vmem:[%s3999_s1 + $0x380] ss:$8 sps:$4 sm:$0xff]   ;;  %v2772_v10 = vld [vmem:[%s3999_s1 + $0x474] ss:$8 sps:$4 sm:$0xff]  }
  0x45   :  { %1939 = vmatprep.subr.bf16.mxu1 %v2683_v11  ;;  %1928 = vmatprep.mubr.bf16.mxu0 %v2270_v35  ;;  %v2777_v11 = vld [vmem:[%s3999_s1 + $0x574] ss:$8 sps:$4 sm:$0xff]   ;;  %v2799_v35 = vld [vmem:[%s3999_s1 + $0x530] ss:$8 sps:$4 sm:$0xff]  }
  0x46   :  { %1969 = vmatprep.mubr.bf16.mxu1 %v2272_v38  ;;  %v2802_v38 = vld [vmem:[%s3999_s1 + $0x420] ss:$8 sps:$4 sm:$0xff]  }
  0x47   :  { %1899 = vmatpush1.bf16.msra.mxu0 %v2678_v12  ;;  %v2269_v12 = vcombine.low %v3327_v32, %v3327_v32  ;;  %v2798_v32 = vld [vmem:[%s3999_s1 + $0x434] ss:$8 sps:$4 sm:$0xff]  }
  0x48   :  { %1940 = vmatpush1.bf16.msra.mxu1 %v2681_v13  ;;  %1900 = vmatprep.subr.bf16.mxu0 %v2686_v14  ;;  %v2770_v13 = vld [vmem:[%s3999_s1 + $0x470] ss:$8 sps:$4 sm:$0xff]   ;;  %v2271_v14 = vcombine.low %v3340_v36, %v3340_v36  ;;  %v2804_v36 = vld [vmem:[%s3999_s1 + $0x424] ss:$8 sps:$4 sm:$0xff]  }
  0x49   :  { %1941 = vmatprep.subr.bf16.mxu1 %v2689_v15  ;;  %v2775_v15 = vld [vmem:[%s3999_s1 + $0x570] ss:$8 sps:$4 sm:$0xff]  }
  0x4b   :  { %1901 = vmatpush1.bf16.msra.mxu0 %v2684_v16  ;;  %v2780_v16 = vld [vmem:[%s3999_s1 + $0x464] ss:$8 sps:$4 sm:$0xff]  }
  0x4c   :  { %1942 = vmatpush1.bf16.msra.mxu1 %v2687_v17  ;;  %1902 = vmatprep.subr.bf16.mxu0 %v2692_v18  ;;  %v2783_v17 = vld [vmem:[%s3999_s1 + $0x564] ss:$8 sps:$4 sm:$0xff]  }
  0x4d   :  { %1943 = vmatprep.subr.bf16.mxu1 %v2695_v19  ;;  %v3477_v18 = vld [vmem:[%s4000_s0 + $0x20] sm:$0xff] }
  0x4e   :  { %v2274_v19 = vcombine.high %v3477_v18, %v3477_v18 }
  0x4f   :  { %1903 = vmatpush1.bf16.msra.mxu0 %v2690_v20  ;;  %v3484_v20 = vld [vmem:[%s4000_s0 + $0x28] sm:$0xff] }
  0x50   :  { %1944 = vmatpush1.bf16.msra.mxu1 %v2693_v21  ;;  %1904 = vmatprep.subr.bf16.mxu0 %v2698_v22  ;;  %v2778_v21 = vld [vmem:[%s3999_s1 + $0x460] ss:$8 sps:$4 sm:$0xff]  }
  0x51   :  { %1945 = vmatprep.subr.bf16.mxu1 %v2701_v23  ;;  %v2781_v22 = vld [vmem:[%s3999_s1 + $0x560] ss:$8 sps:$4 sm:$0xff]   ;;  %v2276_v23 = vcombine.high %v3484_v20, %v3484_v20 }
  0x53   :  { %1905 = vmatpush1.bf16.msra.mxu0 %v2696_v24  ;;  %v2786_v24 = vld [vmem:[%s3999_s1 + $0x454] ss:$8 sps:$4 sm:$0xff]  }
  0x54   :  { %1946 = vmatpush1.bf16.msra.mxu1 %v2699_v25  ;;  %1906 = vmatprep.subr.bf16.mxu0 %v2704_v26  ;;  %v2789_v25 = vld [vmem:[%s3999_s1 + $0x554] ss:$8 sps:$4 sm:$0xff]   ;;  %v2784_v26 = vld [vmem:[%s3999_s1 + $0x450] ss:$8 sps:$4 sm:$0xff]  }
  0x55   :  { %1947 = vmatprep.subr.bf16.mxu1 %v2707_v27  ;;  %v2787_v27 = vld [vmem:[%s3999_s1 + $0x550] ss:$8 sps:$4 sm:$0xff]  }
  0x57   :  { %1907 = vmatpush1.bf16.msra.mxu0 %v2702_v28  ;;  %v2792_v28 = vld [vmem:[%s3999_s1 + $0x444] ss:$8 sps:$4 sm:$0xff]  }
  0x58   :  { %1948 = vmatpush1.bf16.msra.mxu1 %v2705_v29  ;;  %1908 = vmatprep.subr.bf16.mxu0 %v2710_v30  ;;  %v2795_v29 = vld [vmem:[%s3999_s1 + $0x544] ss:$8 sps:$4 sm:$0xff]   ;;  %v2790_v30 = vld [vmem:[%s3999_s1 + $0x440] ss:$8 sps:$4 sm:$0xff]  }
  0x59   :  { %1949 = vmatprep.subr.bf16.mxu1 %v2713_v31  ;;  %v2793_v31 = vld [vmem:[%s3999_s1 + $0x540] ss:$8 sps:$4 sm:$0xff]  }
  0x5b   :  { %1909 = vmatpush1.bf16.msra.mxu0 %v2708_v33  ;;  %v2801_v33 = vld [vmem:[%s3999_s1 + $0x534] ss:$8 sps:$4 sm:$0xff]  }
  0x5c   :  { %1950 = vmatpush1.bf16.msra.mxu1 %v2711_v34  ;;  %1910 = vmatprep.subr.bf16.mxu0 %v2716_v37  ;;  %v2796_v34 = vld [vmem:[%s3999_s1 + $0x430] ss:$8 sps:$4 sm:$0xff]   ;;  %v2807_v37 = vld [vmem:[%s3999_s1 + $0x524] ss:$8 sps:$4 sm:$0xff]  }
  0x5d   :  { %1951 = vmatprep.subr.bf16.mxu1 %v2719_v39  ;;  %v2805_v39 = vld [vmem:[%s3999_s1 + $0x520] ss:$8 sps:$4 sm:$0xff]  }
  0x5f   :  { %1911 = vmatpush1.bf16.msra.mxu0 %v2714_v40  ;;  %v2810_v40 = vld [vmem:[%s3999_s1 + $0x414] ss:$8 sps:$4 sm:$0xff]  }
  0x60   :  { %1952 = vmatpush1.bf16.msra.mxu1 %v2717_v41  ;;  %1912 = vmatprep.subr.bf16.mxu0 %v2722_v42  ;;  %v2813_v41 = vld [vmem:[%s3999_s1 + $0x514] ss:$8 sps:$4 sm:$0xff]   ;;  %v2808_v42 = vld [vmem:[%s3999_s1 + $0x410] ss:$8 sps:$4 sm:$0xff]  }
  0x61   :  { %1953 = vmatprep.subr.bf16.mxu1 %v2725_v43  ;;  %v2811_v43 = vld [vmem:[%s3999_s1 + $0x510] ss:$8 sps:$4 sm:$0xff]  }
  0x63   :  { %1913 = vmatpush2.bf16.msra.mxu0 %v2720_v44  ;;  %v2816_v44 = vld [vmem:[%s3999_s1 + $0x404] ss:$8 sps:$4 sm:$0xff]  }
  0x64   :  { %1954 = vmatpush2.bf16.msra.mxu1 %v2723_v45  ;;  %1914 = vmatprep.subr.bf16.mxu0 %v2728_v46  ;;  %v2819_v45 = vld [vmem:[%s3999_s1 + $0x504] ss:$8 sps:$4 sm:$0xff]   ;;  %v2814_v46 = vld [vmem:[%s3999_s1 + $0x400] ss:$8 sps:$4 sm:$0xff]  }
  0x65   :  { %1955 = vmatprep.subr.bf16.mxu1 %v2731_v47  ;;  %v2817_v47 = vld [vmem:[%s3999_s1 + $0x500] ss:$8 sps:$4 sm:$0xff]  }
  0x67   :  { %1915 = vmatpush2.bf16.msra.mxu0 %v2726_v48  ;;  %v2822_v48 = vld [vmem:[%s3999_s1 + $0x4f4] ss:$8 sps:$4 sm:$0xff]  }
  0x68   :  { %1956 = vmatpush2.bf16.msra.mxu1 %v2729_v49  ;;  %1916 = vmatprep.subr.bf16.mxu0 %v2734_v50  ;;  %v2825_v49 = vld [vmem:[%s3999_s1 + $0x5f4] ss:$8 sps:$4 sm:$0xff]   ;;  %v2820_v50 = vld [vmem:[%s3999_s1 + $0x4f0] ss:$8 sps:$4 sm:$0xff]  }
  0x69   :  { %1957 = vmatprep.subr.bf16.mxu1 %v2737_v51  ;;  %v2823_v51 = vld [vmem:[%s3999_s1 + $0x5f0] ss:$8 sps:$4 sm:$0xff]  }
  0x6b   :  { %1917 = vmatpush2.bf16.msra.mxu0 %v2732_v52  ;;  %v2828_v52 = vld [vmem:[%s3999_s1 + $0x4e4] ss:$8 sps:$4 sm:$0xff]  }
  0x6c   :  { %1958 = vmatpush2.bf16.msra.mxu1 %v2735_v53  ;;  %1918 = vmatprep.subr.bf16.mxu0 %v2740_v54  ;;  %v2831_v53 = vld [vmem:[%s3999_s1 + $0x5e4] ss:$8 sps:$4 sm:$0xff]   ;;  %v2826_v54 = vld [vmem:[%s3999_s1 + $0x4e0] ss:$8 sps:$4 sm:$0xff]  }
  0x6d   :  { %1959 = vmatprep.subr.bf16.mxu1 %v2743_v55  ;;  %v2829_v55 = vld [vmem:[%s3999_s1 + $0x5e0] ss:$8 sps:$4 sm:$0xff]  }
  0x6f   :  { %1919 = vmatpush2.bf16.msra.mxu0 %v2738_v56  ;;  %v2834_v56 = vld [vmem:[%s3999_s1 + $0x4d4] ss:$8 sps:$4 sm:$0xff]  }
  0x70   :  { %1960 = vmatpush2.bf16.msra.mxu1 %v2741_v57  ;;  %1920 = vmatprep.subr.bf16.mxu0 %v2746_v58  ;;  %v2837_v57 = vld [vmem:[%s3999_s1 + $0x5d4] ss:$8 sps:$4 sm:$0xff]   ;;  %v2832_v58 = vld [vmem:[%s3999_s1 + $0x4d0] ss:$8 sps:$4 sm:$0xff]  }
  0x71   :  { %1961 = vmatprep.subr.bf16.mxu1 %v2749_v59  ;;  %v2835_v59 = vld [vmem:[%s3999_s1 + $0x5d0] ss:$8 sps:$4 sm:$0xff]  }
  0x73   :  { %1921 = vmatpush2.bf16.msra.mxu0 %v2744_v60  ;;  %v2840_v60 = vld [vmem:[%s3999_s1 + $0x4c4] ss:$8 sps:$4 sm:$0xff]  }
  0x74   :  { %1962 = vmatpush2.bf16.msra.mxu1 %v2747_v61  ;;  %1922 = vmatprep.subr.bf16.mxu0 %v2752_v62  ;;  %v2843_v61 = vld [vmem:[%s3999_s1 + $0x5c4] ss:$8 sps:$4 sm:$0xff]   ;;  %v2838_v62 = vld [vmem:[%s3999_s1 + $0x4c0] ss:$8 sps:$4 sm:$0xff]  }
  0x75   :  { %1963 = vmatprep.subr.bf16.mxu1 %v2755_v63  ;;  %v2841_v63 = vld [vmem:[%s3999_s1 + $0x5c0] ss:$8 sps:$4 sm:$0xff]  }
  0x77   :  { %1923 = vmatpush2.bf16.msra.mxu0 %v2750_v0  ;;  %v2846_v0 = vld [vmem:[%s3999_s1 + $0x4b4] ss:$8 sps:$4 sm:$0xff]  }
  0x78   :  { %1964 = vmatpush2.bf16.msra.mxu1 %v2753_v1  ;;  %1924 = vmatprep.subr.bf16.mxu0 %v2758_v2  ;;  %v2849_v1 = vld [vmem:[%s3999_s1 + $0x5b4] ss:$8 sps:$4 sm:$0xff]   ;;  %v2844_v2 = vld [vmem:[%s3999_s1 + $0x4b0] ss:$8 sps:$4 sm:$0xff]  }
  0x79   :  { %1965 = vmatprep.subr.bf16.mxu1 %v2761_v3  ;;  %v2847_v3 = vld [vmem:[%s3999_s1 + $0x5b0] ss:$8 sps:$4 sm:$0xff]  }
  0x7b   :  { %1925 = vmatpush2.bf16.msra.mxu0 %v2756_v4  ;;  %v2852_v4 = vld [vmem:[%s3999_s1 + $0x4a4] ss:$8 sps:$4 sm:$0xff]  }
  0x7c   :  { %1966 = vmatpush2.bf16.msra.mxu1 %v2759_v5  ;;  %1926 = vmatprep.subr.bf16.mxu0 %v2764_v6  ;;  %v2855_v5 = vld [vmem:[%s3999_s1 + $0x5a4] ss:$8 sps:$4 sm:$0xff]   ;;  %v2850_v6 = vld [vmem:[%s3999_s1 + $0x4a0] ss:$8 sps:$4 sm:$0xff]  }
  0x7d   :  { %1967 = vmatprep.subr.bf16.mxu1 %v2767_v7  ;;  %v2853_v7 = vld [vmem:[%s3999_s1 + $0x5a0] ss:$8 sps:$4 sm:$0xff]  }
  0x7f   :  { %1927 = vmatpush2.bf16.msra.mxu0 %v2762_v8  ;;  %v2858_v8 = vld [vmem:[%s3999_s1 + $0x494] ss:$8 sps:$4 sm:$0xff]  }
  0x80   :  { %1968 = vmatpush2.bf16.msra.mxu1 %v2765_v9  ;;  %1978 = vmatprep.subr.bf16.mxu0 %v2772_v10  ;;  %v2861_v9 = vld [vmem:[%s3999_s1 + $0x594] ss:$8 sps:$4 sm:$0xff]   ;;  %v2856_v10 = vld [vmem:[%s3999_s1 + $0x490] ss:$8 sps:$4 sm:$0xff]  }
  0x81   :  { %2019 = vmatprep.subr.bf16.mxu1 %v2777_v11  ;;  %v2859_v11 = vld [vmem:[%s3999_s1 + $0x590] ss:$8 sps:$4 sm:$0xff]  }
  0x82   :  { %1929 = vmatmul.mubr.bf16.vlgmr.msra.gmra.mxu0 %v2269_v12  ;;  %v2864_v12 = vld [vmem:[%s3999_s1 + $0x484] ss:$8 sps:$4 sm:$0xff]  }
  0x83   :  { %1970 = vmatmul.mubr.bf16.vlgmr.msra.gmra.mxu1 %v2271_v14  ;;  %1979 = vmatpush1.bf16.msra.mxu0 %v2770_v13  ;;  %v2867_v13 = vld [vmem:[%s3999_s1 + $0x584] ss:$8 sps:$4 sm:$0xff]   ;;  %v2862_v14 = vld [vmem:[%s3999_s1 + $0x480] ss:$8 sps:$4 sm:$0xff]  }
  0x84   :  { %2020 = vmatpush1.bf16.msra.mxu1 %v2775_v15  ;;  %1980 = vmatprep.subr.bf16.mxu0 %v2780_v16  ;;  %v2865_v15 = vld [vmem:[%s3999_s1 + $0x580] ss:$8 sps:$4 sm:$0xff]   ;;  %v2872_v16 = vld [vmem:[%s3999_s1 + $0x674] ss:$8 sps:$4 sm:$0xff]  }
  0x85   :  { %2021 = vmatprep.subr.bf16.mxu1 %v2783_v17  ;;  %2010 = vmatprep.mubr.bf16.mxu0 %v2274_v19  ;;  %v2877_v17 = vld [vmem:[%s3999_s1 + $0x774] ss:$8 sps:$4 sm:$0xff]   ;;  %v2870_v19 = vld [vmem:[%s3999_s1 + $0x670] ss:$8 sps:$4 sm:$0xff]  }
  0x86   :  { %2051 = vmatprep.mubr.bf16.mxu1 %v2276_v23  ;;  %v2275_v23 = vcombine.low %v3484_v20, %v3484_v20 }
  0x87   :  { %1981 = vmatpush1.bf16.msra.mxu0 %v2778_v21  ;;  %v2875_v21 = vld [vmem:[%s3999_s1 + $0x770] ss:$8 sps:$4 sm:$0xff]  }
  0x88   :  { %2022 = vmatpush1.bf16.msra.mxu1 %v2781_v22  ;;  %1982 = vmatprep.subr.bf16.mxu0 %v2786_v24  ;;  %v2273_v22 = vcombine.low %v3477_v18, %v3477_v18  ;;  %v3681_v24 = vld [vmem:[%s4000_s0 + $0x30] sm:$0xff]  ;;  %v2883_v18 = vld [vmem:[%s3999_s1 + $0x764] ss:$8 sps:$4 sm:$0xff]  }
  0x89   :  { %2023 = vmatprep.subr.bf16.mxu1 %v2789_v25  ;;  %v3686_v25 = vld [vmem:[%s4000_s0 + $0x38] sm:$0xff]  ;;  %v2278_v20 = vcombine.high %v3681_v24, %v3681_v24 }
  0x8b   :  { %1983 = vmatpush1.bf16.msra.mxu0 %v2784_v26  ;;  %v2880_v26 = vld [vmem:[%s3999_s1 + $0x664] ss:$8 sps:$4 sm:$0xff]  }
  0x8c   :  { %2024 = vmatpush1.bf16.msra.mxu1 %v2787_v27  ;;  %1984 = vmatprep.subr.bf16.mxu0 %v2792_v28  ;;  %v2280_v27 = vcombine.high %v3686_v25, %v3686_v25  ;;  %v2878_v28 = vld [vmem:[%s3999_s1 + $0x660] ss:$8 sps:$4 sm:$0xff]  }
  0x8d   :  { %2025 = vmatprep.subr.bf16.mxu1 %v2795_v29  ;;  %v2881_v29 = vld [vmem:[%s3999_s1 + $0x760] ss:$8 sps:$4 sm:$0xff]  }
  0x8f   :  { %1985 = vmatpush1.bf16.msra.mxu0 %v2790_v30  ;;  %v2886_v30 = vld [vmem:[%s3999_s1 + $0x654] ss:$8 sps:$4 sm:$0xff]  }
  0x90   :  { %2026 = vmatpush1.bf16.msra.mxu1 %v2793_v31  ;;  %1986 = vmatprep.subr.bf16.mxu0 %v2798_v32  ;;  %v2889_v31 = vld [vmem:[%s3999_s1 + $0x754] ss:$8 sps:$4 sm:$0xff]   ;;  %v2884_v32 = vld [vmem:[%s3999_s1 + $0x650] ss:$8 sps:$4 sm:$0xff]  }
  0x91   :  { %2027 = vmatprep.subr.bf16.mxu1 %v2801_v33  ;;  %v2887_v33 = vld [vmem:[%s3999_s1 + $0x750] ss:$8 sps:$4 sm:$0xff]  }
  0x93   :  { %1987 = vmatpush1.bf16.msra.mxu0 %v2796_v34  ;;  %v2892_v34 = vld [vmem:[%s3999_s1 + $0x644] ss:$8 sps:$4 sm:$0xff]  }
  0x94   :  { %2028 = vmatpush1.bf16.msra.mxu1 %v2799_v35  ;;  %1988 = vmatprep.subr.bf16.mxu0 %v2804_v36  ;;  %v2895_v35 = vld [vmem:[%s3999_s1 + $0x744] ss:$8 sps:$4 sm:$0xff]   ;;  %v2890_v36 = vld [vmem:[%s3999_s1 + $0x640] ss:$8 sps:$4 sm:$0xff]  }
  0x95   :  { %2029 = vmatprep.subr.bf16.mxu1 %v2807_v37  ;;  %v2893_v37 = vld [vmem:[%s3999_s1 + $0x740] ss:$8 sps:$4 sm:$0xff]  }
  0x97   :  { %1989 = vmatpush1.bf16.msra.mxu0 %v2802_v38  ;;  %v2898_v38 = vld [vmem:[%s3999_s1 + $0x634] ss:$8 sps:$4 sm:$0xff]  }
  0x98   :  { %2030 = vmatpush1.bf16.msra.mxu1 %v2805_v39  ;;  %1990 = vmatprep.subr.bf16.mxu0 %v2810_v40  ;;  %v2901_v39 = vld [vmem:[%s3999_s1 + $0x734] ss:$8 sps:$4 sm:$0xff]   ;;  %v2896_v40 = vld [vmem:[%s3999_s1 + $0x630] ss:$8 sps:$4 sm:$0xff]  }
  0x99   :  { %2031 = vmatprep.subr.bf16.mxu1 %v2813_v41  ;;  %v2899_v41 = vld [vmem:[%s3999_s1 + $0x730] ss:$8 sps:$4 sm:$0xff]  }
  0x9b   :  { %1991 = vmatpush1.bf16.msra.mxu0 %v2808_v42  ;;  %v2904_v42 = vld [vmem:[%s3999_s1 + $0x624] ss:$8 sps:$4 sm:$0xff]  }
  0x9c   :  { %2032 = vmatpush1.bf16.msra.mxu1 %v2811_v43  ;;  %1992 = vmatprep.subr.bf16.mxu0 %v2816_v44  ;;  %v2907_v43 = vld [vmem:[%s3999_s1 + $0x724] ss:$8 sps:$4 sm:$0xff]   ;;  %v2902_v44 = vld [vmem:[%s3999_s1 + $0x620] ss:$8 sps:$4 sm:$0xff]  }
  0x9d   :  { %2033 = vmatprep.subr.bf16.mxu1 %v2819_v45  ;;  %v2905_v45 = vld [vmem:[%s3999_s1 + $0x720] ss:$8 sps:$4 sm:$0xff]  }
  0x9f   :  { %1993 = vmatpush1.bf16.msra.mxu0 %v2814_v46  ;;  %v2910_v46 = vld [vmem:[%s3999_s1 + $0x614] ss:$8 sps:$4 sm:$0xff]  }
  0xa0   :  { %2034 = vmatpush1.bf16.msra.mxu1 %v2817_v47  ;;  %1994 = vmatprep.subr.bf16.mxu0 %v2822_v48  ;;  %v2913_v47 = vld [vmem:[%s3999_s1 + $0x714] ss:$8 sps:$4 sm:$0xff]   ;;  %v2908_v48 = vld [vmem:[%s3999_s1 + $0x610] ss:$8 sps:$4 sm:$0xff]  }
  0xa1   :  { %2035 = vmatprep.subr.bf16.mxu1 %v2825_v49  ;;  %v2911_v49 = vld [vmem:[%s3999_s1 + $0x710] ss:$8 sps:$4 sm:$0xff]  }
  0xa3   :  { %1995 = vmatpush2.bf16.msra.mxu0 %v2820_v50  ;;  %v2916_v50 = vld [vmem:[%s3999_s1 + $0x604] ss:$8 sps:$4 sm:$0xff]  }
  0xa4   :  { %2036 = vmatpush2.bf16.msra.mxu1 %v2823_v51  ;;  %1996 = vmatprep.subr.bf16.mxu0 %v2828_v52  ;;  %v2919_v51 = vld [vmem:[%s3999_s1 + $0x704] ss:$8 sps:$4 sm:$0xff]   ;;  %v2914_v52 = vld [vmem:[%s3999_s1 + $0x600] ss:$8 sps:$4 sm:$0xff]  }
  0xa5   :  { %2037 = vmatprep.subr.bf16.mxu1 %v2831_v53  ;;  %v2917_v53 = vld [vmem:[%s3999_s1 + $0x700] ss:$8 sps:$4 sm:$0xff]  }
  0xa7   :  { %1997 = vmatpush2.bf16.msra.mxu0 %v2826_v54  ;;  %v2922_v54 = vld [vmem:[%s3999_s1 + $0x6f4] ss:$8 sps:$4 sm:$0xff]  }
  0xa8   :  { %2038 = vmatpush2.bf16.msra.mxu1 %v2829_v55  ;;  %1998 = vmatprep.subr.bf16.mxu0 %v2834_v56  ;;  %v2925_v55 = vld [vmem:[%s3999_s1 + $0x7f4] ss:$8 sps:$4 sm:$0xff]   ;;  %v2920_v56 = vld [vmem:[%s3999_s1 + $0x6f0] ss:$8 sps:$4 sm:$0xff]  }
  0xa9   :  { %2039 = vmatprep.subr.bf16.mxu1 %v2837_v57  ;;  %v2923_v57 = vld [vmem:[%s3999_s1 + $0x7f0] ss:$8 sps:$4 sm:$0xff]  }
  0xab   :  { %1999 = vmatpush2.bf16.msra.mxu0 %v2832_v58  ;;  %v2928_v58 = vld [vmem:[%s3999_s1 + $0x6e4] ss:$8 sps:$4 sm:$0xff]  }
  0xac   :  { %2040 = vmatpush2.bf16.msra.mxu1 %v2835_v59  ;;  %2000 = vmatprep.subr.bf16.mxu0 %v2840_v60  ;;  %v2931_v59 = vld [vmem:[%s3999_s1 + $0x7e4] ss:$8 sps:$4 sm:$0xff]   ;;  %v2926_v60 = vld [vmem:[%s3999_s1 + $0x6e0] ss:$8 sps:$4 sm:$0xff]  }
  0xad   :  { %2041 = vmatprep.subr.bf16.mxu1 %v2843_v61  ;;  %v2929_v61 = vld [vmem:[%s3999_s1 + $0x7e0] ss:$8 sps:$4 sm:$0xff]  }
  0xaf   :  { %2001 = vmatpush2.bf16.msra.mxu0 %v2838_v62  ;;  %v2934_v62 = vld [vmem:[%s3999_s1 + $0x6d4] ss:$8 sps:$4 sm:$0xff]  }
  0xb0   :  { %2042 = vmatpush2.bf16.msra.mxu1 %v2841_v63  ;;  %2002 = vmatprep.subr.bf16.mxu0 %v2846_v0  ;;  %v2937_v63 = vld [vmem:[%s3999_s1 + $0x7d4] ss:$8 sps:$4 sm:$0xff]   ;;  %v2932_v0 = vld [vmem:[%s3999_s1 + $0x6d0] ss:$8 sps:$4 sm:$0xff]  }
  0xb1   :  { %2043 = vmatprep.subr.bf16.mxu1 %v2849_v1  ;;  %v2935_v1 = vld [vmem:[%s3999_s1 + $0x7d0] ss:$8 sps:$4 sm:$0xff]  }
  0xb3   :  { %2003 = vmatpush2.bf16.msra.mxu0 %v2844_v2  ;;  %v2940_v2 = vld [vmem:[%s3999_s1 + $0x6c4] ss:$8 sps:$4 sm:$0xff]  }
  0xb4   :  { %2044 = vmatpush2.bf16.msra.mxu1 %v2847_v3  ;;  %2004 = vmatprep.subr.bf16.mxu0 %v2852_v4  ;;  %v2943_v3 = vld [vmem:[%s3999_s1 + $0x7c4] ss:$8 sps:$4 sm:$0xff]   ;;  %v2938_v4 = vld [vmem:[%s3999_s1 + $0x6c0] ss:$8 sps:$4 sm:$0xff]  }
  0xb5   :  { %2045 = vmatprep.subr.bf16.mxu1 %v2855_v5  ;;  %v2941_v5 = vld [vmem:[%s3999_s1 + $0x7c0] ss:$8 sps:$4 sm:$0xff]  }
  0xb7   :  { %2005 = vmatpush2.bf16.msra.mxu0 %v2850_v6  ;;  %v2946_v6 = vld [vmem:[%s3999_s1 + $0x6b4] ss:$8 sps:$4 sm:$0xff]  }
  0xb8   :  { %2046 = vmatpush2.bf16.msra.mxu1 %v2853_v7  ;;  %2006 = vmatprep.subr.bf16.mxu0 %v2858_v8  ;;  %v2949_v7 = vld [vmem:[%s3999_s1 + $0x7b4] ss:$8 sps:$4 sm:$0xff]   ;;  %v2944_v8 = vld [vmem:[%s3999_s1 + $0x6b0] ss:$8 sps:$4 sm:$0xff]  }
  0xb9   :  { %2047 = vmatprep.subr.bf16.mxu1 %v2861_v9  ;;  %v2947_v9 = vld [vmem:[%s3999_s1 + $0x7b0] ss:$8 sps:$4 sm:$0xff]  }
  0xbb   :  { %2007 = vmatpush2.bf16.msra.mxu0 %v2856_v10  ;;  %v2952_v10 = vld [vmem:[%s3999_s1 + $0x6a4] ss:$8 sps:$4 sm:$0xff]  }
  0xbc   :  { %2048 = vmatpush2.bf16.msra.mxu1 %v2859_v11  ;;  %2008 = vmatprep.subr.bf16.mxu0 %v2864_v12  ;;  %v2955_v11 = vld [vmem:[%s3999_s1 + $0x7a4] ss:$8 sps:$4 sm:$0xff]   ;;  %v2950_v12 = vld [vmem:[%s3999_s1 + $0x6a0] ss:$8 sps:$4 sm:$0xff]  }
  0xbd   :  { %2049 = vmatprep.subr.bf16.mxu1 %v2867_v13  ;;  %v2953_v13 = vld [vmem:[%s3999_s1 + $0x7a0] ss:$8 sps:$4 sm:$0xff]  }
  0xbf   :  { %2009 = vmatpush2.bf16.msra.mxu0 %v2862_v14  ;;  %v2958_v14 = vld [vmem:[%s3999_s1 + $0x694] ss:$8 sps:$4 sm:$0xff]  }
  0xc0   :  { %2050 = vmatpush2.bf16.msra.mxu1 %v2865_v15  ;;  %2060 = vmatprep.subr.bf16.mxu0 %v2872_v16  ;;  %v2961_v15 = vld [vmem:[%s3999_s1 + $0x794] ss:$8 sps:$4 sm:$0xff]   ;;  %v2956_v16 = vld [vmem:[%s3999_s1 + $0x690] ss:$8 sps:$4 sm:$0xff]  }
  0xc1   :  { %2101 = vmatprep.subr.bf16.mxu1 %v2877_v17  ;;  %v2959_v17 = vld [vmem:[%s3999_s1 + $0x790] ss:$8 sps:$4 sm:$0xff]  }
  0xc2   :  { %2011 = vmatmul.mubr.bf16.vlgmr.msra.gmra.mxu0 %v2273_v22  ;;  %v2962_v22 = vld [vmem:[%s3999_s1 + $0x680] ss:$8 sps:$4 sm:$0xff]  }
  0xc3   :  { %2052 = vmatmul.mubr.bf16.vlgmr.msra.gmra.mxu1 %v2275_v23  ;;  %2061 = vmatpush1.bf16.msra.mxu0 %v2870_v19  ;;  %v2964_v19 = vld [vmem:[%s3999_s1 + $0x684] ss:$8 sps:$4 sm:$0xff]   ;;  %v2965_v23 = vld [vmem:[%s3999_s1 + $0x780] ss:$8 sps:$4 sm:$0xff]  }
  0xc4   :  { %2102 = vmatpush1.bf16.msra.mxu1 %v2875_v21  ;;  %2062 = vmatprep.subr.bf16.mxu0 %v2880_v26  ;;  %v2967_v21 = vld [vmem:[%s3999_s1 + $0x784] ss:$8 sps:$4 sm:$0xff]   ;;  %v2972_v26 = vld [vmem:[%s3999_s1 + $0x874] ss:$8 sps:$4 sm:$0xff]  }
  0xc5   :  { %2103 = vmatprep.subr.bf16.mxu1 %v2883_v18  ;;  %2092 = vmatprep.mubr.bf16.mxu0 %v2278_v20  ;;  %v3878_v18 = vld [vmem:[%s4000_s0 + $0x40] sm:$0xff]  ;;  %v2277_v20 = vcombine.low %v3681_v24, %v3681_v24 }
  0xc6   :  { %2133 = vmatprep.mubr.bf16.mxu1 %v2280_v27  ;;  %v2279_v27 = vcombine.low %v3686_v25, %v3686_v25  ;;  %v2975_v25 = vld [vmem:[%s3999_s1 + $0x860] ss:$8 sps:$4 sm:$0xff]  }
  0xc7   :  { %2063 = vmatpush1.bf16.msra.mxu0 %v2878_v28  ;;  %v2970_v28 = vld [vmem:[%s3999_s1 + $0x870] ss:$8 sps:$4 sm:$0xff]  }
  0xc8   :  { %2104 = vmatpush1.bf16.msra.mxu1 %v2881_v29  ;;  %2064 = vmatprep.subr.bf16.mxu0 %v2886_v30  ;;  %v2282_v29 = vcombine.high %v3878_v18, %v3878_v18  ;;  %v2977_v30 = vld [vmem:[%s3999_s1 + $0x864] ss:$8 sps:$4 sm:$0xff]  }
  0xc9   :  { %2105 = vmatprep.subr.bf16.mxu1 %v2889_v31 }
  0xcb   :  { %2065 = vmatpush1.bf16.msra.mxu0 %v2884_v32 }
  0xcc   :  { %2106 = vmatpush1.bf16.msra.mxu1 %v2887_v33  ;;  %2066 = vmatprep.subr.bf16.mxu0 %v2892_v34 }
  0xcd   :  { %2107 = vmatprep.subr.bf16.mxu1 %v2895_v35  ;;  %v2980_v35 = vld [vmem:[%s3999_s1 + $0x854] ss:$8 sps:$4 sm:$0xff]  }
  0xcf   :  { %2067 = vmatpush1.bf16.msra.mxu0 %v2890_v36 }
  0xd0   :  { %2108 = vmatpush1.bf16.msra.mxu1 %v2893_v37  ;;  %2068 = vmatprep.subr.bf16.mxu0 %v2898_v38 }
  0xd1   :  { %2109 = vmatprep.subr.bf16.mxu1 %v2901_v39  ;;  %v2978_v39 = vld [vmem:[%s3999_s1 + $0x850] ss:$8 sps:$4 sm:$0xff]  }
  0xd3   :  { %2069 = vmatpush1.bf16.msra.mxu0 %v2896_v40 }
  0xd4   :  { %2110 = vmatpush1.bf16.msra.mxu1 %v2899_v41  ;;  %2070 = vmatprep.subr.bf16.mxu0 %v2904_v42  ;;  %v2983_v41 = vld [vmem:[%s3999_s1 + $0x844] ss:$8 sps:$4 sm:$0xff]  }
  0xd5   :  { %2111 = vmatprep.subr.bf16.mxu1 %v2907_v43  ;;  %v2981_v43 = vld [vmem:[%s3999_s1 + $0x840] ss:$8 sps:$4 sm:$0xff]  }
  0xd7   :  { %2071 = vmatpush1.bf16.msra.mxu0 %v2902_v44  ;;  %v2986_v44 = vld [vmem:[%s3999_s1 + $0x834] ss:$8 sps:$4 sm:$0xff]  }
  0xd8   :  { %2112 = vmatpush1.bf16.msra.mxu1 %v2905_v45  ;;  %2072 = vmatprep.subr.bf16.mxu0 %v2910_v46  ;;  %v2984_v45 = vld [vmem:[%s3999_s1 + $0x830] ss:$8 sps:$4 sm:$0xff]   ;;  %v2989_v46 = vld [vmem:[%s3999_s1 + $0x824] ss:$8 sps:$4 sm:$0xff]  }
  0xd9   :  { %2113 = vmatprep.subr.bf16.mxu1 %v2913_v47  ;;  %v2987_v47 = vld [vmem:[%s3999_s1 + $0x820] ss:$8 sps:$4 sm:$0xff]  }
  0xdb   :  { %2073 = vmatpush1.bf16.msra.mxu0 %v2908_v48  ;;  %v2992_v48 = vld [vmem:[%s3999_s1 + $0x814] ss:$8 sps:$4 sm:$0xff]  }
  0xdc   :  { %2114 = vmatpush1.bf16.msra.mxu1 %v2911_v49  ;;  %2074 = vmatprep.subr.bf16.mxu0 %v2916_v50  ;;  %v2990_v49 = vld [vmem:[%s3999_s1 + $0x810] ss:$8 sps:$4 sm:$0xff]   ;;  %v2995_v50 = vld [vmem:[%s3999_s1 + $0x804] ss:$8 sps:$4 sm:$0xff]  }
  0xdd   :  { %2115 = vmatprep.subr.bf16.mxu1 %v2919_v51  ;;  %v2993_v51 = vld [vmem:[%s3999_s1 + $0x800] ss:$8 sps:$4 sm:$0xff]  }
  0xdf   :  { %2075 = vmatpush1.bf16.msra.mxu0 %v2914_v52  ;;  %v2998_v52 = vld [vmem:[%s3999_s1 + $0x8f4] ss:$8 sps:$4 sm:$0xff]  }
  0xe0   :  { %2116 = vmatpush1.bf16.msra.mxu1 %v2917_v53  ;;  %2076 = vmatprep.subr.bf16.mxu0 %v2922_v54  ;;  %v2996_v53 = vld [vmem:[%s3999_s1 + $0x8f0] ss:$8 sps:$4 sm:$0xff]   ;;  %v3001_v54 = vld [vmem:[%s3999_s1 + $0x8e4] ss:$8 sps:$4 sm:$0xff]  }
  0xe1   :  { %2117 = vmatprep.subr.bf16.mxu1 %v2925_v55  ;;  %v2999_v55 = vld [vmem:[%s3999_s1 + $0x8e0] ss:$8 sps:$4 sm:$0xff]  }
  0xe3   :  { %2077 = vmatpush2.bf16.msra.mxu0 %v2920_v56  ;;  %v3004_v56 = vld [vmem:[%s3999_s1 + $0x8d4] ss:$8 sps:$4 sm:$0xff]  }
  0xe4   :  { %2118 = vmatpush2.bf16.msra.mxu1 %v2923_v57  ;;  %2078 = vmatprep.subr.bf16.mxu0 %v2928_v58  ;;  %v3002_v57 = vld [vmem:[%s3999_s1 + $0x8d0] ss:$8 sps:$4 sm:$0xff]   ;;  %v3007_v58 = vld [vmem:[%s3999_s1 + $0x8c4] ss:$8 sps:$4 sm:$0xff]  }
  0xe5   :  { %2119 = vmatprep.subr.bf16.mxu1 %v2931_v59  ;;  %v3005_v59 = vld [vmem:[%s3999_s1 + $0x8c0] ss:$8 sps:$4 sm:$0xff]  }
  0xe7   :  { %2079 = vmatpush2.bf16.msra.mxu0 %v2926_v60  ;;  %v3010_v60 = vld [vmem:[%s3999_s1 + $0x8b4] ss:$8 sps:$4 sm:$0xff]  }
  0xe8   :  { %2120 = vmatpush2.bf16.msra.mxu1 %v2929_v61  ;;  %2080 = vmatprep.subr.bf16.mxu0 %v2934_v62  ;;  %v3008_v61 = vld [vmem:[%s3999_s1 + $0x8b0] ss:$8 sps:$4 sm:$0xff]   ;;  %v3013_v62 = vld [vmem:[%s3999_s1 + $0x8a4] ss:$8 sps:$4 sm:$0xff]  }
  0xe9   :  { %2121 = vmatprep.subr.bf16.mxu1 %v2937_v63  ;;  %v3011_v63 = vld [vmem:[%s3999_s1 + $0x8a0] ss:$8 sps:$4 sm:$0xff]  }
  0xeb   :  { %2081 = vmatpush2.bf16.msra.mxu0 %v2932_v0  ;;  %v3016_v0 = vld [vmem:[%s3999_s1 + $0x894] ss:$8 sps:$4 sm:$0xff]  }
  0xec   :  { %2122 = vmatpush2.bf16.msra.mxu1 %v2935_v1  ;;  %2082 = vmatprep.subr.bf16.mxu0 %v2940_v2  ;;  %v3014_v1 = vld [vmem:[%s3999_s1 + $0x890] ss:$8 sps:$4 sm:$0xff]   ;;  %v3019_v2 = vld [vmem:[%s3999_s1 + $0x884] ss:$8 sps:$4 sm:$0xff]  }
  0xed   :  { %2123 = vmatprep.subr.bf16.mxu1 %v2943_v3  ;;  %v3017_v3 = vld [vmem:[%s3999_s1 + $0x880] ss:$8 sps:$4 sm:$0xff]  }
  0xef   :  { %2083 = vmatpush2.bf16.msra.mxu0 %v2938_v4  ;;  %v2281_v4 = vcombine.low %v3878_v18, %v3878_v18 }
  0xf0   :  { %2124 = vmatpush2.bf16.msra.mxu1 %v2941_v5  ;;  %2084 = vmatprep.subr.bf16.mxu0 %v2946_v6 }
  0xf1   :  { %2125 = vmatprep.subr.bf16.mxu1 %v2949_v7 }
  0xf3   :  { %2085 = vmatpush2.bf16.msra.mxu0 %v2944_v8 }
  0xf4   :  { %2126 = vmatpush2.bf16.msra.mxu1 %v2947_v9  ;;  %2086 = vmatprep.subr.bf16.mxu0 %v2952_v10 }
  0xf5   :  { %2127 = vmatprep.subr.bf16.mxu1 %v2955_v11 }
  0xf7   :  { %2087 = vmatpush2.bf16.msra.mxu0 %v2950_v12 }
  0xf8   :  { %2128 = vmatpush2.bf16.msra.mxu1 %v2953_v13  ;;  %2088 = vmatprep.subr.bf16.mxu0 %v2958_v14 }
  0xf9   :  { %2129 = vmatprep.subr.bf16.mxu1 %v2961_v15 }
  0xfb   :  { %2089 = vmatpush2.bf16.msra.mxu0 %v2956_v16 }
  0xfc   :  { %2130 = vmatpush2.bf16.msra.mxu1 %v2959_v17  ;;  %2090 = vmatprep.subr.bf16.mxu0 %v2964_v19 }
  0xfd   :  { %2131 = vmatprep.subr.bf16.mxu1 %v2967_v21 }
  0xff   :  { %2091 = vmatpush2.bf16.msra.mxu0 %v2962_v22 }
 0x100   :  { %2132 = vmatpush2.bf16.msra.mxu1 %v2965_v23  ;;  %2142 = vmatprep.subr.bf16.mxu0 %v2972_v26 }
 0x102   :  { %v1848_v31 = vpop.f32.mrf.mxu0  ;;  %2093 = vmatmul.mubr.bf16.vlgmr.msra.gmra.mxu0 %v2277_v20 }
 0x103   :  { %v1889_v32 = vpop.f32.mrf.mxu1  ;;  %2134 = vmatmul.mubr.bf16.vlgmr.msra.gmra.mxu1 %v2279_v27  ;;  %2143 = vmatpush1.bf16.msra.mxu0 %v2970_v28 }
 0x104   :  { %v3892_v24 = vadd.f32 %v1889_v32, %v1848_v31  ;;  %2174 = vmatprep.mubr.bf16.mxu0 %v2282_v29  ;;  %v1850_v33 = vpop.f32.mrf.mxu0  ;;  %2144 = vmatprep.subr.bf16.mxu0 %v2977_v30 }
 0x105   :  { %v1891_v34 = vpop.f32.mrf.mxu1 }
 0x106   :  { %v3900_v36 = vadd.f32 %v1891_v34, %v1850_v33  ;;  %v1852_v37 = vpop.f32.mrf.mxu0 }
 0x107   :  { %v1893_v38 = vpop.f32.mrf.mxu1  ;;  %2145 = vmatpush1.bf16.msra.mxu0 %v2975_v25 }
 0x108   :  { %v1853_v40 = vpop.f32.mrf.mxu0  ;;  %2146 = vmatprep.subr.bf16.mxu0 %v2980_v35 }
 0x109   :  { %v1894_v42 = vpop.f32.mrf.mxu1 }
 0x10b   :  { %2147 = vmatpush1.bf16.msra.mxu0 %v2978_v39 }
 0x10c   :  { %2148 = vmatprep.subr.bf16.mxu0 %v2983_v41 }
 0x10f   :  { %2149 = vmatpush1.bf16.msra.mxu0 %v2981_v43 }
 0x110   :  { %2150 = vmatprep.subr.bf16.mxu0 %v2986_v44 }
 0x113   :  { %2151 = vmatpush1.bf16.msra.mxu0 %v2984_v45 }
 0x114   :  { %2152 = vmatprep.subr.bf16.mxu0 %v2989_v46 }
 0x117   :  { %2153 = vmatpush1.bf16.msra.mxu0 %v2987_v47 }
 0x118   :  { %2154 = vmatprep.subr.bf16.mxu0 %v2992_v48 }
 0x11b   :  { %2155 = vmatpush1.bf16.msra.mxu0 %v2990_v49 }
 0x11c   :  { %2156 = vmatprep.subr.bf16.mxu0 %v2995_v50 }
 0x11f   :  { %2157 = vmatpush1.bf16.msra.mxu0 %v2993_v51 }
 0x120   :  { %2158 = vmatprep.subr.bf16.mxu0 %v2998_v52  ;;  %v3022_v52 = vmov 1966171168  }
 0x123   :  { %2159 = vmatpush2.bf16.msra.mxu0 %v2996_v53  ;;  %v2201_v53 = vunpack.c.l.s4 %v3022_v52 }
 0x124   :  { %2160 = vmatprep.subr.bf16.mxu0 %v3001_v54  ;;  %v2203_v54 = vlaneseq }
 0x126   :  { %vm2217_vm0 = vcmp.lt.s32.totalorder %v2203_v54, 256 }
 0x127   :  { %2161 = vmatpush2.bf16.msra.mxu0 %v2999_v55 }
 0x128   :  { %2162 = vmatprep.subr.bf16.mxu0 %v3004_v56 }
 0x12b   :  { %2163 = vmatpush2.bf16.msra.mxu0 %v3002_v57 }
 0x12c   :  { %2164 = vmatprep.subr.bf16.mxu0 %v3007_v58 }
 0x12f   :  { %2165 = vmatpush2.bf16.msra.mxu0 %v3005_v59 }
 0x130   :  { %2166 = vmatprep.subr.bf16.mxu0 %v3010_v60 }
 0x133   :  { %2167 = vmatpush2.bf16.msra.mxu0 %v3008_v61 }
 0x134   :  { %2168 = vmatprep.subr.bf16.mxu0 %v3013_v62 }
 0x137   :  { %2169 = vmatpush2.bf16.msra.mxu0 %v3011_v63 }
 0x138   :  { %2170 = vmatprep.subr.bf16.mxu0 %v3016_v0  ;;  %v2202_v0 = vunpack.c.0.s8 %v2201_v53 }
 0x13b   :  { %2171 = vmatpush2.bf16.msra.mxu0 %v3014_v1  ;;  %v2204_v1 = vshrl.u32 %v2203_v54, 7 }
 0x13c   :  { %2172 = vmatprep.subr.bf16.mxu0 %v3019_v2 }
 0x13f   :  { %2173 = vmatpush2.bf16.msra.mxu0 %v3017_v3 }
 0x142   :  { %v1930_v5 = vpop.f32.mrf.mxu0  ;;  %2175 = vmatmul.mubr.bf16.vlgmr.msra.gmra.mxu0 %v2281_v4 }
 0x143   :  { %v1971_v6 = vpop.f32.mrf.mxu1  ;;  %v1931_v7 = vadd.f32 %v1930_v5, %v3892_v24 }
 0x144   :  { %v1932_v8 = vpop.f32.mrf.mxu0 }
 0x145   :  { %v1973_v9 = vpop.f32.mrf.mxu1  ;;  %v1933_v10 = vadd.f32 %v1932_v8, %v3900_v36  ;;  %v1972_v11 = vadd.f32 %v1971_v6, %v1931_v7 }
 0x146   :  { %v1934_v12 = vpop.f32.mrf.mxu0 }
 0x147   :  { %v1975_v13 = vpop.f32.mrf.mxu1  ;;  %v1974_v14 = vadd.f32 %v1973_v9, %v1933_v10 }
 0x148   :  { %v1935_v15 = vpop.f32.mrf.mxu0 }
 0x149   :  { %v1976_v16 = vpop.f32.mrf.mxu1 }
 0x182   :  { %v2012_v17 = vpop.f32.mrf.mxu0 }
 0x183   :  { %v2053_v19 = vpop.f32.mrf.mxu1  ;;  %v2013_v21 = vadd.f32 %v2012_v17, %v1972_v11  ;;  %v2205_v11 = vsub.s32 %v2202_v0, %v2204_v1 }
 0x184   :  { %v2014_v22 = vpop.f32.mrf.mxu0 }
 0x185   :  { %v2055_v23 = vpop.f32.mrf.mxu1  ;;  %v2015_v26 = vadd.f32 %v2014_v22, %v1974_v14  ;;  %v2054_v18 = vadd.f32 %v2053_v19, %v2013_v21 }
 0x186   :  { %v2016_v20 = vpop.f32.mrf.mxu0 }
 0x187   :  { %v2057_v27 = vpop.f32.mrf.mxu1  ;;  %v2056_v28 = vadd.f32 %v2055_v23, %v2015_v26 }
 0x188   :  { %v2017_v29 = vpop.f32.mrf.mxu0 }
 0x189   :  { %v2058_v30 = vpop.f32.mrf.mxu1 }
 0x1c2   :  { %v2094_v31 = vpop.f32.mrf.mxu0 }
 0x1c3   :  { %v2135_v32 = vpop.f32.mrf.mxu1  ;;  %v2095_v37 = vadd.f32 %v2094_v31, %v2054_v18 }
 0x1c4   :  { %v2096_v24 = vpop.f32.mrf.mxu0 }
 0x1c5   :  { %v2137_v25 = vpop.f32.mrf.mxu1  ;;  %v2097_v38 = vadd.f32 %v2096_v24, %v2056_v28  ;;  %v2136_v39 = vadd.f32 %v2135_v32, %v2095_v37 }
 0x1c6   :  { %v2098_v33 = vpop.f32.mrf.mxu0 }
 0x1c7   :  { %v2139_v34 = vpop.f32.mrf.mxu1  ;;  %v2138_v41 = vadd.f32 %v2137_v25, %v2097_v38 }
 0x1c8   :  { %v2099_v35 = vpop.f32.mrf.mxu0 }
 0x1c9   :  { %v2140_v36 = vpop.f32.mrf.mxu1 }
 0x202   :  { %v2176_v40 = vpop.f32.mrf.mxu0 }
 0x203   :  { %v2177_v42 = vadd.f32 %v2176_v40, %v2136_v39 }
 0x204   :  { %v2178_v43 = vpop.f32.mrf.mxu0 }
 0x205   :  { %2183 = vst [vmem:[%s4001_s2] sm:$0xff] %v2177_v42  ;;  %v2185_v44 = vrot.slane %v2177_v42, 4  ;;  %v2220_v45 = vmul.f32 %v2177_v42, %v2177_v42  ;;  %v2179_v46 = vadd.f32 %v2178_v43, %v2138_v41 }
 0x206   :  { %v2180_v47 = vpop.f32.mrf.mxu0 }
 0x207   :  { %v2186_v48 = vadd.f32 %v2185_v44, %v2177_v42  ;;  %v2222_v49 = vrot.slane %v2220_v45, 4  ;;  %2184 = vst [vmem:[%s4001_s2 + $0x8] sm:$0xff] %v2179_v46  ;;  %v2191_v50 = vrot.slane %v2179_v46, 4  ;;  %v2221_v51 = vmul.f32 %v2179_v46, %v2179_v46 }
 0x208   :  { %v2181_v55 = vpop.f32.mrf.mxu0 }
 0x209   :  { %v2187_v56 = vrot.slane %v2186_v48, 2  ;;  %v2223_v57 = vadd.f32 %v2222_v49, %v2220_v45  ;;  %v2192_v58 = vadd.f32 %v2191_v50, %v2179_v46  ;;  %v2228_v59 = vrot.slane %v2221_v51, 4 }
 0x20b   :  { %v2188_v60 = vadd.f32 %v2187_v56, %v2186_v48  ;;  %v2224_v61 = vrot.slane %v2223_v57, 2  ;;  %v2193_v62 = vrot.slane %v2192_v58, 2  ;;  %v2229_v63 = vadd.f32 %v2228_v59, %v2221_v51 }
 0x20d   :  { %v2189_v2 = vrot.slane %v2188_v60, 1  ;;  %v2225_v3 = vadd.f32 %v2224_v61, %v2223_v57  ;;  %v2194_v4 = vadd.f32 %v2193_v62, %v2192_v58  ;;  %v2230_v5 = vrot.slane %v2229_v63, 2 }
 0x20f   :  { %v2226_v6 = vrot.slane %v2225_v3, 1  ;;  %v2195_v7 = vrot.slane %v2194_v4, 1  ;;  %v2231_v8 = vadd.f32 %v2230_v5, %v2229_v63  ;;  %v2190_v9 = vadd.f32 %v2189_v2, %v2188_v60 }
 0x211   :  { %v2196_v10 = vadd.f32 %v2195_v7, %v2194_v4  ;;  %v2232_v12 = vrot.slane %v2231_v8, 1  ;;  %v2227_v13 = vadd.f32 %v2226_v6, %v2225_v3 }
 0x213   :  { %v2199_v14 = vcombine.low %v2190_v9, %v2196_v10  ;;  %v2233_v15 = vadd.f32 %v2232_v12, %v2231_v8 }
 0x215   :  { %v2206_v16 = vrot.slane %v2199_v14, %v2205_v11  ;;  %v2236_v17 = vcombine.low %v2227_v13, %v2233_v15 }
 0x217   :  { %v2213_v19 = vrot.slane %v2206_v16, %v2205_v11  ;;  %v2243_v21 = vrot.slane %v2236_v17, %v2205_v11 }
 0x219   :  { %2219 = vst.msk [vmem:[%s4002_s3] sm:$0x3] %vm2217_vm0, %v2213_v19  ;;  %v2250_v22 = vrot.slane %v2243_v21, %v2205_v11 }
 0x21b   :  { %2252 = vst.msk [vmem:[%s4003_s4] sm:$0x3] %vm2217_vm0, %v2250_v22 }

// kernel: net_forward.63
= control target key start
LH: loop header
LB: loop body
LE: loop exit
PB: predicated region body
PF: predicated region fallthrough
CT: control target
= control target key end

     0   :  { %vm726_vm0 = vcmask 80896   ;;  %s1195_s1 = inlined_call_operand.vmem [shape: bf16[1024,10], index: 1, kind: input, shape index: {}]   ;;  %s1196_s0 = inlined_call_operand.vmem [shape: bf16[8,1024], index: 0, kind: input, shape index: {}]   ;;  %s1197_s2 = inlined_call_operand.vmem [shape: f32[1,10], index: 2, kind: input, shape index: {}]   ;;  %s1198_s3 = inlined_call_operand.vmem [shape: f32[8,10], index: 3, kind: output, shape index: {}]  }
   0x1   :  { %v893_v0 = vld [vmem:[%s1195_s1 + $0x78] sm:$0xff]   ;;  %v897_v4 = vld [vmem:[%s1195_s1 + $0x70] sm:$0xff]   ;;  %v901_v8 = vld [vmem:[%s1195_s1 + $0x68] sm:$0xff]  }
   0x2   :  { %v894_v1 = vld [vmem:[%s1195_s1 + $0xf8] sm:$0xff]   ;;  %805 = vmatprep.subr.bf16.mxu0 %v893_v0  ;;  %v898_v5 = vld [vmem:[%s1195_s1 + $0xf0] sm:$0xff]   ;;  %v902_v9 = vld [vmem:[%s1195_s1 + $0xe8] sm:$0xff]  }
   0x3   :  { %v895_v2 = vld [vmem:[%s1195_s1 + $0x38] sm:$0xff]   ;;  %827 = vmatprep.subr.bf16.mxu1 %v894_v1  ;;  %v899_v6 = vld [vmem:[%s1195_s1 + $0x30] sm:$0xff]   ;;  %v903_v10 = vld [vmem:[%s1195_s1 + $0x28] sm:$0xff]  }
   0x4   :  { %v896_v3 = vld [vmem:[%s1195_s1 + $0xb8] sm:$0xff]   ;;  %806 = vmatpush3.bf16.msra.mxu0 %v895_v2  ;;  %v900_v7 = vld [vmem:[%s1195_s1 + $0xb0] sm:$0xff]   ;;  %v904_v11 = vld [vmem:[%s1195_s1 + $0xa8] sm:$0xff]  }
   0x5   :  { %828 = vmatpush3.bf16.msra.mxu1 %v896_v3  ;;  %807 = vmatprep.subr.bf16.mxu0 %v897_v4  ;;  %v905_v12 = vld [vmem:[%s1195_s1 + $0x60] sm:$0xff]   ;;  %v909_v16 = vld [vmem:[%s1195_s1 + $0x58] sm:$0xff]   ;;  %v913_v20 = vld [vmem:[%s1195_s1 + $0x50] sm:$0xff]  }
   0x6   :  { %829 = vmatprep.subr.bf16.mxu1 %v898_v5  ;;  %v906_v13 = vld [vmem:[%s1195_s1 + $0xe0] sm:$0xff]   ;;  %v910_v17 = vld [vmem:[%s1195_s1 + $0xd8] sm:$0xff]   ;;  %v914_v21 = vld [vmem:[%s1195_s1 + $0xd0] sm:$0xff]  }
   0x7   :  { %v907_v14 = vld [vmem:[%s1195_s1 + $0x20] sm:$0xff]   ;;  %v911_v18 = vld [vmem:[%s1195_s1 + $0x18] sm:$0xff]   ;;  %v915_v22 = vld [vmem:[%s1195_s1 + $0x10] sm:$0xff]  }
   0x8   :  { %808 = vmatpush3.bf16.msra.mxu0 %v899_v6  ;;  %v908_v15 = vld [vmem:[%s1195_s1 + $0xa0] sm:$0xff]   ;;  %v912_v19 = vld [vmem:[%s1195_s1 + $0x98] sm:$0xff]   ;;  %v916_v23 = vld [vmem:[%s1195_s1 + $0x90] sm:$0xff]  }
   0x9   :  { %830 = vmatpush3.bf16.msra.mxu1 %v900_v7  ;;  %809 = vmatprep.subr.bf16.mxu0 %v901_v8  ;;  %v917_v24 = vld [vmem:[%s1195_s1 + $0x48] sm:$0xff]   ;;  %v921_v28 = vld [vmem:[%s1195_s1 + $0x40] sm:$0xff]   ;;  %v929_v38 = vld [vmem:[%s1195_s1 + $0x178] sm:$0xff]  }
   0xa   :  { %831 = vmatprep.subr.bf16.mxu1 %v902_v9  ;;  %v918_v25 = vld [vmem:[%s1195_s1 + $0xc8] sm:$0xff]   ;;  %v922_v29 = vld [vmem:[%s1195_s1 + $0xc0] sm:$0xff]   ;;  %v930_v39 = vld [vmem:[%s1195_s1 + $0x1f8] sm:$0xff]  }
   0xb   :  { %v919_v26 = vld [vmem:[%s1195_s1 + $0x8] sm:$0xff]   ;;  %v923_v30 = vld [vmem:[%s1195_s1] sm:$0xff]   ;;  %v931_v40 = vld [vmem:[%s1195_s1 + $0x138] sm:$0xff]  }
   0xc   :  { %810 = vmatpush3.bf16.msra.mxu0 %v903_v10  ;;  %v920_v27 = vld [vmem:[%s1195_s1 + $0x88] sm:$0xff]   ;;  %v924_v31 = vld [vmem:[%s1195_s1 + $0x80] sm:$0xff]   ;;  %v932_v41 = vld [vmem:[%s1195_s1 + $0x1b8] sm:$0xff]  }
   0xd   :  { %832 = vmatpush3.bf16.msra.mxu1 %v904_v11  ;;  %811 = vmatprep.subr.bf16.mxu0 %v905_v12  ;;  %v15_v32 = vld [vmem:[%s1196_s0] sm:$0xff]  ;;  %v16_v33 = vld [vmem:[%s1196_s0 + $0x8] sm:$0xff]  ;;  %v933_v42 = vld [vmem:[%s1195_s1 + $0x170] sm:$0xff]  }
   0xe   :  { %833 = vmatprep.subr.bf16.mxu1 %v906_v13  ;;  %v733_v34 = vcombine.low %v15_v32, %v15_v32  ;;  %v734_v35 = vcombine.high %v15_v32, %v15_v32  ;;  %v735_v36 = vcombine.low %v16_v33, %v16_v33  ;;  %v736_v37 = vcombine.high %v16_v33, %v16_v33  ;;  %v934_v43 = vld [vmem:[%s1195_s1 + $0x1f0] sm:$0xff]   ;;  %v937_v46 = vld [vmem:[%s1195_s1 + $0x168] sm:$0xff]   ;;  %v941_v50 = vld [vmem:[%s1195_s1 + $0x160] sm:$0xff]  }
   0xf   :  { %v935_v44 = vld [vmem:[%s1195_s1 + $0x130] sm:$0xff]   ;;  %v938_v47 = vld [vmem:[%s1195_s1 + $0x1e8] sm:$0xff]   ;;  %v942_v51 = vld [vmem:[%s1195_s1 + $0x1e0] sm:$0xff]  }
  0x10   :  { %812 = vmatpush3.bf16.msra.mxu0 %v907_v14  ;;  %598 = vmatprep.mubr.bf16.mxu0 %v734_v35  ;;  %v936_v45 = vld [vmem:[%s1195_s1 + $0x1b0] sm:$0xff]   ;;  %v939_v48 = vld [vmem:[%s1195_s1 + $0x128] sm:$0xff]   ;;  %v943_v52 = vld [vmem:[%s1195_s1 + $0x120] sm:$0xff]  }
  0x11   :  { %834 = vmatpush3.bf16.msra.mxu1 %v908_v15  ;;  %813 = vmatprep.subr.bf16.mxu0 %v909_v16  ;;  %v940_v49 = vld [vmem:[%s1195_s1 + $0x1a8] sm:$0xff]   ;;  %v944_v53 = vld [vmem:[%s1195_s1 + $0x1a0] sm:$0xff]   ;;  %v945_v54 = vld [vmem:[%s1195_s1 + $0x158] sm:$0xff]  }
  0x12   :  { %835 = vmatprep.subr.bf16.mxu1 %v910_v17  ;;  %638 = vmatprep.mubr.bf16.mxu1 %v736_v37  ;;  %v946_v55 = vld [vmem:[%s1195_s1 + $0x1d8] sm:$0xff]   ;;  %v949_v58 = vld [vmem:[%s1195_s1 + $0x150] sm:$0xff]   ;;  %v953_v62 = vld [vmem:[%s1195_s1 + $0x148] sm:$0xff]  }
  0x13   :  { %v947_v56 = vld [vmem:[%s1195_s1 + $0x118] sm:$0xff]   ;;  %v950_v59 = vld [vmem:[%s1195_s1 + $0x1d0] sm:$0xff]   ;;  %v954_v63 = vld [vmem:[%s1195_s1 + $0x1c8] sm:$0xff]  }
  0x14   :  { %814 = vmatpush3.bf16.msra.mxu0 %v911_v18  ;;  %v948_v57 = vld [vmem:[%s1195_s1 + $0x198] sm:$0xff]   ;;  %v951_v60 = vld [vmem:[%s1195_s1 + $0x110] sm:$0xff]   ;;  %v955_v0 = vld [vmem:[%s1195_s1 + $0x108] sm:$0xff]  }
  0x15   :  { %836 = vmatpush3.bf16.msra.mxu1 %v912_v19  ;;  %815 = vmatprep.subr.bf16.mxu0 %v913_v20  ;;  %v952_v61 = vld [vmem:[%s1195_s1 + $0x190] sm:$0xff]   ;;  %v956_v1 = vld [vmem:[%s1195_s1 + $0x188] sm:$0xff]   ;;  %v957_v2 = vld [vmem:[%s1195_s1 + $0x140] sm:$0xff]  }
  0x16   :  { %837 = vmatprep.subr.bf16.mxu1 %v914_v21  ;;  %v958_v3 = vld [vmem:[%s1195_s1 + $0x1c0] sm:$0xff]   ;;  %v17_v6 = vld [vmem:[%s1196_s0 + $0x10] sm:$0xff]  ;;  %v18_v9 = vld [vmem:[%s1196_s0 + $0x18] sm:$0xff] }
  0x17   :  { %v959_v4 = vld [vmem:[%s1195_s1 + $0x100] sm:$0xff]   ;;  %v737_v7 = vcombine.low %v17_v6, %v17_v6  ;;  %v738_v8 = vcombine.high %v17_v6, %v17_v6  ;;  %v739_v10 = vcombine.low %v18_v9, %v18_v9  ;;  %v740_v11 = vcombine.high %v18_v9, %v18_v9 }
  0x18   :  { %816 = vmatpush3.bf16.msra.mxu0 %v915_v22  ;;  %v960_v5 = vld [vmem:[%s1195_s1 + $0x180] sm:$0xff]  }
  0x19   :  { %838 = vmatpush3.bf16.msra.mxu1 %v916_v23  ;;  %817 = vmatprep.subr.bf16.mxu0 %v917_v24  ;;  %v732_v21 = vld [vmem:[%s1197_s2] ss:$0 sm:$0xff] }
  0x1a   :  { %839 = vmatprep.subr.bf16.mxu1 %v918_v25 }
  0x1c   :  { %818 = vmatpush3.bf16.msra.mxu0 %v919_v26 }
  0x1d   :  { %840 = vmatpush3.bf16.msra.mxu1 %v920_v27  ;;  %819 = vmatprep.subr.bf16.mxu0 %v921_v28 }
  0x1e   :  { %841 = vmatprep.subr.bf16.mxu1 %v922_v29 }
  0x20   :  { %820 = vmatpush3.bf16.msra.mxu0 %v923_v30 }
  0x21   :  { %842 = vmatpush3.bf16.msra.mxu1 %v924_v31  ;;  %849 = vmatprep.subr.bf16.mxu0 %v929_v38 }
  0x22   :  { %871 = vmatprep.subr.bf16.mxu1 %v930_v39 }
  0x23   :  { %599 = vmatmul.mubr.bf16.vlgmr.msra.gmra.mxu0 %v733_v34 }
  0x24   :  { %639 = vmatmul.mubr.bf16.vlgmr.msra.gmra.mxu1 %v735_v36  ;;  %850 = vmatpush3.bf16.msra.mxu0 %v931_v40 }
  0x25   :  { %872 = vmatpush3.bf16.msra.mxu1 %v932_v41  ;;  %851 = vmatprep.subr.bf16.mxu0 %v933_v42 }
  0x26   :  { %873 = vmatprep.subr.bf16.mxu1 %v934_v43  ;;  %678 = vmatprep.mubr.bf16.mxu0 %v738_v8 }
  0x27   :  { %718 = vmatprep.mubr.bf16.mxu1 %v740_v11 }
  0x28   :  { %852 = vmatpush3.bf16.msra.mxu0 %v935_v44 }
  0x29   :  { %874 = vmatpush3.bf16.msra.mxu1 %v936_v45  ;;  %853 = vmatprep.subr.bf16.mxu0 %v937_v46 }
  0x2a   :  { %875 = vmatprep.subr.bf16.mxu1 %v938_v47 }
  0x2c   :  { %854 = vmatpush3.bf16.msra.mxu0 %v939_v48 }
  0x2d   :  { %876 = vmatpush3.bf16.msra.mxu1 %v940_v49  ;;  %855 = vmatprep.subr.bf16.mxu0 %v941_v50 }
  0x2e   :  { %877 = vmatprep.subr.bf16.mxu1 %v942_v51 }
  0x30   :  { %856 = vmatpush3.bf16.msra.mxu0 %v943_v52 }
  0x31   :  { %878 = vmatpush3.bf16.msra.mxu1 %v944_v53  ;;  %857 = vmatprep.subr.bf16.mxu0 %v945_v54 }
  0x32   :  { %879 = vmatprep.subr.bf16.mxu1 %v946_v55 }
  0x34   :  { %858 = vmatpush3.bf16.msra.mxu0 %v947_v56 }
  0x35   :  { %880 = vmatpush3.bf16.msra.mxu1 %v948_v57  ;;  %859 = vmatprep.subr.bf16.mxu0 %v949_v58 }
  0x36   :  { %881 = vmatprep.subr.bf16.mxu1 %v950_v59 }
  0x38   :  { %860 = vmatpush3.bf16.msra.mxu0 %v951_v60 }
  0x39   :  { %882 = vmatpush3.bf16.msra.mxu1 %v952_v61  ;;  %861 = vmatprep.subr.bf16.mxu0 %v953_v62 }
  0x3a   :  { %883 = vmatprep.subr.bf16.mxu1 %v954_v63 }
  0x3c   :  { %862 = vmatpush3.bf16.msra.mxu0 %v955_v0 }
  0x3d   :  { %884 = vmatpush3.bf16.msra.mxu1 %v956_v1  ;;  %863 = vmatprep.subr.bf16.mxu0 %v957_v2 }
  0x3e   :  { %885 = vmatprep.subr.bf16.mxu1 %v958_v3 }
  0x40   :  { %864 = vmatpush3.bf16.msra.mxu0 %v959_v4 }
  0x41   :  { %886 = vmatpush3.bf16.msra.mxu1 %v960_v5 }
  0x43   :  { %679 = vmatmul.mubr.bf16.vlgmr.msra.gmra.mxu0 %v737_v7 }
  0x44   :  { %719 = vmatmul.mubr.bf16.vlgmr.msra.gmra.mxu1 %v739_v10 }
  0xe3   :  { %v821_v12 = vpop.f32.mrf.mxu0 }
  0xe4   :  { %v843_v13 = vpop.f32.mrf.mxu1 }
  0xe5   :  { %v822_v14 = vpop.f32.mrf.mxu0 }
  0xe6   :  { %v844_v15 = vpop.f32.mrf.mxu1  ;;  %v823_v20 = vadd.f32 %v822_v14, %v821_v12 }
  0xe7   :  { %v824_v16 = vpop.f32.mrf.mxu0  ;;  %v845_v23 = vadd.f32 %v844_v15, %v843_v13 }
  0xe8   :  { %v846_v17 = vpop.f32.mrf.mxu1  ;;  %v601_v22 = vadd.f32 %v823_v20, %v732_v21 }
  0xe9   :  { %v825_v18 = vpop.f32.mrf.mxu0 }
  0xea   :  { %v847_v19 = vpop.f32.mrf.mxu1  ;;  %v641_v28 = vadd.f32 %v845_v23, %v601_v22 }
 0x103   :  { %v865_v24 = vpop.f32.mrf.mxu0 }
 0x104   :  { %v887_v25 = vpop.f32.mrf.mxu1 }
 0x105   :  { %v866_v26 = vpop.f32.mrf.mxu0 }
 0x106   :  { %v888_v27 = vpop.f32.mrf.mxu1  ;;  %v867_v29 = vadd.f32 %v866_v26, %v865_v24 }
 0x107   :  { %v868_v30 = vpop.f32.mrf.mxu0  ;;  %v889_v33 = vadd.f32 %v888_v27, %v887_v25 }
 0x108   :  { %v890_v31 = vpop.f32.mrf.mxu1  ;;  %v681_v32 = vadd.f32 %v867_v29, %v641_v28 }
 0x109   :  { %v869_v34 = vpop.f32.mrf.mxu0 }
 0x10a   :  { %v891_v35 = vpop.f32.mrf.mxu1  ;;  %v721_v36 = vadd.f32 %v889_v33, %v681_v32 }
 0x10c   :  { %727 = vst.msk [vmem:[%s1198_s3] sm:$0xff] %vm726_vm0, %v721_v36 }

</bundles_post_ra>
